<compile_context>
chip_gen: v7x
topology: tpu7x:2x2x1
jax: 0.10.0
libtpu: 0.0.40
codegen_flags: <defaults>
</compile_context>

<pallas_src>
import functools
import math

import jax
import jax.numpy as jnp
from jax.experimental import pallas as pl
from jax.experimental.pallas import tpu as pltpu

LEAKY_ALPHA = 0.2
INV_SQRT2 = 1.0 / math.sqrt(2.0)
LANE = 128


def _round_up(x, m):
    return ((x + m - 1) // m) * m


def _pick_tile(c):
    # c is always a multiple of 128; prefer 256 tiles for the 256-wide MXUs.
    for t in (256, 128):
        if c % t == 0:
            return t
    return c


# ----------------------------------------------------------------------------
# Fused direct-conv kernel
#   For each filter tap (di,dj) accumulate  x[(h+di, w+dj), :] @ W[di,dj]
#   into a f32 VMEM accumulator; epilogue applies equalized-lr scale, bias,
#   LeakyReLU, optional residual add and a final multiplier, then stores bf16.
# ----------------------------------------------------------------------------
def _conv_kernel(x_ref, w_ref, b_ref, *rest, taps, m, scale, alpha,
                 apply_act, has_res, out_mult):
    if has_res:
        res_ref, o_ref, acc_ref = rest
    else:
        o_ref, acc_ref = rest
    k = pl.program_id(2)

    @pl.when(k == 0)
    def _init():
        acc_ref[...] = jnp.zeros_like(acc_ref)

    # Direct conv: one MXU matmul per tap, reading a shifted contiguous window
    # of the flattened (row-major, width-padded) input straight from VMEM.
    # No im2col tensor is ever materialized in HBM.
    for t, off in enumerate(taps):
        patch = x_ref[0, pl.ds(off, m), :]                      # (M, tcin) bf16
        acc_ref[...] += jnp.dot(patch, w_ref[t],
                                preferred_element_type=jnp.float32)

    @pl.when(k == pl.num_programs(2) - 1)
    def _finalize():
        o = acc_ref[...] * scale + b_ref[...]                   # f32 epilogue
        if apply_act:
            o = jnp.where(o >= 0.0, o, o * alpha)
        if has_res:
            o = o + res_ref[0].astype(jnp.float32)
        if out_mult != 1.0:
            o = o * out_mult
        o_ref[0] = o.astype(o_ref.dtype)


def conv2d(x, w, b, *, pad, apply_act, equalized=True, residual=None,
           out_mult=1.0, alpha=LEAKY_ALPHA):
    """Direct stride-1 2-D conv as one fused Pallas kernel.

    x        : (N, H, W, Cin_pad) bf16 activations, channels lane-padded.
    w        : (kh, kw, cin_real, cout_real) f32 (unpadded).
    b        : (cout_real,) f32.
    residual : optional (N, Ho, Wo, Cout_pad) bf16; fused `out += residual`.
    Returns  : (N, Ho, Wo, Cout_pad) bf16.
    """
    x = x.astype(jnp.bfloat16)
    N, H, W, cinp = x.shape
    kh, kw, cinr, coutr = w.shape
    assert cinp % LANE == 0 and cinr <= cinp
    coutp = _round_up(coutr, LANE)

    Hp, Wp = H + 2 * pad, W + 2 * pad
    Ho, Wo = Hp - kh + 1, Wp - kw + 1
    extra = 1 if kw > 1 else 0          # one spare zero row for the last taps
    M = Ho * Wp                         # output rows in width-padded layout
    Lp = (Hp + extra) * Wp

    # Single cheap spatial halo pad + free flatten.
    # TODO(synk): for very large feature maps (full image > VMEM) switch to
    # row-tiled blocks with manual halo DMA (pl.ANY + make_async_copy).
    xf = jnp.pad(x, ((0, 0), (pad, pad + extra), (pad, pad), (0, 0)))
    xf = xf.reshape(N, Lp, cinp)

    # Lane-dense packed weight / bias (tiny, done under jit; zero padding keeps
    # the padded lanes exactly zero downstream).
    wp = jnp.pad(w.reshape(kh * kw, cinr, coutr),
                 ((0, 0), (0, cinp - cinr), (0, coutp - coutr))
                 ).astype(jnp.bfloat16)
    bp = jnp.pad(jnp.asarray(b, jnp.float32).reshape(1, coutr),
                 ((0, 0), (0, coutp - coutr)))

    # Equalized-lr scale is a STATIC float derived from the real fan-in.
    scale = (1.0 / math.sqrt(kh * kw * cinr)) if equalized else 1.0
    taps = tuple(di * Wp + dj for di in range(kh) for dj in range(kw))

    tcin = _pick_tile(cinp)
    tcout = _pick_tile(coutp)

    in_specs = [
        pl.BlockSpec((1, Lp, tcin), lambda bb, j, k: (bb, 0, k)),
        pl.BlockSpec((kh * kw, tcin, tcout), lambda bb, j, k: (0, k, j)),
        pl.BlockSpec((1, tcout), lambda bb, j, k: (0, j)),
    ]
    operands = [xf, wp, bp]
    has_res = residual is not None
    if has_res:
        assert Wp == Wo, "fused residual only supported for 1x1 / pad=0 convs"
        rf = residual.astype(jnp.bfloat16).reshape(N, M, coutp)
        in_specs.append(pl.BlockSpec((1, M, tcout), lambda bb, j, k: (bb, 0, j)))
        operands.append(rf)

    kern = functools.partial(
        _conv_kernel, taps=taps, m=M, scale=float(scale), alpha=float(alpha),
        apply_act=bool(apply_act), has_res=has_res, out_mult=float(out_mult))

    y = pl.pallas_call(
        kern,
        out_shape=jax.ShapeDtypeStruct((N, M, coutp), jnp.bfloat16),
        grid=(N, coutp // tcout, cinp // tcin),
        in_specs=in_specs,
        out_specs=pl.BlockSpec((1, M, tcout), lambda bb, j, k: (bb, 0, j)),
        scratch_shapes=[pltpu.VMEM((M, tcout), jnp.float32)],
        compiler_params=pltpu.CompilerParams(
            dimension_semantics=("parallel", "parallel", "arbitrary"),
            vmem_limit_bytes=32 * 1024 * 1024),
    )(*operands)

    # Back to NHWC; drop the (kw-1 wrap-around) garbage columns of each row.
    y = y.reshape(N, Ho, Wp, coutp)
    if Wp != Wo:
        y = y[:, :, :Wo, :]
    return y


# ----------------------------------------------------------------------------
# Cheap plain-JAX glue (single-pass ops on bf16 tensors)
# ----------------------------------------------------------------------------
def avg_pool2(x):
    # TODO(synk): fold the 2x2 average into the producing conv's epilogue
    # (strided reads of the f32 accumulator) to save one HBM round-trip.
    N, H, W, C = x.shape
    y = x.astype(jnp.float32).reshape(N, H // 2, 2, W // 2, 2, C).mean(axis=(2, 4))
    return y.astype(jnp.bfloat16)


def minibatch_std(x, c_real, group_size=4, eps=1e-8):
    """StyleGAN2 minibatch-stddev feature.  Operates on the real (unpadded)
    channels only and writes the new feature into the first zero-pad lane, so
    the lane-padded carry stays valid."""
    N, H, W, Cp = x.shape
    xr = x[..., :c_real].astype(jnp.float32)
    G = min(group_size, N)
    while N % G != 0:                      # handle batches not divisible by 4
        G -= 1
    y = xr.reshape(G, N // G, H, W, c_real)
    y = y - y.mean(axis=0, keepdims=True)
    y = jnp.sqrt(jnp.mean(y * y, axis=0) + eps)     # (N//G, H, W, C)
    y = y.mean(axis=(1, 2, 3), keepdims=True)       # (N//G, 1, 1, 1)
    y = jnp.tile(y, (G, H, W, 1)).astype(x.dtype)   # (N, H, W, 1)
    if c_real + 1 > Cp:
        x = jnp.pad(x, ((0, 0), (0, 0), (0, 0),
                        (0, _round_up(c_real + 1, LANE) - Cp)))
    x = jax.lax.dynamic_update_slice_in_dim(x, y, c_real, axis=3)
    return x, c_real + 1


# ----------------------------------------------------------------------------
# Model blocks
# ----------------------------------------------------------------------------
def res_down_block(x, p, pooling):
    cout = p['c2_w'].shape[-1]
    # main path: conv3x3 + lrelu -> conv3x3 + lrelu -> (avgpool)
    h = conv2d(x, p['c1_w'], p['c1_b'], pad=1, apply_act=True)
    h = conv2d(h, p['c2_w'], p['c2_b'], pad=1, apply_act=True)
    s = x
    if pooling == 'avg':
        h = avg_pool2(h)
        s = avg_pool2(s)
    zb = jnp.zeros((cout,), jnp.float32)
    # skip 1x1 EqualConv (no bias) fused with the residual merge:
    #   out = (h + scale * s @ w_skip) / sqrt(2)
    return conv2d(s, p['sk_w'], zb, pad=0, apply_act=False,
                  residual=h, out_mult=INV_SQRT2)


def _make_block_params(key, cin, cout):
    k1, k2, k3 = jax.random.split(key, 3)
    return dict(
        c1_w=jax.random.normal(k1, (3, 3, cin, cin), jnp.float32),
        c1_b=jnp.zeros((cin,), jnp.float32),
        c2_w=jax.random.normal(k2, (3, 3, cin, cout), jnp.float32),
        c2_b=jnp.zeros((cout,), jnp.float32),
        sk_w=jax.random.normal(k3, (1, 1, cin, cout), jnp.float32),
    )


def make_params(key, image_size, image_channels, img_channels):
    keys = jax.random.split(key, 8 + len(img_channels))
    p = {}
    # from_rgb: EqualConv2D 1x1, image_channels -> img_channels[0]
    p['rgb_w'] = jax.random.normal(
        keys[0], (1, 1, image_channels, img_channels[0]), jnp.float32)
    p['rgb_b'] = jnp.zeros((img_channels[0],), jnp.float32)

    size = image_size
    blocks = []
    for i in range(len(img_channels) - 1):
        blocks.append(_make_block_params(keys[1 + i],
                                         img_channels[i], img_channels[i + 1]))
        size //= 2
    p['blocks'] = blocks

    # last ResDownBlock (after MiniBatchStd): in = C_last+1, out = C_last, no pooling
    c_last = img_channels[-1]
    p['last_block'] = _make_block_params(keys[len(img_channels)], c_last + 1, c_last)

    # final nn.Conv2d(c_last, c_last, kernel=size)  (standard conv, no equalization)
    p['final_conv_w'] = 0.05 * jax.random.normal(
        keys[len(img_channels) + 1], (size, size, c_last, c_last), jnp.float32)
    p['final_conv_b'] = jnp.zeros((c_last,), jnp.float32)

    # final EqualLinear(c_last, 1)
    p['fc_w'] = jax.random.normal(keys[len(img_channels) + 2], (c_last, 1), jnp.float32)
    p['fc_b'] = jnp.zeros((1,), jnp.float32)
    return p


def sg2_discriminator_forward(x_nchw, params, pooling='avg'):
    """x_nchw: (N, C_img, H, W) -> logits (N, 1)."""
    x = jnp.transpose(x_nchw, (0, 2, 3, 1))                     # NCHW -> NHWC
    c_img = x.shape[-1]
    # Lane-pad channels ONCE; carry padded bf16 activations end-to-end.
    x = jnp.pad(x, ((0, 0), (0, 0), (0, 0),
                    (0, _round_up(c_img, LANE) - c_img))).astype(jnp.bfloat16)

    # from_rgb (EqualConv2D 1x1, no activation)
    out = conv2d(x, params['rgb_w'], params['rgb_b'], pad=0, apply_act=False)

    # ResDownBlocks with avg-pool downsampling
    for bp in params['blocks']:
        out = res_down_block(out, bp, pooling)
        # TODO(synk): insert_sa_layers self-attention not implemented (unused: []).

    c_last = (params['blocks'][-1]['c2_w'].shape[-1] if params['blocks']
              else params['rgb_w'].shape[-1])

    # MiniBatchStdLayer (reads only the real channels; writes feature into the
    # first zero-pad lane so the padded carry stays exact).
    out, _ = minibatch_std(out, c_last)

    # final ResDownBlock (pooling=None)
    out = res_down_block(out, params['last_block'], None)

    # nn.Conv2d(C, C, final_size) + Flatten + LeakyReLU (lrelu fused in-kernel,
    # since it commutes with Flatten).
    out = conv2d(out, params['final_conv_w'], params['final_conv_b'],
                 pad=0, apply_act=True, equalized=False)        # (N, 1, 1, Cpad)
    flat = out.reshape(out.shape[0], -1)[:, :c_last].astype(jnp.float32)

    # TODO(synk): last_fc_double extra EqualLinear not instantiated (flag False).
    # EqualLinear(C, 1): plain jnp.dot (XLA) -- per perf review a Pallas launch
    # (N padded 1 -> 128 lanes) costs far more than these few FLOPs.
    logits = flat @ (params['fc_w'] * (1.0 / math.sqrt(c_last))) + params['fc_b']
    return logits                                               # (N, 1)


# ----------------------------------------------------------------------------
if __name__ == "__main__":
    IMAGE_SIZE = 16
    IMAGE_CHANNELS = 3           # RGB input channels
    IMG_CHANNELS = [8, 16, 16]   # discriminator channel schedule
    BATCH = 2

    key = jax.random.PRNGKey(0)
    k_x, k_p = jax.random.split(key)
    x = jax.random.normal(k_x, (BATCH, IMAGE_CHANNELS, IMAGE_SIZE, IMAGE_SIZE),
                          jnp.float32)
    params = make_params(k_p, IMAGE_SIZE, IMAGE_CHANNELS, IMG_CHANNELS)

    fwd = jax.jit(functools.partial(sg2_discriminator_forward, pooling='avg'))
    logits = fwd(x, params)
    jax.block_until_ready(logits)
    assert logits.shape == (BATCH, 1), logits.shape
    print("KERNEL_OK")
</pallas_src>

<mosaic_0001>
module attributes {stable_mosaic.version = 11 : i64} {
  func.func @_conv_kernel(%arg0: i32, %arg1: i32, %arg2: i32, %arg3: memref<1x256x128xbf16, #tpu.memory_space<vmem>>, %arg4: memref<1x128x128xbf16, #tpu.memory_space<vmem>>, %arg5: memref<1x128xf32, #tpu.memory_space<vmem>>, %arg6: memref<1x256x128xbf16, #tpu.memory_space<vmem>>, %arg7: memref<256x128xf32, #tpu.memory_space<vmem>>) attributes {dimension_semantics = [#tpu.dimension_semantics<parallel>, #tpu.dimension_semantics<parallel>, #tpu.dimension_semantics<arbitrary>], iteration_bounds = array<i64: 2, 1, 1>, scalar_prefetch = 0 : i64, scratch_operands = 1 : i64, tpu.core_type = #tpu.core_type<tc>, window_params = [{transform_indices = @transform_0, window_bounds = array<i64: 1, 256, 128>}, {transform_indices = @transform_1, window_bounds = array<i64: 1, 128, 128>}, {transform_indices = @transform_2, window_bounds = array<i64: 1, 128>}, {transform_indices = @transform_3, window_bounds = array<i64: 1, 256, 128>}]} {
    %c0_i32 = arith.constant 0 : i32
    %0 = arith.cmpi eq, %arg2, %c0_i32 : i32
    %1 = arith.extui %0 : i1 to i32
    %c0_i32_0 = arith.constant 0 : i32
    %2 = arith.cmpi ne, %1, %c0_i32_0 : i32
    scf.if %2 {
      %cst_12 = arith.constant 0.000000e+00 : f32
      %14 = vector.broadcast %cst_12 : f32 to vector<256x128xf32>
      %c0_13 = arith.constant 0 : index
      %c0_14 = arith.constant 0 : index
      %15 = vector.load %arg7[%c0_13, %c0_14] : memref<256x128xf32, #tpu.memory_space<vmem>>, vector<256x128xf32>
      tpu.vector_store %arg7[%c0_13, %c0_14], %14 {strides = array<i32>} : memref<256x128xf32, #tpu.memory_space<vmem>>, vector<256x128xf32>,
    } else {
    }
    %c0 = arith.constant 0 : index
    %c0_1 = arith.constant 0 : index
    %c0_2 = arith.constant 0 : index
    %3 = vector.load %arg3[%c0, %c0_1, %c0_2] : memref<1x256x128xbf16, #tpu.memory_space<vmem>>, vector<1x256x128xbf16>
    %4 = vector.shape_cast %3 : vector<1x256x128xbf16> to vector<256x128xbf16>
    %c0_3 = arith.constant 0 : index
    %c0_4 = arith.constant 0 : index
    %5 = vector.load %arg7[%c0_3, %c0_4] : memref<256x128xf32, #tpu.memory_space<vmem>>, vector<256x128xf32>
    %c0_5 = arith.constant 0 : index
    %c0_6 = arith.constant 0 : index
    %c0_7 = arith.constant 0 : index
    %6 = vector.load %arg4[%c0_5, %c0_6, %c0_7] : memref<1x128x128xbf16, #tpu.memory_space<vmem>>, vector<1x128x128xbf16>
    %7 = vector.shape_cast %6 : vector<1x128x128xbf16> to vector<128x128xbf16>
    %cst = arith.constant dense<0.000000e+00> : vector<256x128xf32>
    %8 = tpu.matmul %4, %7, %cst {dimension_numbers = #tpu.dot_dimension_numbers<[1], [0], [0], [1], [0, 0, 1, 1], [], []>} : vector<256x128xbf16>, vector<128x128xbf16>, vector<256x128xf32> -> vector<256x128xf32>
    %9 = arith.addf %5, %8 : vector<256x128xf32>
    %c0_8 = arith.constant 0 : index
    %c0_9 = arith.constant 0 : index
    %10 = vector.load %arg7[%c0_8, %c0_9] : memref<256x128xf32, #tpu.memory_space<vmem>>, vector<256x128xf32>
    tpu.vector_store %arg7[%c0_8, %c0_9], %9 {strides = array<i32>} : memref<256x128xf32, #tpu.memory_space<vmem>>, vector<256x128xf32>,
    %c0_i32_10 = arith.constant 0 : i32
    %11 = arith.cmpi eq, %arg2, %c0_i32_10 : i32
    %12 = arith.extui %11 : i1 to i32
    %c0_i32_11 = arith.constant 0 : i32
    %13 = arith.cmpi ne, %12, %c0_i32_11 : i32
    scf.if %13 {
      %c0_12 = arith.constant 0 : index
      %c0_13 = arith.constant 0 : index
      %14 = vector.load %arg7[%c0_12, %c0_13] : memref<256x128xf32, #tpu.memory_space<vmem>>, vector<256x128xf32>
      %cst_14 = arith.constant 0.577350259 : f32
      %15 = vector.broadcast %cst_14 : f32 to vector<256x128xf32>
      %16 = arith.mulf %14, %15 : vector<256x128xf32>
      %c0_15 = arith.constant 0 : index
      %c0_16 = arith.constant 0 : index
      %17 = vector.load %arg5[%c0_15, %c0_16] : memref<1x128xf32, #tpu.memory_space<vmem>>, vector<1x128xf32>
      %18 = vector.broadcast %17 : vector<1x128xf32> to vector<256x128xf32>
      %19 = arith.addf %16, %18 : vector<256x128xf32>
      %20 = arith.truncf %19 : vector<256x128xf32> to vector<256x128xbf16>
      %c0_17 = arith.constant 0 : index
      %c0_18 = arith.constant 0 : index
      %c0_19 = arith.constant 0 : index
      %21 = vector.load %arg6[%c0_17, %c0_18, %c0_19] : memref<1x256x128xbf16, #tpu.memory_space<vmem>>, vector<1x256x128xbf16>
      %22 = vector.shape_cast %21 : vector<1x256x128xbf16> to vector<256x128xbf16>
      %23 = vector.shape_cast %20 : vector<256x128xbf16> to vector<1x256x128xbf16>
      tpu.vector_store %arg6[%c0_17, %c0_18, %c0_19], %23 {strides = array<i32>} : memref<1x256x128xbf16, #tpu.memory_space<vmem>>, vector<1x256x128xbf16>,
    } else {
    }
    return
  }
  func.func @transform_0(%arg0: i32, %arg1: i32, %arg2: i32) -> (i32, i32, i32) {
    %c0_i32 = arith.constant 0 : i32
    %c0_i32_0 = arith.constant 0 : i32
    return %arg0, %c0_i32, %arg2 : i32, i32, i32
  }
  func.func @transform_1(%arg0: i32, %arg1: i32, %arg2: i32) -> (i32, i32, i32) {
    %c0_i32 = arith.constant 0 : i32
    %c0_i32_0 = arith.constant 0 : i32
    return %c0_i32, %arg2, %arg1 : i32, i32, i32
  }
  func.func @transform_2(%arg0: i32, %arg1: i32, %arg2: i32) -> (i32, i32) {
    %c0_i32 = arith.constant 0 : i32
    %c0_i32_0 = arith.constant 0 : i32
    return %c0_i32, %arg1 : i32, i32
  }
  func.func @transform_3(%arg0: i32, %arg1: i32, %arg2: i32) -> (i32, i32, i32) {
    %c0_i32 = arith.constant 0 : i32
    %c0_i32_0 = arith.constant 0 : i32
    return %arg0, %c0_i32, %arg1 : i32, i32, i32
  }
}

module attributes {stable_mosaic.version = 11 : i64} {
  func.func @_conv_kernel(%arg0: i32, %arg1: i32, %arg2: i32, %arg3: memref<1x342x128xbf16, #tpu.memory_space<vmem>>, %arg4: memref<9x128x128xbf16, #tpu.memory_space<vmem>>, %arg5: memref<1x128xf32, #tpu.memory_space<vmem>>, %arg6: memref<1x288x128xbf16, #tpu.memory_space<vmem>>, %arg7: memref<288x128xf32, #tpu.memory_space<vmem>>) attributes {dimension_semantics = [#tpu.dimension_semantics<parallel>, #tpu.dimension_semantics<parallel>, #tpu.dimension_semantics<arbitrary>], iteration_bounds = array<i64: 2, 1, 1>, scalar_prefetch = 0 : i64, scratch_operands = 1 : i64, tpu.core_type = #tpu.core_type<tc>, window_params = [{transform_indices = @transform_0, window_bounds = array<i64: 1, 342, 128>}, {transform_indices = @transform_1, window_bounds = array<i64: 9, 128, 128>}, {transform_indices = @transform_2, window_bounds = array<i64: 1, 128>}, {transform_indices = @transform_3, window_bounds = array<i64: 1, 288, 128>}]} {
    %c0_i32 = arith.constant 0 : i32
    %0 = arith.cmpi eq, %arg2, %c0_i32 : i32
    %1 = arith.extui %0 : i1 to i32
    %c0_i32_0 = arith.constant 0 : i32
    %2 = arith.cmpi ne, %1, %c0_i32_0 : i32
    scf.if %2 {
      %cst_86 = arith.constant 0.000000e+00 : f32
      %78 = vector.broadcast %cst_86 : f32 to vector<288x128xf32>
      %c0_87 = arith.constant 0 : index
      %c0_88 = arith.constant 0 : index
      %79 = vector.load %arg7[%c0_87, %c0_88] : memref<288x128xf32, #tpu.memory_space<vmem>>, vector<288x128xf32>
      tpu.vector_store %arg7[%c0_87, %c0_88], %78 {strides = array<i32>} : memref<288x128xf32, #tpu.memory_space<vmem>>, vector<288x128xf32>,
    } else {
    }
    %c0 = arith.constant 0 : index
    %c0_1 = arith.constant 0 : index
    %c0_2 = arith.constant 0 : index
    %3 = vector.load %arg3[%c0, %c0_1, %c0_2] : memref<1x342x128xbf16, #tpu.memory_space<vmem>>, vector<1x288x128xbf16>
    %4 = vector.shape_cast %3 : vector<1x288x128xbf16> to vector<288x128xbf16>
    %c0_3 = arith.constant 0 : index
    %c0_4 = arith.constant 0 : index
    %5 = vector.load %arg7[%c0_3, %c0_4] : memref<288x128xf32, #tpu.memory_space<vmem>>, vector<288x128xf32>
    %c0_5 = arith.constant 0 : index
    %c0_6 = arith.constant 0 : index
    %c0_7 = arith.constant 0 : index
    %6 = vector.load %arg4[%c0_5, %c0_6, %c0_7] : memref<9x128x128xbf16, #tpu.memory_space<vmem>>, vector<1x128x128xbf16>
    %7 = vector.shape_cast %6 : vector<1x128x128xbf16> to vector<128x128xbf16>
    %cst = arith.constant dense<0.000000e+00> : vector<288x128xf32>
    %8 = tpu.matmul %4, %7, %cst {dimension_numbers = #tpu.dot_dimension_numbers<[1], [0], [0], [1], [0, 0, 1, 1], [], []>} : vector<288x128xbf16>, vector<128x128xbf16>, vector<288x128xf32> -> vector<288x128xf32>
    %9 = arith.addf %5, %8 : vector<288x128xf32>
    %c0_8 = arith.constant 0 : index
    %c0_9 = arith.constant 0 : index
    %10 = vector.load %arg7[%c0_8, %c0_9] : memref<288x128xf32, #tpu.memory_space<vmem>>, vector<288x128xf32>
    tpu.vector_store %arg7[%c0_8, %c0_9], %9 {strides = array<i32>} : memref<288x128xf32, #tpu.memory_space<vmem>>, vector<288x128xf32>,
    %c0_10 = arith.constant 0 : index
    %c1 = arith.constant 1 : index
    %c0_11 = arith.constant 0 : index
    %11 = vector.load %arg3[%c0_10, %c1, %c0_11] : memref<1x342x128xbf16, #tpu.memory_space<vmem>>, vector<1x288x128xbf16>
    %12 = vector.shape_cast %11 : vector<1x288x128xbf16> to vector<288x128xbf16>
    %c0_12 = arith.constant 0 : index
    %c0_13 = arith.constant 0 : index
    %13 = vector.load %arg7[%c0_12, %c0_13] : memref<288x128xf32, #tpu.memory_space<vmem>>, vector<288x128xf32>
    %c1_14 = arith.constant 1 : index
    %c0_15 = arith.constant 0 : index
    %c0_16 = arith.constant 0 : index
    %14 = vector.load %arg4[%c1_14, %c0_15, %c0_16] : memref<9x128x128xbf16, #tpu.memory_space<vmem>>, vector<1x128x128xbf16>
    %15 = vector.shape_cast %14 : vector<1x128x128xbf16> to vector<128x128xbf16>
    %cst_17 = arith.constant dense<0.000000e+00> : vector<288x128xf32>
    %16 = tpu.matmul %12, %15, %cst_17 {dimension_numbers = #tpu.dot_dimension_numbers<[1], [0], [0], [1], [0, 0, 1, 1], [], []>} : vector<288x128xbf16>, vector<128x128xbf16>, vector<288x128xf32> -> vector<288x128xf32>
    %17 = arith.addf %13, %16 : vector<288x128xf32>
    %c0_18 = arith.constant 0 : index
    %c0_19 = arith.constant 0 : index
    %18 = vector.load %arg7[%c0_18, %c0_19] : memref<288x128xf32, #tpu.memory_space<vmem>>, vector<288x128xf32>
    tpu.vector_store %arg7[%c0_18, %c0_19], %17 {strides = array<i32>} : memref<288x128xf32, #tpu.memory_space<vmem>>, vector<288x128xf32>,
    %c0_20 = arith.constant 0 : index
    %c2 = arith.constant 2 : index
    %c0_21 = arith.constant 0 : index
    %19 = vector.load %arg3[%c0_20, %c2, %c0_21] : memref<1x342x128xbf16, #tpu.memory_space<vmem>>, vector<1x288x128xbf16>
    %20 = vector.shape_cast %19 : vector<1x288x128xbf16> to vector<288x128xbf16>
    %c0_22 = arith.constant 0 : index
    %c0_23 = arith.constant 0 : index
    %21 = vector.load %arg7[%c0_22, %c0_23] : memref<288x128xf32, #tpu.memory_space<vmem>>, vector<288x128xf32>
    %c2_24 = arith.constant 2 : index
    %c0_25 = arith.constant 0 : index
    %c0_26 = arith.constant 0 : index
    %22 = vector.load %arg4[%c2_24, %c0_25, %c0_26] : memref<9x128x128xbf16, #tpu.memory_space<vmem>>, vector<1x128x128xbf16>
    %23 = vector.shape_cast %22 : vector<1x128x128xbf16> to vector<128x128xbf16>
    %cst_27 = arith.constant dense<0.000000e+00> : vector<288x128xf32>
    %24 = tpu.matmul %20, %23, %cst_27 {dimension_numbers = #tpu.dot_dimension_numbers<[1], [0], [0], [1], [0, 0, 1, 1], [], []>} : vector<288x128xbf16>, vector<128x128xbf16>, vector<288x128xf32> -> vector<288x128xf32>
    %25 = arith.addf %21, %24 : vector<288x128xf32>
    %c0_28 = arith.constant 0 : index
    %c0_29 = arith.constant 0 : index
    %26 = vector.load %arg7[%c0_28, %c0_29] : memref<288x128xf32, #tpu.memory_space<vmem>>, vector<288x128xf32>
    tpu.vector_store %arg7[%c0_28, %c0_29], %25 {strides = array<i32>} : memref<288x128xf32, #tpu.memory_space<vmem>>, vector<288x128xf32>,
    %c0_30 = arith.constant 0 : index
    %c18 = arith.constant 18 : index
    %c0_31 = arith.constant 0 : index
    %27 = vector.load %arg3[%c0_30, %c18, %c0_31] : memref<1x342x128xbf16, #tpu.memory_space<vmem>>, vector<1x288x128xbf16>
    %28 = vector.shape_cast %27 : vector<1x288x128xbf16> to vector<288x128xbf16>
    %c0_32 = arith.constant 0 : index
    %c0_33 = arith.constant 0 : index
    %29 = vector.load %arg7[%c0_32, %c0_33] : memref<288x128xf32, #tpu.memory_space<vmem>>, vector<288x128xf32>
    %c3 = arith.constant 3 : index
    %c0_34 = arith.constant 0 : index
    %c0_35 = arith.constant 0 : index
    %30 = vector.load %arg4[%c3, %c0_34, %c0_35] : memref<9x128x128xbf16, #tpu.memory_space<vmem>>, vector<1x128x128xbf16>
    %31 = vector.shape_cast %30 : vector<1x128x128xbf16> to vector<128x128xbf16>
    %cst_36 = arith.constant dense<0.000000e+00> : vector<288x128xf32>
    %32 = tpu.matmul %28, %31, %cst_36 {dimension_numbers = #tpu.dot_dimension_numbers<[1], [0], [0], [1], [0, 0, 1, 1], [], []>} : vector<288x128xbf16>, vector<128x128xbf16>, vector<288x128xf32> -> vector<288x128xf32>
    %33 = arith.addf %29, %32 : vector<288x128xf32>
    %c0_37 = arith.constant 0 : index
    %c0_38 = arith.constant 0 : index
    %34 = vector.load %arg7[%c0_37, %c0_38] : memref<288x128xf32, #tpu.memory_space<vmem>>, vector<288x128xf32>
    tpu.vector_store %arg7[%c0_37, %c0_38], %33 {strides = array<i32>} : memref<288x128xf32, #tpu.memory_space<vmem>>, vector<288x128xf32>,
    %c0_39 = arith.constant 0 : index
    %c19 = arith.constant 19 : index
    %c0_40 = arith.constant 0 : index
    %35 = vector.load %arg3[%c0_39, %c19, %c0_40] : memref<1x342x128xbf16, #tpu.memory_space<vmem>>, vector<1x288x128xbf16>
    %36 = vector.shape_cast %35 : vector<1x288x128xbf16> to vector<288x128xbf16>
    %c0_41 = arith.constant 0 : index
    %c0_42 = arith.constant 0 : index
    %37 = vector.load %arg7[%c0_41, %c0_42] : memref<288x128xf32, #tpu.memory_space<vmem>>, vector<288x128xf32>
    %c4 = arith.constant 4 : index
    %c0_43 = arith.constant 0 : index
    %c0_44 = arith.constant 0 : index
    %38 = vector.load %arg4[%c4, %c0_43, %c0_44] : memref<9x128x128xbf16, #tpu.memory_space<vmem>>, vector<1x128x128xbf16>
    %39 = vector.shape_cast %38 : vector<1x128x128xbf16> to vector<128x128xbf16>
    %cst_45 = arith.constant dense<0.000000e+00> : vector<288x128xf32>
    %40 = tpu.matmul %36, %39, %cst_45 {dimension_numbers = #tpu.dot_dimension_numbers<[1], [0], [0], [1], [0, 0, 1, 1], [], []>} : vector<288x128xbf16>, vector<128x128xbf16>, vector<288x128xf32> -> vector<288x128xf32>
    %41 = arith.addf %37, %40 : vector<288x128xf32>
    %c0_46 = arith.constant 0 : index
    %c0_47 = arith.constant 0 : index
    %42 = vector.load %arg7[%c0_46, %c0_47] : memref<288x128xf32, #tpu.memory_space<vmem>>, vector<288x128xf32>
    tpu.vector_store %arg7[%c0_46, %c0_47], %41 {strides = array<i32>} : memref<288x128xf32, #tpu.memory_space<vmem>>, vector<288x128xf32>,
    %c0_48 = arith.constant 0 : index
    %c20 = arith.constant 20 : index
    %c0_49 = arith.constant 0 : index
    %43 = vector.load %arg3[%c0_48, %c20, %c0_49] : memref<1x342x128xbf16, #tpu.memory_space<vmem>>, vector<1x288x128xbf16>
    %44 = vector.shape_cast %43 : vector<1x288x128xbf16> to vector<288x128xbf16>
    %c0_50 = arith.constant 0 : index
    %c0_51 = arith.constant 0 : index
    %45 = vector.load %arg7[%c0_50, %c0_51] : memref<288x128xf32, #tpu.memory_space<vmem>>, vector<288x128xf32>
    %c5 = arith.constant 5 : index
    %c0_52 = arith.constant 0 : index
    %c0_53 = arith.constant 0 : index
    %46 = vector.load %arg4[%c5, %c0_52, %c0_53] : memref<9x128x128xbf16, #tpu.memory_space<vmem>>, vector<1x128x128xbf16>
    %47 = vector.shape_cast %46 : vector<1x128x128xbf16> to vector<128x128xbf16>
    %cst_54 = arith.constant dense<0.000000e+00> : vector<288x128xf32>
    %48 = tpu.matmul %44, %47, %cst_54 {dimension_numbers = #tpu.dot_dimension_numbers<[1], [0], [0], [1], [0, 0, 1, 1], [], []>} : vector<288x128xbf16>, vector<128x128xbf16>, vector<288x128xf32> -> vector<288x128xf32>
    %49 = arith.addf %45, %48 : vector<288x128xf32>
    %c0_55 = arith.constant 0 : index
    %c0_56 = arith.constant 0 : index
    %50 = vector.load %arg7[%c0_55, %c0_56] : memref<288x128xf32, #tpu.memory_space<vmem>>, vector<288x128xf32>
    tpu.vector_store %arg7[%c0_55, %c0_56], %49 {strides = array<i32>} : memref<288x128xf32, #tpu.memory_space<vmem>>, vector<288x128xf32>,
    %c0_57 = arith.constant 0 : index
    %c36 = arith.constant 36 : index
    %c0_58 = arith.constant 0 : index
    %51 = vector.load %arg3[%c0_57, %c36, %c0_58] : memref<1x342x128xbf16, #tpu.memory_space<vmem>>, vector<1x288x128xbf16>
    %52 = vector.shape_cast %51 : vector<1x288x128xbf16> to vector<288x128xbf16>
    %c0_59 = arith.constant 0 : index
    %c0_60 = arith.constant 0 : index
    %53 = vector.load %arg7[%c0_59, %c0_60] : memref<288x128xf32, #tpu.memory_space<vmem>>, vector<288x128xf32>
    %c6 = arith.constant 6 : index
    %c0_61 = arith.constant 0 : index
    %c0_62 = arith.constant 0 : index
    %54 = vector.load %arg4[%c6, %c0_61, %c0_62] : memref<9x128x128xbf16, #tpu.memory_space<vmem>>, vector<1x128x128xbf16>
    %55 = vector.shape_cast %54 : vector<1x128x128xbf16> to vector<128x128xbf16>
    %cst_63 = arith.constant dense<0.000000e+00> : vector<288x128xf32>
    %56 = tpu.matmul %52, %55, %cst_63 {dimension_numbers = #tpu.dot_dimension_numbers<[1], [0], [0], [1], [0, 0, 1, 1], [], []>} : vector<288x128xbf16>, vector<128x128xbf16>, vector<288x128xf32> -> vector<288x128xf32>
    %57 = arith.addf %53, %56 : vector<288x128xf32>
    %c0_64 = arith.constant 0 : index
    %c0_65 = arith.constant 0 : index
    %58 = vector.load %arg7[%c0_64, %c0_65] : memref<288x128xf32, #tpu.memory_space<vmem>>, vector<288x128xf32>
    tpu.vector_store %arg7[%c0_64, %c0_65], %57 {strides = array<i32>} : memref<288x128xf32, #tpu.memory_space<vmem>>, vector<288x128xf32>,
    %c0_66 = arith.constant 0 : index
    %c37 = arith.constant 37 : index
    %c0_67 = arith.constant 0 : index
    %59 = vector.load %arg3[%c0_66, %c37, %c0_67] : memref<1x342x128xbf16, #tpu.memory_space<vmem>>, vector<1x288x128xbf16>
    %60 = vector.shape_cast %59 : vector<1x288x128xbf16> to vector<288x128xbf16>
    %c0_68 = arith.constant 0 : index
    %c0_69 = arith.constant 0 : index
    %61 = vector.load %arg7[%c0_68, %c0_69] : memref<288x128xf32, #tpu.memory_space<vmem>>, vector<288x128xf32>
    %c7 = arith.constant 7 : index
    %c0_70 = arith.constant 0 : index
    %c0_71 = arith.constant 0 : index
    %62 = vector.load %arg4[%c7, %c0_70, %c0_71] : memref<9x128x128xbf16, #tpu.memory_space<vmem>>, vector<1x128x128xbf16>
    %63 = vector.shape_cast %62 : vector<1x128x128xbf16> to vector<128x128xbf16>
    %cst_72 = arith.constant dense<0.000000e+00> : vector<288x128xf32>
    %64 = tpu.matmul %60, %63, %cst_72 {dimension_numbers = #tpu.dot_dimension_numbers<[1], [0], [0], [1], [0, 0, 1, 1], [], []>} : vector<288x128xbf16>, vector<128x128xbf16>, vector<288x128xf32> -> vector<288x128xf32>
    %65 = arith.addf %61, %64 : vector<288x128xf32>
    %c0_73 = arith.constant 0 : index
    %c0_74 = arith.constant 0 : index
    %66 = vector.load %arg7[%c0_73, %c0_74] : memref<288x128xf32, #tpu.memory_space<vmem>>, vector<288x128xf32>
    tpu.vector_store %arg7[%c0_73, %c0_74], %65 {strides = array<i32>} : memref<288x128xf32, #tpu.memory_space<vmem>>, vector<288x128xf32>,
    %c0_75 = arith.constant 0 : index
    %c38 = arith.constant 38 : index
    %c0_76 = arith.constant 0 : index
    %67 = vector.load %arg3[%c0_75, %c38, %c0_76] : memref<1x342x128xbf16, #tpu.memory_space<vmem>>, vector<1x288x128xbf16>
    %68 = vector.shape_cast %67 : vector<1x288x128xbf16> to vector<288x128xbf16>
    %c0_77 = arith.constant 0 : index
    %c0_78 = arith.constant 0 : index
    %69 = vector.load %arg7[%c0_77, %c0_78] : memref<288x128xf32, #tpu.memory_space<vmem>>, vector<288x128xf32>
    %c8 = arith.constant 8 : index
    %c0_79 = arith.constant 0 : index
    %c0_80 = arith.constant 0 : index
    %70 = vector.load %arg4[%c8, %c0_79, %c0_80] : memref<9x128x128xbf16, #tpu.memory_space<vmem>>, vector<1x128x128xbf16>
    %71 = vector.shape_cast %70 : vector<1x128x128xbf16> to vector<128x128xbf16>
    %cst_81 = arith.constant dense<0.000000e+00> : vector<288x128xf32>
    %72 = tpu.matmul %68, %71, %cst_81 {dimension_numbers = #tpu.dot_dimension_numbers<[1], [0], [0], [1], [0, 0, 1, 1], [], []>} : vector<288x128xbf16>, vector<128x128xbf16>, vector<288x128xf32> -> vector<288x128xf32>
    %73 = arith.addf %69, %72 : vector<288x128xf32>
    %c0_82 = arith.constant 0 : index
    %c0_83 = arith.constant 0 : index
    %74 = vector.load %arg7[%c0_82, %c0_83] : memref<288x128xf32, #tpu.memory_space<vmem>>, vector<288x128xf32>
    tpu.vector_store %arg7[%c0_82, %c0_83], %73 {strides = array<i32>} : memref<288x128xf32, #tpu.memory_space<vmem>>, vector<288x128xf32>,
    %c0_i32_84 = arith.constant 0 : i32
    %75 = arith.cmpi eq, %arg2, %c0_i32_84 : i32
    %76 = arith.extui %75 : i1 to i32
    %c0_i32_85 = arith.constant 0 : i32
    %77 = arith.cmpi ne, %76, %c0_i32_85 : i32
    scf.if %77 {
      %c0_86 = arith.constant 0 : index
      %c0_87 = arith.constant 0 : index
      %78 = vector.load %arg7[%c0_86, %c0_87] : memref<288x128xf32, #tpu.memory_space<vmem>>, vector<288x128xf32>
      %cst_88 = arith.constant 0.117851131 : f32
      %79 = vector.broadcast %cst_88 : f32 to vector<288x128xf32>
      %80 = arith.mulf %78, %79 : vector<288x128xf32>
      %c0_89 = arith.constant 0 : index
      %c0_90 = arith.constant 0 : index
      %81 = vector.load %arg5[%c0_89, %c0_90] : memref<1x128xf32, #tpu.memory_space<vmem>>, vector<1x128xf32>
      %82 = vector.broadcast %81 : vector<1x128xf32> to vector<288x128xf32>
      %83 = arith.addf %80, %82 : vector<288x128xf32>
      %cst_91 = arith.constant 0.000000e+00 : f32
      %84 = vector.broadcast %cst_91 : f32 to vector<288x128xf32>
      %85 = arith.cmpf oge, %83, %84 : vector<288x128xf32>
      %cst_92 = arith.constant 2.000000e-01 : f32
      %86 = vector.broadcast %cst_92 : f32 to vector<288x128xf32>
      %87 = arith.mulf %83, %86 : vector<288x128xf32>
      %88 = arith.select %85, %83, %87 : vector<288x128xi1>, vector<288x128xf32>
      %89 = arith.truncf %88 : vector<288x128xf32> to vector<288x128xbf16>
      %c0_93 = arith.constant 0 : index
      %c0_94 = arith.constant 0 : index
      %c0_95 = arith.constant 0 : index
      %90 = vector.load %arg6[%c0_93, %c0_94, %c0_95] : memref<1x288x128xbf16, #tpu.memory_space<vmem>>, vector<1x288x128xbf16>
      %91 = vector.shape_cast %90 : vector<1x288x128xbf16> to vector<288x128xbf16>
      %92 = vector.shape_cast %89 : vector<288x128xbf16> to vector<1x288x128xbf16>
      tpu.vector_store %arg6[%c0_93, %c0_94, %c0_95], %92 {strides = array<i32>} : memref<1x288x128xbf16, #tpu.memory_space<vmem>>, vector<1x288x128xbf16>,
    } else {
    }
    return
  }
  func.func @transform_0(%arg0: i32, %arg1: i32, %arg2: i32) -> (i32, i32, i32) {
    %c0_i32 = arith.constant 0 : i32
    %c0_i32_0 = arith.constant 0 : i32
    return %arg0, %c0_i32, %arg2 : i32, i32, i32
  }
  func.func @transform_1(%arg0: i32, %arg1: i32, %arg2: i32) -> (i32, i32, i32) {
    %c0_i32 = arith.constant 0 : i32
    %c0_i32_0 = arith.constant 0 : i32
    return %c0_i32, %arg2, %arg1 : i32, i32, i32
  }
  func.func @transform_2(%arg0: i32, %arg1: i32, %arg2: i32) -> (i32, i32) {
    %c0_i32 = arith.constant 0 : i32
    %c0_i32_0 = arith.constant 0 : i32
    return %c0_i32, %arg1 : i32, i32
  }
  func.func @transform_3(%arg0: i32, %arg1: i32, %arg2: i32) -> (i32, i32, i32) {
    %c0_i32 = arith.constant 0 : i32
    %c0_i32_0 = arith.constant 0 : i32
    return %arg0, %c0_i32, %arg1 : i32, i32, i32
  }
}

module attributes {stable_mosaic.version = 11 : i64} {
  func.func @_conv_kernel(%arg0: i32, %arg1: i32, %arg2: i32, %arg3: memref<1x64x128xbf16, #tpu.memory_space<vmem>>, %arg4: memref<1x128x128xbf16, #tpu.memory_space<vmem>>, %arg5: memref<1x128xf32, #tpu.memory_space<vmem>>, %arg6: memref<1x64x128xbf16, #tpu.memory_space<vmem>>, %arg7: memref<1x64x128xbf16, #tpu.memory_space<vmem>>, %arg8: memref<64x128xf32, #tpu.memory_space<vmem>>) attributes {dimension_semantics = [#tpu.dimension_semantics<parallel>, #tpu.dimension_semantics<parallel>, #tpu.dimension_semantics<arbitrary>], iteration_bounds = array<i64: 2, 1, 1>, scalar_prefetch = 0 : i64, scratch_operands = 1 : i64, tpu.core_type = #tpu.core_type<tc>, window_params = [{transform_indices = @transform_0, window_bounds = array<i64: 1, 64, 128>}, {transform_indices = @transform_1, window_bounds = array<i64: 1, 128, 128>}, {transform_indices = @transform_2, window_bounds = array<i64: 1, 128>}, {transform_indices = @transform_3, window_bounds = array<i64: 1, 64, 128>}, {transform_indices = @transform_4, window_bounds = array<i64: 1, 64, 128>}]} {
    %c0_i32 = arith.constant 0 : i32
    %0 = arith.cmpi eq, %arg2, %c0_i32 : i32
    %1 = arith.extui %0 : i1 to i32
    %c0_i32_0 = arith.constant 0 : i32
    %2 = arith.cmpi ne, %1, %c0_i32_0 : i32
    scf.if %2 {
      %cst_12 = arith.constant 0.000000e+00 : f32
      %14 = vector.broadcast %cst_12 : f32 to vector<64x128xf32>
      %c0_13 = arith.constant 0 : index
      %c0_14 = arith.constant 0 : index
      %15 = vector.load %arg8[%c0_13, %c0_14] : memref<64x128xf32, #tpu.memory_space<vmem>>, vector<64x128xf32>
      tpu.vector_store %arg8[%c0_13, %c0_14], %14 {strides = array<i32>} : memref<64x128xf32, #tpu.memory_space<vmem>>, vector<64x128xf32>,
    } else {
    }
    %c0 = arith.constant 0 : index
    %c0_1 = arith.constant 0 : index
    %c0_2 = arith.constant 0 : index
    %3 = vector.load %arg3[%c0, %c0_1, %c0_2] : memref<1x64x128xbf16, #tpu.memory_space<vmem>>, vector<1x64x128xbf16>
    %4 = vector.shape_cast %3 : vector<1x64x128xbf16> to vector<64x128xbf16>
    %c0_3 = arith.constant 0 : index
    %c0_4 = arith.constant 0 : index
    %5 = vector.load %arg8[%c0_3, %c0_4] : memref<64x128xf32, #tpu.memory_space<vmem>>, vector<64x128xf32>
    %c0_5 = arith.constant 0 : index
    %c0_6 = arith.constant 0 : index
    %c0_7 = arith.constant 0 : index
    %6 = vector.load %arg4[%c0_5, %c0_6, %c0_7] : memref<1x128x128xbf16, #tpu.memory_space<vmem>>, vector<1x128x128xbf16>
    %7 = vector.shape_cast %6 : vector<1x128x128xbf16> to vector<128x128xbf16>
    %cst = arith.constant dense<0.000000e+00> : vector<64x128xf32>
    %8 = tpu.matmul %4, %7, %cst {dimension_numbers = #tpu.dot_dimension_numbers<[1], [0], [0], [1], [0, 0, 1, 1], [], []>} : vector<64x128xbf16>, vector<128x128xbf16>, vector<64x128xf32> -> vector<64x128xf32>
    %9 = arith.addf %5, %8 : vector<64x128xf32>
    %c0_8 = arith.constant 0 : index
    %c0_9 = arith.constant 0 : index
    %10 = vector.load %arg8[%c0_8, %c0_9] : memref<64x128xf32, #tpu.memory_space<vmem>>, vector<64x128xf32>
    tpu.vector_store %arg8[%c0_8, %c0_9], %9 {strides = array<i32>} : memref<64x128xf32, #tpu.memory_space<vmem>>, vector<64x128xf32>,
    %c0_i32_10 = arith.constant 0 : i32
    %11 = arith.cmpi eq, %arg2, %c0_i32_10 : i32
    %12 = arith.extui %11 : i1 to i32
    %c0_i32_11 = arith.constant 0 : i32
    %13 = arith.cmpi ne, %12, %c0_i32_11 : i32
    scf.if %13 {
      %c0_12 = arith.constant 0 : index
      %c0_13 = arith.constant 0 : index
      %14 = vector.load %arg8[%c0_12, %c0_13] : memref<64x128xf32, #tpu.memory_space<vmem>>, vector<64x128xf32>
      %cst_14 = arith.constant 0.353553385 : f32
      %15 = vector.broadcast %cst_14 : f32 to vector<64x128xf32>
      %16 = arith.mulf %14, %15 : vector<64x128xf32>
      %c0_15 = arith.constant 0 : index
      %c0_16 = arith.constant 0 : index
      %17 = vector.load %arg5[%c0_15, %c0_16] : memref<1x128xf32, #tpu.memory_space<vmem>>, vector<1x128xf32>
      %18 = vector.broadcast %17 : vector<1x128xf32> to vector<64x128xf32>
      %19 = arith.addf %16, %18 : vector<64x128xf32>
      %c0_17 = arith.constant 0 : index
      %c0_18 = arith.constant 0 : index
      %c0_19 = arith.constant 0 : index
      %20 = vector.load %arg6[%c0_17, %c0_18, %c0_19] : memref<1x64x128xbf16, #tpu.memory_space<vmem>>, vector<1x64x128xbf16>
      %21 = vector.shape_cast %20 : vector<1x64x128xbf16> to vector<64x128xbf16>
      %22 = arith.extf %21 : vector<64x128xbf16> to vector<64x128xf32>
      %23 = arith.addf %19, %22 : vector<64x128xf32>
      %cst_20 = arith.constant 0.707106769 : f32
      %24 = vector.broadcast %cst_20 : f32 to vector<64x128xf32>
      %25 = arith.mulf %23, %24 : vector<64x128xf32>
      %26 = arith.truncf %25 : vector<64x128xf32> to vector<64x128xbf16>
      %c0_21 = arith.constant 0 : index
      %c0_22 = arith.constant 0 : index
      %c0_23 = arith.constant 0 : index
      %27 = vector.load %arg7[%c0_21, %c0_22, %c0_23] : memref<1x64x128xbf16, #tpu.memory_space<vmem>>, vector<1x64x128xbf16>
      %28 = vector.shape_cast %27 : vector<1x64x128xbf16> to vector<64x128xbf16>
      %29 = vector.shape_cast %26 : vector<64x128xbf16> to vector<1x64x128xbf16>
      tpu.vector_store %arg7[%c0_21, %c0_22, %c0_23], %29 {strides = array<i32>} : memref<1x64x128xbf16, #tpu.memory_space<vmem>>, vector<1x64x128xbf16>,
    } else {
    }
    return
  }
  func.func @transform_0(%arg0: i32, %arg1: i32, %arg2: i32) -> (i32, i32, i32) {
    %c0_i32 = arith.constant 0 : i32
    %c0_i32_0 = arith.constant 0 : i32
    return %arg0, %c0_i32, %arg2 : i32, i32, i32
  }
  func.func @transform_1(%arg0: i32, %arg1: i32, %arg2: i32) -> (i32, i32, i32) {
    %c0_i32 = arith.constant 0 : i32
    %c0_i32_0 = arith.constant 0 : i32
    return %c0_i32, %arg2, %arg1 : i32, i32, i32
  }
  func.func @transform_2(%arg0: i32, %arg1: i32, %arg2: i32) -> (i32, i32) {
    %c0_i32 = arith.constant 0 : i32
    %c0_i32_0 = arith.constant 0 : i32
    return %c0_i32, %arg1 : i32, i32
  }
  func.func @transform_3(%arg0: i32, %arg1: i32, %arg2: i32) -> (i32, i32, i32) {
    %c0_i32 = arith.constant 0 : i32
    %c0_i32_0 = arith.constant 0 : i32
    return %arg0, %c0_i32, %arg1 : i32, i32, i32
  }
  func.func @transform_4(%arg0: i32, %arg1: i32, %arg2: i32) -> (i32, i32, i32) {
    %c0_i32 = arith.constant 0 : i32
    %c0_i32_0 = arith.constant 0 : i32
    return %arg0, %c0_i32, %arg1 : i32, i32, i32
  }
}

module attributes {stable_mosaic.version = 11 : i64} {
  func.func @_conv_kernel(%arg0: i32, %arg1: i32, %arg2: i32, %arg3: memref<1x110x128xbf16, #tpu.memory_space<vmem>>, %arg4: memref<9x128x128xbf16, #tpu.memory_space<vmem>>, %arg5: memref<1x128xf32, #tpu.memory_space<vmem>>, %arg6: memref<1x80x128xbf16, #tpu.memory_space<vmem>>, %arg7: memref<80x128xf32, #tpu.memory_space<vmem>>) attributes {dimension_semantics = [#tpu.dimension_semantics<parallel>, #tpu.dimension_semantics<parallel>, #tpu.dimension_semantics<arbitrary>], iteration_bounds = array<i64: 2, 1, 1>, scalar_prefetch = 0 : i64, scratch_operands = 1 : i64, tpu.core_type = #tpu.core_type<tc>, window_params = [{transform_indices = @transform_0, window_bounds = array<i64: 1, 110, 128>}, {transform_indices = @transform_1, window_bounds = array<i64: 9, 128, 128>}, {transform_indices = @transform_2, window_bounds = array<i64: 1, 128>}, {transform_indices = @transform_3, window_bounds = array<i64: 1, 80, 128>}]} {
    %c0_i32 = arith.constant 0 : i32
    %0 = arith.cmpi eq, %arg2, %c0_i32 : i32
    %1 = arith.extui %0 : i1 to i32
    %c0_i32_0 = arith.constant 0 : i32
    %2 = arith.cmpi ne, %1, %c0_i32_0 : i32
    scf.if %2 {
      %cst_86 = arith.constant 0.000000e+00 : f32
      %78 = vector.broadcast %cst_86 : f32 to vector<80x128xf32>
      %c0_87 = arith.constant 0 : index
      %c0_88 = arith.constant 0 : index
      %79 = vector.load %arg7[%c0_87, %c0_88] : memref<80x128xf32, #tpu.memory_space<vmem>>, vector<80x128xf32>
      tpu.vector_store %arg7[%c0_87, %c0_88], %78 {strides = array<i32>} : memref<80x128xf32, #tpu.memory_space<vmem>>, vector<80x128xf32>,
    } else {
    }
    %c0 = arith.constant 0 : index
    %c0_1 = arith.constant 0 : index
    %c0_2 = arith.constant 0 : index
    %3 = vector.load %arg3[%c0, %c0_1, %c0_2] : memref<1x110x128xbf16, #tpu.memory_space<vmem>>, vector<1x80x128xbf16>
    %4 = vector.shape_cast %3 : vector<1x80x128xbf16> to vector<80x128xbf16>
    %c0_3 = arith.constant 0 : index
    %c0_4 = arith.constant 0 : index
    %5 = vector.load %arg7[%c0_3, %c0_4] : memref<80x128xf32, #tpu.memory_space<vmem>>, vector<80x128xf32>
    %c0_5 = arith.constant 0 : index
    %c0_6 = arith.constant 0 : index
    %c0_7 = arith.constant 0 : index
    %6 = vector.load %arg4[%c0_5, %c0_6, %c0_7] : memref<9x128x128xbf16, #tpu.memory_space<vmem>>, vector<1x128x128xbf16>
    %7 = vector.shape_cast %6 : vector<1x128x128xbf16> to vector<128x128xbf16>
    %cst = arith.constant dense<0.000000e+00> : vector<80x128xf32>
    %8 = tpu.matmul %4, %7, %cst {dimension_numbers = #tpu.dot_dimension_numbers<[1], [0], [0], [1], [0, 0, 1, 1], [], []>} : vector<80x128xbf16>, vector<128x128xbf16>, vector<80x128xf32> -> vector<80x128xf32>
    %9 = arith.addf %5, %8 : vector<80x128xf32>
    %c0_8 = arith.constant 0 : index
    %c0_9 = arith.constant 0 : index
    %10 = vector.load %arg7[%c0_8, %c0_9] : memref<80x128xf32, #tpu.memory_space<vmem>>, vector<80x128xf32>
    tpu.vector_store %arg7[%c0_8, %c0_9], %9 {strides = array<i32>} : memref<80x128xf32, #tpu.memory_space<vmem>>, vector<80x128xf32>,
    %c0_10 = arith.constant 0 : index
    %c1 = arith.constant 1 : index
    %c0_11 = arith.constant 0 : index
    %11 = vector.load %arg3[%c0_10, %c1, %c0_11] : memref<1x110x128xbf16, #tpu.memory_space<vmem>>, vector<1x80x128xbf16>
    %12 = vector.shape_cast %11 : vector<1x80x128xbf16> to vector<80x128xbf16>
    %c0_12 = arith.constant 0 : index
    %c0_13 = arith.constant 0 : index
    %13 = vector.load %arg7[%c0_12, %c0_13] : memref<80x128xf32, #tpu.memory_space<vmem>>, vector<80x128xf32>
    %c1_14 = arith.constant 1 : index
    %c0_15 = arith.constant 0 : index
    %c0_16 = arith.constant 0 : index
    %14 = vector.load %arg4[%c1_14, %c0_15, %c0_16] : memref<9x128x128xbf16, #tpu.memory_space<vmem>>, vector<1x128x128xbf16>
    %15 = vector.shape_cast %14 : vector<1x128x128xbf16> to vector<128x128xbf16>
    %cst_17 = arith.constant dense<0.000000e+00> : vector<80x128xf32>
    %16 = tpu.matmul %12, %15, %cst_17 {dimension_numbers = #tpu.dot_dimension_numbers<[1], [0], [0], [1], [0, 0, 1, 1], [], []>} : vector<80x128xbf16>, vector<128x128xbf16>, vector<80x128xf32> -> vector<80x128xf32>
    %17 = arith.addf %13, %16 : vector<80x128xf32>
    %c0_18 = arith.constant 0 : index
    %c0_19 = arith.constant 0 : index
    %18 = vector.load %arg7[%c0_18, %c0_19] : memref<80x128xf32, #tpu.memory_space<vmem>>, vector<80x128xf32>
    tpu.vector_store %arg7[%c0_18, %c0_19], %17 {strides = array<i32>} : memref<80x128xf32, #tpu.memory_space<vmem>>, vector<80x128xf32>,
    %c0_20 = arith.constant 0 : index
    %c2 = arith.constant 2 : index
    %c0_21 = arith.constant 0 : index
    %19 = vector.load %arg3[%c0_20, %c2, %c0_21] : memref<1x110x128xbf16, #tpu.memory_space<vmem>>, vector<1x80x128xbf16>
    %20 = vector.shape_cast %19 : vector<1x80x128xbf16> to vector<80x128xbf16>
    %c0_22 = arith.constant 0 : index
    %c0_23 = arith.constant 0 : index
    %21 = vector.load %arg7[%c0_22, %c0_23] : memref<80x128xf32, #tpu.memory_space<vmem>>, vector<80x128xf32>
    %c2_24 = arith.constant 2 : index
    %c0_25 = arith.constant 0 : index
    %c0_26 = arith.constant 0 : index
    %22 = vector.load %arg4[%c2_24, %c0_25, %c0_26] : memref<9x128x128xbf16, #tpu.memory_space<vmem>>, vector<1x128x128xbf16>
    %23 = vector.shape_cast %22 : vector<1x128x128xbf16> to vector<128x128xbf16>
    %cst_27 = arith.constant dense<0.000000e+00> : vector<80x128xf32>
    %24 = tpu.matmul %20, %23, %cst_27 {dimension_numbers = #tpu.dot_dimension_numbers<[1], [0], [0], [1], [0, 0, 1, 1], [], []>} : vector<80x128xbf16>, vector<128x128xbf16>, vector<80x128xf32> -> vector<80x128xf32>
    %25 = arith.addf %21, %24 : vector<80x128xf32>
    %c0_28 = arith.constant 0 : index
    %c0_29 = arith.constant 0 : index
    %26 = vector.load %arg7[%c0_28, %c0_29] : memref<80x128xf32, #tpu.memory_space<vmem>>, vector<80x128xf32>
    tpu.vector_store %arg7[%c0_28, %c0_29], %25 {strides = array<i32>} : memref<80x128xf32, #tpu.memory_space<vmem>>, vector<80x128xf32>,
    %c0_30 = arith.constant 0 : index
    %c10 = arith.constant 10 : index
    %c0_31 = arith.constant 0 : index
    %27 = vector.load %arg3[%c0_30, %c10, %c0_31] : memref<1x110x128xbf16, #tpu.memory_space<vmem>>, vector<1x80x128xbf16>
    %28 = vector.shape_cast %27 : vector<1x80x128xbf16> to vector<80x128xbf16>
    %c0_32 = arith.constant 0 : index
    %c0_33 = arith.constant 0 : index
    %29 = vector.load %arg7[%c0_32, %c0_33] : memref<80x128xf32, #tpu.memory_space<vmem>>, vector<80x128xf32>
    %c3 = arith.constant 3 : index
    %c0_34 = arith.constant 0 : index
    %c0_35 = arith.constant 0 : index
    %30 = vector.load %arg4[%c3, %c0_34, %c0_35] : memref<9x128x128xbf16, #tpu.memory_space<vmem>>, vector<1x128x128xbf16>
    %31 = vector.shape_cast %30 : vector<1x128x128xbf16> to vector<128x128xbf16>
    %cst_36 = arith.constant dense<0.000000e+00> : vector<80x128xf32>
    %32 = tpu.matmul %28, %31, %cst_36 {dimension_numbers = #tpu.dot_dimension_numbers<[1], [0], [0], [1], [0, 0, 1, 1], [], []>} : vector<80x128xbf16>, vector<128x128xbf16>, vector<80x128xf32> -> vector<80x128xf32>
    %33 = arith.addf %29, %32 : vector<80x128xf32>
    %c0_37 = arith.constant 0 : index
    %c0_38 = arith.constant 0 : index
    %34 = vector.load %arg7[%c0_37, %c0_38] : memref<80x128xf32, #tpu.memory_space<vmem>>, vector<80x128xf32>
    tpu.vector_store %arg7[%c0_37, %c0_38], %33 {strides = array<i32>} : memref<80x128xf32, #tpu.memory_space<vmem>>, vector<80x128xf32>,
    %c0_39 = arith.constant 0 : index
    %c11 = arith.constant 11 : index
    %c0_40 = arith.constant 0 : index
    %35 = vector.load %arg3[%c0_39, %c11, %c0_40] : memref<1x110x128xbf16, #tpu.memory_space<vmem>>, vector<1x80x128xbf16>
    %36 = vector.shape_cast %35 : vector<1x80x128xbf16> to vector<80x128xbf16>
    %c0_41 = arith.constant 0 : index
    %c0_42 = arith.constant 0 : index
    %37 = vector.load %arg7[%c0_41, %c0_42] : memref<80x128xf32, #tpu.memory_space<vmem>>, vector<80x128xf32>
    %c4 = arith.constant 4 : index
    %c0_43 = arith.constant 0 : index
    %c0_44 = arith.constant 0 : index
    %38 = vector.load %arg4[%c4, %c0_43, %c0_44] : memref<9x128x128xbf16, #tpu.memory_space<vmem>>, vector<1x128x128xbf16>
    %39 = vector.shape_cast %38 : vector<1x128x128xbf16> to vector<128x128xbf16>
    %cst_45 = arith.constant dense<0.000000e+00> : vector<80x128xf32>
    %40 = tpu.matmul %36, %39, %cst_45 {dimension_numbers = #tpu.dot_dimension_numbers<[1], [0], [0], [1], [0, 0, 1, 1], [], []>} : vector<80x128xbf16>, vector<128x128xbf16>, vector<80x128xf32> -> vector<80x128xf32>
    %41 = arith.addf %37, %40 : vector<80x128xf32>
    %c0_46 = arith.constant 0 : index
    %c0_47 = arith.constant 0 : index
    %42 = vector.load %arg7[%c0_46, %c0_47] : memref<80x128xf32, #tpu.memory_space<vmem>>, vector<80x128xf32>
    tpu.vector_store %arg7[%c0_46, %c0_47], %41 {strides = array<i32>} : memref<80x128xf32, #tpu.memory_space<vmem>>, vector<80x128xf32>,
    %c0_48 = arith.constant 0 : index
    %c12 = arith.constant 12 : index
    %c0_49 = arith.constant 0 : index
    %43 = vector.load %arg3[%c0_48, %c12, %c0_49] : memref<1x110x128xbf16, #tpu.memory_space<vmem>>, vector<1x80x128xbf16>
    %44 = vector.shape_cast %43 : vector<1x80x128xbf16> to vector<80x128xbf16>
    %c0_50 = arith.constant 0 : index
    %c0_51 = arith.constant 0 : index
    %45 = vector.load %arg7[%c0_50, %c0_51] : memref<80x128xf32, #tpu.memory_space<vmem>>, vector<80x128xf32>
    %c5 = arith.constant 5 : index
    %c0_52 = arith.constant 0 : index
    %c0_53 = arith.constant 0 : index
    %46 = vector.load %arg4[%c5, %c0_52, %c0_53] : memref<9x128x128xbf16, #tpu.memory_space<vmem>>, vector<1x128x128xbf16>
    %47 = vector.shape_cast %46 : vector<1x128x128xbf16> to vector<128x128xbf16>
    %cst_54 = arith.constant dense<0.000000e+00> : vector<80x128xf32>
    %48 = tpu.matmul %44, %47, %cst_54 {dimension_numbers = #tpu.dot_dimension_numbers<[1], [0], [0], [1], [0, 0, 1, 1], [], []>} : vector<80x128xbf16>, vector<128x128xbf16>, vector<80x128xf32> -> vector<80x128xf32>
    %49 = arith.addf %45, %48 : vector<80x128xf32>
    %c0_55 = arith.constant 0 : index
    %c0_56 = arith.constant 0 : index
    %50 = vector.load %arg7[%c0_55, %c0_56] : memref<80x128xf32, #tpu.memory_space<vmem>>, vector<80x128xf32>
    tpu.vector_store %arg7[%c0_55, %c0_56], %49 {strides = array<i32>} : memref<80x128xf32, #tpu.memory_space<vmem>>, vector<80x128xf32>,
    %c0_57 = arith.constant 0 : index
    %c20 = arith.constant 20 : index
    %c0_58 = arith.constant 0 : index
    %51 = vector.load %arg3[%c0_57, %c20, %c0_58] : memref<1x110x128xbf16, #tpu.memory_space<vmem>>, vector<1x80x128xbf16>
    %52 = vector.shape_cast %51 : vector<1x80x128xbf16> to vector<80x128xbf16>
    %c0_59 = arith.constant 0 : index
    %c0_60 = arith.constant 0 : index
    %53 = vector.load %arg7[%c0_59, %c0_60] : memref<80x128xf32, #tpu.memory_space<vmem>>, vector<80x128xf32>
    %c6 = arith.constant 6 : index
    %c0_61 = arith.constant 0 : index
    %c0_62 = arith.constant 0 : index
    %54 = vector.load %arg4[%c6, %c0_61, %c0_62] : memref<9x128x128xbf16, #tpu.memory_space<vmem>>, vector<1x128x128xbf16>
    %55 = vector.shape_cast %54 : vector<1x128x128xbf16> to vector<128x128xbf16>
    %cst_63 = arith.constant dense<0.000000e+00> : vector<80x128xf32>
    %56 = tpu.matmul %52, %55, %cst_63 {dimension_numbers = #tpu.dot_dimension_numbers<[1], [0], [0], [1], [0, 0, 1, 1], [], []>} : vector<80x128xbf16>, vector<128x128xbf16>, vector<80x128xf32> -> vector<80x128xf32>
    %57 = arith.addf %53, %56 : vector<80x128xf32>
    %c0_64 = arith.constant 0 : index
    %c0_65 = arith.constant 0 : index
    %58 = vector.load %arg7[%c0_64, %c0_65] : memref<80x128xf32, #tpu.memory_space<vmem>>, vector<80x128xf32>
    tpu.vector_store %arg7[%c0_64, %c0_65], %57 {strides = array<i32>} : memref<80x128xf32, #tpu.memory_space<vmem>>, vector<80x128xf32>,
    %c0_66 = arith.constant 0 : index
    %c21 = arith.constant 21 : index
    %c0_67 = arith.constant 0 : index
    %59 = vector.load %arg3[%c0_66, %c21, %c0_67] : memref<1x110x128xbf16, #tpu.memory_space<vmem>>, vector<1x80x128xbf16>
    %60 = vector.shape_cast %59 : vector<1x80x128xbf16> to vector<80x128xbf16>
    %c0_68 = arith.constant 0 : index
    %c0_69 = arith.constant 0 : index
    %61 = vector.load %arg7[%c0_68, %c0_69] : memref<80x128xf32, #tpu.memory_space<vmem>>, vector<80x128xf32>
    %c7 = arith.constant 7 : index
    %c0_70 = arith.constant 0 : index
    %c0_71 = arith.constant 0 : index
    %62 = vector.load %arg4[%c7, %c0_70, %c0_71] : memref<9x128x128xbf16, #tpu.memory_space<vmem>>, vector<1x128x128xbf16>
    %63 = vector.shape_cast %62 : vector<1x128x128xbf16> to vector<128x128xbf16>
    %cst_72 = arith.constant dense<0.000000e+00> : vector<80x128xf32>
    %64 = tpu.matmul %60, %63, %cst_72 {dimension_numbers = #tpu.dot_dimension_numbers<[1], [0], [0], [1], [0, 0, 1, 1], [], []>} : vector<80x128xbf16>, vector<128x128xbf16>, vector<80x128xf32> -> vector<80x128xf32>
    %65 = arith.addf %61, %64 : vector<80x128xf32>
    %c0_73 = arith.constant 0 : index
    %c0_74 = arith.constant 0 : index
    %66 = vector.load %arg7[%c0_73, %c0_74] : memref<80x128xf32, #tpu.memory_space<vmem>>, vector<80x128xf32>
    tpu.vector_store %arg7[%c0_73, %c0_74], %65 {strides = array<i32>} : memref<80x128xf32, #tpu.memory_space<vmem>>, vector<80x128xf32>,
    %c0_75 = arith.constant 0 : index
    %c22 = arith.constant 22 : index
    %c0_76 = arith.constant 0 : index
    %67 = vector.load %arg3[%c0_75, %c22, %c0_76] : memref<1x110x128xbf16, #tpu.memory_space<vmem>>, vector<1x80x128xbf16>
    %68 = vector.shape_cast %67 : vector<1x80x128xbf16> to vector<80x128xbf16>
    %c0_77 = arith.constant 0 : index
    %c0_78 = arith.constant 0 : index
    %69 = vector.load %arg7[%c0_77, %c0_78] : memref<80x128xf32, #tpu.memory_space<vmem>>, vector<80x128xf32>
    %c8 = arith.constant 8 : index
    %c0_79 = arith.constant 0 : index
    %c0_80 = arith.constant 0 : index
    %70 = vector.load %arg4[%c8, %c0_79, %c0_80] : memref<9x128x128xbf16, #tpu.memory_space<vmem>>, vector<1x128x128xbf16>
    %71 = vector.shape_cast %70 : vector<1x128x128xbf16> to vector<128x128xbf16>
    %cst_81 = arith.constant dense<0.000000e+00> : vector<80x128xf32>
    %72 = tpu.matmul %68, %71, %cst_81 {dimension_numbers = #tpu.dot_dimension_numbers<[1], [0], [0], [1], [0, 0, 1, 1], [], []>} : vector<80x128xbf16>, vector<128x128xbf16>, vector<80x128xf32> -> vector<80x128xf32>
    %73 = arith.addf %69, %72 : vector<80x128xf32>
    %c0_82 = arith.constant 0 : index
    %c0_83 = arith.constant 0 : index
    %74 = vector.load %arg7[%c0_82, %c0_83] : memref<80x128xf32, #tpu.memory_space<vmem>>, vector<80x128xf32>
    tpu.vector_store %arg7[%c0_82, %c0_83], %73 {strides = array<i32>} : memref<80x128xf32, #tpu.memory_space<vmem>>, vector<80x128xf32>,
    %c0_i32_84 = arith.constant 0 : i32
    %75 = arith.cmpi eq, %arg2, %c0_i32_84 : i32
    %76 = arith.extui %75 : i1 to i32
    %c0_i32_85 = arith.constant 0 : i32
    %77 = arith.cmpi ne, %76, %c0_i32_85 : i32
    scf.if %77 {
      %c0_86 = arith.constant 0 : index
      %c0_87 = arith.constant 0 : index
      %78 = vector.load %arg7[%c0_86, %c0_87] : memref<80x128xf32, #tpu.memory_space<vmem>>, vector<80x128xf32>
      %cst_88 = arith.constant 0.0833333358 : f32
      %79 = vector.broadcast %cst_88 : f32 to vector<80x128xf32>
      %80 = arith.mulf %78, %79 : vector<80x128xf32>
      %c0_89 = arith.constant 0 : index
      %c0_90 = arith.constant 0 : index
      %81 = vector.load %arg5[%c0_89, %c0_90] : memref<1x128xf32, #tpu.memory_space<vmem>>, vector<1x128xf32>
      %82 = vector.broadcast %81 : vector<1x128xf32> to vector<80x128xf32>
      %83 = arith.addf %80, %82 : vector<80x128xf32>
      %cst_91 = arith.constant 0.000000e+00 : f32
      %84 = vector.broadcast %cst_91 : f32 to vector<80x128xf32>
      %85 = arith.cmpf oge, %83, %84 : vector<80x128xf32>
      %cst_92 = arith.constant 2.000000e-01 : f32
      %86 = vector.broadcast %cst_92 : f32 to vector<80x128xf32>
      %87 = arith.mulf %83, %86 : vector<80x128xf32>
      %88 = arith.select %85, %83, %87 : vector<80x128xi1>, vector<80x128xf32>
      %89 = arith.truncf %88 : vector<80x128xf32> to vector<80x128xbf16>
      %c0_93 = arith.constant 0 : index
      %c0_94 = arith.constant 0 : index
      %c0_95 = arith.constant 0 : index
      %90 = vector.load %arg6[%c0_93, %c0_94, %c0_95] : memref<1x80x128xbf16, #tpu.memory_space<vmem>>, vector<1x80x128xbf16>
      %91 = vector.shape_cast %90 : vector<1x80x128xbf16> to vector<80x128xbf16>
      %92 = vector.shape_cast %89 : vector<80x128xbf16> to vector<1x80x128xbf16>
      tpu.vector_store %arg6[%c0_93, %c0_94, %c0_95], %92 {strides = array<i32>} : memref<1x80x128xbf16, #tpu.memory_space<vmem>>, vector<1x80x128xbf16>,
    } else {
    }
    return
  }
  func.func @transform_0(%arg0: i32, %arg1: i32, %arg2: i32) -> (i32, i32, i32) {
    %c0_i32 = arith.constant 0 : i32
    %c0_i32_0 = arith.constant 0 : i32
    return %arg0, %c0_i32, %arg2 : i32, i32, i32
  }
  func.func @transform_1(%arg0: i32, %arg1: i32, %arg2: i32) -> (i32, i32, i32) {
    %c0_i32 = arith.constant 0 : i32
    %c0_i32_0 = arith.constant 0 : i32
    return %c0_i32, %arg2, %arg1 : i32, i32, i32
  }
  func.func @transform_2(%arg0: i32, %arg1: i32, %arg2: i32) -> (i32, i32) {
    %c0_i32 = arith.constant 0 : i32
    %c0_i32_0 = arith.constant 0 : i32
    return %c0_i32, %arg1 : i32, i32
  }
  func.func @transform_3(%arg0: i32, %arg1: i32, %arg2: i32) -> (i32, i32, i32) {
    %c0_i32 = arith.constant 0 : i32
    %c0_i32_0 = arith.constant 0 : i32
    return %arg0, %c0_i32, %arg1 : i32, i32, i32
  }
}

module attributes {stable_mosaic.version = 11 : i64} {
  func.func @_conv_kernel(%arg0: i32, %arg1: i32, %arg2: i32, %arg3: memref<1x16x128xbf16, #tpu.memory_space<vmem>>, %arg4: memref<1x128x128xbf16, #tpu.memory_space<vmem>>, %arg5: memref<1x128xf32, #tpu.memory_space<vmem>>, %arg6: memref<1x16x128xbf16, #tpu.memory_space<vmem>>, %arg7: memref<1x16x128xbf16, #tpu.memory_space<vmem>>, %arg8: memref<16x128xf32, #tpu.memory_space<vmem>>) attributes {dimension_semantics = [#tpu.dimension_semantics<parallel>, #tpu.dimension_semantics<parallel>, #tpu.dimension_semantics<arbitrary>], iteration_bounds = array<i64: 2, 1, 1>, scalar_prefetch = 0 : i64, scratch_operands = 1 : i64, tpu.core_type = #tpu.core_type<tc>, window_params = [{transform_indices = @transform_0, window_bounds = array<i64: 1, 16, 128>}, {transform_indices = @transform_1, window_bounds = array<i64: 1, 128, 128>}, {transform_indices = @transform_2, window_bounds = array<i64: 1, 128>}, {transform_indices = @transform_3, window_bounds = array<i64: 1, 16, 128>}, {transform_indices = @transform_4, window_bounds = array<i64: 1, 16, 128>}]} {
    %c0_i32 = arith.constant 0 : i32
    %0 = arith.cmpi eq, %arg2, %c0_i32 : i32
    %1 = arith.extui %0 : i1 to i32
    %c0_i32_0 = arith.constant 0 : i32
    %2 = arith.cmpi ne, %1, %c0_i32_0 : i32
    scf.if %2 {
      %cst_12 = arith.constant 0.000000e+00 : f32
      %14 = vector.broadcast %cst_12 : f32 to vector<16x128xf32>
      %c0_13 = arith.constant 0 : index
      %c0_14 = arith.constant 0 : index
      %15 = vector.load %arg8[%c0_13, %c0_14] : memref<16x128xf32, #tpu.memory_space<vmem>>, vector<16x128xf32>
      tpu.vector_store %arg8[%c0_13, %c0_14], %14 {strides = array<i32>} : memref<16x128xf32, #tpu.memory_space<vmem>>, vector<16x128xf32>,
    } else {
    }
    %c0 = arith.constant 0 : index
    %c0_1 = arith.constant 0 : index
    %c0_2 = arith.constant 0 : index
    %3 = vector.load %arg3[%c0, %c0_1, %c0_2] : memref<1x16x128xbf16, #tpu.memory_space<vmem>>, vector<1x16x128xbf16>
    %4 = vector.shape_cast %3 : vector<1x16x128xbf16> to vector<16x128xbf16>
    %c0_3 = arith.constant 0 : index
    %c0_4 = arith.constant 0 : index
    %5 = vector.load %arg8[%c0_3, %c0_4] : memref<16x128xf32, #tpu.memory_space<vmem>>, vector<16x128xf32>
    %c0_5 = arith.constant 0 : index
    %c0_6 = arith.constant 0 : index
    %c0_7 = arith.constant 0 : index
    %6 = vector.load %arg4[%c0_5, %c0_6, %c0_7] : memref<1x128x128xbf16, #tpu.memory_space<vmem>>, vector<1x128x128xbf16>
    %7 = vector.shape_cast %6 : vector<1x128x128xbf16> to vector<128x128xbf16>
    %cst = arith.constant dense<0.000000e+00> : vector<16x128xf32>
    %8 = tpu.matmul %4, %7, %cst {dimension_numbers = #tpu.dot_dimension_numbers<[1], [0], [0], [1], [0, 0, 1, 1], [], []>} : vector<16x128xbf16>, vector<128x128xbf16>, vector<16x128xf32> -> vector<16x128xf32>
    %9 = arith.addf %5, %8 : vector<16x128xf32>
    %c0_8 = arith.constant 0 : index
    %c0_9 = arith.constant 0 : index
    %10 = vector.load %arg8[%c0_8, %c0_9] : memref<16x128xf32, #tpu.memory_space<vmem>>, vector<16x128xf32>
    tpu.vector_store %arg8[%c0_8, %c0_9], %9 {strides = array<i32>} : memref<16x128xf32, #tpu.memory_space<vmem>>, vector<16x128xf32>,
    %c0_i32_10 = arith.constant 0 : i32
    %11 = arith.cmpi eq, %arg2, %c0_i32_10 : i32
    %12 = arith.extui %11 : i1 to i32
    %c0_i32_11 = arith.constant 0 : i32
    %13 = arith.cmpi ne, %12, %c0_i32_11 : i32
    scf.if %13 {
      %c0_12 = arith.constant 0 : index
      %c0_13 = arith.constant 0 : index
      %14 = vector.load %arg8[%c0_12, %c0_13] : memref<16x128xf32, #tpu.memory_space<vmem>>, vector<16x128xf32>
      %cst_14 = arith.constant 2.500000e-01 : f32
      %15 = vector.broadcast %cst_14 : f32 to vector<16x128xf32>
      %16 = arith.mulf %14, %15 : vector<16x128xf32>
      %c0_15 = arith.constant 0 : index
      %c0_16 = arith.constant 0 : index
      %17 = vector.load %arg5[%c0_15, %c0_16] : memref<1x128xf32, #tpu.memory_space<vmem>>, vector<1x128xf32>
      %18 = vector.broadcast %17 : vector<1x128xf32> to vector<16x128xf32>
      %19 = arith.addf %16, %18 : vector<16x128xf32>
      %c0_17 = arith.constant 0 : index
      %c0_18 = arith.constant 0 : index
      %c0_19 = arith.constant 0 : index
      %20 = vector.load %arg6[%c0_17, %c0_18, %c0_19] : memref<1x16x128xbf16, #tpu.memory_space<vmem>>, vector<1x16x128xbf16>
      %21 = vector.shape_cast %20 : vector<1x16x128xbf16> to vector<16x128xbf16>
      %22 = arith.extf %21 : vector<16x128xbf16> to vector<16x128xf32>
      %23 = arith.addf %19, %22 : vector<16x128xf32>
      %cst_20 = arith.constant 0.707106769 : f32
      %24 = vector.broadcast %cst_20 : f32 to vector<16x128xf32>
      %25 = arith.mulf %23, %24 : vector<16x128xf32>
      %26 = arith.truncf %25 : vector<16x128xf32> to vector<16x128xbf16>
      %c0_21 = arith.constant 0 : index
      %c0_22 = arith.constant 0 : index
      %c0_23 = arith.constant 0 : index
      %27 = vector.load %arg7[%c0_21, %c0_22, %c0_23] : memref<1x16x128xbf16, #tpu.memory_space<vmem>>, vector<1x16x128xbf16>
      %28 = vector.shape_cast %27 : vector<1x16x128xbf16> to vector<16x128xbf16>
      %29 = vector.shape_cast %26 : vector<16x128xbf16> to vector<1x16x128xbf16>
      tpu.vector_store %arg7[%c0_21, %c0_22, %c0_23], %29 {strides = array<i32>} : memref<1x16x128xbf16, #tpu.memory_space<vmem>>, vector<1x16x128xbf16>,
    } else {
    }
    return
  }
  func.func @transform_0(%arg0: i32, %arg1: i32, %arg2: i32) -> (i32, i32, i32) {
    %c0_i32 = arith.constant 0 : i32
    %c0_i32_0 = arith.constant 0 : i32
    return %arg0, %c0_i32, %arg2 : i32, i32, i32
  }
  func.func @transform_1(%arg0: i32, %arg1: i32, %arg2: i32) -> (i32, i32, i32) {
    %c0_i32 = arith.constant 0 : i32
    %c0_i32_0 = arith.constant 0 : i32
    return %c0_i32, %arg2, %arg1 : i32, i32, i32
  }
  func.func @transform_2(%arg0: i32, %arg1: i32, %arg2: i32) -> (i32, i32) {
    %c0_i32 = arith.constant 0 : i32
    %c0_i32_0 = arith.constant 0 : i32
    return %c0_i32, %arg1 : i32, i32
  }
  func.func @transform_3(%arg0: i32, %arg1: i32, %arg2: i32) -> (i32, i32, i32) {
    %c0_i32 = arith.constant 0 : i32
    %c0_i32_0 = arith.constant 0 : i32
    return %arg0, %c0_i32, %arg1 : i32, i32, i32
  }
  func.func @transform_4(%arg0: i32, %arg1: i32, %arg2: i32) -> (i32, i32, i32) {
    %c0_i32 = arith.constant 0 : i32
    %c0_i32_0 = arith.constant 0 : i32
    return %arg0, %c0_i32, %arg1 : i32, i32, i32
  }
}

module attributes {stable_mosaic.version = 11 : i64} {
  func.func @_conv_kernel(%arg0: i32, %arg1: i32, %arg2: i32, %arg3: memref<1x42x128xbf16, #tpu.memory_space<vmem>>, %arg4: memref<9x128x128xbf16, #tpu.memory_space<vmem>>, %arg5: memref<1x128xf32, #tpu.memory_space<vmem>>, %arg6: memref<1x24x128xbf16, #tpu.memory_space<vmem>>, %arg7: memref<24x128xf32, #tpu.memory_space<vmem>>) attributes {dimension_semantics = [#tpu.dimension_semantics<parallel>, #tpu.dimension_semantics<parallel>, #tpu.dimension_semantics<arbitrary>], iteration_bounds = array<i64: 2, 1, 1>, scalar_prefetch = 0 : i64, scratch_operands = 1 : i64, tpu.core_type = #tpu.core_type<tc>, window_params = [{transform_indices = @transform_0, window_bounds = array<i64: 1, 42, 128>}, {transform_indices = @transform_1, window_bounds = array<i64: 9, 128, 128>}, {transform_indices = @transform_2, window_bounds = array<i64: 1, 128>}, {transform_indices = @transform_3, window_bounds = array<i64: 1, 24, 128>}]} {
    %c0_i32 = arith.constant 0 : i32
    %0 = arith.cmpi eq, %arg2, %c0_i32 : i32
    %1 = arith.extui %0 : i1 to i32
    %c0_i32_0 = arith.constant 0 : i32
    %2 = arith.cmpi ne, %1, %c0_i32_0 : i32
    scf.if %2 {
      %cst_89 = arith.constant 0.000000e+00 : f32
      %78 = vector.broadcast %cst_89 : f32 to vector<24x128xf32>
      %c0_90 = arith.constant 0 : index
      %c0_91 = arith.constant 0 : index
      %79 = vector.load %arg7[%c0_90, %c0_91] : memref<24x128xf32, #tpu.memory_space<vmem>>, vector<24x128xf32>
      tpu.vector_store %arg7[%c0_90, %c0_91], %78 {strides = array<i32>} : memref<24x128xf32, #tpu.memory_space<vmem>>, vector<24x128xf32>,
    } else {
    }
    %c0 = arith.constant 0 : index
    %c0_1 = arith.constant 0 : index
    %c0_2 = arith.constant 0 : index
    %3 = vector.load %arg3[%c0, %c0_1, %c0_2] : memref<1x42x128xbf16, #tpu.memory_space<vmem>>, vector<1x24x128xbf16>
    %4 = vector.shape_cast %3 : vector<1x24x128xbf16> to vector<24x128xbf16>
    %c0_3 = arith.constant 0 : index
    %c0_4 = arith.constant 0 : index
    %5 = vector.load %arg7[%c0_3, %c0_4] : memref<24x128xf32, #tpu.memory_space<vmem>>, vector<24x128xf32>
    %c0_5 = arith.constant 0 : index
    %c0_6 = arith.constant 0 : index
    %c0_7 = arith.constant 0 : index
    %6 = vector.load %arg4[%c0_5, %c0_6, %c0_7] : memref<9x128x128xbf16, #tpu.memory_space<vmem>>, vector<1x128x128xbf16>
    %7 = vector.shape_cast %6 : vector<1x128x128xbf16> to vector<128x128xbf16>
    %cst = arith.constant dense<0.000000e+00> : vector<24x128xf32>
    %8 = tpu.matmul %4, %7, %cst {dimension_numbers = #tpu.dot_dimension_numbers<[1], [0], [0], [1], [0, 0, 1, 1], [], []>} : vector<24x128xbf16>, vector<128x128xbf16>, vector<24x128xf32> -> vector<24x128xf32>
    %9 = arith.addf %5, %8 : vector<24x128xf32>
    %c0_8 = arith.constant 0 : index
    %c0_9 = arith.constant 0 : index
    %10 = vector.load %arg7[%c0_8, %c0_9] : memref<24x128xf32, #tpu.memory_space<vmem>>, vector<24x128xf32>
    tpu.vector_store %arg7[%c0_8, %c0_9], %9 {strides = array<i32>} : memref<24x128xf32, #tpu.memory_space<vmem>>, vector<24x128xf32>,
    %c0_10 = arith.constant 0 : index
    %c1 = arith.constant 1 : index
    %c0_11 = arith.constant 0 : index
    %11 = vector.load %arg3[%c0_10, %c1, %c0_11] : memref<1x42x128xbf16, #tpu.memory_space<vmem>>, vector<1x24x128xbf16>
    %12 = vector.shape_cast %11 : vector<1x24x128xbf16> to vector<24x128xbf16>
    %c0_12 = arith.constant 0 : index
    %c0_13 = arith.constant 0 : index
    %13 = vector.load %arg7[%c0_12, %c0_13] : memref<24x128xf32, #tpu.memory_space<vmem>>, vector<24x128xf32>
    %c1_14 = arith.constant 1 : index
    %c0_15 = arith.constant 0 : index
    %c0_16 = arith.constant 0 : index
    %14 = vector.load %arg4[%c1_14, %c0_15, %c0_16] : memref<9x128x128xbf16, #tpu.memory_space<vmem>>, vector<1x128x128xbf16>
    %15 = vector.shape_cast %14 : vector<1x128x128xbf16> to vector<128x128xbf16>
    %cst_17 = arith.constant dense<0.000000e+00> : vector<24x128xf32>
    %16 = tpu.matmul %12, %15, %cst_17 {dimension_numbers = #tpu.dot_dimension_numbers<[1], [0], [0], [1], [0, 0, 1, 1], [], []>} : vector<24x128xbf16>, vector<128x128xbf16>, vector<24x128xf32> -> vector<24x128xf32>
    %17 = arith.addf %13, %16 : vector<24x128xf32>
    %c0_18 = arith.constant 0 : index
    %c0_19 = arith.constant 0 : index
    %18 = vector.load %arg7[%c0_18, %c0_19] : memref<24x128xf32, #tpu.memory_space<vmem>>, vector<24x128xf32>
    tpu.vector_store %arg7[%c0_18, %c0_19], %17 {strides = array<i32>} : memref<24x128xf32, #tpu.memory_space<vmem>>, vector<24x128xf32>,
    %c0_20 = arith.constant 0 : index
    %c2 = arith.constant 2 : index
    %c0_21 = arith.constant 0 : index
    %19 = vector.load %arg3[%c0_20, %c2, %c0_21] : memref<1x42x128xbf16, #tpu.memory_space<vmem>>, vector<1x24x128xbf16>
    %20 = vector.shape_cast %19 : vector<1x24x128xbf16> to vector<24x128xbf16>
    %c0_22 = arith.constant 0 : index
    %c0_23 = arith.constant 0 : index
    %21 = vector.load %arg7[%c0_22, %c0_23] : memref<24x128xf32, #tpu.memory_space<vmem>>, vector<24x128xf32>
    %c2_24 = arith.constant 2 : index
    %c0_25 = arith.constant 0 : index
    %c0_26 = arith.constant 0 : index
    %22 = vector.load %arg4[%c2_24, %c0_25, %c0_26] : memref<9x128x128xbf16, #tpu.memory_space<vmem>>, vector<1x128x128xbf16>
    %23 = vector.shape_cast %22 : vector<1x128x128xbf16> to vector<128x128xbf16>
    %cst_27 = arith.constant dense<0.000000e+00> : vector<24x128xf32>
    %24 = tpu.matmul %20, %23, %cst_27 {dimension_numbers = #tpu.dot_dimension_numbers<[1], [0], [0], [1], [0, 0, 1, 1], [], []>} : vector<24x128xbf16>, vector<128x128xbf16>, vector<24x128xf32> -> vector<24x128xf32>
    %25 = arith.addf %21, %24 : vector<24x128xf32>
    %c0_28 = arith.constant 0 : index
    %c0_29 = arith.constant 0 : index
    %26 = vector.load %arg7[%c0_28, %c0_29] : memref<24x128xf32, #tpu.memory_space<vmem>>, vector<24x128xf32>
    tpu.vector_store %arg7[%c0_28, %c0_29], %25 {strides = array<i32>} : memref<24x128xf32, #tpu.memory_space<vmem>>, vector<24x128xf32>,
    %c0_30 = arith.constant 0 : index
    %c6 = arith.constant 6 : index
    %c0_31 = arith.constant 0 : index
    %27 = vector.load %arg3[%c0_30, %c6, %c0_31] : memref<1x42x128xbf16, #tpu.memory_space<vmem>>, vector<1x24x128xbf16>
    %28 = vector.shape_cast %27 : vector<1x24x128xbf16> to vector<24x128xbf16>
    %c0_32 = arith.constant 0 : index
    %c0_33 = arith.constant 0 : index
    %29 = vector.load %arg7[%c0_32, %c0_33] : memref<24x128xf32, #tpu.memory_space<vmem>>, vector<24x128xf32>
    %c3 = arith.constant 3 : index
    %c0_34 = arith.constant 0 : index
    %c0_35 = arith.constant 0 : index
    %30 = vector.load %arg4[%c3, %c0_34, %c0_35] : memref<9x128x128xbf16, #tpu.memory_space<vmem>>, vector<1x128x128xbf16>
    %31 = vector.shape_cast %30 : vector<1x128x128xbf16> to vector<128x128xbf16>
    %cst_36 = arith.constant dense<0.000000e+00> : vector<24x128xf32>
    %32 = tpu.matmul %28, %31, %cst_36 {dimension_numbers = #tpu.dot_dimension_numbers<[1], [0], [0], [1], [0, 0, 1, 1], [], []>} : vector<24x128xbf16>, vector<128x128xbf16>, vector<24x128xf32> -> vector<24x128xf32>
    %33 = arith.addf %29, %32 : vector<24x128xf32>
    %c0_37 = arith.constant 0 : index
    %c0_38 = arith.constant 0 : index
    %34 = vector.load %arg7[%c0_37, %c0_38] : memref<24x128xf32, #tpu.memory_space<vmem>>, vector<24x128xf32>
    tpu.vector_store %arg7[%c0_37, %c0_38], %33 {strides = array<i32>} : memref<24x128xf32, #tpu.memory_space<vmem>>, vector<24x128xf32>,
    %c0_39 = arith.constant 0 : index
    %c7 = arith.constant 7 : index
    %c0_40 = arith.constant 0 : index
    %35 = vector.load %arg3[%c0_39, %c7, %c0_40] : memref<1x42x128xbf16, #tpu.memory_space<vmem>>, vector<1x24x128xbf16>
    %36 = vector.shape_cast %35 : vector<1x24x128xbf16> to vector<24x128xbf16>
    %c0_41 = arith.constant 0 : index
    %c0_42 = arith.constant 0 : index
    %37 = vector.load %arg7[%c0_41, %c0_42] : memref<24x128xf32, #tpu.memory_space<vmem>>, vector<24x128xf32>
    %c4 = arith.constant 4 : index
    %c0_43 = arith.constant 0 : index
    %c0_44 = arith.constant 0 : index
    %38 = vector.load %arg4[%c4, %c0_43, %c0_44] : memref<9x128x128xbf16, #tpu.memory_space<vmem>>, vector<1x128x128xbf16>
    %39 = vector.shape_cast %38 : vector<1x128x128xbf16> to vector<128x128xbf16>
    %cst_45 = arith.constant dense<0.000000e+00> : vector<24x128xf32>
    %40 = tpu.matmul %36, %39, %cst_45 {dimension_numbers = #tpu.dot_dimension_numbers<[1], [0], [0], [1], [0, 0, 1, 1], [], []>} : vector<24x128xbf16>, vector<128x128xbf16>, vector<24x128xf32> -> vector<24x128xf32>
    %41 = arith.addf %37, %40 : vector<24x128xf32>
    %c0_46 = arith.constant 0 : index
    %c0_47 = arith.constant 0 : index
    %42 = vector.load %arg7[%c0_46, %c0_47] : memref<24x128xf32, #tpu.memory_space<vmem>>, vector<24x128xf32>
    tpu.vector_store %arg7[%c0_46, %c0_47], %41 {strides = array<i32>} : memref<24x128xf32, #tpu.memory_space<vmem>>, vector<24x128xf32>,
    %c0_48 = arith.constant 0 : index
    %c8 = arith.constant 8 : index
    %c0_49 = arith.constant 0 : index
    %43 = vector.load %arg3[%c0_48, %c8, %c0_49] : memref<1x42x128xbf16, #tpu.memory_space<vmem>>, vector<1x24x128xbf16>
    %44 = vector.shape_cast %43 : vector<1x24x128xbf16> to vector<24x128xbf16>
    %c0_50 = arith.constant 0 : index
    %c0_51 = arith.constant 0 : index
    %45 = vector.load %arg7[%c0_50, %c0_51] : memref<24x128xf32, #tpu.memory_space<vmem>>, vector<24x128xf32>
    %c5 = arith.constant 5 : index
    %c0_52 = arith.constant 0 : index
    %c0_53 = arith.constant 0 : index
    %46 = vector.load %arg4[%c5, %c0_52, %c0_53] : memref<9x128x128xbf16, #tpu.memory_space<vmem>>, vector<1x128x128xbf16>
    %47 = vector.shape_cast %46 : vector<1x128x128xbf16> to vector<128x128xbf16>
    %cst_54 = arith.constant dense<0.000000e+00> : vector<24x128xf32>
    %48 = tpu.matmul %44, %47, %cst_54 {dimension_numbers = #tpu.dot_dimension_numbers<[1], [0], [0], [1], [0, 0, 1, 1], [], []>} : vector<24x128xbf16>, vector<128x128xbf16>, vector<24x128xf32> -> vector<24x128xf32>
    %49 = arith.addf %45, %48 : vector<24x128xf32>
    %c0_55 = arith.constant 0 : index
    %c0_56 = arith.constant 0 : index
    %50 = vector.load %arg7[%c0_55, %c0_56] : memref<24x128xf32, #tpu.memory_space<vmem>>, vector<24x128xf32>
    tpu.vector_store %arg7[%c0_55, %c0_56], %49 {strides = array<i32>} : memref<24x128xf32, #tpu.memory_space<vmem>>, vector<24x128xf32>,
    %c0_57 = arith.constant 0 : index
    %c12 = arith.constant 12 : index
    %c0_58 = arith.constant 0 : index
    %51 = vector.load %arg3[%c0_57, %c12, %c0_58] : memref<1x42x128xbf16, #tpu.memory_space<vmem>>, vector<1x24x128xbf16>
    %52 = vector.shape_cast %51 : vector<1x24x128xbf16> to vector<24x128xbf16>
    %c0_59 = arith.constant 0 : index
    %c0_60 = arith.constant 0 : index
    %53 = vector.load %arg7[%c0_59, %c0_60] : memref<24x128xf32, #tpu.memory_space<vmem>>, vector<24x128xf32>
    %c6_61 = arith.constant 6 : index
    %c0_62 = arith.constant 0 : index
    %c0_63 = arith.constant 0 : index
    %54 = vector.load %arg4[%c6_61, %c0_62, %c0_63] : memref<9x128x128xbf16, #tpu.memory_space<vmem>>, vector<1x128x128xbf16>
    %55 = vector.shape_cast %54 : vector<1x128x128xbf16> to vector<128x128xbf16>
    %cst_64 = arith.constant dense<0.000000e+00> : vector<24x128xf32>
    %56 = tpu.matmul %52, %55, %cst_64 {dimension_numbers = #tpu.dot_dimension_numbers<[1], [0], [0], [1], [0, 0, 1, 1], [], []>} : vector<24x128xbf16>, vector<128x128xbf16>, vector<24x128xf32> -> vector<24x128xf32>
    %57 = arith.addf %53, %56 : vector<24x128xf32>
    %c0_65 = arith.constant 0 : index
    %c0_66 = arith.constant 0 : index
    %58 = vector.load %arg7[%c0_65, %c0_66] : memref<24x128xf32, #tpu.memory_space<vmem>>, vector<24x128xf32>
    tpu.vector_store %arg7[%c0_65, %c0_66], %57 {strides = array<i32>} : memref<24x128xf32, #tpu.memory_space<vmem>>, vector<24x128xf32>,
    %c0_67 = arith.constant 0 : index
    %c13 = arith.constant 13 : index
    %c0_68 = arith.constant 0 : index
    %59 = vector.load %arg3[%c0_67, %c13, %c0_68] : memref<1x42x128xbf16, #tpu.memory_space<vmem>>, vector<1x24x128xbf16>
    %60 = vector.shape_cast %59 : vector<1x24x128xbf16> to vector<24x128xbf16>
    %c0_69 = arith.constant 0 : index
    %c0_70 = arith.constant 0 : index
    %61 = vector.load %arg7[%c0_69, %c0_70] : memref<24x128xf32, #tpu.memory_space<vmem>>, vector<24x128xf32>
    %c7_71 = arith.constant 7 : index
    %c0_72 = arith.constant 0 : index
    %c0_73 = arith.constant 0 : index
    %62 = vector.load %arg4[%c7_71, %c0_72, %c0_73] : memref<9x128x128xbf16, #tpu.memory_space<vmem>>, vector<1x128x128xbf16>
    %63 = vector.shape_cast %62 : vector<1x128x128xbf16> to vector<128x128xbf16>
    %cst_74 = arith.constant dense<0.000000e+00> : vector<24x128xf32>
    %64 = tpu.matmul %60, %63, %cst_74 {dimension_numbers = #tpu.dot_dimension_numbers<[1], [0], [0], [1], [0, 0, 1, 1], [], []>} : vector<24x128xbf16>, vector<128x128xbf16>, vector<24x128xf32> -> vector<24x128xf32>
    %65 = arith.addf %61, %64 : vector<24x128xf32>
    %c0_75 = arith.constant 0 : index
    %c0_76 = arith.constant 0 : index
    %66 = vector.load %arg7[%c0_75, %c0_76] : memref<24x128xf32, #tpu.memory_space<vmem>>, vector<24x128xf32>
    tpu.vector_store %arg7[%c0_75, %c0_76], %65 {strides = array<i32>} : memref<24x128xf32, #tpu.memory_space<vmem>>, vector<24x128xf32>,
    %c0_77 = arith.constant 0 : index
    %c14 = arith.constant 14 : index
    %c0_78 = arith.constant 0 : index
    %67 = vector.load %arg3[%c0_77, %c14, %c0_78] : memref<1x42x128xbf16, #tpu.memory_space<vmem>>, vector<1x24x128xbf16>
    %68 = vector.shape_cast %67 : vector<1x24x128xbf16> to vector<24x128xbf16>
    %c0_79 = arith.constant 0 : index
    %c0_80 = arith.constant 0 : index
    %69 = vector.load %arg7[%c0_79, %c0_80] : memref<24x128xf32, #tpu.memory_space<vmem>>, vector<24x128xf32>
    %c8_81 = arith.constant 8 : index
    %c0_82 = arith.constant 0 : index
    %c0_83 = arith.constant 0 : index
    %70 = vector.load %arg4[%c8_81, %c0_82, %c0_83] : memref<9x128x128xbf16, #tpu.memory_space<vmem>>, vector<1x128x128xbf16>
    %71 = vector.shape_cast %70 : vector<1x128x128xbf16> to vector<128x128xbf16>
    %cst_84 = arith.constant dense<0.000000e+00> : vector<24x128xf32>
    %72 = tpu.matmul %68, %71, %cst_84 {dimension_numbers = #tpu.dot_dimension_numbers<[1], [0], [0], [1], [0, 0, 1, 1], [], []>} : vector<24x128xbf16>, vector<128x128xbf16>, vector<24x128xf32> -> vector<24x128xf32>
    %73 = arith.addf %69, %72 : vector<24x128xf32>
    %c0_85 = arith.constant 0 : index
    %c0_86 = arith.constant 0 : index
    %74 = vector.load %arg7[%c0_85, %c0_86] : memref<24x128xf32, #tpu.memory_space<vmem>>, vector<24x128xf32>
    tpu.vector_store %arg7[%c0_85, %c0_86], %73 {strides = array<i32>} : memref<24x128xf32, #tpu.memory_space<vmem>>, vector<24x128xf32>,
    %c0_i32_87 = arith.constant 0 : i32
    %75 = arith.cmpi eq, %arg2, %c0_i32_87 : i32
    %76 = arith.extui %75 : i1 to i32
    %c0_i32_88 = arith.constant 0 : i32
    %77 = arith.cmpi ne, %76, %c0_i32_88 : i32
    scf.if %77 {
      %c0_89 = arith.constant 0 : index
      %c0_90 = arith.constant 0 : index
      %78 = vector.load %arg7[%c0_89, %c0_90] : memref<24x128xf32, #tpu.memory_space<vmem>>, vector<24x128xf32>
      %cst_91 = arith.constant 0.0808452069 : f32
      %79 = vector.broadcast %cst_91 : f32 to vector<24x128xf32>
      %80 = arith.mulf %78, %79 : vector<24x128xf32>
      %c0_92 = arith.constant 0 : index
      %c0_93 = arith.constant 0 : index
      %81 = vector.load %arg5[%c0_92, %c0_93] : memref<1x128xf32, #tpu.memory_space<vmem>>, vector<1x128xf32>
      %82 = vector.broadcast %81 : vector<1x128xf32> to vector<24x128xf32>
      %83 = arith.addf %80, %82 : vector<24x128xf32>
      %cst_94 = arith.constant 0.000000e+00 : f32
      %84 = vector.broadcast %cst_94 : f32 to vector<24x128xf32>
      %85 = arith.cmpf oge, %83, %84 : vector<24x128xf32>
      %cst_95 = arith.constant 2.000000e-01 : f32
      %86 = vector.broadcast %cst_95 : f32 to vector<24x128xf32>
      %87 = arith.mulf %83, %86 : vector<24x128xf32>
      %88 = arith.select %85, %83, %87 : vector<24x128xi1>, vector<24x128xf32>
      %89 = arith.truncf %88 : vector<24x128xf32> to vector<24x128xbf16>
      %c0_96 = arith.constant 0 : index
      %c0_97 = arith.constant 0 : index
      %c0_98 = arith.constant 0 : index
      %90 = vector.load %arg6[%c0_96, %c0_97, %c0_98] : memref<1x24x128xbf16, #tpu.memory_space<vmem>>, vector<1x24x128xbf16>
      %91 = vector.shape_cast %90 : vector<1x24x128xbf16> to vector<24x128xbf16>
      %92 = vector.shape_cast %89 : vector<24x128xbf16> to vector<1x24x128xbf16>
      tpu.vector_store %arg6[%c0_96, %c0_97, %c0_98], %92 {strides = array<i32>} : memref<1x24x128xbf16, #tpu.memory_space<vmem>>, vector<1x24x128xbf16>,
    } else {
    }
    return
  }
  func.func @transform_0(%arg0: i32, %arg1: i32, %arg2: i32) -> (i32, i32, i32) {
    %c0_i32 = arith.constant 0 : i32
    %c0_i32_0 = arith.constant 0 : i32
    return %arg0, %c0_i32, %arg2 : i32, i32, i32
  }
  func.func @transform_1(%arg0: i32, %arg1: i32, %arg2: i32) -> (i32, i32, i32) {
    %c0_i32 = arith.constant 0 : i32
    %c0_i32_0 = arith.constant 0 : i32
    return %c0_i32, %arg2, %arg1 : i32, i32, i32
  }
  func.func @transform_2(%arg0: i32, %arg1: i32, %arg2: i32) -> (i32, i32) {
    %c0_i32 = arith.constant 0 : i32
    %c0_i32_0 = arith.constant 0 : i32
    return %c0_i32, %arg1 : i32, i32
  }
  func.func @transform_3(%arg0: i32, %arg1: i32, %arg2: i32) -> (i32, i32, i32) {
    %c0_i32 = arith.constant 0 : i32
    %c0_i32_0 = arith.constant 0 : i32
    return %arg0, %c0_i32, %arg1 : i32, i32, i32
  }
}

module attributes {stable_mosaic.version = 11 : i64} {
  func.func @_conv_kernel(%arg0: i32, %arg1: i32, %arg2: i32, %arg3: memref<1x16x128xbf16, #tpu.memory_space<vmem>>, %arg4: memref<1x128x128xbf16, #tpu.memory_space<vmem>>, %arg5: memref<1x128xf32, #tpu.memory_space<vmem>>, %arg6: memref<1x16x128xbf16, #tpu.memory_space<vmem>>, %arg7: memref<1x16x128xbf16, #tpu.memory_space<vmem>>, %arg8: memref<16x128xf32, #tpu.memory_space<vmem>>) attributes {dimension_semantics = [#tpu.dimension_semantics<parallel>, #tpu.dimension_semantics<parallel>, #tpu.dimension_semantics<arbitrary>], iteration_bounds = array<i64: 2, 1, 1>, scalar_prefetch = 0 : i64, scratch_operands = 1 : i64, tpu.core_type = #tpu.core_type<tc>, window_params = [{transform_indices = @transform_0, window_bounds = array<i64: 1, 16, 128>}, {transform_indices = @transform_1, window_bounds = array<i64: 1, 128, 128>}, {transform_indices = @transform_2, window_bounds = array<i64: 1, 128>}, {transform_indices = @transform_3, window_bounds = array<i64: 1, 16, 128>}, {transform_indices = @transform_4, window_bounds = array<i64: 1, 16, 128>}]} {
    %c0_i32 = arith.constant 0 : i32
    %0 = arith.cmpi eq, %arg2, %c0_i32 : i32
    %1 = arith.extui %0 : i1 to i32
    %c0_i32_0 = arith.constant 0 : i32
    %2 = arith.cmpi ne, %1, %c0_i32_0 : i32
    scf.if %2 {
      %cst_12 = arith.constant 0.000000e+00 : f32
      %14 = vector.broadcast %cst_12 : f32 to vector<16x128xf32>
      %c0_13 = arith.constant 0 : index
      %c0_14 = arith.constant 0 : index
      %15 = vector.load %arg8[%c0_13, %c0_14] : memref<16x128xf32, #tpu.memory_space<vmem>>, vector<16x128xf32>
      tpu.vector_store %arg8[%c0_13, %c0_14], %14 {strides = array<i32>} : memref<16x128xf32, #tpu.memory_space<vmem>>, vector<16x128xf32>,
    } else {
    }
    %c0 = arith.constant 0 : index
    %c0_1 = arith.constant 0 : index
    %c0_2 = arith.constant 0 : index
    %3 = vector.load %arg3[%c0, %c0_1, %c0_2] : memref<1x16x128xbf16, #tpu.memory_space<vmem>>, vector<1x16x128xbf16>
    %4 = vector.shape_cast %3 : vector<1x16x128xbf16> to vector<16x128xbf16>
    %c0_3 = arith.constant 0 : index
    %c0_4 = arith.constant 0 : index
    %5 = vector.load %arg8[%c0_3, %c0_4] : memref<16x128xf32, #tpu.memory_space<vmem>>, vector<16x128xf32>
    %c0_5 = arith.constant 0 : index
    %c0_6 = arith.constant 0 : index
    %c0_7 = arith.constant 0 : index
    %6 = vector.load %arg4[%c0_5, %c0_6, %c0_7] : memref<1x128x128xbf16, #tpu.memory_space<vmem>>, vector<1x128x128xbf16>
    %7 = vector.shape_cast %6 : vector<1x128x128xbf16> to vector<128x128xbf16>
    %cst = arith.constant dense<0.000000e+00> : vector<16x128xf32>
    %8 = tpu.matmul %4, %7, %cst {dimension_numbers = #tpu.dot_dimension_numbers<[1], [0], [0], [1], [0, 0, 1, 1], [], []>} : vector<16x128xbf16>, vector<128x128xbf16>, vector<16x128xf32> -> vector<16x128xf32>
    %9 = arith.addf %5, %8 : vector<16x128xf32>
    %c0_8 = arith.constant 0 : index
    %c0_9 = arith.constant 0 : index
    %10 = vector.load %arg8[%c0_8, %c0_9] : memref<16x128xf32, #tpu.memory_space<vmem>>, vector<16x128xf32>
    tpu.vector_store %arg8[%c0_8, %c0_9], %9 {strides = array<i32>} : memref<16x128xf32, #tpu.memory_space<vmem>>, vector<16x128xf32>,
    %c0_i32_10 = arith.constant 0 : i32
    %11 = arith.cmpi eq, %arg2, %c0_i32_10 : i32
    %12 = arith.extui %11 : i1 to i32
    %c0_i32_11 = arith.constant 0 : i32
    %13 = arith.cmpi ne, %12, %c0_i32_11 : i32
    scf.if %13 {
      %c0_12 = arith.constant 0 : index
      %c0_13 = arith.constant 0 : index
      %14 = vector.load %arg8[%c0_12, %c0_13] : memref<16x128xf32, #tpu.memory_space<vmem>>, vector<16x128xf32>
      %cst_14 = arith.constant 0.242535621 : f32
      %15 = vector.broadcast %cst_14 : f32 to vector<16x128xf32>
      %16 = arith.mulf %14, %15 : vector<16x128xf32>
      %c0_15 = arith.constant 0 : index
      %c0_16 = arith.constant 0 : index
      %17 = vector.load %arg5[%c0_15, %c0_16] : memref<1x128xf32, #tpu.memory_space<vmem>>, vector<1x128xf32>
      %18 = vector.broadcast %17 : vector<1x128xf32> to vector<16x128xf32>
      %19 = arith.addf %16, %18 : vector<16x128xf32>
      %c0_17 = arith.constant 0 : index
      %c0_18 = arith.constant 0 : index
      %c0_19 = arith.constant 0 : index
      %20 = vector.load %arg6[%c0_17, %c0_18, %c0_19] : memref<1x16x128xbf16, #tpu.memory_space<vmem>>, vector<1x16x128xbf16>
      %21 = vector.shape_cast %20 : vector<1x16x128xbf16> to vector<16x128xbf16>
      %22 = arith.extf %21 : vector<16x128xbf16> to vector<16x128xf32>
      %23 = arith.addf %19, %22 : vector<16x128xf32>
      %cst_20 = arith.constant 0.707106769 : f32
      %24 = vector.broadcast %cst_20 : f32 to vector<16x128xf32>
      %25 = arith.mulf %23, %24 : vector<16x128xf32>
      %26 = arith.truncf %25 : vector<16x128xf32> to vector<16x128xbf16>
      %c0_21 = arith.constant 0 : index
      %c0_22 = arith.constant 0 : index
      %c0_23 = arith.constant 0 : index
      %27 = vector.load %arg7[%c0_21, %c0_22, %c0_23] : memref<1x16x128xbf16, #tpu.memory_space<vmem>>, vector<1x16x128xbf16>
      %28 = vector.shape_cast %27 : vector<1x16x128xbf16> to vector<16x128xbf16>
      %29 = vector.shape_cast %26 : vector<16x128xbf16> to vector<1x16x128xbf16>
      tpu.vector_store %arg7[%c0_21, %c0_22, %c0_23], %29 {strides = array<i32>} : memref<1x16x128xbf16, #tpu.memory_space<vmem>>, vector<1x16x128xbf16>,
    } else {
    }
    return
  }
  func.func @transform_0(%arg0: i32, %arg1: i32, %arg2: i32) -> (i32, i32, i32) {
    %c0_i32 = arith.constant 0 : i32
    %c0_i32_0 = arith.constant 0 : i32
    return %arg0, %c0_i32, %arg2 : i32, i32, i32
  }
  func.func @transform_1(%arg0: i32, %arg1: i32, %arg2: i32) -> (i32, i32, i32) {
    %c0_i32 = arith.constant 0 : i32
    %c0_i32_0 = arith.constant 0 : i32
    return %c0_i32, %arg2, %arg1 : i32, i32, i32
  }
  func.func @transform_2(%arg0: i32, %arg1: i32, %arg2: i32) -> (i32, i32) {
    %c0_i32 = arith.constant 0 : i32
    %c0_i32_0 = arith.constant 0 : i32
    return %c0_i32, %arg1 : i32, i32
  }
  func.func @transform_3(%arg0: i32, %arg1: i32, %arg2: i32) -> (i32, i32, i32) {
    %c0_i32 = arith.constant 0 : i32
    %c0_i32_0 = arith.constant 0 : i32
    return %arg0, %c0_i32, %arg1 : i32, i32, i32
  }
  func.func @transform_4(%arg0: i32, %arg1: i32, %arg2: i32) -> (i32, i32, i32) {
    %c0_i32 = arith.constant 0 : i32
    %c0_i32_0 = arith.constant 0 : i32
    return %arg0, %c0_i32, %arg1 : i32, i32, i32
  }
}

module attributes {stable_mosaic.version = 11 : i64} {
  func.func @_conv_kernel(%arg0: i32, %arg1: i32, %arg2: i32, %arg3: memref<1x20x128xbf16, #tpu.memory_space<vmem>>, %arg4: memref<16x128x128xbf16, #tpu.memory_space<vmem>>, %arg5: memref<1x128xf32, #tpu.memory_space<vmem>>, %arg6: memref<1x4x128xbf16, #tpu.memory_space<vmem>>, %arg7: memref<4x128xf32, #tpu.memory_space<vmem>>) attributes {dimension_semantics = [#tpu.dimension_semantics<parallel>, #tpu.dimension_semantics<parallel>, #tpu.dimension_semantics<arbitrary>], iteration_bounds = array<i64: 2, 1, 1>, scalar_prefetch = 0 : i64, scratch_operands = 1 : i64, tpu.core_type = #tpu.core_type<tc>, window_params = [{transform_indices = @transform_0, window_bounds = array<i64: 1, 20, 128>}, {transform_indices = @transform_1, window_bounds = array<i64: 16, 128, 128>}, {transform_indices = @transform_2, window_bounds = array<i64: 1, 128>}, {transform_indices = @transform_3, window_bounds = array<i64: 1, 4, 128>}]} {
    %c0_i32 = arith.constant 0 : i32
    %0 = arith.cmpi eq, %arg2, %c0_i32 : i32
    %1 = arith.extui %0 : i1 to i32
    %c0_i32_0 = arith.constant 0 : i32
    %2 = arith.cmpi ne, %1, %c0_i32_0 : i32
    scf.if %2 {
      %cst_162 = arith.constant 0.000000e+00 : f32
      %134 = vector.broadcast %cst_162 : f32 to vector<4x128xf32>
      %c0_163 = arith.constant 0 : index
      %c0_164 = arith.constant 0 : index
      %135 = vector.load %arg7[%c0_163, %c0_164] : memref<4x128xf32, #tpu.memory_space<vmem>>, vector<4x128xf32>
      tpu.vector_store %arg7[%c0_163, %c0_164], %134 {strides = array<i32>} : memref<4x128xf32, #tpu.memory_space<vmem>>, vector<4x128xf32>,
    } else {
    }
    %c0 = arith.constant 0 : index
    %c0_1 = arith.constant 0 : index
    %c0_2 = arith.constant 0 : index
    %3 = vector.load %arg3[%c0, %c0_1, %c0_2] : memref<1x20x128xbf16, #tpu.memory_space<vmem>>, vector<1x4x128xbf16>
    %4 = vector.shape_cast %3 : vector<1x4x128xbf16> to vector<4x128xbf16>
    %c0_3 = arith.constant 0 : index
    %c0_4 = arith.constant 0 : index
    %5 = vector.load %arg7[%c0_3, %c0_4] : memref<4x128xf32, #tpu.memory_space<vmem>>, vector<4x128xf32>
    %c0_5 = arith.constant 0 : index
    %c0_6 = arith.constant 0 : index
    %c0_7 = arith.constant 0 : index
    %6 = vector.load %arg4[%c0_5, %c0_6, %c0_7] : memref<16x128x128xbf16, #tpu.memory_space<vmem>>, vector<1x128x128xbf16>
    %7 = vector.shape_cast %6 : vector<1x128x128xbf16> to vector<128x128xbf16>
    %cst = arith.constant dense<0.000000e+00> : vector<4x128xf32>
    %8 = tpu.matmul %4, %7, %cst {dimension_numbers = #tpu.dot_dimension_numbers<[1], [0], [0], [1], [0, 0, 1, 1], [], []>} : vector<4x128xbf16>, vector<128x128xbf16>, vector<4x128xf32> -> vector<4x128xf32>
    %9 = arith.addf %5, %8 : vector<4x128xf32>
    %c0_8 = arith.constant 0 : index
    %c0_9 = arith.constant 0 : index
    %10 = vector.load %arg7[%c0_8, %c0_9] : memref<4x128xf32, #tpu.memory_space<vmem>>, vector<4x128xf32>
    tpu.vector_store %arg7[%c0_8, %c0_9], %9 {strides = array<i32>} : memref<4x128xf32, #tpu.memory_space<vmem>>, vector<4x128xf32>,
    %c0_10 = arith.constant 0 : index
    %c1 = arith.constant 1 : index
    %c0_11 = arith.constant 0 : index
    %11 = vector.load %arg3[%c0_10, %c1, %c0_11] : memref<1x20x128xbf16, #tpu.memory_space<vmem>>, vector<1x4x128xbf16>
    %12 = vector.shape_cast %11 : vector<1x4x128xbf16> to vector<4x128xbf16>
    %c0_12 = arith.constant 0 : index
    %c0_13 = arith.constant 0 : index
    %13 = vector.load %arg7[%c0_12, %c0_13] : memref<4x128xf32, #tpu.memory_space<vmem>>, vector<4x128xf32>
    %c1_14 = arith.constant 1 : index
    %c0_15 = arith.constant 0 : index
    %c0_16 = arith.constant 0 : index
    %14 = vector.load %arg4[%c1_14, %c0_15, %c0_16] : memref<16x128x128xbf16, #tpu.memory_space<vmem>>, vector<1x128x128xbf16>
    %15 = vector.shape_cast %14 : vector<1x128x128xbf16> to vector<128x128xbf16>
    %cst_17 = arith.constant dense<0.000000e+00> : vector<4x128xf32>
    %16 = tpu.matmul %12, %15, %cst_17 {dimension_numbers = #tpu.dot_dimension_numbers<[1], [0], [0], [1], [0, 0, 1, 1], [], []>} : vector<4x128xbf16>, vector<128x128xbf16>, vector<4x128xf32> -> vector<4x128xf32>
    %17 = arith.addf %13, %16 : vector<4x128xf32>
    %c0_18 = arith.constant 0 : index
    %c0_19 = arith.constant 0 : index
    %18 = vector.load %arg7[%c0_18, %c0_19] : memref<4x128xf32, #tpu.memory_space<vmem>>, vector<4x128xf32>
    tpu.vector_store %arg7[%c0_18, %c0_19], %17 {strides = array<i32>} : memref<4x128xf32, #tpu.memory_space<vmem>>, vector<4x128xf32>,
    %c0_20 = arith.constant 0 : index
    %c2 = arith.constant 2 : index
    %c0_21 = arith.constant 0 : index
    %19 = vector.load %arg3[%c0_20, %c2, %c0_21] : memref<1x20x128xbf16, #tpu.memory_space<vmem>>, vector<1x4x128xbf16>
    %20 = vector.shape_cast %19 : vector<1x4x128xbf16> to vector<4x128xbf16>
    %c0_22 = arith.constant 0 : index
    %c0_23 = arith.constant 0 : index
    %21 = vector.load %arg7[%c0_22, %c0_23] : memref<4x128xf32, #tpu.memory_space<vmem>>, vector<4x128xf32>
    %c2_24 = arith.constant 2 : index
    %c0_25 = arith.constant 0 : index
    %c0_26 = arith.constant 0 : index
    %22 = vector.load %arg4[%c2_24, %c0_25, %c0_26] : memref<16x128x128xbf16, #tpu.memory_space<vmem>>, vector<1x128x128xbf16>
    %23 = vector.shape_cast %22 : vector<1x128x128xbf16> to vector<128x128xbf16>
    %cst_27 = arith.constant dense<0.000000e+00> : vector<4x128xf32>
    %24 = tpu.matmul %20, %23, %cst_27 {dimension_numbers = #tpu.dot_dimension_numbers<[1], [0], [0], [1], [0, 0, 1, 1], [], []>} : vector<4x128xbf16>, vector<128x128xbf16>, vector<4x128xf32> -> vector<4x128xf32>
    %25 = arith.addf %21, %24 : vector<4x128xf32>
    %c0_28 = arith.constant 0 : index
    %c0_29 = arith.constant 0 : index
    %26 = vector.load %arg7[%c0_28, %c0_29] : memref<4x128xf32, #tpu.memory_space<vmem>>, vector<4x128xf32>
    tpu.vector_store %arg7[%c0_28, %c0_29], %25 {strides = array<i32>} : memref<4x128xf32, #tpu.memory_space<vmem>>, vector<4x128xf32>,
    %c0_30 = arith.constant 0 : index
    %c3 = arith.constant 3 : index
    %c0_31 = arith.constant 0 : index
    %27 = vector.load %arg3[%c0_30, %c3, %c0_31] : memref<1x20x128xbf16, #tpu.memory_space<vmem>>, vector<1x4x128xbf16>
    %28 = vector.shape_cast %27 : vector<1x4x128xbf16> to vector<4x128xbf16>
    %c0_32 = arith.constant 0 : index
    %c0_33 = arith.constant 0 : index
    %29 = vector.load %arg7[%c0_32, %c0_33] : memref<4x128xf32, #tpu.memory_space<vmem>>, vector<4x128xf32>
    %c3_34 = arith.constant 3 : index
    %c0_35 = arith.constant 0 : index
    %c0_36 = arith.constant 0 : index
    %30 = vector.load %arg4[%c3_34, %c0_35, %c0_36] : memref<16x128x128xbf16, #tpu.memory_space<vmem>>, vector<1x128x128xbf16>
    %31 = vector.shape_cast %30 : vector<1x128x128xbf16> to vector<128x128xbf16>
    %cst_37 = arith.constant dense<0.000000e+00> : vector<4x128xf32>
    %32 = tpu.matmul %28, %31, %cst_37 {dimension_numbers = #tpu.dot_dimension_numbers<[1], [0], [0], [1], [0, 0, 1, 1], [], []>} : vector<4x128xbf16>, vector<128x128xbf16>, vector<4x128xf32> -> vector<4x128xf32>
    %33 = arith.addf %29, %32 : vector<4x128xf32>
    %c0_38 = arith.constant 0 : index
    %c0_39 = arith.constant 0 : index
    %34 = vector.load %arg7[%c0_38, %c0_39] : memref<4x128xf32, #tpu.memory_space<vmem>>, vector<4x128xf32>
    tpu.vector_store %arg7[%c0_38, %c0_39], %33 {strides = array<i32>} : memref<4x128xf32, #tpu.memory_space<vmem>>, vector<4x128xf32>,
    %c0_40 = arith.constant 0 : index
    %c4 = arith.constant 4 : index
    %c0_41 = arith.constant 0 : index
    %35 = vector.load %arg3[%c0_40, %c4, %c0_41] : memref<1x20x128xbf16, #tpu.memory_space<vmem>>, vector<1x4x128xbf16>
    %36 = vector.shape_cast %35 : vector<1x4x128xbf16> to vector<4x128xbf16>
    %c0_42 = arith.constant 0 : index
    %c0_43 = arith.constant 0 : index
    %37 = vector.load %arg7[%c0_42, %c0_43] : memref<4x128xf32, #tpu.memory_space<vmem>>, vector<4x128xf32>
    %c4_44 = arith.constant 4 : index
    %c0_45 = arith.constant 0 : index
    %c0_46 = arith.constant 0 : index
    %38 = vector.load %arg4[%c4_44, %c0_45, %c0_46] : memref<16x128x128xbf16, #tpu.memory_space<vmem>>, vector<1x128x128xbf16>
    %39 = vector.shape_cast %38 : vector<1x128x128xbf16> to vector<128x128xbf16>
    %cst_47 = arith.constant dense<0.000000e+00> : vector<4x128xf32>
    %40 = tpu.matmul %36, %39, %cst_47 {dimension_numbers = #tpu.dot_dimension_numbers<[1], [0], [0], [1], [0, 0, 1, 1], [], []>} : vector<4x128xbf16>, vector<128x128xbf16>, vector<4x128xf32> -> vector<4x128xf32>
    %41 = arith.addf %37, %40 : vector<4x128xf32>
    %c0_48 = arith.constant 0 : index
    %c0_49 = arith.constant 0 : index
    %42 = vector.load %arg7[%c0_48, %c0_49] : memref<4x128xf32, #tpu.memory_space<vmem>>, vector<4x128xf32>
    tpu.vector_store %arg7[%c0_48, %c0_49], %41 {strides = array<i32>} : memref<4x128xf32, #tpu.memory_space<vmem>>, vector<4x128xf32>,
    %c0_50 = arith.constant 0 : index
    %c5 = arith.constant 5 : index
    %c0_51 = arith.constant 0 : index
    %43 = vector.load %arg3[%c0_50, %c5, %c0_51] : memref<1x20x128xbf16, #tpu.memory_space<vmem>>, vector<1x4x128xbf16>
    %44 = vector.shape_cast %43 : vector<1x4x128xbf16> to vector<4x128xbf16>
    %c0_52 = arith.constant 0 : index
    %c0_53 = arith.constant 0 : index
    %45 = vector.load %arg7[%c0_52, %c0_53] : memref<4x128xf32, #tpu.memory_space<vmem>>, vector<4x128xf32>
    %c5_54 = arith.constant 5 : index
    %c0_55 = arith.constant 0 : index
    %c0_56 = arith.constant 0 : index
    %46 = vector.load %arg4[%c5_54, %c0_55, %c0_56] : memref<16x128x128xbf16, #tpu.memory_space<vmem>>, vector<1x128x128xbf16>
    %47 = vector.shape_cast %46 : vector<1x128x128xbf16> to vector<128x128xbf16>
    %cst_57 = arith.constant dense<0.000000e+00> : vector<4x128xf32>
    %48 = tpu.matmul %44, %47, %cst_57 {dimension_numbers = #tpu.dot_dimension_numbers<[1], [0], [0], [1], [0, 0, 1, 1], [], []>} : vector<4x128xbf16>, vector<128x128xbf16>, vector<4x128xf32> -> vector<4x128xf32>
    %49 = arith.addf %45, %48 : vector<4x128xf32>
    %c0_58 = arith.constant 0 : index
    %c0_59 = arith.constant 0 : index
    %50 = vector.load %arg7[%c0_58, %c0_59] : memref<4x128xf32, #tpu.memory_space<vmem>>, vector<4x128xf32>
    tpu.vector_store %arg7[%c0_58, %c0_59], %49 {strides = array<i32>} : memref<4x128xf32, #tpu.memory_space<vmem>>, vector<4x128xf32>,
    %c0_60 = arith.constant 0 : index
    %c6 = arith.constant 6 : index
    %c0_61 = arith.constant 0 : index
    %51 = vector.load %arg3[%c0_60, %c6, %c0_61] : memref<1x20x128xbf16, #tpu.memory_space<vmem>>, vector<1x4x128xbf16>
    %52 = vector.shape_cast %51 : vector<1x4x128xbf16> to vector<4x128xbf16>
    %c0_62 = arith.constant 0 : index
    %c0_63 = arith.constant 0 : index
    %53 = vector.load %arg7[%c0_62, %c0_63] : memref<4x128xf32, #tpu.memory_space<vmem>>, vector<4x128xf32>
    %c6_64 = arith.constant 6 : index
    %c0_65 = arith.constant 0 : index
    %c0_66 = arith.constant 0 : index
    %54 = vector.load %arg4[%c6_64, %c0_65, %c0_66] : memref<16x128x128xbf16, #tpu.memory_space<vmem>>, vector<1x128x128xbf16>
    %55 = vector.shape_cast %54 : vector<1x128x128xbf16> to vector<128x128xbf16>
    %cst_67 = arith.constant dense<0.000000e+00> : vector<4x128xf32>
    %56 = tpu.matmul %52, %55, %cst_67 {dimension_numbers = #tpu.dot_dimension_numbers<[1], [0], [0], [1], [0, 0, 1, 1], [], []>} : vector<4x128xbf16>, vector<128x128xbf16>, vector<4x128xf32> -> vector<4x128xf32>
    %57 = arith.addf %53, %56 : vector<4x128xf32>
    %c0_68 = arith.constant 0 : index
    %c0_69 = arith.constant 0 : index
    %58 = vector.load %arg7[%c0_68, %c0_69] : memref<4x128xf32, #tpu.memory_space<vmem>>, vector<4x128xf32>
    tpu.vector_store %arg7[%c0_68, %c0_69], %57 {strides = array<i32>} : memref<4x128xf32, #tpu.memory_space<vmem>>, vector<4x128xf32>,
    %c0_70 = arith.constant 0 : index
    %c7 = arith.constant 7 : index
    %c0_71 = arith.constant 0 : index
    %59 = vector.load %arg3[%c0_70, %c7, %c0_71] : memref<1x20x128xbf16, #tpu.memory_space<vmem>>, vector<1x4x128xbf16>
    %60 = vector.shape_cast %59 : vector<1x4x128xbf16> to vector<4x128xbf16>
    %c0_72 = arith.constant 0 : index
    %c0_73 = arith.constant 0 : index
    %61 = vector.load %arg7[%c0_72, %c0_73] : memref<4x128xf32, #tpu.memory_space<vmem>>, vector<4x128xf32>
    %c7_74 = arith.constant 7 : index
    %c0_75 = arith.constant 0 : index
    %c0_76 = arith.constant 0 : index
    %62 = vector.load %arg4[%c7_74, %c0_75, %c0_76] : memref<16x128x128xbf16, #tpu.memory_space<vmem>>, vector<1x128x128xbf16>
    %63 = vector.shape_cast %62 : vector<1x128x128xbf16> to vector<128x128xbf16>
    %cst_77 = arith.constant dense<0.000000e+00> : vector<4x128xf32>
    %64 = tpu.matmul %60, %63, %cst_77 {dimension_numbers = #tpu.dot_dimension_numbers<[1], [0], [0], [1], [0, 0, 1, 1], [], []>} : vector<4x128xbf16>, vector<128x128xbf16>, vector<4x128xf32> -> vector<4x128xf32>
    %65 = arith.addf %61, %64 : vector<4x128xf32>
    %c0_78 = arith.constant 0 : index
    %c0_79 = arith.constant 0 : index
    %66 = vector.load %arg7[%c0_78, %c0_79] : memref<4x128xf32, #tpu.memory_space<vmem>>, vector<4x128xf32>
    tpu.vector_store %arg7[%c0_78, %c0_79], %65 {strides = array<i32>} : memref<4x128xf32, #tpu.memory_space<vmem>>, vector<4x128xf32>,
    %c0_80 = arith.constant 0 : index
    %c8 = arith.constant 8 : index
    %c0_81 = arith.constant 0 : index
    %67 = vector.load %arg3[%c0_80, %c8, %c0_81] : memref<1x20x128xbf16, #tpu.memory_space<vmem>>, vector<1x4x128xbf16>
    %68 = vector.shape_cast %67 : vector<1x4x128xbf16> to vector<4x128xbf16>
    %c0_82 = arith.constant 0 : index
    %c0_83 = arith.constant 0 : index
    %69 = vector.load %arg7[%c0_82, %c0_83] : memref<4x128xf32, #tpu.memory_space<vmem>>, vector<4x128xf32>
    %c8_84 = arith.constant 8 : index
    %c0_85 = arith.constant 0 : index
    %c0_86 = arith.constant 0 : index
    %70 = vector.load %arg4[%c8_84, %c0_85, %c0_86] : memref<16x128x128xbf16, #tpu.memory_space<vmem>>, vector<1x128x128xbf16>
    %71 = vector.shape_cast %70 : vector<1x128x128xbf16> to vector<128x128xbf16>
    %cst_87 = arith.constant dense<0.000000e+00> : vector<4x128xf32>
    %72 = tpu.matmul %68, %71, %cst_87 {dimension_numbers = #tpu.dot_dimension_numbers<[1], [0], [0], [1], [0, 0, 1, 1], [], []>} : vector<4x128xbf16>, vector<128x128xbf16>, vector<4x128xf32> -> vector<4x128xf32>
    %73 = arith.addf %69, %72 : vector<4x128xf32>
    %c0_88 = arith.constant 0 : index
    %c0_89 = arith.constant 0 : index
    %74 = vector.load %arg7[%c0_88, %c0_89] : memref<4x128xf32, #tpu.memory_space<vmem>>, vector<4x128xf32>
    tpu.vector_store %arg7[%c0_88, %c0_89], %73 {strides = array<i32>} : memref<4x128xf32, #tpu.memory_space<vmem>>, vector<4x128xf32>,
    %c0_90 = arith.constant 0 : index
    %c9 = arith.constant 9 : index
    %c0_91 = arith.constant 0 : index
    %75 = vector.load %arg3[%c0_90, %c9, %c0_91] : memref<1x20x128xbf16, #tpu.memory_space<vmem>>, vector<1x4x128xbf16>
    %76 = vector.shape_cast %75 : vector<1x4x128xbf16> to vector<4x128xbf16>
    %c0_92 = arith.constant 0 : index
    %c0_93 = arith.constant 0 : index
    %77 = vector.load %arg7[%c0_92, %c0_93] : memref<4x128xf32, #tpu.memory_space<vmem>>, vector<4x128xf32>
    %c9_94 = arith.constant 9 : index
    %c0_95 = arith.constant 0 : index
    %c0_96 = arith.constant 0 : index
    %78 = vector.load %arg4[%c9_94, %c0_95, %c0_96] : memref<16x128x128xbf16, #tpu.memory_space<vmem>>, vector<1x128x128xbf16>
    %79 = vector.shape_cast %78 : vector<1x128x128xbf16> to vector<128x128xbf16>
    %cst_97 = arith.constant dense<0.000000e+00> : vector<4x128xf32>
    %80 = tpu.matmul %76, %79, %cst_97 {dimension_numbers = #tpu.dot_dimension_numbers<[1], [0], [0], [1], [0, 0, 1, 1], [], []>} : vector<4x128xbf16>, vector<128x128xbf16>, vector<4x128xf32> -> vector<4x128xf32>
    %81 = arith.addf %77, %80 : vector<4x128xf32>
    %c0_98 = arith.constant 0 : index
    %c0_99 = arith.constant 0 : index
    %82 = vector.load %arg7[%c0_98, %c0_99] : memref<4x128xf32, #tpu.memory_space<vmem>>, vector<4x128xf32>
    tpu.vector_store %arg7[%c0_98, %c0_99], %81 {strides = array<i32>} : memref<4x128xf32, #tpu.memory_space<vmem>>, vector<4x128xf32>,
    %c0_100 = arith.constant 0 : index
    %c10 = arith.constant 10 : index
    %c0_101 = arith.constant 0 : index
    %83 = vector.load %arg3[%c0_100, %c10, %c0_101] : memref<1x20x128xbf16, #tpu.memory_space<vmem>>, vector<1x4x128xbf16>
    %84 = vector.shape_cast %83 : vector<1x4x128xbf16> to vector<4x128xbf16>
    %c0_102 = arith.constant 0 : index
    %c0_103 = arith.constant 0 : index
    %85 = vector.load %arg7[%c0_102, %c0_103] : memref<4x128xf32, #tpu.memory_space<vmem>>, vector<4x128xf32>
    %c10_104 = arith.constant 10 : index
    %c0_105 = arith.constant 0 : index
    %c0_106 = arith.constant 0 : index
    %86 = vector.load %arg4[%c10_104, %c0_105, %c0_106] : memref<16x128x128xbf16, #tpu.memory_space<vmem>>, vector<1x128x128xbf16>
    %87 = vector.shape_cast %86 : vector<1x128x128xbf16> to vector<128x128xbf16>
    %cst_107 = arith.constant dense<0.000000e+00> : vector<4x128xf32>
    %88 = tpu.matmul %84, %87, %cst_107 {dimension_numbers = #tpu.dot_dimension_numbers<[1], [0], [0], [1], [0, 0, 1, 1], [], []>} : vector<4x128xbf16>, vector<128x128xbf16>, vector<4x128xf32> -> vector<4x128xf32>
    %89 = arith.addf %85, %88 : vector<4x128xf32>
    %c0_108 = arith.constant 0 : index
    %c0_109 = arith.constant 0 : index
    %90 = vector.load %arg7[%c0_108, %c0_109] : memref<4x128xf32, #tpu.memory_space<vmem>>, vector<4x128xf32>
    tpu.vector_store %arg7[%c0_108, %c0_109], %89 {strides = array<i32>} : memref<4x128xf32, #tpu.memory_space<vmem>>, vector<4x128xf32>,
    %c0_110 = arith.constant 0 : index
    %c11 = arith.constant 11 : index
    %c0_111 = arith.constant 0 : index
    %91 = vector.load %arg3[%c0_110, %c11, %c0_111] : memref<1x20x128xbf16, #tpu.memory_space<vmem>>, vector<1x4x128xbf16>
    %92 = vector.shape_cast %91 : vector<1x4x128xbf16> to vector<4x128xbf16>
    %c0_112 = arith.constant 0 : index
    %c0_113 = arith.constant 0 : index
    %93 = vector.load %arg7[%c0_112, %c0_113] : memref<4x128xf32, #tpu.memory_space<vmem>>, vector<4x128xf32>
    %c11_114 = arith.constant 11 : index
    %c0_115 = arith.constant 0 : index
    %c0_116 = arith.constant 0 : index
    %94 = vector.load %arg4[%c11_114, %c0_115, %c0_116] : memref<16x128x128xbf16, #tpu.memory_space<vmem>>, vector<1x128x128xbf16>
    %95 = vector.shape_cast %94 : vector<1x128x128xbf16> to vector<128x128xbf16>
    %cst_117 = arith.constant dense<0.000000e+00> : vector<4x128xf32>
    %96 = tpu.matmul %92, %95, %cst_117 {dimension_numbers = #tpu.dot_dimension_numbers<[1], [0], [0], [1], [0, 0, 1, 1], [], []>} : vector<4x128xbf16>, vector<128x128xbf16>, vector<4x128xf32> -> vector<4x128xf32>
    %97 = arith.addf %93, %96 : vector<4x128xf32>
    %c0_118 = arith.constant 0 : index
    %c0_119 = arith.constant 0 : index
    %98 = vector.load %arg7[%c0_118, %c0_119] : memref<4x128xf32, #tpu.memory_space<vmem>>, vector<4x128xf32>
    tpu.vector_store %arg7[%c0_118, %c0_119], %97 {strides = array<i32>} : memref<4x128xf32, #tpu.memory_space<vmem>>, vector<4x128xf32>,
    %c0_120 = arith.constant 0 : index
    %c12 = arith.constant 12 : index
    %c0_121 = arith.constant 0 : index
    %99 = vector.load %arg3[%c0_120, %c12, %c0_121] : memref<1x20x128xbf16, #tpu.memory_space<vmem>>, vector<1x4x128xbf16>
    %100 = vector.shape_cast %99 : vector<1x4x128xbf16> to vector<4x128xbf16>
    %c0_122 = arith.constant 0 : index
    %c0_123 = arith.constant 0 : index
    %101 = vector.load %arg7[%c0_122, %c0_123] : memref<4x128xf32, #tpu.memory_space<vmem>>, vector<4x128xf32>
    %c12_124 = arith.constant 12 : index
    %c0_125 = arith.constant 0 : index
    %c0_126 = arith.constant 0 : index
    %102 = vector.load %arg4[%c12_124, %c0_125, %c0_126] : memref<16x128x128xbf16, #tpu.memory_space<vmem>>, vector<1x128x128xbf16>
    %103 = vector.shape_cast %102 : vector<1x128x128xbf16> to vector<128x128xbf16>
    %cst_127 = arith.constant dense<0.000000e+00> : vector<4x128xf32>
    %104 = tpu.matmul %100, %103, %cst_127 {dimension_numbers = #tpu.dot_dimension_numbers<[1], [0], [0], [1], [0, 0, 1, 1], [], []>} : vector<4x128xbf16>, vector<128x128xbf16>, vector<4x128xf32> -> vector<4x128xf32>
    %105 = arith.addf %101, %104 : vector<4x128xf32>
    %c0_128 = arith.constant 0 : index
    %c0_129 = arith.constant 0 : index
    %106 = vector.load %arg7[%c0_128, %c0_129] : memref<4x128xf32, #tpu.memory_space<vmem>>, vector<4x128xf32>
    tpu.vector_store %arg7[%c0_128, %c0_129], %105 {strides = array<i32>} : memref<4x128xf32, #tpu.memory_space<vmem>>, vector<4x128xf32>,
    %c0_130 = arith.constant 0 : index
    %c13 = arith.constant 13 : index
    %c0_131 = arith.constant 0 : index
    %107 = vector.load %arg3[%c0_130, %c13, %c0_131] : memref<1x20x128xbf16, #tpu.memory_space<vmem>>, vector<1x4x128xbf16>
    %108 = vector.shape_cast %107 : vector<1x4x128xbf16> to vector<4x128xbf16>
    %c0_132 = arith.constant 0 : index
    %c0_133 = arith.constant 0 : index
    %109 = vector.load %arg7[%c0_132, %c0_133] : memref<4x128xf32, #tpu.memory_space<vmem>>, vector<4x128xf32>
    %c13_134 = arith.constant 13 : index
    %c0_135 = arith.constant 0 : index
    %c0_136 = arith.constant 0 : index
    %110 = vector.load %arg4[%c13_134, %c0_135, %c0_136] : memref<16x128x128xbf16, #tpu.memory_space<vmem>>, vector<1x128x128xbf16>
    %111 = vector.shape_cast %110 : vector<1x128x128xbf16> to vector<128x128xbf16>
    %cst_137 = arith.constant dense<0.000000e+00> : vector<4x128xf32>
    %112 = tpu.matmul %108, %111, %cst_137 {dimension_numbers = #tpu.dot_dimension_numbers<[1], [0], [0], [1], [0, 0, 1, 1], [], []>} : vector<4x128xbf16>, vector<128x128xbf16>, vector<4x128xf32> -> vector<4x128xf32>
    %113 = arith.addf %109, %112 : vector<4x128xf32>
    %c0_138 = arith.constant 0 : index
    %c0_139 = arith.constant 0 : index
    %114 = vector.load %arg7[%c0_138, %c0_139] : memref<4x128xf32, #tpu.memory_space<vmem>>, vector<4x128xf32>
    tpu.vector_store %arg7[%c0_138, %c0_139], %113 {strides = array<i32>} : memref<4x128xf32, #tpu.memory_space<vmem>>, vector<4x128xf32>,
    %c0_140 = arith.constant 0 : index
    %c14 = arith.constant 14 : index
    %c0_141 = arith.constant 0 : index
    %115 = vector.load %arg3[%c0_140, %c14, %c0_141] : memref<1x20x128xbf16, #tpu.memory_space<vmem>>, vector<1x4x128xbf16>
    %116 = vector.shape_cast %115 : vector<1x4x128xbf16> to vector<4x128xbf16>
    %c0_142 = arith.constant 0 : index
    %c0_143 = arith.constant 0 : index
    %117 = vector.load %arg7[%c0_142, %c0_143] : memref<4x128xf32, #tpu.memory_space<vmem>>, vector<4x128xf32>
    %c14_144 = arith.constant 14 : index
    %c0_145 = arith.constant 0 : index
    %c0_146 = arith.constant 0 : index
    %118 = vector.load %arg4[%c14_144, %c0_145, %c0_146] : memref<16x128x128xbf16, #tpu.memory_space<vmem>>, vector<1x128x128xbf16>
    %119 = vector.shape_cast %118 : vector<1x128x128xbf16> to vector<128x128xbf16>
    %cst_147 = arith.constant dense<0.000000e+00> : vector<4x128xf32>
    %120 = tpu.matmul %116, %119, %cst_147 {dimension_numbers = #tpu.dot_dimension_numbers<[1], [0], [0], [1], [0, 0, 1, 1], [], []>} : vector<4x128xbf16>, vector<128x128xbf16>, vector<4x128xf32> -> vector<4x128xf32>
    %121 = arith.addf %117, %120 : vector<4x128xf32>
    %c0_148 = arith.constant 0 : index
    %c0_149 = arith.constant 0 : index
    %122 = vector.load %arg7[%c0_148, %c0_149] : memref<4x128xf32, #tpu.memory_space<vmem>>, vector<4x128xf32>
    tpu.vector_store %arg7[%c0_148, %c0_149], %121 {strides = array<i32>} : memref<4x128xf32, #tpu.memory_space<vmem>>, vector<4x128xf32>,
    %c0_150 = arith.constant 0 : index
    %c15 = arith.constant 15 : index
    %c0_151 = arith.constant 0 : index
    %123 = vector.load %arg3[%c0_150, %c15, %c0_151] : memref<1x20x128xbf16, #tpu.memory_space<vmem>>, vector<1x4x128xbf16>
    %124 = vector.shape_cast %123 : vector<1x4x128xbf16> to vector<4x128xbf16>
    %c0_152 = arith.constant 0 : index
    %c0_153 = arith.constant 0 : index
    %125 = vector.load %arg7[%c0_152, %c0_153] : memref<4x128xf32, #tpu.memory_space<vmem>>, vector<4x128xf32>
    %c15_154 = arith.constant 15 : index
    %c0_155 = arith.constant 0 : index
    %c0_156 = arith.constant 0 : index
    %126 = vector.load %arg4[%c15_154, %c0_155, %c0_156] : memref<16x128x128xbf16, #tpu.memory_space<vmem>>, vector<1x128x128xbf16>
    %127 = vector.shape_cast %126 : vector<1x128x128xbf16> to vector<128x128xbf16>
    %cst_157 = arith.constant dense<0.000000e+00> : vector<4x128xf32>
    %128 = tpu.matmul %124, %127, %cst_157 {dimension_numbers = #tpu.dot_dimension_numbers<[1], [0], [0], [1], [0, 0, 1, 1], [], []>} : vector<4x128xbf16>, vector<128x128xbf16>, vector<4x128xf32> -> vector<4x128xf32>
    %129 = arith.addf %125, %128 : vector<4x128xf32>
    %c0_158 = arith.constant 0 : index
    %c0_159 = arith.constant 0 : index
    %130 = vector.load %arg7[%c0_158, %c0_159] : memref<4x128xf32, #tpu.memory_space<vmem>>, vector<4x128xf32>
    tpu.vector_store %arg7[%c0_158, %c0_159], %129 {strides = array<i32>} : memref<4x128xf32, #tpu.memory_space<vmem>>, vector<4x128xf32>,
    %c0_i32_160 = arith.constant 0 : i32
    %131 = arith.cmpi eq, %arg2, %c0_i32_160 : i32
    %132 = arith.extui %131 : i1 to i32
    %c0_i32_161 = arith.constant 0 : i32
    %133 = arith.cmpi ne, %132, %c0_i32_161 : i32
    scf.if %133 {
      %c0_162 = arith.constant 0 : index
      %c0_163 = arith.constant 0 : index
      %134 = vector.load %arg7[%c0_162, %c0_163] : memref<4x128xf32, #tpu.memory_space<vmem>>, vector<4x128xf32>
      %cst_164 = arith.constant 1.000000e+00 : f32
      %135 = vector.broadcast %cst_164 : f32 to vector<4x128xf32>
      %136 = arith.mulf %134, %135 : vector<4x128xf32>
      %c0_165 = arith.constant 0 : index
      %c0_166 = arith.constant 0 : index
      %137 = vector.load %arg5[%c0_165, %c0_166] : memref<1x128xf32, #tpu.memory_space<vmem>>, vector<1x128xf32>
      %138 = vector.broadcast %137 : vector<1x128xf32> to vector<4x128xf32>
      %139 = arith.addf %136, %138 : vector<4x128xf32>
      %cst_167 = arith.constant 0.000000e+00 : f32
      %140 = vector.broadcast %cst_167 : f32 to vector<4x128xf32>
      %141 = arith.cmpf oge, %139, %140 : vector<4x128xf32>
      %cst_168 = arith.constant 2.000000e-01 : f32
      %142 = vector.broadcast %cst_168 : f32 to vector<4x128xf32>
      %143 = arith.mulf %139, %142 : vector<4x128xf32>
      %144 = arith.select %141, %139, %143 : vector<4x128xi1>, vector<4x128xf32>
      %145 = arith.truncf %144 : vector<4x128xf32> to vector<4x128xbf16>
      %c0_169 = arith.constant 0 : index
      %c0_170 = arith.constant 0 : index
      %c0_171 = arith.constant 0 : index
      %146 = vector.load %arg6[%c0_169, %c0_170, %c0_171] : memref<1x4x128xbf16, #tpu.memory_space<vmem>>, vector<1x4x128xbf16>
      %147 = vector.shape_cast %146 : vector<1x4x128xbf16> to vector<4x128xbf16>
      %148 = vector.shape_cast %145 : vector<4x128xbf16> to vector<1x4x128xbf16>
      tpu.vector_store %arg6[%c0_169, %c0_170, %c0_171], %148 {strides = array<i32>} : memref<1x4x128xbf16, #tpu.memory_space<vmem>>, vector<1x4x128xbf16>,
    } else {
    }
    return
  }
  func.func @transform_0(%arg0: i32, %arg1: i32, %arg2: i32) -> (i32, i32, i32) {
    %c0_i32 = arith.constant 0 : i32
    %c0_i32_0 = arith.constant 0 : i32
    return %arg0, %c0_i32, %arg2 : i32, i32, i32
  }
  func.func @transform_1(%arg0: i32, %arg1: i32, %arg2: i32) -> (i32, i32, i32) {
    %c0_i32 = arith.constant 0 : i32
    %c0_i32_0 = arith.constant 0 : i32
    return %c0_i32, %arg2, %arg1 : i32, i32, i32
  }
  func.func @transform_2(%arg0: i32, %arg1: i32, %arg2: i32) -> (i32, i32) {
    %c0_i32 = arith.constant 0 : i32
    %c0_i32_0 = arith.constant 0 : i32
    return %c0_i32, %arg1 : i32, i32
  }
  func.func @transform_3(%arg0: i32, %arg1: i32, %arg2: i32) -> (i32, i32, i32) {
    %c0_i32 = arith.constant 0 : i32
    %c0_i32_0 = arith.constant 0 : i32
    return %arg0, %c0_i32, %arg1 : i32, i32, i32
  }
}

</mosaic_0001>

<bundles_post_ra>
// kernel: sg2_discriminator_forward.11
= control target key start
LH: loop header
LB: loop body
LE: loop exit
PB: predicated region body
PF: predicated region fallthrough
CT: control target
= control target key end

     0   :  { %s1504_s12 = smov 0   ;;  %s1506_s13 = smov 0   ;;  %s1641_s0 = inlined_call_operand.vmem [shape: bf16[2,256,128], index: 0, kind: input, shape index: {}]   ;;  %s1642_s1 = inlined_call_operand.vmem [shape: bf16[1,128,128], index: 1, kind: input, shape index: {}]   ;;  %s1643_s2 = inlined_call_operand.vmem [shape: f32[1,128], index: 2, kind: input, shape index: {}]   ;;  %s1644_s3 = inlined_call_operand.vmem [shape: bf16[2,256,128], index: 3, kind: output, shape index: {}]  }
   0x1   :  { %s1508_s14 = smov 0  }
   0x2 LB: > { %s32_s15 = sadd.s32 1, %s1478_s13  ;;  %p1131_p0 = scmp.ge.s32.totalorder %s1482_s14, 1  ;;  %s1482_s14 = sphi %s1508_s14, %s13_s14   ;;  %s1478_s13 = sphi %s1506_s13, %s1646_s13   ;;  %s1474_s12 = sphi %s1504_s12, %s1645_s12  }
   0x3   : > { %p34_p1 = scmp.ge.s32.totalorder %s32_s15, 2  ;;  %p187_p2 = scmp.lt.s32.totalorder %s1482_s14, 3 }
   0x5   : > { %s1648_s15 = smov (%p34_p1, %s32_s15), 0  ;;  %p188_p3 = pnand %p1131_p0, %p187_p2 }
   0x6   : > { %v1436_v0 = vld [vmem:[%s1642_s1] sm:$0xff] (!%p188_p3)   ;;  %p228_p4 = scmp.lt.s32.totalorder (!%p188_p3), %s1474_s12, 1  ;;  %v1437_v1 = vld [vmem:[%s1642_s1 + $0x8] sm:$0xff] (!%p188_p3)   ;;  %v1438_v2 = vld [vmem:[%s1642_s1 + $0x10] sm:$0xff] (!%p188_p3)  }
   0x7   : > { %191 = sbr.rel (%p188_p3) target bundleno = 286 (0x11e), region = 32  ;;  %1348 = vmatprep.subr.bf16.mxu0 (!%p188_p3), %v1436_v0  ;;  %1396 = vmatprep.subr.bf16.mxu1 (!%p188_p3), %v1436_v0  ;;  %v1439_v3 = vld [vmem:[%s1642_s1 + $0x18] sm:$0xff] (!%p188_p3)   ;;  %v1440_v6 = vld [vmem:[%s1642_s1 + $0x20] sm:$0xff] (!%p188_p3)   ;;  %v1441_v7 = vld [vmem:[%s1642_s1 + $0x28] sm:$0xff] (!%p188_p3)  }
   0x8   : > { %1349 = vmatpush3.bf16.msra.mxu0 (!%p188_p3), %v1436_v0  ;;  %1404 = vmatpush3.bf16.msra.mxu1 (!%p188_p3), %v1436_v0  ;;  %v1442_v8 = vld [vmem:[%s1642_s1 + $0x30] sm:$0xff] (!%p188_p3)   ;;  %v1443_v9 = vld [vmem:[%s1642_s1 + $0x38] sm:$0xff] (!%p188_p3)   ;;  %v1575_v25 = vld [vmem:[%s1643_s2] ss:$0 sm:$0xff] (!%p188_p3) }
   0x9   : > { %1350 = vmatprep.subr.bf16.mxu0 (!%p188_p3), %v1437_v1  ;;  %1397 = vmatprep.subr.bf16.mxu1 (!%p188_p3), %v1437_v1 }
   0xc   : > { %1351 = vmatpush3.bf16.msra.mxu0 (!%p188_p3), %v1437_v1  ;;  %1405 = vmatpush3.bf16.msra.mxu1 (!%p188_p3), %v1437_v1 }
   0xd   : > { %1352 = vmatprep.subr.bf16.mxu0 (!%p188_p3), %v1438_v2  ;;  %1398 = vmatprep.subr.bf16.mxu1 (!%p188_p3), %v1438_v2 }
   0xe   : > { %s1650_s12 = smov (!%p228_p4, %s1474_s12), 1 }
   0xf   : > { %s1195_s22 = sshll.u32 %s1650_s12, 7 }
  0x10   : > { %s1539_s25 = scalar_lea.vmem %s1641_s0, %s1195_s22  ;;  %1353 = vmatpush3.bf16.msra.mxu0 %v1438_v2  ;;  %1406 = vmatpush3.bf16.msra.mxu1 %v1438_v2  ;;  %s1588_s17 = scalar_lea.vmem %s1644_s3, %s1195_s22 }
  0x11   : > { %v1444_v4 = vld [vmem:[%s1539_s25] sm:$0xff]   ;;  %1354 = vmatprep.subr.bf16.mxu0 %v1439_v3  ;;  %1399 = vmatprep.subr.bf16.mxu1 %v1439_v3  ;;  %v1446_v10 = vld [vmem:[%s1539_s25 + $0x8] sm:$0xff]   ;;  %v1448_v12 = vld [vmem:[%s1539_s25 + $0x10] sm:$0xff]  }
  0x12   : > { %v1445_v5 = vld [vmem:[%s1539_s25 + $0x40] sm:$0xff]   ;;  %1364 = vmatprep.mubr.bf16.mxu0 %v1444_v4  ;;  %v1447_v11 = vld [vmem:[%s1539_s25 + $0x48] sm:$0xff]   ;;  %v1449_v13 = vld [vmem:[%s1539_s25 + $0x50] sm:$0xff]  }
  0x13   : > { %1380 = vmatprep.mubr.bf16.mxu1 %v1445_v5  ;;  %v1450_v14 = vld [vmem:[%s1539_s25 + $0x18] sm:$0xff]   ;;  %v1452_v16 = vld [vmem:[%s1539_s25 + $0x20] sm:$0xff]   ;;  %v1454_v18 = vld [vmem:[%s1539_s25 + $0x28] sm:$0xff]  }
  0x14   : > { %1355 = vmatpush3.bf16.msra.mxu0 %v1439_v3  ;;  %1407 = vmatpush3.bf16.msra.mxu1 %v1439_v3  ;;  %v1451_v15 = vld [vmem:[%s1539_s25 + $0x58] sm:$0xff]   ;;  %v1453_v17 = vld [vmem:[%s1539_s25 + $0x60] sm:$0xff]   ;;  %v1455_v19 = vld [vmem:[%s1539_s25 + $0x68] sm:$0xff]  }
  0x15   : > { %1356 = vmatprep.subr.bf16.mxu0 %v1440_v6  ;;  %1400 = vmatprep.subr.bf16.mxu1 %v1440_v6  ;;  %v1456_v20 = vld [vmem:[%s1539_s25 + $0x30] sm:$0xff]   ;;  %v1458_v22 = vld [vmem:[%s1539_s25 + $0x38] sm:$0xff]  }
  0x16   : > { %v1457_v21 = vld [vmem:[%s1539_s25 + $0x70] sm:$0xff]   ;;  %v1459_v23 = vld [vmem:[%s1539_s25 + $0x78] sm:$0xff]  }
  0x18   : > { %1357 = vmatpush3.bf16.msra.mxu0 %v1440_v6  ;;  %1408 = vmatpush3.bf16.msra.mxu1 %v1440_v6 }
  0x19   : > { %1358 = vmatprep.subr.bf16.mxu0 %v1441_v7  ;;  %1401 = vmatprep.subr.bf16.mxu1 %v1441_v7 }
  0x1c   : > { %1359 = vmatpush3.bf16.msra.mxu0 %v1441_v7  ;;  %1409 = vmatpush3.bf16.msra.mxu1 %v1441_v7 }
  0x1d   : > { %1360 = vmatprep.subr.bf16.mxu0 %v1442_v8  ;;  %1402 = vmatprep.subr.bf16.mxu1 %v1442_v8 }
  0x20   : > { %1361 = vmatpush3.bf16.msra.mxu0 %v1442_v8  ;;  %1410 = vmatpush3.bf16.msra.mxu1 %v1442_v8 }
  0x21   : > { %1362 = vmatprep.subr.bf16.mxu0 %v1443_v9  ;;  %1403 = vmatprep.subr.bf16.mxu1 %v1443_v9 }
  0x24   : > { %1363 = vmatpush3.bf16.msra.mxu0 %v1443_v9  ;;  %1411 = vmatpush3.bf16.msra.mxu1 %v1443_v9 }
  0x27   : > { %1365 = vmatmul.mubr.bf16.vlgmr.msra.gmra.mrb[0].mxu0 %v1446_v10  ;;  %1381 = vmatmul.mubr.bf16.vlgmr.msra.gmra.mrb[0].mxu1 %v1447_v11 }
  0x28   : > { %1368 = vmatprep.mubr.bf16.mxu0 %v1448_v12  ;;  %1384 = vmatprep.mubr.bf16.mxu1 %v1449_v13 }
  0x2f   : > { %1369 = vmatmul.mubr.bf16.gmra.mrb[4].mxu0 %v1450_v14  ;;  %1385 = vmatmul.mubr.bf16.gmra.mrb[4].mxu1 %v1451_v15 }
  0x30   : > { %1372 = vmatprep.mubr.bf16.mxu0 %v1452_v16  ;;  %1388 = vmatprep.mubr.bf16.mxu1 %v1453_v17 }
  0x37   : > { %1373 = vmatmul.mubr.bf16.gmra.mrb[8].mxu0 %v1454_v18  ;;  %1389 = vmatmul.mubr.bf16.gmra.mrb[8].mxu1 %v1455_v19 }
  0x38   : > { %1376 = vmatprep.mubr.bf16.mxu0 %v1456_v20  ;;  %1392 = vmatprep.mubr.bf16.mxu1 %v1457_v21 }
  0x3f   : > { %1377 = vmatmul.mubr.bf16.gmra.mrb[12].mxu0 %v1458_v22  ;;  %1393 = vmatmul.mubr.bf16.gmra.mrb[12].mxu1 %v1459_v23 }
  0xfa   : > { %v1366_v24 = vpop.f32.mrb[0].mxu0  ;;  %v1382_v26 = vpop.f32.mrb[0].mxu1 }
  0xfb   : > { %v779_v27 = vmul.f32 0.57735026, %v1366_v24  ;;  %v795_v28 = vmul.f32 0.57735026, %v1382_v26  ;;  %v551_v29 = vpop.f32.mrb[1].mxu0  ;;  %v615_v30 = vpop.f32.mrb[1].mxu1 }
  0xfc   : > { %v777_v31 = vmul.f32 0.57735026, %v551_v29  ;;  %v793_v32 = vmul.f32 0.57735026, %v615_v30  ;;  %v1367_v33 = vpop.f32.mrb[2].mxu0  ;;  %v1383_v34 = vpop.f32.mrb[2].mxu1 }
  0xfd   : > { %v780_v35 = vmul.f32 0.57735026, %v1367_v33  ;;  %v796_v36 = vmul.f32 0.57735026, %v1383_v34  ;;  %v554_v37 = vpop.f32.mrb[3].mxu0  ;;  %v618_v38 = vpop.f32.mrb[3].mxu1  ;;  %v818_v41 = vadd.f32 %v1575_v25, %v779_v27  ;;  %v834_v42 = vadd.f32 %v1575_v25, %v795_v28 }
  0xfe   : > { %v778_v39 = vmul.f32 0.57735026, %v554_v37  ;;  %v794_v40 = vmul.f32 0.57735026, %v618_v38  ;;  %v816_v45 = vadd.f32 %v1575_v25, %v777_v31  ;;  %v832_v46 = vadd.f32 %v1575_v25, %v793_v32 }
  0xff   : > { %v819_v43 = vadd.f32 %v1575_v25, %v780_v35  ;;  %v835_v44 = vadd.f32 %v1575_v25, %v796_v36 }
 0x100   : > { %v817_v47 = vadd.f32 %v1575_v25, %v778_v39  ;;  %v833_v48 = vadd.f32 %v1575_v25, %v794_v40 }
 0x101   : > { %v1237_v49 = vpack.c.bf16 %v819_v43, %v818_v41  ;;  %v1277_v50 = vpack.c.bf16 %v835_v44, %v834_v42 }
 0x102   : > { %v1232_v51 = vpack.c.bf16 %v817_v47, %v816_v45  ;;  %v1272_v52 = vpack.c.bf16 %v833_v48, %v832_v46  ;;  %v1370_v53 = vpop.f32.mrb[4].mxu0  ;;  %v1386_v54 = vpop.f32.mrb[4].mxu1 }
 0x103   : > { %1309 = vst [vmem:[%s1588_s17 + $0x8] sm:$0xff] %v1237_v49   ;;  %1317 = vst [vmem:[%s1588_s17 + $0x48] sm:$0xff] %v1277_v50   ;;  %v783_v55 = vmul.f32 0.57735026, %v1370_v53  ;;  %v799_v56 = vmul.f32 0.57735026, %v1386_v54 }
 0x104   : > { %v567_v57 = vpop.f32.mrb[5].mxu0  ;;  %v631_v58 = vpop.f32.mrb[5].mxu1  ;;  %1233 = vst [vmem:[%s1588_s17] sm:$0xff] %v1232_v51   ;;  %1316 = vst [vmem:[%s1588_s17 + $0x40] sm:$0xff] %v1272_v52  }
 0x105   : > { %v781_v59 = vmul.f32 0.57735026, %v567_v57  ;;  %v797_v60 = vmul.f32 0.57735026, %v631_v58  ;;  %v1371_v61 = vpop.f32.mrb[6].mxu0  ;;  %v1387_v62 = vpop.f32.mrb[6].mxu1  ;;  %v822_v5 = vadd.f32 %v1575_v25, %v783_v55  ;;  %v838_v6 = vadd.f32 %v1575_v25, %v799_v56 }
 0x106   : > { %v784_v63 = vmul.f32 0.57735026, %v1371_v61  ;;  %v800_v0 = vmul.f32 0.57735026, %v1387_v62  ;;  %v570_v1 = vpop.f32.mrb[7].mxu0  ;;  %v634_v2 = vpop.f32.mrb[7].mxu1 }
 0x107   : > { %v782_v3 = vmul.f32 0.57735026, %v570_v1  ;;  %v798_v4 = vmul.f32 0.57735026, %v634_v2  ;;  %v820_v9 = vadd.f32 %v1575_v25, %v781_v59  ;;  %v836_v10 = vadd.f32 %v1575_v25, %v797_v60 }
 0x108   : > { %v823_v7 = vadd.f32 %v1575_v25, %v784_v63  ;;  %v839_v8 = vadd.f32 %v1575_v25, %v800_v0 }
 0x109   : > { %v821_v11 = vadd.f32 %v1575_v25, %v782_v3  ;;  %v837_v12 = vadd.f32 %v1575_v25, %v798_v4 }
 0x10a   : > { %v1247_v13 = vpack.c.bf16 %v823_v7, %v822_v5  ;;  %v1287_v14 = vpack.c.bf16 %v839_v8, %v838_v6  ;;  %v1374_v17 = vpop.f32.mrb[8].mxu0  ;;  %v1390_v18 = vpop.f32.mrb[8].mxu1 }
 0x10b   : > { %v1242_v15 = vpack.c.bf16 %v821_v11, %v820_v9  ;;  %v1282_v16 = vpack.c.bf16 %v837_v12, %v836_v10  ;;  %v787_v19 = vmul.f32 0.57735026, %v1374_v17  ;;  %v803_v20 = vmul.f32 0.57735026, %v1390_v18  ;;  %v583_v21 = vpop.f32.mrb[9].mxu0  ;;  %v647_v22 = vpop.f32.mrb[9].mxu1 }
 0x10c   : > { %1311 = vst [vmem:[%s1588_s17 + $0x18] sm:$0xff] %v1247_v13   ;;  %1319 = vst [vmem:[%s1588_s17 + $0x58] sm:$0xff] %v1287_v14   ;;  %v785_v23 = vmul.f32 0.57735026, %v583_v21  ;;  %v801_v24 = vmul.f32 0.57735026, %v647_v22 }
 0x10d   : > { %1310 = vst [vmem:[%s1588_s17 + $0x10] sm:$0xff] %v1242_v15   ;;  %1318 = vst [vmem:[%s1588_s17 + $0x50] sm:$0xff] %v1282_v16   ;;  %v1375_v26 = vpop.f32.mrb[10].mxu0  ;;  %v1391_v27 = vpop.f32.mrb[10].mxu1  ;;  %v826_v34 = vadd.f32 %v1575_v25, %v787_v19  ;;  %v842_v35 = vadd.f32 %v1575_v25, %v803_v20 }
 0x10e   : > { %v788_v28 = vmul.f32 0.57735026, %v1375_v26  ;;  %v804_v29 = vmul.f32 0.57735026, %v1391_v27  ;;  %v586_v30 = vpop.f32.mrb[11].mxu0  ;;  %v650_v31 = vpop.f32.mrb[11].mxu1  ;;  %v824_v38 = vadd.f32 %v1575_v25, %v785_v23  ;;  %v840_v39 = vadd.f32 %v1575_v25, %v801_v24 }
 0x10f   : > { %v786_v32 = vmul.f32 0.57735026, %v586_v30  ;;  %v802_v33 = vmul.f32 0.57735026, %v650_v31 }
 0x110   : > { %v827_v36 = vadd.f32 %v1575_v25, %v788_v28  ;;  %v843_v37 = vadd.f32 %v1575_v25, %v804_v29 }
 0x111   : > { %v825_v40 = vadd.f32 %v1575_v25, %v786_v32  ;;  %v841_v41 = vadd.f32 %v1575_v25, %v802_v33 }
 0x112   : > { %v1257_v42 = vpack.c.bf16 %v827_v36, %v826_v34  ;;  %v1297_v43 = vpack.c.bf16 %v843_v37, %v842_v35  ;;  %v1378_v46 = vpop.f32.mrb[12].mxu0  ;;  %v1394_v47 = vpop.f32.mrb[12].mxu1 }
 0x113   : > { %v1252_v44 = vpack.c.bf16 %v825_v40, %v824_v38  ;;  %v1292_v45 = vpack.c.bf16 %v841_v41, %v840_v39  ;;  %v791_v48 = vmul.f32 0.57735026, %v1378_v46  ;;  %v807_v49 = vmul.f32 0.57735026, %v1394_v47  ;;  %v599_v50 = vpop.f32.mrb[13].mxu0  ;;  %v663_v51 = vpop.f32.mrb[13].mxu1 }
 0x114   : > { %1313 = vst [vmem:[%s1588_s17 + $0x28] sm:$0xff] %v1257_v42   ;;  %1321 = vst [vmem:[%s1588_s17 + $0x68] sm:$0xff] %v1297_v43   ;;  %v789_v52 = vmul.f32 0.57735026, %v599_v50  ;;  %v805_v53 = vmul.f32 0.57735026, %v663_v51 }
 0x115   : > { %1312 = vst [vmem:[%s1588_s17 + $0x20] sm:$0xff] %v1252_v44   ;;  %1320 = vst [vmem:[%s1588_s17 + $0x60] sm:$0xff] %v1292_v45   ;;  %v1379_v54 = vpop.f32.mrb[14].mxu0  ;;  %v1395_v55 = vpop.f32.mrb[14].mxu1  ;;  %v830_v62 = vadd.f32 %v1575_v25, %v791_v48  ;;  %v846_v63 = vadd.f32 %v1575_v25, %v807_v49 }
 0x116   : > { %v792_v56 = vmul.f32 0.57735026, %v1379_v54  ;;  %v808_v57 = vmul.f32 0.57735026, %v1395_v55  ;;  %v602_v58 = vpop.f32.mrb[15].mxu0  ;;  %v666_v59 = vpop.f32.mrb[15].mxu1  ;;  %v828_v2 = vadd.f32 %v1575_v25, %v789_v52  ;;  %v844_v3 = vadd.f32 %v1575_v25, %v805_v53 }
 0x117   : > { %v790_v60 = vmul.f32 0.57735026, %v602_v58  ;;  %v806_v61 = vmul.f32 0.57735026, %v666_v59 }
 0x118   : > { %v831_v0 = vadd.f32 %v1575_v25, %v792_v56  ;;  %v847_v1 = vadd.f32 %v1575_v25, %v808_v57 }
 0x119   : > { %v829_v4 = vadd.f32 %v1575_v25, %v790_v60  ;;  %v845_v5 = vadd.f32 %v1575_v25, %v806_v61 }
 0x11a   : > { %v1267_v6 = vpack.c.bf16 %v831_v0, %v830_v62  ;;  %v1307_v7 = vpack.c.bf16 %v847_v1, %v846_v63 }
 0x11b   : > { %v1262_v8 = vpack.c.bf16 %v829_v4, %v828_v2  ;;  %v1302_v9 = vpack.c.bf16 %v845_v5, %v844_v3 }
 0x11c   : > { %1315 = vst [vmem:[%s1588_s17 + $0x38] sm:$0xff] %v1267_v6   ;;  %1323 = vst [vmem:[%s1588_s17 + $0x78] sm:$0xff] %v1307_v7  }
 0x11d   : > { %1314 = vst [vmem:[%s1588_s17 + $0x30] sm:$0xff] %v1262_v8   ;;  %1322 = vst [vmem:[%s1588_s17 + $0x70] sm:$0xff] %v1302_v9  }
 0x11e PF: > { %s13_s14 = sadd.s32 1, %s1482_s14   ;;  %s1645_s12 = smov %s1478_s13 }
 0x11f   : > { %p10_p5 = scmp.ge.s32.totalorder %s13_s14, 4   ;;  %s1646_s13 = smov %s1648_s15 }
 0x121   :  { %12 = sbr.rel (!%p10_p5) target bundleno = 2 (0x2), region = 76 }

// kernel: sg2_discriminator_forward.14
= control target key start
LH: loop header
LB: loop body
LE: loop exit
PB: predicated region body
PF: predicated region fallthrough
CT: control target
= control target key end

     0   :  { %s979_s15 = smov 0   ;;  %s981_s16 = smov 0   ;;  %s1053_s0 = inlined_call_operand.vmem [shape: bf16[2,64,128], index: 0, kind: input, shape index: {}]   ;;  %s1054_s1 = inlined_call_operand.vmem [shape: bf16[1,128,128], index: 1, kind: input, shape index: {}]   ;;  %s1055_s2 = inlined_call_operand.vmem [shape: f32[1,128], index: 2, kind: input, shape index: {}]   ;;  %s1056_s3 = inlined_call_operand.vmem [shape: bf16[2,64,128], index: 3, kind: input, shape index: {}]   ;;  %s1057_s4 = inlined_call_operand.vmem [shape: bf16[2,64,128], index: 4, kind: output, shape index: {}]  }
   0x1   :  { %s983_s17 = smov 0  }
   0x2 LB: > { %s33_s18 = sadd.s32 1, %s948_s16  ;;  %p759_p0 = scmp.ge.s32.totalorder %s952_s17, 1  ;;  %s952_s17 = sphi %s983_s17, %s14_s17   ;;  %s948_s16 = sphi %s981_s16, %s1059_s16   ;;  %s944_s15 = sphi %s979_s15, %s1058_s15  }
   0x3   : > { %p35_p1 = scmp.ge.s32.totalorder %s33_s18, 2  ;;  %p227_p2 = scmp.lt.s32.totalorder %s952_s17, 3 }
   0x5   : > { %s1061_s18 = smov (%p35_p1, %s33_s18), 0  ;;  %p228_p3 = pnand %p759_p0, %p227_p2 }
   0x6   : > { %v918_v0 = vld [vmem:[%s1054_s1] sm:$0xff] (!%p228_p3)   ;;  %p278_p4 = scmp.lt.s32.totalorder (!%p228_p3), %s944_s15, 1  ;;  %v919_v1 = vld [vmem:[%s1054_s1 + $0x8] sm:$0xff] (!%p228_p3)   ;;  %v920_v2 = vld [vmem:[%s1054_s1 + $0x10] sm:$0xff] (!%p228_p3)  }
   0x7   : > { %231 = sbr.rel (%p228_p3) target bundleno = 265 (0x109), region = 36  ;;  %854 = vmatprep.subr.bf16.mxu0 (!%p228_p3), %v918_v0  ;;  %878 = vmatprep.subr.bf16.mxu1 (!%p228_p3), %v918_v0  ;;  %v921_v3 = vld [vmem:[%s1054_s1 + $0x18] sm:$0xff] (!%p228_p3)   ;;  %v922_v6 = vld [vmem:[%s1054_s1 + $0x20] sm:$0xff] (!%p228_p3)   ;;  %v923_v7 = vld [vmem:[%s1054_s1 + $0x28] sm:$0xff] (!%p228_p3)  }
   0x8   : > { %855 = vmatpush3.bf16.msra.mxu0 (!%p228_p3), %v918_v0  ;;  %886 = vmatpush3.bf16.msra.mxu1 (!%p228_p3), %v918_v0  ;;  %v924_v8 = vld [vmem:[%s1054_s1 + $0x30] sm:$0xff] (!%p228_p3)   ;;  %v925_v9 = vld [vmem:[%s1054_s1 + $0x38] sm:$0xff] (!%p228_p3)   ;;  %v778_v17 = vld [vmem:[%s1055_s2] ss:$0 sm:$0xff] (!%p228_p3) }
   0x9   : > { %856 = vmatprep.subr.bf16.mxu0 (!%p228_p3), %v919_v1  ;;  %879 = vmatprep.subr.bf16.mxu1 (!%p228_p3), %v919_v1 }
   0xc   : > { %857 = vmatpush3.bf16.msra.mxu0 (!%p228_p3), %v919_v1  ;;  %887 = vmatpush3.bf16.msra.mxu1 (!%p228_p3), %v919_v1 }
   0xd   : > { %858 = vmatprep.subr.bf16.mxu0 (!%p228_p3), %v920_v2  ;;  %880 = vmatprep.subr.bf16.mxu1 (!%p228_p3), %v920_v2 }
   0xe   : > { %s1063_s15 = smov (!%p278_p4, %s944_s15), 1 }
   0xf   : > { %s1006_s25 = sshll.u32 %s1063_s15, 5 }
  0x10   : > { %s1012_s28 = scalar_lea.vmem %s1053_s0, %s1006_s25  ;;  %859 = vmatpush3.bf16.msra.mxu0 %v920_v2  ;;  %888 = vmatpush3.bf16.msra.mxu1 %v920_v2  ;;  %s305_s15 = scalar_lea.vmem %s1056_s3, %s1006_s25 }
  0x11   : > { %v926_v4 = vld [vmem:[%s1012_s28] sm:$0xff]   ;;  %v927_v5 = vld [vmem:[%s1012_s28 + $0x10] sm:$0xff]   ;;  %860 = vmatprep.subr.bf16.mxu0 %v921_v3  ;;  %881 = vmatprep.subr.bf16.mxu1 %v921_v3  ;;  %v928_v10 = vld [vmem:[%s1012_s28 + $0x8] sm:$0xff]   ;;  %s313_s23 = scalar_lea.vmem %s1057_s4, %s1006_s25 }
  0x12   : > { %870 = vmatprep.mubr.bf16.mxu0 %v926_v4  ;;  %874 = vmatprep.mubr.bf16.mxu1 %v927_v5  ;;  %v929_v11 = vld [vmem:[%s1012_s28 + $0x18] sm:$0xff]   ;;  %v836_v12 = vld [vmem:[%s305_s15 + $0x8] sm:$0xff]   ;;  %v801_v14 = vld [vmem:[%s305_s15] sm:$0xff]  }
  0x13   : > { %v838_v13 = vld [vmem:[%s305_s15 + $0x18] sm:$0xff]   ;;  %v837_v15 = vld [vmem:[%s305_s15 + $0x10] sm:$0xff]   ;;  %v806_v18 = vunpack.c.l.bf16 %v836_v12  ;;  %v802_v21 = vunpack.c.l.bf16 %v801_v14  ;;  %v807_v27 = vunpack.c.h.bf16 %v836_v12  ;;  %v803_v33 = vunpack.c.h.bf16 %v801_v14 }
  0x14   : > { %861 = vmatpush3.bf16.msra.mxu0 %v921_v3  ;;  %889 = vmatpush3.bf16.msra.mxu1 %v921_v3  ;;  %v814_v20 = vunpack.c.l.bf16 %v838_v13  ;;  %v810_v22 = vunpack.c.l.bf16 %v837_v15  ;;  %v815_v28 = vunpack.c.h.bf16 %v838_v13  ;;  %v811_v34 = vunpack.c.h.bf16 %v837_v15 }
  0x15   : > { %862 = vmatprep.subr.bf16.mxu0 %v922_v6  ;;  %882 = vmatprep.subr.bf16.mxu1 %v922_v6 }
  0x18   : > { %863 = vmatpush3.bf16.msra.mxu0 %v922_v6  ;;  %890 = vmatpush3.bf16.msra.mxu1 %v922_v6 }
  0x19   : > { %864 = vmatprep.subr.bf16.mxu0 %v923_v7  ;;  %883 = vmatprep.subr.bf16.mxu1 %v923_v7 }
  0x1c   : > { %865 = vmatpush3.bf16.msra.mxu0 %v923_v7  ;;  %891 = vmatpush3.bf16.msra.mxu1 %v923_v7 }
  0x1d   : > { %866 = vmatprep.subr.bf16.mxu0 %v924_v8  ;;  %884 = vmatprep.subr.bf16.mxu1 %v924_v8 }
  0x20   : > { %867 = vmatpush3.bf16.msra.mxu0 %v924_v8  ;;  %892 = vmatpush3.bf16.msra.mxu1 %v924_v8 }
  0x21   : > { %868 = vmatprep.subr.bf16.mxu0 %v925_v9  ;;  %885 = vmatprep.subr.bf16.mxu1 %v925_v9 }
  0x24   : > { %869 = vmatpush3.bf16.msra.mxu0 %v925_v9  ;;  %893 = vmatpush3.bf16.msra.mxu1 %v925_v9 }
  0x27   : > { %871 = vmatmul.mubr.bf16.vlgmr.msra.gmra.mrb[0].mxu0 %v928_v10  ;;  %875 = vmatmul.mubr.bf16.vlgmr.msra.gmra.mrb[0].mxu1 %v929_v11 }
  0xfa   : > { %v872_v16 = vpop.f32.mrb[0].mxu0  ;;  %v876_v19 = vpop.f32.mrb[0].mxu1 }
  0xfb   : > { %v525_v23 = vmul.f32 0.35355338, %v872_v16  ;;  %v529_v24 = vmul.f32 0.35355338, %v876_v19  ;;  %v465_v25 = vpop.f32.mrb[1].mxu0  ;;  %v481_v26 = vpop.f32.mrb[1].mxu1 }
  0xfc   : > { %v523_v29 = vmul.f32 0.35355338, %v465_v25  ;;  %v527_v30 = vmul.f32 0.35355338, %v481_v26  ;;  %v873_v31 = vpop.f32.mrb[2].mxu0  ;;  %v877_v32 = vpop.f32.mrb[2].mxu1 }
  0xfd   : > { %v540_v35 = vadd.f32 %v778_v17, %v525_v23  ;;  %v544_v36 = vadd.f32 %v778_v17, %v529_v24  ;;  %v526_v37 = vmul.f32 0.35355338, %v873_v31  ;;  %v530_v38 = vmul.f32 0.35355338, %v877_v32  ;;  %v468_v39 = vpop.f32.mrb[3].mxu0  ;;  %v484_v40 = vpop.f32.mrb[3].mxu1 }
  0xfe   : > { %v538_v41 = vadd.f32 %v778_v17, %v523_v29  ;;  %v542_v42 = vadd.f32 %v778_v17, %v527_v30  ;;  %v524_v43 = vmul.f32 0.35355338, %v468_v39  ;;  %v528_v44 = vmul.f32 0.35355338, %v484_v40 }
  0xff   : > { %v564_v45 = vadd.f32 %v806_v18, %v540_v35  ;;  %v568_v46 = vadd.f32 %v814_v20, %v544_v36  ;;  %v541_v47 = vadd.f32 %v778_v17, %v526_v37  ;;  %v545_v48 = vadd.f32 %v778_v17, %v530_v38 }
 0x100   : > { %v562_v49 = vadd.f32 %v802_v21, %v538_v41  ;;  %v566_v50 = vadd.f32 %v810_v22, %v542_v42  ;;  %v539_v51 = vadd.f32 %v778_v17, %v524_v43  ;;  %v543_v52 = vadd.f32 %v778_v17, %v528_v44 }
 0x101   : > { %v565_v53 = vadd.f32 %v807_v27, %v541_v47  ;;  %v569_v54 = vadd.f32 %v815_v28, %v545_v48  ;;  %v572_v55 = vmul.f32 0.70710677, %v564_v45  ;;  %v576_v56 = vmul.f32 0.70710677, %v568_v46 }
 0x102   : > { %v563_v57 = vadd.f32 %v803_v33, %v539_v51  ;;  %v567_v58 = vadd.f32 %v811_v34, %v543_v52  ;;  %v570_v59 = vmul.f32 0.70710677, %v562_v49  ;;  %v574_v62 = vmul.f32 0.70710677, %v566_v50 }
 0x103   : > { %v573_v60 = vmul.f32 0.70710677, %v565_v53  ;;  %v577_v61 = vmul.f32 0.70710677, %v569_v54 }
 0x104   : > { %v571_v63 = vmul.f32 0.70710677, %v563_v57  ;;  %v575_v0 = vmul.f32 0.70710677, %v567_v58 }
 0x105   : > { %v824_v1 = vpack.c.bf16 %v573_v60, %v572_v55  ;;  %v834_v2 = vpack.c.bf16 %v577_v61, %v576_v56 }
 0x106   : > { %v819_v3 = vpack.c.bf16 %v571_v63, %v570_v59  ;;  %v829_v4 = vpack.c.bf16 %v575_v0, %v574_v62 }
 0x107   : > { %839 = vst [vmem:[%s313_s23 + $0x8] sm:$0xff] %v824_v1   ;;  %841 = vst [vmem:[%s313_s23 + $0x18] sm:$0xff] %v834_v2  }
 0x108   : > { %820 = vst [vmem:[%s313_s23] sm:$0xff] %v819_v3   ;;  %840 = vst [vmem:[%s313_s23 + $0x10] sm:$0xff] %v829_v4  }
 0x109 PF: > { %s14_s17 = sadd.s32 1, %s952_s17   ;;  %s1058_s15 = smov %s948_s16 }
 0x10a   : > { %p11_p5 = scmp.ge.s32.totalorder %s14_s17, 4   ;;  %s1059_s16 = smov %s1061_s18 }
 0x10c   :  { %13 = sbr.rel (!%p11_p5) target bundleno = 2 (0x2), region = 83 }

// kernel: sg2_discriminator_forward.17
= control target key start
LH: loop header
LB: loop body
LE: loop exit
PB: predicated region body
PF: predicated region fallthrough
CT: control target
= control target key end

     0   :  { %s765_s15 = smov 0   ;;  %s767_s16 = smov 0   ;;  %s833_s0 = inlined_call_operand.vmem [shape: bf16[2,16,128], index: 0, kind: input, shape index: {}]   ;;  %s834_s1 = inlined_call_operand.vmem [shape: bf16[1,128,128], index: 1, kind: input, shape index: {}]   ;;  %s835_s2 = inlined_call_operand.vmem [shape: f32[1,128], index: 2, kind: input, shape index: {}]   ;;  %s836_s3 = inlined_call_operand.vmem [shape: bf16[2,16,128], index: 3, kind: input, shape index: {}]   ;;  %s837_s4 = inlined_call_operand.vmem [shape: bf16[2,16,128], index: 4, kind: output, shape index: {}]  }
   0x1   :  { %s769_s17 = smov 0  }
   0x2 LB: > { %s33_s18 = sadd.s32 1, %s732_s16  ;;  %p615_p0 = scmp.ge.s32.totalorder %s736_s17, 1  ;;  %s736_s17 = sphi %s769_s17, %s14_s17   ;;  %s732_s16 = sphi %s767_s16, %s839_s16   ;;  %s728_s15 = sphi %s765_s15, %s838_s15  }
   0x3   : > { %p35_p1 = scmp.ge.s32.totalorder %s33_s18, 2  ;;  %p227_p2 = scmp.lt.s32.totalorder %s736_s17, 3 }
   0x5   : > { %s841_s18 = smov (%p35_p1, %s33_s18), 0  ;;  %p228_p3 = pnand %p615_p0, %p227_p2 }
   0x6   : > { %v705_v0 = vld [vmem:[%s834_s1] sm:$0xff] (!%p228_p3)   ;;  %v738_v1 = vmov (!%p228_p3), 0.0   ;;  %v706_v2 = vld [vmem:[%s834_s1 + $0x8] sm:$0xff] (!%p228_p3)   ;;  %vm739_vm0 = vmmov (!%p228_p3), 0   ;;  %p278_p4 = scmp.lt.s32.totalorder (!%p228_p3), %s728_s15, 1  ;;  %v707_v3 = vld [vmem:[%s834_s1 + $0x10] sm:$0xff] (!%p228_p3)  }
   0x7   : > { %231 = sbr.rel (%p228_p3) target bundleno = 264 (0x108), region = 36  ;;  %659 = vmatprep.subr.bf16.mxu0 (!%p228_p3), %v738_v1  ;;  %675 = vmatprep.mubr.msk.bf16.mxu0 (!%p228_p3), %vm739_vm0, %v738_v1  ;;  %v708_v4 = vld [vmem:[%s834_s1 + $0x18] sm:$0xff] (!%p228_p3)   ;;  %v709_v5 = vld [vmem:[%s834_s1 + $0x20] sm:$0xff] (!%p228_p3)   ;;  %v710_v6 = vld [vmem:[%s834_s1 + $0x28] sm:$0xff] (!%p228_p3)  }
   0x8   : > { %660 = vmatpush3.bf16.msra.mxu0 (!%p228_p3), %v705_v0  ;;  %v711_v7 = vld [vmem:[%s834_s1 + $0x30] sm:$0xff] (!%p228_p3)   ;;  %v712_v8 = vld [vmem:[%s834_s1 + $0x38] sm:$0xff] (!%p228_p3)   ;;  %v631_v12 = vld [vmem:[%s835_s2] ss:$0 sm:$0xff] (!%p228_p3) }
   0x9   : > { %661 = vmatprep.subr.bf16.mxu0 (!%p228_p3), %v738_v1 }
   0xc   : > { %662 = vmatpush3.bf16.msra.mxu0 (!%p228_p3), %v706_v2 }
   0xd   : > { %663 = vmatprep.subr.bf16.mxu0 (!%p228_p3), %v738_v1 }
   0xe   : > { %s843_s15 = smov (!%p278_p4, %s728_s15), 1 }
   0xf   : > { %s792_s25 = sshll.u32 %s843_s15, 3 }
  0x10   : > { %s285_s28 = scalar_lea.vmem %s833_s0, %s792_s25  ;;  %664 = vmatpush3.bf16.msra.mxu0 %v707_v3  ;;  %s305_s15 = scalar_lea.vmem %s836_s3, %s792_s25 }
  0x11   : > { %665 = vmatprep.subr.bf16.mxu0 %v738_v1  ;;  %v713_v9 = vld [vmem:[%s285_s28] sm:$0xff]   ;;  %s313_s23 = scalar_lea.vmem %s837_s4, %s792_s25 }
  0x12   : > { %v642_v10 = vld [vmem:[%s305_s15] sm:$0xff]  }
  0x13   : > { %v643_v14 = vunpack.c.l.bf16 %v642_v10  ;;  %v644_v19 = vunpack.c.h.bf16 %v642_v10 }
  0x14   : > { %666 = vmatpush3.bf16.msra.mxu0 %v708_v4 }
  0x15   : > { %667 = vmatprep.subr.bf16.mxu0 %v738_v1 }
  0x18   : > { %668 = vmatpush3.bf16.msra.mxu0 %v709_v5 }
  0x19   : > { %669 = vmatprep.subr.bf16.mxu0 %v738_v1 }
  0x1c   : > { %670 = vmatpush3.bf16.msra.mxu0 %v710_v6 }
  0x1d   : > { %671 = vmatprep.subr.bf16.mxu0 %v738_v1 }
  0x20   : > { %672 = vmatpush3.bf16.msra.mxu0 %v711_v7 }
  0x21   : > { %673 = vmatprep.subr.bf16.mxu0 %v738_v1 }
  0x24   : > { %674 = vmatpush3.bf16.msra.mxu0 %v712_v8 }
  0x27   : > { %676 = vmatmul.mubr.bf16.vlgmr.msra.gmra.mrb[0].mxu0 %v713_v9 }
  0xfa   : > { %v429_v11 = vpop.f32.mrb[0].mxu0 }
  0xfb   : > { %v445_v13 = vmul.f32 0.25, %v429_v11  ;;  %v677_v15 = vpop.f32.mrb[1].mxu0 }
  0xfc   : > { %v432_v16 = vpop.f32.mrb[2].mxu0 }
  0xfd   : > { %v454_v17 = vadd.f32 %v631_v12, %v445_v13  ;;  %v446_v18 = vmul.f32 0.25, %v432_v16  ;;  %v678_v20 = vpop.f32.mrb[3].mxu0 }
  0xff   : > { %v460_v21 = vadd.f32 %v643_v14, %v454_v17  ;;  %v455_v22 = vadd.f32 %v631_v12, %v446_v18 }
 0x101   : > { %v461_v23 = vadd.f32 %v644_v19, %v455_v22  ;;  %v462_v24 = vmul.f32 0.70710677, %v460_v21 }
 0x103   : > { %v463_v25 = vmul.f32 0.70710677, %v461_v23 }
 0x105   : > { %v648_v26 = vpack.c.bf16 %v463_v25, %v462_v24 }
 0x107   : > { %649 = vst [vmem:[%s313_s23] sm:$0xff] %v648_v26  }
 0x108 PF: > { %s14_s17 = sadd.s32 1, %s736_s17   ;;  %s838_s15 = smov %s732_s16 }
 0x109   : > { %p11_p5 = scmp.ge.s32.totalorder %s14_s17, 4   ;;  %s839_s16 = smov %s841_s18 }
 0x10b   :  { %13 = sbr.rel (!%p11_p5) target bundleno = 2 (0x2), region = 83 }

// kernel: sg2_discriminator_forward.12
= control target key start
LH: loop header
LB: loop body
LE: loop exit
PB: predicated region body
PF: predicated region fallthrough
CT: control target
= control target key end

     0   :  { %s7863_s12 = smov 0   ;;  %s7865_s13 = smov 0   ;;  %s8584_s0 = inlined_call_operand.vmem [shape: bf16[2,342,128], index: 0, kind: input, shape index: {}]   ;;  %s8585_s1 = inlined_call_operand.vmem [shape: bf16[9,128,128], index: 1, kind: input, shape index: {}]   ;;  %s8586_s2 = inlined_call_operand.vmem [shape: f32[1,128], index: 2, kind: input, shape index: {}]   ;;  %s8587_s3 = inlined_call_operand.vmem [shape: bf16[2,288,128], index: 3, kind: output, shape index: {}]  }
   0x1   :  { %s7867_s14 = smov 0  }
   0x2 LB: > { %s32_s15 = sadd.s32 1, %s7837_s13  ;;  %p5982_p0 = scmp.ge.s32.totalorder %s7841_s14, 1  ;;  %s7841_s14 = sphi %s7867_s14, %s13_s14   ;;  %s7837_s13 = sphi %s7865_s13, %s8589_s13   ;;  %s7833_s12 = sphi %s7863_s12, %s8588_s12  }
   0x3   : > { %p34_p1 = scmp.ge.s32.totalorder %s32_s15, 2  ;;  %p187_p2 = scmp.lt.s32.totalorder %s7841_s14, 3 }
   0x5   : > { %s8591_s15 = smov (%p34_p1, %s32_s15), 0  ;;  %p188_p3 = pnand %p5982_p0, %p187_p2 }
   0x6   : > { %v7569_v0 = vld [vmem:[%s8585_s1] sm:$0xff] (!%p188_p3)   ;;  %v7571_v2 = vld [vmem:[%s8585_s1 + $0x8] sm:$0xff] (!%p188_p3)   ;;  %p228_p4 = scmp.lt.s32.totalorder (!%p188_p3), %s7833_s12, 1  ;;  %v7573_v4 = vld [vmem:[%s8585_s1 + $0x10] sm:$0xff] (!%p188_p3)   ;;  %vm2691_vm0 = vsmask.f32 (!%p188_p3), 6400 }
   0x7   : > { %191 = sbr.rel (%p188_p3) target bundleno = 586 (0x24a), region = 32  ;;  %v7570_v1 = vld [vmem:[%s8585_s1 + $0x100] sm:$0xff] (!%p188_p3)   ;;  %6771 = vmatprep.subr.bf16.mxu1 (!%p188_p3), %v7569_v0  ;;  %v7572_v3 = vld [vmem:[%s8585_s1 + $0x108] sm:$0xff] (!%p188_p3)   ;;  %v7574_v5 = vld [vmem:[%s8585_s1 + $0x110] sm:$0xff] (!%p188_p3)   ;;  %vm3360_vm1 = vcmask (!%p188_p3), 1045504   ;;  %vm1620_vm3 = vcmask (!%p188_p3), 1046528  }
   0x8   : > { %6979 = vmatprep.subr.bf16.mxu0 (!%p188_p3), %v7570_v1  ;;  %6772 = vmatpush3.bf16.msra.mxu1 (!%p188_p3), %v7569_v0  ;;  %v7575_v6 = vld [vmem:[%s8585_s1 + $0x18] sm:$0xff] (!%p188_p3)   ;;  %v7577_v8 = vld [vmem:[%s8585_s1 + $0x20] sm:$0xff] (!%p188_p3)   ;;  %v7579_v10 = vld [vmem:[%s8585_s1 + $0x28] sm:$0xff] (!%p188_p3)   ;;  %vm973_vm2 = vsmask.f32 (!%p188_p3), 7424  ;;  %vm5100_vm5 = vcmask (!%p188_p3), 1044480  }
   0x9   : > { %6980 = vmatpush3.bf16.msra.mxu0 (!%p188_p3), %v7570_v1  ;;  %6773 = vmatprep.subr.bf16.mxu1 (!%p188_p3), %v7571_v2  ;;  %v7576_v7 = vld [vmem:[%s8585_s1 + $0x118] sm:$0xff] (!%p188_p3)   ;;  %v7578_v9 = vld [vmem:[%s8585_s1 + $0x120] sm:$0xff] (!%p188_p3)   ;;  %v7580_v11 = vld [vmem:[%s8585_s1 + $0x128] sm:$0xff] (!%p188_p3)   ;;  %vm4431_vm4 = vsmask.f32 (!%p188_p3), 5376 }
   0xa   : > { %6981 = vmatprep.subr.bf16.mxu0 (!%p188_p3), %v7572_v3  ;;  %v7581_v15 = vld [vmem:[%s8585_s1 + $0x30] sm:$0xff] (!%p188_p3)   ;;  %v7583_v26 = vld [vmem:[%s8585_s1 + $0x38] sm:$0xff] (!%p188_p3)   ;;  %v7589_v33 = vld [vmem:[%s8585_s1 + $0x40] sm:$0xff] (!%p188_p3)  }
   0xb   : > { %v7582_v16 = vld [vmem:[%s8585_s1 + $0x130] sm:$0xff] (!%p188_p3)   ;;  %v7584_v29 = vld [vmem:[%s8585_s1 + $0x138] sm:$0xff] (!%p188_p3)   ;;  %v7591_v39 = vld [vmem:[%s8585_s1 + $0x140] sm:$0xff] (!%p188_p3)  }
   0xc   : > { %6774 = vmatpush3.bf16.msra.mxu1 (!%p188_p3), %v7571_v2  ;;  %v7592_v43 = vld [vmem:[%s8585_s1 + $0x148] sm:$0xff] (!%p188_p3)   ;;  %v7597_v58 = vld [vmem:[%s8585_s1 + $0x150] sm:$0xff] (!%p188_p3)  }
   0xd   : > { %6982 = vmatpush3.bf16.msra.mxu0 (!%p188_p3), %v7572_v3  ;;  %6775 = vmatprep.subr.bf16.mxu1 (!%p188_p3), %v7573_v4  ;;  %v7598_v52 = vld [vmem:[%s8585_s1 + $0x48] sm:$0xff] (!%p188_p3)   ;;  %v7605_v1 = vld [vmem:[%s8585_s1 + $0x50] sm:$0xff] (!%p188_p3)  }
   0xe   : > { %s8593_s12 = smov (!%p228_p4, %s7833_s12), 1  ;;  %6983 = vmatprep.subr.bf16.mxu0 %v7574_v5 }
   0xf   : > { %s7543_s5 = smul.u32 172, %s8593_s12 }
  0x10   : > { %6776 = vmatpush3.bf16.msra.mxu1 %v7573_v4  ;;  %s7544_s26 = smul.u32 144, %s8593_s12 }
  0x11   : > { %6984 = vmatpush3.bf16.msra.mxu0 %v7574_v5  ;;  %6777 = vmatprep.subr.bf16.mxu1 %v7575_v6  ;;  %s7923_s20 = scalar_lea.vmem %s8584_s0, %s7543_s5  ;;  %v7599_v5 = vld [vmem:[%s8585_s1 + $0x158] sm:$0xff]  }
  0x12   : > { %6985 = vmatprep.subr.bf16.mxu0 %v7576_v7  ;;  %v7585_v12 = vld [vmem:[%s7923_s20] sm:$0xff]   ;;  %v7586_v13 = vld [vmem:[%s7923_s20 + $0x8] sm:$0xfe]   ;;  %v7587_v14 = vld [vmem:[%s7923_s20 + $0x10] sm:$0xff]   ;;  %s8515_s12 = scalar_lea.vmem %s8587_s3, %s7544_s26 }
  0x13   : > { %6787 = vmatprep.mubr.bf16.mxu1 %v7585_v12  ;;  %v2693_v17 = vshrl.u32 %v7586_v13, 16  ;;  %v2696_v18 = vshll.u32 %v7586_v13, 16  ;;  %v2701_v19 = vshrl.u32 %v7587_v14, 16  ;;  %v2704_v20 = vshll.u32 %v7587_v14, 16  ;;  %v7590_v25 = vld [vmem:[%s7923_s20 + $0x18] sm:$0xff]   ;;  %v7594_v36 = vld [vmem:[%s7923_s20 + $0x20] sm:$0xff]  }
  0x14   : > { %6778 = vmatpush3.bf16.msra.mxu1 %v7575_v6  ;;  %v2710_v30 = vshrl.u32 %v7590_v25, 16  ;;  %v2713_v31 = vshll.u32 %v7590_v25, 16  ;;  %v7588_v37 = vld [vmem:[%s7923_s20 + $0x8] sm:$0xff]   ;;  %v2719_v40 = vshrl.u32 %v7594_v36, 16  ;;  %v2722_v41 = vshll.u32 %v7594_v36, 16  ;;  %v7593_v48 = vld [vmem:[%s7923_s20 + $0x10] sm:$0xff]  }
  0x15   : > { %6986 = vmatpush3.bf16.msra.mxu0 %v7576_v7  ;;  %6779 = vmatprep.subr.bf16.mxu1 %v7577_v8  ;;  %v2695_v21 = vrot.slane %v2693_v17, 1  ;;  %v2698_v22 = vrot.slane %v2696_v18, 2  ;;  %v2703_v23 = vrot.slane %v2701_v19, 1  ;;  %v2706_v24 = vrot.slane %v2704_v20, 2  ;;  %v7596_v42 = vld [vmem:[%s7923_s20 + $0x28] sm:$0xff]   ;;  %v7601_v54 = vld [vmem:[%s7923_s20 + $0x30] sm:$0xff]  }
  0x16   : > { %6987 = vmatprep.subr.bf16.mxu0 %v7578_v9  ;;  %v2712_v34 = vrot.slane %v2710_v30, 1  ;;  %v2715_v35 = vrot.slane %v2713_v31, 2  ;;  %v2721_v44 = vrot.slane %v2719_v40, 1  ;;  %v2724_v45 = vrot.slane %v2722_v41, 2  ;;  %v7595_v56 = vld [vmem:[%s7923_s20 + $0x18] sm:$0xff]   ;;  %v7600_v2 = vld [vmem:[%s7923_s20 + $0x20] sm:$0xff]  }
  0x17   : > { %v2699_v27 = vor.u32 %v2698_v22, %v2695_v21  ;;  %v2707_v28 = vor.u32 %v2706_v24, %v2703_v23  ;;  %v2728_v46 = vshrl.u32 %v7596_v42, 16  ;;  %v2731_v49 = vshll.u32 %v7596_v42, 16  ;;  %v7603_v61 = vld [vmem:[%s7923_s20 + $0x38] sm:$0xff]   ;;  %v7602_v13 = vld [vmem:[%s7923_s20 + $0x28] sm:$0xff]   ;;  %v7607_v22 = vld [vmem:[%s7923_s20 + $0x30] sm:$0xff]  }
  0x18   : > { %6780 = vmatpush3.bf16.msra.mxu1 %v7577_v8  ;;  %v2716_v38 = vor.u32 %v2715_v35, %v2712_v34  ;;  %v2725_v50 = vor.u32 %v2724_v45, %v2721_v44  ;;  %v2737_v59 = vshrl.u32 %v7601_v54, 16  ;;  %v2740_v60 = vshll.u32 %v7601_v54, 16  ;;  %v7612_v19 = vld [vmem:[%s8585_s1 + $0x58] sm:$0xff]   ;;  %v7606_v25 = vld [vmem:[%s8585_s1 + $0x168] sm:$0xff]   ;;  %v7619_v35 = vld [vmem:[%s8585_s1 + $0x60] sm:$0xff]  }
  0x19   : > { %6988 = vmatpush3.bf16.msra.mxu0 %v7578_v9  ;;  %6781 = vmatprep.subr.bf16.mxu1 %v7579_v10  ;;  %v2708_v32 = vsel %vm2691_vm0, %v2699_v27, %v2707_v28  ;;  %v2730_v51 = vrot.slane %v2728_v46, 1  ;;  %v2733_v53 = vrot.slane %v2731_v49, 2  ;;  %v2746_v0 = vshrl.u32 %v7603_v61, 16  ;;  %v7608_v9 = vld [vmem:[%s7923_s20 + $0x40] sm:$0xff]   ;;  %v7615_v30 = vld [vmem:[%s7923_s20 + $0x8] sm:$0xfc]  }
  0x1a   : > { %6989 = vmatprep.subr.bf16.mxu0 %v7580_v11  ;;  %6995 = vmatprep.mubr.bf16.mxu0 %v2708_v32  ;;  %v2717_v47 = vsel %vm2691_vm0, %v2707_v28, %v2716_v38  ;;  %v2726_v55 = vsel %vm2691_vm0, %v2716_v38, %v2725_v50  ;;  %v2739_v62 = vrot.slane %v2737_v59, 1  ;;  %v2742_v63 = vrot.slane %v2740_v60, 2  ;;  %v7616_v28 = vld [vmem:[%s7923_s20 + $0x10] sm:$0xff]   ;;  %v7609_v36 = vld [vmem:[%s7923_s20 + $0x38] sm:$0xff]   ;;  %v7614_v38 = vld [vmem:[%s7923_s20 + $0x40] sm:$0xff]  }
  0x1b   : > { %v2734_v57 = vor.u32 %v2733_v53, %v2730_v51  ;;  %v2749_v3 = vshll.u32 %v7603_v61, 16  ;;  %v2748_v7 = vrot.slane %v2746_v0, 1  ;;  %v2758_v12 = vshll.u32 %v7608_v9, 16  ;;  %v7611_v32 = vld [vmem:[%s8585_s1 + $0x170] sm:$0xff]   ;;  %v7618_v40 = vld [vmem:[%s7923_s20 + $0x18] sm:$0xff]   ;;  %v7621_v42 = vld [vmem:[%s7923_s20 + $0x20] sm:$0xff]  }
  0x1c   : > { %6782 = vmatpush3.bf16.msra.mxu1 %v7579_v10  ;;  %v2743_v6 = vor.u32 %v2742_v63, %v2739_v62  ;;  %v3361_v34 = vrot.slane %v7615_v30, 2  ;;  %v7617_v44 = vld [vmem:[%s7923_s20 + $0x48] sm:$0xff]   ;;  %v3364_v45 = vrot.slane %v7618_v40, 2  ;;  %v7620_v46 = vld [vmem:[%s7923_s20 + $0x50] sm:$0xff]   ;;  %v7629_v60 = vld [vmem:[%s7923_s20 + $0x38] sm:$0xff]  }
  0x1d   : > { %6990 = vmatpush3.bf16.msra.mxu0 %v7580_v11  ;;  %6783 = vmatprep.subr.bf16.mxu1 %v7581_v15  ;;  %v2735_v4 = vsel %vm2691_vm0, %v2725_v50, %v2734_v57  ;;  %v2751_v8 = vrot.slane %v2749_v3, 2  ;;  %v2755_v11 = vshrl.u32 %v7608_v9, 16  ;;  %v2760_v18 = vrot.slane %v2758_v12, 2  ;;  %v7623_v49 = vld [vmem:[%s7923_s20 + $0x28] sm:$0xff]   ;;  %v7627_v50 = vld [vmem:[%s7923_s20 + $0x30] sm:$0xff]   ;;  %v7638_v62 = vld [vmem:[%s8585_s1 + $0x78] sm:$0xff]  }
  0x1e   : > { %6991 = vmatprep.subr.bf16.mxu0 %v7582_v16  ;;  %v2744_v10 = vsel %vm2691_vm0, %v2734_v57, %v2743_v6  ;;  %v7631_v54 = vld [vmem:[%s8585_s1 + $0x70] sm:$0xff]   ;;  %v7626_v57 = vld [vmem:[%s7923_s20 + $0x60] sm:$0xff]  }
  0x1f   : > { %v2752_v14 = vor.u32 %v2751_v8, %v2748_v7  ;;  %v2757_v17 = vrot.slane %v2755_v11, 1  ;;  %v7636_v59 = vld [vmem:[%s8585_s1 + $0x190] sm:$0xff]   ;;  %v7633_v0 = vld [vmem:[%s7923_s20 + $0x40] sm:$0xff]  }
  0x20   : > { %6784 = vmatpush3.bf16.msra.mxu1 %v7581_v15  ;;  %v7610_v15 = vld [vmem:[%s7923_s20 + $0x48] sm:$0xff]   ;;  %v3374_v3 = vrot.slane %v7633_v0, 2  ;;  %v7639_v8 = vld [vmem:[%s7923_s20 + $0x50] sm:$0xff]   ;;  %v7643_v9 = vld [vmem:[%s7923_s20] sm:$0xff]  }
  0x21   : > { %6992 = vmatpush3.bf16.msra.mxu0 %v7582_v16  ;;  %6785 = vmatprep.subr.bf16.mxu1 %v7583_v26  ;;  %v7604_v16 = vld [vmem:[%s8585_s1 + $0x160] sm:$0xff]   ;;  %v2764_v20 = vshrl.u32 %v7610_v15, 16  ;;  %v2767_v21 = vshll.u32 %v7610_v15, 16  ;;  %v2761_v23 = vor.u32 %v2760_v18, %v2757_v17  ;;  %v2753_v24 = vsel %vm2691_vm0, %v2743_v6, %v2752_v14  ;;  %v7635_v6 = vld [vmem:[%s7923_s20 + $0x48] sm:$0xff]   ;;  %v7634_v17 = vld [vmem:[%s7923_s20 + $0x78] sm:$0xff]  }
  0x22   : > { %6993 = vmatprep.subr.bf16.mxu0 %v7584_v29  ;;  %v8053_v11 = vld [vmem:[%s8585_s1 + $0x80] sm:$0xff]   ;;  %v3376_v12 = vrot.slane %v7635_v6, 2  ;;  %v7654_v0 = vld [vmem:[%s8585_s1 + $0x88] sm:$0xff]  }
  0x23   : > { %v2769_v27 = vrot.slane %v2767_v21, 2  ;;  %v7649_v15 = vld [vmem:[%s8585_s1 + $0x1a0] sm:$0xff]  }
  0x24   : > { %6786 = vmatpush3.bf16.msra.mxu1 %v7583_v26  ;;  %v2766_v26 = vrot.slane %v2764_v20, 1  ;;  %v7637_v18 = vld [vmem:[%s7923_s20 + $0x80] sm:$0xff]   ;;  %v975_v20 = vshrl.u32 %v7643_v9, 16  ;;  %v3377_v21 = vsel %vm3360_vm1, %v3374_v3, %v3376_v12 }
  0x25   : > { %6994 = vmatpush3.bf16.msra.mxu0 %v7584_v29  ;;  %6823 = vmatprep.subr.bf16.mxu1 %v7589_v33  ;;  %v2762_v29 = vsel %vm2691_vm0, %v2752_v14, %v2761_v23  ;;  %v977_v14 = vshll.u32 %v7643_v9, 16  ;;  %v7662_v9 = vld [vmem:[%s7923_s20 + $0x38] sm:$0xff]  }
  0x26   : > { %7031 = vmatprep.subr.bf16.mxu0 %v7591_v39  ;;  %v7992_v31 = vor.u32 %v2769_v27, %v2766_v26  ;;  %v7655_v26 = vld [vmem:[%s8585_s1 + $0x1a8] sm:$0xff]   ;;  %v7646_v27 = vld [vmem:[%s7923_s20 + $0x10] sm:$0xff]  }
  0x27   : > { %6788 = vmatmul.mubr.bf16.vlgmr.msra.gmra.mrb[0].mxu1 %v7588_v37  ;;  %v7613_v37 = vld [vmem:[%s8585_s1 + $0x178] sm:$0xff]  }
  0x28   : > { %6996 = vmatmul.mubr.bf16.vlgmr.msra.gmra.mrb[0].mxu0 %v2717_v47  ;;  %6824 = vmatpush3.bf16.msra.mxu1 %v7589_v33  ;;  %v3362_v33 = vrot.slane %v7616_v28, 2  ;;  %v3366_v47 = vrot.slane %v7621_v42, 2  ;;  %v994_v42 = vshrl.u32 %v7646_v27, 16 }
  0x29   : > { %7032 = vmatpush3.bf16.msra.mxu0 %v7591_v39  ;;  %6791 = vmatprep.mubr.bf16.mxu1 %v7593_v48  ;;  %v2771_v39 = vsel %vm2691_vm0, %v2761_v23, %v7992_v31  ;;  %v7624_v48 = vld [vmem:[%s8585_s1 + $0x180] sm:$0xff]  }
  0x2a   : > { %7033 = vmatprep.subr.bf16.mxu0 %v7592_v43  ;;  %6999 = vmatprep.mubr.bf16.mxu0 %v2726_v55  ;;  %v3363_v41 = vsel %vm3360_vm1, %v3361_v34, %v3362_v33  ;;  %v3365_v51 = vsel %vm3360_vm1, %v3362_v33, %v3364_v45  ;;  %v3367_v53 = vsel %vm3360_vm1, %v3364_v45, %v3366_v47  ;;  %v7622_v55 = vld [vmem:[%s7923_s20 + $0x58] sm:$0xff]   ;;  %v7640_v34 = vld [vmem:[%s7923_s20 + $0x88] sm:$0xff]   ;;  %v7661_v45 = vld [vmem:[%s8585_s1 + $0x1b0] sm:$0xff]  }
  0x2b   : > { %6825 = vmatprep.subr.bf16.mxu1 %v7598_v52  ;;  %v7650_v33 = vld [vmem:[%s7923_s20 + $0x18] sm:$0xff]  }
  0x2c   : > { %6826 = vmatpush3.bf16.msra.mxu1 %v7598_v52  ;;  %v7630_v52 = vld [vmem:[%s8585_s1 + $0x188] sm:$0xff]  }
  0x2d   : > { %7034 = vmatpush3.bf16.msra.mxu0 %v7592_v43  ;;  %6827 = vmatprep.subr.bf16.mxu1 %v7605_v1  ;;  %v7625_v43 = vld [vmem:[%s8585_s1 + $0x68] sm:$0xff]  }
  0x2e   : > { %7035 = vmatprep.subr.bf16.mxu0 %v7597_v58 }
  0x2f   : > { %6792 = vmatmul.mubr.bf16.gmra.mrb[4].mxu1 %v7595_v56  ;;  %v3368_v56 = vrot.slane %v7623_v49, 2  ;;  %v7656_v49 = vld [vmem:[%s7923_s20 + $0x28] sm:$0xff]  }
  0x30   : > { %7000 = vmatmul.mubr.bf16.gmra.mrb[4].mxu0 %v2735_v4  ;;  %6795 = vmatprep.mubr.bf16.mxu1 %v7600_v2  ;;  %v7642_v2 = vld [vmem:[%s8585_s1 + $0x198] sm:$0xff]   ;;  %v7628_v4 = vld [vmem:[%s7923_s20 + $0x68] sm:$0xff]  }
  0x31   : > { %7036 = vmatpush3.bf16.msra.mxu0 %v7597_v58  ;;  %7003 = vmatprep.mubr.bf16.mxu0 %v2744_v10  ;;  %v3370_v58 = vrot.slane %v7627_v50, 2  ;;  %v3369_v61 = vsel %vm3360_vm1, %v3366_v47, %v3368_v56 }
  0x32   : > { %7037 = vmatprep.subr.bf16.mxu0 %v7599_v5  ;;  %6828 = vmatpush3.bf16.msra.mxu1 %v7605_v1  ;;  %v3372_v1 = vrot.slane %v7629_v60, 2  ;;  %v1014_v60 = vshll.u32 %v7656_v49, 16 }
  0x33   : > { %6829 = vmatprep.subr.bf16.mxu1 %v7612_v19  ;;  %v3371_v63 = vsel %vm3360_vm1, %v3368_v56, %v3370_v58  ;;  %v7653_v56 = vld [vmem:[%s7923_s20 + $0x78] sm:$0xff]  }
  0x34   : > { %v3373_v7 = vsel %vm3360_vm1, %v3370_v58, %v3372_v1  ;;  %v3375_v10 = vsel %vm3360_vm1, %v3372_v1, %v3374_v3  ;;  %v7667_v58 = vld [vmem:[%s8585_s1 + $0x1b8] sm:$0xff]   ;;  %v1016_v6 = vrot.slane %v1014_v60, 1 }
  0x35   : > { %7038 = vmatpush3.bf16.msra.mxu0 %v7599_v5  ;;  %v7632_v5 = vld [vmem:[%s7923_s20 + $0x70] sm:$0xff]  }
  0x36   : > { %7039 = vmatprep.subr.bf16.mxu0 %v7604_v16  ;;  %6830 = vmatpush3.bf16.msra.mxu1 %v7612_v19  ;;  %v7641_v19 = vld [vmem:[%s7923_s20 + $0x58] sm:$0xff]  }
  0x37   : > { %6796 = vmatmul.mubr.bf16.gmra.mrb[8].mxu1 %v7602_v13  ;;  %6831 = vmatprep.subr.bf16.mxu1 %v7619_v35  ;;  %v7644_v13 = vld [vmem:[%s7923_s20 + $0x8] sm:$0xff]   ;;  %v3380_v28 = vrot.slane %v7641_v19, 2  ;;  %v7664_v19 = vld [vmem:[%s7923_s20 + $0x40] sm:$0xff]  }
  0x38   : > { %7004 = vmatmul.mubr.bf16.gmra.mrb[8].mxu0 %v2753_v24  ;;  %6799 = vmatprep.mubr.bf16.mxu1 %v7607_v22  ;;  %v979_v22 = vrot.slane %v977_v14, 1  ;;  %v982_v23 = vshll.u32 %v7644_v13, 16 }
  0x39   : > { %7040 = vmatpush3.bf16.msra.mxu0 %v7604_v16  ;;  %7007 = vmatprep.mubr.bf16.mxu0 %v2762_v29  ;;  %v3378_v16 = vrot.slane %v7639_v8, 2  ;;  %v7660_v8 = vld [vmem:[%s8585_s1 + $0x90] sm:$0xff]  }
  0x3a   : > { %7041 = vmatprep.subr.bf16.mxu0 %v7606_v25  ;;  %6832 = vmatpush3.bf16.msra.mxu1 %v7619_v35  ;;  %v980_v29 = vor.u32 %v979_v22, %v975_v20  ;;  %v984_v30 = vrot.slane %v982_v23, 1  ;;  %v986_v35 = vshrl.u32 %v7644_v13, 16  ;;  %v7659_v13 = vld [vmem:[%s7923_s20 + $0x88] sm:$0xff]  }
  0x3b   : > { %6833 = vmatprep.subr.bf16.mxu1 %v7625_v43  ;;  %v3379_v24 = vsel %vm3360_vm1, %v3376_v12, %v3378_v16  ;;  %v8111_v23 = vld [vmem:[%s7923_s20 + $0x48] sm:$0xff]  }
  0x3c   : > { %v985_v40 = vsel %vm973_vm2, %v980_v29, %v984_v30 }
  0x3d   : > { %7042 = vmatpush3.bf16.msra.mxu0 %v7606_v25  ;;  %v7645_v25 = vld [vmem:[%s7923_s20 + $0x60] sm:$0xff]  }
  0x3e   : > { %7043 = vmatprep.subr.bf16.mxu0 %v7611_v32  ;;  %6834 = vmatpush3.bf16.msra.mxu1 %v7625_v43  ;;  %v998_v43 = vshll.u32 %v7650_v33, 16 }
  0x3f   : > { %6800 = vmatmul.mubr.bf16.gmra.mrb[12].mxu1 %v7609_v36  ;;  %6835 = vmatprep.subr.bf16.mxu1 %v7631_v54  ;;  %v990_v36 = vshll.u32 %v7646_v27, 16 }
  0x40   : > { %7008 = vmatmul.mubr.bf16.gmra.mrb[12].mxu0 %v2771_v39  ;;  %6803 = vmatprep.mubr.bf16.mxu1 %v7614_v38  ;;  %v7651_v38 = vld [vmem:[%s7923_s20 + $0x70] sm:$0xff]   ;;  %v3381_v39 = vsel %vm3360_vm1, %v3378_v16, %v3380_v28 }
  0x41   : > { %7044 = vmatpush3.bf16.msra.mxu0 %v7611_v32  ;;  %7047 = vmatprep.mubr.bf16.mxu0 %v3363_v41  ;;  %v3382_v32 = vrot.slane %v7645_v25, 2  ;;  %v992_v47 = vrot.slane %v990_v36, 1 }
  0x42   : > { %7045 = vmatprep.subr.bf16.mxu0 %v7613_v37  ;;  %6836 = vmatpush3.bf16.msra.mxu1 %v7631_v54 }
  0x43   : > { %6837 = vmatprep.subr.bf16.mxu1 %v7638_v62  ;;  %v3383_v41 = vsel %vm3360_vm1, %v3380_v28, %v3382_v32  ;;  %v996_v50 = vor.u32 %v994_v42, %v992_v47 }
  0x45   : > { %7046 = vmatpush3.bf16.msra.mxu0 %v7613_v37  ;;  %v7648_v37 = vld [vmem:[%s7923_s20 + $0x68] sm:$0xff]  }
  0x46   : > { %7083 = vmatprep.subr.bf16.mxu0 %v7624_v48  ;;  %6838 = vmatpush3.bf16.msra.mxu1 %v7638_v62 }
  0x47   : > { %6804 = vmatmul.mubr.bf16.gmra.mrb[16].mxu1 %v7617_v44  ;;  %6875 = vmatprep.subr.bf16.mxu1 %v8053_v11  ;;  %v7652_v44 = vld [vmem:[%s7923_s20 + $0x20] sm:$0xff]  }
  0x48   : > { %7048 = vmatmul.mubr.bf16.vlgmr.msra.gmra.mrb[0].mxu0 %v3365_v51  ;;  %6807 = vmatprep.mubr.bf16.mxu1 %v7620_v46  ;;  %v988_v46 = vor.u32 %v986_v35, %v984_v30  ;;  %v1000_v51 = vrot.slane %v998_v43, 1  ;;  %v1034_v30 = vshrl.u32 %v7662_v9, 16  ;;  %v1042_v35 = vshrl.u32 %v7664_v19, 16  ;;  %v7679_v43 = vld [vmem:[%s8585_s1 + $0xa8] sm:$0xff]  }
  0x49   : > { %7051 = vmatprep.mubr.bf16.mxu0 %v3367_v53  ;;  %7084 = vmatpush3.bf16.msra.mxu0 %v7624_v48  ;;  %v3384_v48 = vrot.slane %v7648_v37, 2  ;;  %v1006_v53 = vshll.u32 %v7652_v44, 16  ;;  %v1046_v37 = vshll.u32 %v8111_v23, 16 }
  0x4a   : > { %7085 = vmatprep.subr.bf16.mxu0 %v7630_v52  ;;  %v993_v54 = vsel %vm973_vm2, %v988_v46, %v992_v47  ;;  %v1001_v62 = vsel %vm973_vm2, %v996_v50, %v1000_v51 }
  0x4b   : > { %v1008_v1 = vrot.slane %v1006_v53, 1  ;;  %v7685_v53 = vld [vmem:[%s8585_s1 + $0xb0] sm:$0xff]  }
  0x4d   : > { %7086 = vmatpush3.bf16.msra.mxu0 %v7630_v52  ;;  %v3386_v52 = vrot.slane %v7651_v38, 2  ;;  %v7670_v38 = vld [vmem:[%s7923_s20 + $0x18] sm:$0xff]  }
  0x4e   : > { %7087 = vmatprep.subr.bf16.mxu0 %v7636_v59  ;;  %v3897_v50 = vrot.slane %v7670_v38, 2 }
  0x4f   : > { %6808 = vmatmul.mubr.bf16.gmra.mrb[20].mxu1 %v7622_v55  ;;  %v1002_v55 = vshrl.u32 %v7650_v33, 16  ;;  %v7673_v33 = vld [vmem:[%s8585_s1 + $0xa0] sm:$0xff]  }
  0x50   : > { %7052 = vmatmul.mubr.bf16.gmra.mrb[4].mxu0 %v3369_v61  ;;  %6811 = vmatprep.mubr.bf16.mxu1 %v7626_v57  ;;  %v1010_v57 = vshrl.u32 %v7652_v44, 16  ;;  %v7657_v61 = vld [vmem:[%s7923_s20 + $0x80] sm:$0xff]  }
  0x51   : > { %7055 = vmatprep.mubr.bf16.mxu0 %v3371_v63  ;;  %7088 = vmatpush3.bf16.msra.mxu0 %v7636_v59  ;;  %v3385_v59 = vsel %vm3360_vm1, %v3382_v32, %v3384_v48  ;;  %v3387_v63 = vsel %vm3360_vm1, %v3384_v48, %v3386_v52  ;;  %v1004_v3 = vor.u32 %v1002_v55, %v1000_v51  ;;  %v7665_v32 = vld [vmem:[%s7923_s20 + $0x98] ss:$0 sps:$4 sm:$0x33]   ;;  %v1048_v48 = vrot.slane %v1046_v37, 1 }
  0x52   : > { %7089 = vmatprep.subr.bf16.mxu0 %v7642_v2  ;;  %v3396_v47 = vrot.slane %v7665_v32, 2  ;;  %v7674_v51 = vld [vmem:[%s7923_s20 + $0x58] sm:$0xff]  }
  0x55   : > { %7090 = vmatpush3.bf16.msra.mxu0 %v7642_v2  ;;  %v7658_v2 = vld [vmem:[%s7923_s20 + $0x30] sm:$0xff]  }
  0x56   : > { %7091 = vmatprep.subr.bf16.mxu0 %v7649_v15  ;;  %v1022_v12 = vshll.u32 %v7658_v2, 16  ;;  %v1026_v14 = vshrl.u32 %v7658_v2, 16 }
  0x57   : > { %6812 = vmatmul.mubr.bf16.gmra.mrb[24].mxu1 %v7628_v4  ;;  %v3388_v4 = vrot.slane %v7653_v56, 2  ;;  %v1050_v56 = vshrl.u32 %v8111_v23, 16  ;;  %v8163_v23 = vld [vmem:[%s8585_s1 + $0xc0] sm:$0xff]  }
  0x58   : > { %7056 = vmatmul.mubr.bf16.gmra.mrb[8].mxu0 %v3373_v7  ;;  %6815 = vmatprep.mubr.bf16.mxu1 %v7632_v5  ;;  %v1012_v5 = vor.u32 %v1010_v57, %v1008_v1  ;;  %v3390_v7 = vrot.slane %v7657_v61, 2  ;;  %v1024_v22 = vrot.slane %v1022_v12, 1  ;;  %v7672_v57 = vld [vmem:[%s7923_s20 + $0x20] sm:$0xff]   ;;  %v1062_v61 = vshll.u32 %v7674_v51, 16 }
  0x59   : > { %7059 = vmatprep.mubr.bf16.mxu0 %v3375_v10  ;;  %7092 = vmatpush3.bf16.msra.mxu0 %v7649_v15  ;;  %v1018_v10 = vshrl.u32 %v7656_v49, 16  ;;  %v7663_v15 = vld [vmem:[%s7923_s20 + $0x90] sm:$0xff]   ;;  %v3389_v16 = vsel %vm3360_vm1, %v3386_v52, %v3388_v4 }
  0x5a   : > { %7093 = vmatprep.subr.bf16.mxu0 %v7655_v26  ;;  %v3391_v20 = vsel %vm3360_vm1, %v3388_v4, %v3390_v7  ;;  %v1028_v27 = vor.u32 %v1026_v14, %v1024_v22  ;;  %v3394_v29 = vrot.slane %v7663_v15, 2  ;;  %v7680_v4 = vld [vmem:[%s7923_s20 + $0x68] sm:$0xff]  }
  0x5b   : > { %v1020_v25 = vor.u32 %v1018_v10, %v1016_v6  ;;  %v7677_v10 = vld [vmem:[%s7923_s20 + $0x30] sm:$0xff]   ;;  %v1082_v32 = vshrl.u32 %v7680_v4, 16 }
  0x5d   : > { %7094 = vmatpush3.bf16.msra.mxu0 %v7655_v26  ;;  %v3392_v26 = vrot.slane %v7659_v13, 2  ;;  %v1025_v36 = vsel %vm973_vm2, %v1020_v25, %v1024_v22  ;;  %v1066_v13 = vshrl.u32 %v7674_v51, 16  ;;  %v3903_v22 = vrot.slane %v7677_v10, 2 }
  0x5e   : > { %7095 = vmatprep.subr.bf16.mxu0 %v7661_v45 }
  0x5f   : > { %6816 = vmatmul.mubr.bf16.gmra.mrb[28].mxu1 %v7634_v17  ;;  %v1017_v17 = vsel %vm973_vm2, %v1012_v5, %v1016_v6  ;;  %v3395_v42 = vsel %vm3360_vm1, %v3392_v26, %v3394_v29  ;;  %v3899_v5 = vrot.slane %v7672_v57, 2 }
  0x60   : > { %7060 = vmatmul.mubr.bf16.gmra.mrb[12].mxu0 %v3377_v21  ;;  %6819 = vmatprep.mubr.bf16.mxu1 %v7637_v18  ;;  %v1030_v18 = vshll.u32 %v7662_v9, 16  ;;  %v7666_v21 = vld [vmem:[%s8585_s1 + $0x98] sm:$0xff]  }
  0x61   : > { %7063 = vmatprep.mubr.bf16.mxu0 %v3379_v24  ;;  %7096 = vmatpush3.bf16.msra.mxu0 %v7661_v45  ;;  %v8116_v24 = vld [vmem:[%s8585_s1 + $0x1c0] sm:$0xff]   ;;  %v7671_v45 = vld [vmem:[%s7923_s20 + $0x50] sm:$0xff]   ;;  %v3900_v14 = vsel %vm3360_vm1, %v3897_v50, %v3899_v5 }
  0x62   : > { %7097 = vmatprep.subr.bf16.mxu0 %v7667_v58  ;;  %v1032_v28 = vrot.slane %v1030_v18, 1  ;;  %v1058_v60 = vshrl.u32 %v7671_v45, 16 }
  0x64   : > { %v1036_v46 = vor.u32 %v1034_v30, %v1032_v28  ;;  %v7690_v30 = vld [vmem:[%s8585_s1 + $0x1d0] sm:$0xff]  }
  0x65   : > { %7098 = vmatpush3.bf16.msra.mxu0 %v7667_v58  ;;  %v3397_v58 = vsel %vm3360_vm1, %v3394_v29, %v3396_v47 }
  0x66   : > { %7135 = vmatprep.subr.bf16.mxu0 %v8116_v24 }
  0x67   : > { %6820 = vmatmul.mubr.bf16.gmra.mrb[32].mxu1 %v7640_v34  ;;  %v1038_v34 = vshll.u32 %v7664_v19, 16 }
  0x68   : > { %7064 = vmatmul.mubr.bf16.gmra.mrb[16].mxu0 %v3381_v39  ;;  %6839 = vmatprep.mubr.bf16.mxu1 %v985_v40  ;;  %v3393_v39 = vsel %vm3360_vm1, %v3390_v7, %v3392_v26  ;;  %v1033_v40 = vsel %vm973_vm2, %v1028_v27, %v1032_v28  ;;  %v1064_v7 = vrot.slane %v1062_v61, 1  ;;  %v7686_v27 = vld [vmem:[%s7923_s20 + $0x78] sm:$0xff]   ;;  %v7694_v61 = vld [vmem:[%s7923_s20 + $0x90] ss:$0 sps:$4 sm:$0x11]  }
  0x69   : > { %7067 = vmatprep.mubr.bf16.mxu0 %v3383_v41  ;;  %v7669_v41 = vld [vmem:[%s7923_s20 + $0x10] sm:$0xfc]   ;;  %v1040_v44 = vrot.slane %v1038_v34, 1  ;;  %v1094_v38 = vshll.u32 %v7686_v27, 16  ;;  %v1098_v51 = vshrl.u32 %v7686_v27, 16  ;;  %v1118_v10 = vshll.u32 %v7694_v61, 16 }
  0x6a   : > { %v3896_v52 = vrot.slane %v7669_v41, 2  ;;  %v1068_v25 = vor.u32 %v1066_v13, %v1064_v7  ;;  %v7696_v41 = vld [vmem:[%s8585_s1 + $0x1d8] sm:$0xff]   ;;  %v7702_v27 = vld [vmem:[%s7923_s20 + $0x70] sm:$0xff]  }
  0x6b   : > { %v1044_v49 = vor.u32 %v1042_v35, %v1040_v44  ;;  %v1041_v55 = vsel %vm973_vm2, %v1036_v46, %v1040_v44  ;;  %v7683_v35 = vld [vmem:[%s7923_s20 + $0x40] sm:$0xff]   ;;  %v1096_v47 = vrot.slane %v1094_v38, 1  ;;  %v7720_v61 = vld [vmem:[%s8585_s1 + $0xd8] sm:$0xff]  }
  0x6c   : > { %v7706_v38 = vld [vmem:[%s7923_s20 + $0x20] sm:$0xff]  }
  0x6f   : > { %6840 = vmatmul.mubr.bf16.vlgmr.msra.gmra.mrb[0].mxu1 %v993_v54  ;;  %v1054_v54 = vshll.u32 %v7671_v45, 16  ;;  %v3907_v45 = vrot.slane %v7683_v35, 2  ;;  %v3919_v35 = vrot.slane %v7702_v27, 2 }
  0x70   : > { %7068 = vmatmul.mubr.bf16.gmra.mrb[20].mxu0 %v3385_v59  ;;  %6876 = vmatpush3.bf16.msra.mxu1 %v8053_v11  ;;  %v1009_v11 = vsel %vm973_vm2, %v1004_v3, %v1008_v1  ;;  %v1049_v59 = vsel %vm973_vm2, %v1044_v49, %v1048_v48  ;;  %v7692_v1 = vld [vmem:[%s8585_s1 + $0xb8] sm:$0xff]   ;;  %v1052_v3 = vor.u32 %v1050_v56, %v1048_v48  ;;  %v7691_v48 = vld [vmem:[%s7923_s20 + $0x88] sm:$0xff]  }
  0x71   : > { %6843 = vmatprep.mubr.bf16.mxu1 %v1001_v62  ;;  %7071 = vmatprep.mubr.bf16.mxu0 %v3387_v63  ;;  %v7675_v62 = vld [vmem:[%s7923_s20 + $0x28] sm:$0xff]   ;;  %v7676_v63 = vld [vmem:[%s7923_s20 + $0x60] sm:$0xff]   ;;  %v1056_v2 = vrot.slane %v1054_v54, 1  ;;  %v7689_v54 = vld [vmem:[%s7923_s20 + $0x50] sm:$0xff]  }
  0x72   : > { %6877 = vmatprep.subr.bf16.mxu1 %v7654_v0  ;;  %v1070_v9 = vshll.u32 %v7676_v63, 16 }
  0x73   : > { %v1060_v6 = vor.u32 %v1058_v60, %v1056_v2  ;;  %v1057_v12 = vsel %vm973_vm2, %v1052_v3, %v1056_v2 }
  0x74   : > { %6878 = vmatpush3.bf16.msra.mxu1 %v7654_v0  ;;  %v3898_v0 = vsel %vm3360_vm1, %v3896_v52, %v3897_v50  ;;  %v1072_v19 = vrot.slane %v1070_v9, 1  ;;  %v7703_v50 = vld [vmem:[%s8585_s1 + $0x1e0] sm:$0xff]  }
  0x75   : > { %6879 = vmatprep.subr.bf16.mxu1 %v7660_v8  ;;  %v1065_v15 = vsel %vm973_vm2, %v1060_v6, %v1064_v7  ;;  %v1114_v6 = vshrl.u32 %v7691_v48, 16  ;;  %v7695_v7 = vld [vmem:[%s7923_s20 + $0x60] sm:$0xff]  }
  0x76   : > { %v1073_v34 = vsel %vm973_vm2, %v1068_v25, %v1072_v19 }
  0x77   : > { %6844 = vmatmul.mubr.bf16.gmra.mrb[4].mxu1 %v1009_v11  ;;  %v1078_v11 = vshll.u32 %v7680_v4, 16 }
  0x78   : > { %7072 = vmatmul.mubr.bf16.gmra.mrb[24].mxu0 %v3389_v16  ;;  %6847 = vmatprep.mubr.bf16.mxu1 %v1017_v17  ;;  %v1074_v16 = vshrl.u32 %v7676_v63, 16  ;;  %v7681_v17 = vld [vmem:[%s7923_s20 + $0x38] sm:$0xff]  }
  0x79   : > { %7075 = vmatprep.mubr.bf16.mxu0 %v3391_v20  ;;  %6880 = vmatpush3.bf16.msra.mxu1 %v7660_v8  ;;  %v3901_v8 = vrot.slane %v7675_v62, 2  ;;  %v7682_v20 = vld [vmem:[%s7923_s20 + $0x70] sm:$0xff]   ;;  %v1080_v26 = vrot.slane %v1078_v11, 1  ;;  %v3905_v29 = vrot.slane %v7681_v17, 2  ;;  %v7709_v62 = vld [vmem:[%s8585_s1 + $0x1e8] sm:$0xff]  }
  0x7a   : > { %6881 = vmatprep.subr.bf16.mxu1 %v7666_v21  ;;  %v1076_v28 = vor.u32 %v1074_v16, %v1072_v19  ;;  %v7721_v16 = vld [vmem:[%s8585_s1 + $0x1f8] sm:$0xff]   ;;  %v3915_v19 = vrot.slane %v7695_v7, 2  ;;  %v7718_v7 = vld [vmem:[%s7923_s20 + $0x40] sm:$0xff]  }
  0x7b   : > { %v3902_v18 = vsel %vm3360_vm1, %v3899_v5, %v3901_v8  ;;  %v3904_v37 = vsel %vm3360_vm1, %v3901_v8, %v3903_v22  ;;  %v1084_v44 = vor.u32 %v1082_v32, %v1080_v26  ;;  %v3908_v56 = vsel %vm3360_vm1, %v3905_v29, %v3907_v45  ;;  %v7715_v5 = vld [vmem:[%s8585_s1 + $0x1f0] sm:$0xff]   ;;  %v7698_v8 = vld [vmem:[%s7923_s20 + $0x8] sm:$0xff]  }
  0x7d   : > { %6882 = vmatpush3.bf16.msra.mxu1 %v7666_v21  ;;  %v7684_v21 = vld [vmem:[%s8585_s1 + $0x1c8] sm:$0xff]  }
  0x7e   : > { %6883 = vmatprep.subr.bf16.mxu1 %v7673_v33 }
  0x7f   : > { %6848 = vmatmul.mubr.bf16.gmra.mrb[8].mxu1 %v1025_v36  ;;  %v1090_v36 = vshrl.u32 %v7682_v20, 16 }
  0x80   : > { %7076 = vmatmul.mubr.bf16.gmra.mrb[28].mxu0 %v3393_v39  ;;  %6851 = vmatprep.mubr.bf16.mxu1 %v1033_v40  ;;  %v7687_v39 = vld [vmem:[%s7923_s20 + $0x48] sm:$0xff]   ;;  %v3906_v40 = vsel %vm3360_vm1, %v3903_v22, %v3905_v29 }
  0x81   : > { %7079 = vmatprep.mubr.bf16.mxu0 %v3395_v42  ;;  %6884 = vmatpush3.bf16.msra.mxu1 %v7673_v33  ;;  %v1086_v33 = vshll.u32 %v7682_v20, 16  ;;  %v3909_v49 = vrot.slane %v7687_v39, 2 }
  0x82   : > { %6885 = vmatprep.subr.bf16.mxu1 %v7679_v43 }
  0x83   : > { %v1088_v42 = vrot.slane %v1086_v33, 1  ;;  %v3910_v60 = vsel %vm3360_vm1, %v3907_v45, %v3909_v49  ;;  %v7705_v33 = vld [vmem:[%s7923_s20 + $0x78] sm:$0xff]  }
  0x85   : > { %6886 = vmatpush3.bf16.msra.mxu1 %v7679_v43  ;;  %v7688_v43 = vld [vmem:[%s7923_s20 + $0x80] sm:$0xff]   ;;  %v1092_v46 = vor.u32 %v1090_v36, %v1088_v42 }
  0x86   : > { %6887 = vmatprep.subr.bf16.mxu1 %v7685_v53  ;;  %v1102_v52 = vshll.u32 %v7688_v43, 16 }
  0x87   : > { %6852 = vmatmul.mubr.bf16.gmra.mrb[12].mxu1 %v1041_v55  ;;  %v1106_v55 = vshrl.u32 %v7688_v43, 16  ;;  %v1097_v57 = vsel %vm973_vm2, %v1092_v46, %v1096_v47  ;;  %v7710_v43 = vld [vmem:[%s7923_s20 + $0x28] sm:$0xff]  }
  0x88   : > { %7080 = vmatmul.mubr.bf16.gmra.mrb[32].mxu0 %v3397_v58  ;;  %6855 = vmatprep.mubr.bf16.mxu1 %v1049_v59  ;;  %v1110_v58 = vshll.u32 %v7691_v48, 16  ;;  %v7693_v59 = vld [vmem:[%s7923_s20 + $0x58] sm:$0xff]   ;;  %v1104_v63 = vrot.slane %v1102_v52, 1  ;;  %v7711_v46 = vld [vmem:[%s7923_s20 + $0x88] sm:$0xff]  }
  0x89   : > { %7099 = vmatprep.mubr.bf16.mxu0 %v3898_v0  ;;  %6888 = vmatpush3.bf16.msra.mxu1 %v7685_v53  ;;  %v1089_v53 = vsel %vm973_vm2, %v1084_v44, %v1088_v42  ;;  %v1100_v0 = vor.u32 %v1098_v51, %v1096_v47  ;;  %v3913_v4 = vrot.slane %v7693_v59, 2  ;;  %v7708_v42 = vld [vmem:[%s8585_s1 + $0xc8] sm:$0xff]   ;;  %v1628_v47 = vrot.slane %v7706_v38, 1  ;;  %v7714_v51 = vld [vmem:[%s8585_s1 + $0xd0] sm:$0xff]   ;;  %v7724_v59 = vld [vmem:[%s7923_s20 + $0x18] sm:$0xff]  }
  0x8a   : > { %6889 = vmatprep.subr.bf16.mxu1 %v7692_v1  ;;  %v1108_v2 = vor.u32 %v1106_v55, %v1104_v63  ;;  %v1112_v3 = vrot.slane %v1110_v58, 1  ;;  %v3925_v52 = vrot.slane %v7711_v46, 2  ;;  %v8244_v55 = vld [vmem:[%s7923_s20 + $0x98] sm:$0xff]  }
  0x8b   : > { %v1105_v9 = vsel %vm973_vm2, %v1100_v0, %v1104_v63  ;;  %v7746_v46 = vld [vmem:[%s8585_s1 + $0xf8] sm:$0xff]  }
  0x8c   : > { %v1113_v11 = vsel %vm973_vm2, %v1108_v2, %v1112_v3  ;;  %v1116_v17 = vor.u32 %v1114_v6, %v1112_v3  ;;  %v7727_v6 = vld [vmem:[%s8585_s1 + $0xe0] sm:$0xff]  }
  0x8d   : > { %6890 = vmatpush3.bf16.msra.mxu1 %v7692_v1  ;;  %v3911_v1 = vrot.slane %v7689_v54, 2  ;;  %v8241_v54 = vld [vmem:[%s7923_s20 + $0x38] sm:$0xff]  }
  0x8e   : > { %6927 = vmatprep.subr.bf16.mxu1 %v8163_v23  ;;  %v1634_v0 = vrot.slane %v8241_v54, 1 }
  0x8f   : > { %6856 = vmatmul.mubr.bf16.gmra.mrb[16].mxu1 %v1057_v12  ;;  %v7699_v12 = vld [vmem:[%s7923_s20 + $0x68] sm:$0xff]   ;;  %v3912_v13 = vsel %vm3360_vm1, %v3909_v49, %v3911_v1  ;;  %v1630_v49 = vrot.slane %v7710_v43, 1  ;;  %v7735_v43 = vld [vmem:[%s7923_s20 + $0x38] sm:$0xff]  }
  0x90   : > { %7100 = vmatmul.mubr.bf16.vlgmr.msra.gmra.mrb[0].mxu0 %v3900_v14  ;;  %6859 = vmatprep.mubr.bf16.mxu1 %v1065_v15  ;;  %v7697_v14 = vld [vmem:[%s7923_s20] sm:$0xfe]   ;;  %v3914_v15 = vsel %vm3360_vm1, %v3911_v1, %v3913_v4  ;;  %v3917_v22 = vrot.slane %v7699_v12, 2  ;;  %v3929_v1 = vrot.slane %v8244_v55, 2  ;;  %v4480_v54 = vshll.u32 %v7735_v43, 16 }
  0x91   : > { %7103 = vmatprep.mubr.bf16.mxu0 %v3902_v18  ;;  %7136 = vmatpush3.bf16.msra.mxu0 %v8116_v24  ;;  %v1081_v24 = vsel %vm973_vm2, %v1076_v28, %v1080_v26  ;;  %v1120_v18 = vrot.slane %v1118_v10, 1  ;;  %v1621_v20 = vrot.slane %v7697_v14, 1  ;;  %v7700_v26 = vld [vmem:[%s7923_s20 + $0x10] sm:$0xff]   ;;  %v3916_v28 = vsel %vm3360_vm1, %v3913_v4, %v3915_v19  ;;  %v7722_v10 = vld [vmem:[%s7923_s20 + $0x48] sm:$0xff]   ;;  %v7726_v12 = vld [vmem:[%s7923_s20 + $0x20] sm:$0xff]  }
  0x92   : > { %7137 = vmatprep.subr.bf16.mxu0 %v7684_v21  ;;  %v3918_v32 = vsel %vm3360_vm1, %v3915_v19, %v3917_v22  ;;  %v1631_v58 = vsel %vm1620_vm3, %v1628_v47, %v1630_v49  ;;  %v4441_v4 = vshrl.u32 %v7724_v59, 16  ;;  %v4453_v27 = vshll.u32 %v7726_v12, 16  ;;  %v7730_v55 = vld [vmem:[%s7923_s20 + $0x60] sm:$0xff]  }
  0x93   : > { %v1121_v25 = vsel %vm973_vm2, %v1116_v17, %v1120_v18 }
  0x94   : > { %v4443_v18 = vrot.slane %v4441_v4, 2  ;;  %v1644_v4 = vrot.slane %v7730_v55, 1  ;;  %v7748_v55 = vld [vmem:[%s7923_s20 + $0x90] ss:$0 sps:$4 sm:$0x11]  }
  0x95   : > { %7138 = vmatpush3.bf16.msra.mxu0 %v7684_v21  ;;  %v1622_v21 = vrot.slane %v7698_v8, 1  ;;  %v7719_v8 = vld [vmem:[%s7923_s20 + $0xa0] ss:$0 sps:$4 sm:$0x33]  }
  0x96   : > { %7139 = vmatprep.subr.bf16.mxu0 %v7690_v30 }
  0x97   : > { %6860 = vmatmul.mubr.bf16.gmra.mrb[20].mxu1 %v1073_v34  ;;  %v1623_v29 = vsel %vm1620_vm3, %v1621_v20, %v1622_v21  ;;  %v1624_v34 = vrot.slane %v7700_v26, 1  ;;  %v7733_v20 = vld [vmem:[%s8585_s1 + $0xe8] sm:$0xff]   ;;  %v1638_v26 = vrot.slane %v7722_v10, 1 }
  0x98   : > { %7104 = vmatmul.mubr.bf16.gmra.mrb[4].mxu0 %v3904_v37  ;;  %6863 = vmatprep.mubr.bf16.mxu1 %v1081_v24  ;;  %v3921_v37 = vrot.slane %v7705_v33, 2  ;;  %v8220_v24 = vld [vmem:[%s8585_s1 + $0x200] sm:$0xff]   ;;  %v7739_v33 = vld [vmem:[%s8585_s1 + $0xf0] sm:$0xff]  }
  0x99   : > { %7107 = vmatprep.mubr.bf16.mxu0 %v3906_v40  ;;  %7140 = vmatpush3.bf16.msra.mxu0 %v7690_v30  ;;  %v7704_v30 = vld [vmem:[%s7923_s20 + $0x18] sm:$0xff]   ;;  %v1625_v39 = vsel %vm1620_vm3, %v1622_v21, %v1624_v34  ;;  %v7707_v40 = vld [vmem:[%s7923_s20 + $0x80] sm:$0xff]   ;;  %v1636_v21 = vrot.slane %v7718_v7, 1 }
  0x9a   : > { %7141 = vmatprep.subr.bf16.mxu0 %v7696_v41  ;;  %v1626_v36 = vrot.slane %v7704_v30, 1  ;;  %v3922_v45 = vsel %vm3360_vm1, %v3919_v35, %v3921_v37  ;;  %v3923_v48 = vrot.slane %v7707_v40, 2  ;;  %v4455_v40 = vrot.slane %v4453_v27, 3 }
  0x9c   : > { %v1627_v44 = vsel %vm1620_vm3, %v1624_v34, %v1626_v36  ;;  %v7725_v34 = vld [vmem:[%s7923_s20 + $0x50] sm:$0xff]  }
  0x9d   : > { %7142 = vmatpush3.bf16.msra.mxu0 %v7696_v41  ;;  %v3920_v41 = vsel %vm3360_vm1, %v3917_v22, %v3919_v35  ;;  %v4450_v22 = vshrl.u32 %v7726_v12, 16  ;;  %v7731_v35 = vld [vmem:[%s7923_s20 + $0x30] sm:$0xff]  }
  0x9e   : > { %7143 = vmatprep.subr.bf16.mxu0 %v7703_v50 }
  0x9f   : > { %6864 = vmatmul.mubr.bf16.gmra.mrb[24].mxu1 %v1089_v53  ;;  %v7713_v53 = vld [vmem:[%s7923_s20 + $0x90] sm:$0xff]  }
  0xa0   : > { %7108 = vmatmul.mubr.bf16.gmra.mrb[8].mxu0 %v3908_v56  ;;  %6867 = vmatprep.mubr.bf16.mxu1 %v1097_v57  ;;  %v7723_v56 = vld [vmem:[%s7923_s20 + $0x10] sm:$0xfc]   ;;  %v3924_v57 = vsel %vm3360_vm1, %v3921_v37, %v3923_v48  ;;  %v3927_v63 = vrot.slane %v7713_v53, 2  ;;  %v4452_v37 = vrot.slane %v4450_v22, 2  ;;  %v4477_v53 = vshrl.u32 %v7735_v43, 16 }
  0xa1   : > { %7111 = vmatprep.mubr.bf16.mxu0 %v3910_v60  ;;  %7144 = vmatpush3.bf16.msra.mxu0 %v7703_v50  ;;  %v7712_v50 = vld [vmem:[%s7923_s20 + $0x30] sm:$0xff]   ;;  %v3926_v60 = vsel %vm3360_vm1, %v3923_v48, %v3925_v52  ;;  %v4433_v2 = vshrl.u32 %v7723_v56, 16  ;;  %v4436_v3 = vshll.u32 %v7723_v56, 16  ;;  %v4468_v48 = vshrl.u32 %v7731_v35, 16 }
  0xa2   : > { %7145 = vmatprep.subr.bf16.mxu0 %v7709_v62 }
  0xa3   : > { %v4435_v14 = vrot.slane %v4433_v2, 2  ;;  %v4438_v17 = vrot.slane %v4436_v3, 3  ;;  %v4470_v56 = vrot.slane %v4468_v48, 2  ;;  %v7738_v2 = vld [vmem:[%s8585_s1 + $0x208] sm:$0xff]   ;;  %v8302_v3 = vld [vmem:[%s8585_s1 + $0x100] sm:$0xff]  }
  0xa5   : > { %7146 = vmatpush3.bf16.msra.mxu0 %v7709_v62  ;;  %v1632_v62 = vrot.slane %v7712_v50, 1 }
  0xa6   : > { %7147 = vmatprep.subr.bf16.mxu0 %v7715_v5 }
  0xa7   : > { %6868 = vmatmul.mubr.bf16.gmra.mrb[28].mxu1 %v1105_v9  ;;  %v1633_v9 = vsel %vm1620_vm3, %v1630_v49, %v1632_v62  ;;  %v4456_v49 = vor.u32 %v4455_v40, %v4452_v37  ;;  %v7756_v37 = vld [vmem:[%s8585_s1 + $0x220] sm:$0xff]  }
  0xa8   : > { %7112 = vmatmul.mubr.bf16.gmra.mrb[12].mxu0 %v3912_v13  ;;  %6871 = vmatprep.mubr.bf16.mxu1 %v1113_v11  ;;  %v3928_v13 = vsel %vm3360_vm1, %v3925_v52, %v3927_v63  ;;  %v1635_v11 = vsel %vm1620_vm3, %v1632_v62, %v1634_v0  ;;  %v7741_v62 = vld [vmem:[%s7923_s20 + $0x48] sm:$0xff]  }
  0xa9   : > { %7115 = vmatprep.mubr.bf16.mxu0 %v3914_v15  ;;  %7148 = vmatpush3.bf16.msra.mxu0 %v7715_v5  ;;  %v4444_v5 = vshll.u32 %v7724_v59, 16  ;;  %v7729_v15 = vld [vmem:[%s7923_s20 + $0x28] sm:$0xff]   ;;  %v4495_v10 = vshrl.u32 %v7741_v62, 16 }
  0xaa   : > { %7149 = vmatprep.subr.bf16.mxu0 %v7721_v16 }
  0xab   : > { %v4446_v19 = vrot.slane %v4444_v5, 3  ;;  %v4497_v22 = vrot.slane %v4495_v10, 2 }
  0xad   : > { %7150 = vmatpush3.bf16.msra.mxu0 %v7721_v16  ;;  %v3930_v16 = vsel %vm3360_vm1, %v3927_v63, %v3929_v1  ;;  %v4447_v30 = vor.u32 %v4446_v19, %v4443_v18 }
  0xae   : > { %7187 = vmatprep.subr.bf16.mxu0 %v8220_v24 }
  0xaf   : > { %6872 = vmatmul.mubr.bf16.gmra.mrb[32].mxu1 %v1121_v25  ;;  %v3931_v25 = vrot.slane %v7719_v8, 2  ;;  %v4457_v59 = vsel %vm4431_vm4, %v4447_v30, %v4456_v49  ;;  %v7736_v8 = vld [vmem:[%s7923_s20 + $0x70] sm:$0xff]  }
  0xb0   : > { %7116 = vmatmul.mubr.bf16.gmra.mrb[16].mxu0 %v3916_v28  ;;  %6891 = vmatprep.mubr.bf16.mxu1 %v1623_v29  ;;  %v4459_v28 = vshrl.u32 %v7729_v15, 16  ;;  %v4439_v29 = vor.u32 %v4438_v17, %v4435_v14  ;;  %v7744_v14 = vld [vmem:[%s8585_s1 + $0x210] sm:$0xff]   ;;  %v1648_v27 = vrot.slane %v7736_v8, 1  ;;  %v7771_v8 = vld [vmem:[%s8585_s1 + $0x238] sm:$0xff]  }
  0xb1   : > { %7119 = vmatprep.mubr.bf16.mxu0 %v3918_v32  ;;  %v4462_v32 = vshll.u32 %v7729_v15, 16  ;;  %v3932_v38 = vsel %vm3360_vm1, %v3929_v1, %v3931_v25  ;;  %v4482_v1 = vrot.slane %v4480_v54, 3  ;;  %v7743_v15 = vld [vmem:[%s7923_s20 + $0x50] sm:$0xff]  }
  0xb7   : > { %6892 = vmatmul.mubr.bf16.vlgmr.msra.gmra.mrb[0].mxu1 %v1625_v39  ;;  %v1639_v39 = vsel %vm1620_vm3, %v1636_v21, %v1638_v26 }
  0xb8   : > { %7120 = vmatmul.mubr.bf16.gmra.mrb[20].mxu0 %v3920_v41  ;;  %6928 = vmatpush3.bf16.msra.mxu1 %v8163_v23  ;;  %v1629_v23 = vsel %vm1620_vm3, %v1626_v36, %v1628_v47  ;;  %v1637_v36 = vsel %vm1620_vm3, %v1634_v0, %v1636_v21  ;;  %v7728_v41 = vld [vmem:[%s7923_s20 + $0x58] sm:$0xff]   ;;  %v1640_v47 = vrot.slane %v7725_v34, 1  ;;  %v4479_v0 = vrot.slane %v4477_v53, 2 }
  0xb9   : > { %6895 = vmatprep.mubr.bf16.mxu1 %v1627_v44  ;;  %7123 = vmatprep.mubr.bf16.mxu0 %v3922_v45  ;;  %v4448_v44 = vsel %vm4431_vm4, %v4439_v29, %v4447_v30  ;;  %v4464_v45 = vrot.slane %v4462_v32, 3  ;;  %v1642_v50 = vrot.slane %v7728_v41, 1  ;;  %v4504_v29 = vshrl.u32 %v7743_v15, 16 }
  0xba   : > { %6929 = vmatprep.subr.bf16.mxu1 %v7708_v42  ;;  %v4483_v12 = vor.u32 %v4482_v1, %v4479_v0  ;;  %v4507_v30 = vshll.u32 %v7743_v15, 16  ;;  %v7755_v0 = vld [vmem:[%s7923_s20 + $0x70] sm:$0xff]  }
  0xbb   : > { %v1645_v17 = vsel %vm1620_vm3, %v1642_v50, %v1644_v4  ;;  %v4506_v41 = vrot.slane %v4504_v29, 2 }
  0xbc   : > { %6930 = vmatpush3.bf16.msra.mxu1 %v7708_v42  ;;  %v4461_v42 = vrot.slane %v4459_v28, 2 }
  0xbd   : > { %6931 = vmatprep.subr.bf16.mxu1 %v7714_v51 }
  0xbe   : > { %v4465_v52 = vor.u32 %v4464_v45, %v4461_v42  ;;  %v4509_v42 = vrot.slane %v4507_v30, 3 }
  0xbf   : > { %6896 = vmatmul.mubr.bf16.gmra.mrb[4].mxu1 %v1629_v23  ;;  %v1641_v23 = vsel %vm1620_vm3, %v1638_v26, %v1640_v47  ;;  %v7750_v26 = vld [vmem:[%s8585_s1 + $0x218] sm:$0xff]  }
  0xc0   : > { %7124 = vmatmul.mubr.bf16.gmra.mrb[24].mxu0 %v3924_v57  ;;  %6899 = vmatprep.mubr.bf16.mxu1 %v1631_v58  ;;  %v8289_v57 = vld [vmem:[%s7923_s20 + $0x68] sm:$0xff]   ;;  %v7737_v58 = vld [vmem:[%s7923_s20 + $0x40] sm:$0xff]   ;;  %v4466_v63 = vsel %vm4431_vm4, %v4456_v49, %v4465_v52  ;;  %v4510_v53 = vor.u32 %v4509_v42, %v4506_v41  ;;  %v7765_v41 = vld [vmem:[%s7923_s20 + $0x90] sm:$0xff]  }
  0xc1   : > { %7127 = vmatprep.mubr.bf16.mxu0 %v3926_v60  ;;  %6932 = vmatpush3.bf16.msra.mxu1 %v7714_v51  ;;  %v4471_v51 = vshll.u32 %v7731_v35, 16  ;;  %v1643_v60 = vsel %vm1620_vm3, %v1640_v47, %v1642_v50  ;;  %v1646_v5 = vrot.slane %v8289_v57, 1  ;;  %v7742_v35 = vld [vmem:[%s7923_s20 + $0x80] sm:$0xff]   ;;  %v7761_v49 = vld [vmem:[%s8585_s1 + $0x228] sm:$0xff]  }
  0xc2   : > { %6933 = vmatprep.subr.bf16.mxu1 %v7720_v61  ;;  %v7751_v57 = vld [vmem:[%s7923_s20 + $0x8] sm:$0xfe]  }
  0xc3   : > { %v1649_v40 = vsel %vm1620_vm3, %v1646_v5, %v1648_v27  ;;  %v2156_v10 = vrot.slane %v7751_v57, 1 }
  0xc5   : > { %6934 = vmatpush3.bf16.msra.mxu1 %v7720_v61  ;;  %v4473_v61 = vrot.slane %v4471_v51, 3  ;;  %v1652_v51 = vrot.slane %v7742_v35, 1 }
  0xc6   : > { %6935 = vmatprep.subr.bf16.mxu1 %v7727_v6 }
  0xc7   : > { %6900 = vmatmul.mubr.bf16.gmra.mrb[8].mxu1 %v1633_v9  ;;  %v4474_v7 = vor.u32 %v4473_v61, %v4470_v56  ;;  %v4489_v9 = vshll.u32 %v7737_v58, 16  ;;  %v7752_v61 = vld [vmem:[%s7923_s20 + $0x10] sm:$0xff]  }
  0xc8   : > { %7128 = vmatmul.mubr.bf16.gmra.mrb[28].mxu0 %v3928_v13  ;;  %6903 = vmatprep.mubr.bf16.mxu1 %v1635_v11  ;;  %v8309_v13 = vld [vmem:[%s7923_s20 + $0x78] sm:$0xff]   ;;  %v4498_v11 = vshll.u32 %v7741_v62, 16 }
  0xc9   : > { %7131 = vmatprep.mubr.bf16.mxu0 %v3930_v16  ;;  %6936 = vmatpush3.bf16.msra.mxu1 %v7727_v6  ;;  %v4486_v6 = vshrl.u32 %v7737_v58, 16  ;;  %v7747_v16 = vld [vmem:[%s7923_s20 + $0x58] sm:$0xff]   ;;  %v4475_v18 = vsel %vm4431_vm4, %v4465_v52, %v4474_v7  ;;  %v4484_v21 = vsel %vm4431_vm4, %v4474_v7, %v4483_v12  ;;  %v1650_v28 = vrot.slane %v8309_v13, 1 }
  0xca   : > { %6937 = vmatprep.subr.bf16.mxu1 %v7733_v20  ;;  %v4500_v25 = vrot.slane %v4498_v11, 3  ;;  %v4513_v32 = vshrl.u32 %v7747_v16, 16  ;;  %v2157_v11 = vrot.slane %v7752_v61, 1 }
  0xcb   : > { %v4488_v19 = vrot.slane %v4486_v6, 2  ;;  %v1653_v62 = vsel %vm1620_vm3, %v1650_v28, %v1652_v51 }
  0xcc   : > { %v4501_v34 = vor.u32 %v4500_v25, %v4497_v22  ;;  %v4515_v45 = vrot.slane %v4513_v32, 2  ;;  %v2158_v25 = vsel %vm1620_vm3, %v2156_v10, %v2157_v11 }
  0xcd   : > { %6938 = vmatpush3.bf16.msra.mxu1 %v7733_v20  ;;  %v4491_v20 = vrot.slane %v4489_v9, 3  ;;  %v1656_v9 = vrot.slane %v7748_v55, 1 }
  0xce   : > { %6939 = vmatprep.subr.bf16.mxu1 %v7739_v33  ;;  %v4511_v1 = vsel %vm4431_vm4, %v4501_v34, %v4510_v53 }
  0xcf   : > { %6904 = vmatmul.mubr.bf16.gmra.mrb[12].mxu1 %v1637_v36  ;;  %v4516_v36 = vshll.u32 %v7747_v16, 16 }
  0xd0   : > { %7132 = vmatmul.mubr.bf16.gmra.mrb[32].mxu0 %v3932_v38  ;;  %6907 = vmatprep.mubr.bf16.mxu1 %v1639_v39  ;;  %v8329_v38 = vld [vmem:[%s7923_s20 + $0x88] sm:$0xff]   ;;  %v7749_v39 = vld [vmem:[%s7923_s20 + $0x60] sm:$0xff]  }
  0xd1   : > { %7151 = vmatprep.mubr.bf16.mxu0 %v4448_v44  ;;  %6940 = vmatpush3.bf16.msra.mxu1 %v7739_v33  ;;  %v4492_v33 = vor.u32 %v4491_v20, %v4488_v19  ;;  %v1651_v44 = vsel %vm1620_vm3, %v1648_v27, %v1650_v28  ;;  %v4518_v48 = vrot.slane %v4516_v36, 3  ;;  %v4522_v50 = vshrl.u32 %v7749_v39, 16  ;;  %v7757_v20 = vld [vmem:[%s7923_s20 + $0x20] sm:$0xff]   ;;  %v7763_v27 = vld [vmem:[%s7923_s20 + $0x88] sm:$0xff]  }
  0xd2   : > { %6941 = vmatprep.subr.bf16.mxu1 %v7746_v46  ;;  %v4525_v52 = vshll.u32 %v7749_v39, 16  ;;  %v1654_v54 = vrot.slane %v8329_v38, 1  ;;  %v4567_v36 = vshrl.u32 %v7763_v27, 16  ;;  %v2161_v38 = vrot.slane %v7757_v20, 1  ;;  %v7772_v20 = vld [vmem:[%s7923_s20 + $0x50] sm:$0xff]  }
  0xd3   : > { %v4493_v43 = vsel %vm4431_vm4, %v4483_v12, %v4492_v33  ;;  %v4502_v47 = vsel %vm4431_vm4, %v4492_v33, %v4501_v34  ;;  %v4519_v56 = vor.u32 %v4518_v48, %v4515_v45  ;;  %v4540_v12 = vshrl.u32 %v7755_v0, 16 }
  0xd5   : > { %6942 = vmatpush3.bf16.msra.mxu1 %v7746_v46  ;;  %v7753_v46 = vld [vmem:[%s7923_s20 + $0x68] sm:$0xff]   ;;  %v4520_v6 = vsel %vm4431_vm4, %v4510_v53, %v4519_v56  ;;  %v4542_v19 = vrot.slane %v4540_v12, 2  ;;  %v4576_v53 = vshrl.u32 %v7765_v41, 16 }
  0xd6   : > { %7239 = vmatprep.subr.bf16.mxu1 %v8302_v3  ;;  %v4534_v58 = vshll.u32 %v7753_v46, 16 }
  0xd7   : > { %6908 = vmatmul.mubr.bf16.gmra.mrb[16].mxu1 %v1641_v23  ;;  %v4531_v23 = vshrl.u32 %v7753_v46, 16 }
  0xd8   : > { %7152 = vmatmul.mubr.bf16.vlgmr.msra.gmra.mrb[0].mxu0 %v4457_v59  ;;  %6911 = vmatprep.mubr.bf16.mxu1 %v1643_v60  ;;  %v7766_v59 = vld [vmem:[%s8585_s1 + $0x230] sm:$0xff]   ;;  %v4524_v60 = vrot.slane %v4522_v50, 2  ;;  %v4536_v7 = vrot.slane %v4534_v58, 3 }
  0xd9   : > { %7155 = vmatprep.mubr.bf16.mxu0 %v4466_v63  ;;  %7188 = vmatpush3.bf16.msra.mxu0 %v8220_v24  ;;  %v1647_v24 = vsel %vm1620_vm3, %v1644_v4, %v1646_v5  ;;  %v4527_v63 = vrot.slane %v4525_v52, 3  ;;  %v4533_v4 = vrot.slane %v4531_v23, 2  ;;  %v7758_v5 = vld [vmem:[%s7923_s20 + $0x78] sm:$0xff]   ;;  %v4579_v23 = vshll.u32 %v7765_v41, 16  ;;  %v7778_v41 = vld [vmem:[%s7923_s20 + $0x28] sm:$0xff]  }
  0xda   : > { %7189 = vmatprep.subr.bf16.mxu0 %v7738_v2  ;;  %v4549_v16 = vshrl.u32 %v7758_v5, 16 }
  0xdb   : > { %v4528_v13 = vor.u32 %v4527_v63, %v4524_v60  ;;  %v4537_v15 = vor.u32 %v4536_v7, %v4533_v4  ;;  %v7764_v60 = vld [vmem:[%s7923_s20 + $0x38] sm:$0xff]   ;;  %v7767_v4 = vld [vmem:[%s7923_s20 + $0x40] sm:$0xff]  }
  0xdc   : > { %v4551_v29 = vrot.slane %v4549_v16, 2  ;;  %v2169_v10 = vrot.slane %v7767_v4, 1  ;;  %v7769_v16 = vld [vmem:[%s7923_s20 + $0x48] sm:$0xff]  }
  0xdd   : > { %7190 = vmatpush3.bf16.msra.mxu0 %v7738_v2  ;;  %v1655_v2 = vsel %vm1620_vm3, %v1652_v51, %v1654_v54  ;;  %v4529_v22 = vsel %vm4431_vm4, %v4519_v56, %v4528_v13  ;;  %v4538_v28 = vsel %vm4431_vm4, %v4528_v13, %v4537_v15  ;;  %v7812_v56 = vld [vmem:[%s8585_s1 + $0x108] sm:$0xff]  }
  0xde   : > { %7191 = vmatprep.subr.bf16.mxu0 %v7744_v14 }
  0xdf   : > { %6912 = vmatmul.mubr.bf16.gmra.mrb[20].mxu1 %v1645_v17  ;;  %v4552_v17 = vshll.u32 %v7758_v5, 16 }
  0xe0   : > { %7156 = vmatmul.mubr.bf16.gmra.mrb[4].mxu0 %v4475_v18  ;;  %6915 = vmatprep.mubr.bf16.mxu1 %v1647_v24  ;;  %v7754_v18 = vld [vmem:[%s7923_s20 + $0x18] sm:$0xff]   ;;  %v1657_v24 = vsel %vm1620_vm3, %v1654_v54, %v1656_v9 }
  0xe1   : > { %7159 = vmatprep.mubr.bf16.mxu0 %v4484_v21  ;;  %7192 = vmatpush3.bf16.msra.mxu0 %v7744_v14  ;;  %v4543_v14 = vshll.u32 %v7755_v0, 16  ;;  %v7760_v21 = vld [vmem:[%s7923_s20 + $0x80] sm:$0xff]   ;;  %v4554_v30 = vrot.slane %v4552_v17, 3  ;;  %v2159_v32 = vrot.slane %v7754_v18, 1 }
  0xe2   : > { %7193 = vmatprep.subr.bf16.mxu0 %v7750_v26  ;;  %v4558_v33 = vshrl.u32 %v7760_v21, 16  ;;  %v4561_v34 = vshll.u32 %v7760_v21, 16 }
  0xe3   : > { %v4555_v39 = vor.u32 %v4554_v30, %v4551_v29  ;;  %v2160_v42 = vsel %vm1620_vm3, %v2157_v11, %v2159_v32  ;;  %v2162_v50 = vsel %vm1620_vm3, %v2159_v32, %v2161_v38  ;;  %v2173_v29 = vrot.slane %v7772_v20, 1 }
  0xe4   : > { %v4563_v46 = vrot.slane %v4561_v34, 3 }
  0xe5   : > { %7194 = vmatpush3.bf16.msra.mxu0 %v7750_v26  ;;  %v4545_v26 = vrot.slane %v4543_v14, 3  ;;  %v7814_v14 = vld [vmem:[%s8585_s1 + $0x118] sm:$0xff]  }
  0xe6   : > { %7195 = vmatprep.subr.bf16.mxu0 %v7756_v37 }
  0xe7   : > { %6916 = vmatmul.mubr.bf16.gmra.mrb[24].mxu1 %v1649_v40  ;;  %v4546_v35 = vor.u32 %v4545_v26, %v4542_v19  ;;  %v7759_v40 = vld [vmem:[%s7923_s20 + $0x28] sm:$0xff]   ;;  %v7815_v26 = vld [vmem:[%s8585_s1 + $0x120] sm:$0xff]  }
  0xe8   : > { %7160 = vmatmul.mubr.bf16.gmra.mrb[8].mxu0 %v4493_v43  ;;  %6919 = vmatprep.mubr.bf16.mxu1 %v1651_v44  ;;  %v4560_v43 = vrot.slane %v4558_v33, 2  ;;  %v7762_v44 = vld [vmem:[%s7923_s20 + $0x30] sm:$0xff]   ;;  %v2163_v52 = vrot.slane %v7759_v40, 1  ;;  %v7816_v33 = vld [vmem:[%s8585_s1 + $0x128] sm:$0xff]  }
  0xe9   : > { %7163 = vmatprep.mubr.bf16.mxu0 %v4502_v47  ;;  %7196 = vmatpush3.bf16.msra.mxu0 %v7756_v37  ;;  %v4570_v37 = vshll.u32 %v7763_v27, 16  ;;  %v4547_v45 = vsel %vm4431_vm4, %v4537_v15, %v4546_v35  ;;  %v4569_v47 = vrot.slane %v4567_v36, 2  ;;  %v4556_v51 = vsel %vm4431_vm4, %v4546_v35, %v4555_v39  ;;  %v7775_v35 = vld [vmem:[%s7923_s20 + $0x58] sm:$0xff]  }
  0xea   : > { %7197 = vmatprep.subr.bf16.mxu0 %v7761_v49  ;;  %v4564_v54 = vor.u32 %v4563_v46, %v4560_v43  ;;  %v2165_v55 = vrot.slane %v7762_v44, 1  ;;  %v2164_v61 = vsel %vm1620_vm3, %v2161_v38, %v2163_v52  ;;  %v2171_v27 = vrot.slane %v7769_v16, 1  ;;  %v7776_v38 = vld [vmem:[%s7923_s20 + $0x20] sm:$0xff]  }
  0xeb   : > { %v4572_v48 = vrot.slane %v4570_v37, 3  ;;  %v2175_v43 = vrot.slane %v7775_v35, 1  ;;  %v5104_v44 = vrot.slane %v7776_v38, 3  ;;  %v5106_v46 = vrot.slane %v7778_v41, 3 }
  0xec   : > { %v4565_v63 = vsel %vm4431_vm4, %v4555_v39, %v4564_v54  ;;  %v2166_v0 = vsel %vm1620_vm3, %v2163_v52, %v2165_v55  ;;  %v2172_v34 = vsel %vm1620_vm3, %v2169_v10, %v2171_v27  ;;  %v2174_v37 = vsel %vm1620_vm3, %v2171_v27, %v2173_v29  ;;  %v7777_v39 = vld [vmem:[%s7923_s20 + $0x60] sm:$0xff]   ;;  %v7780_v52 = vld [vmem:[%s7923_s20 + $0x30] sm:$0xff]  }
  0xed   : > { %7198 = vmatpush3.bf16.msra.mxu0 %v7761_v49  ;;  %v7768_v49 = vld [vmem:[%s7923_s20 + $0x98] sm:$0xff]   ;;  %v4573_v57 = vor.u32 %v4572_v48, %v4569_v47  ;;  %v2176_v48 = vsel %vm1620_vm3, %v2173_v29, %v2175_v43 }
  0xee   : > { %7199 = vmatprep.subr.bf16.mxu0 %v7766_v59  ;;  %v4585_v58 = vshrl.u32 %v7768_v49, 16  ;;  %v7818_v47 = vld [vmem:[%s8585_s1 + $0x138] sm:$0xff]  }
  0xef   : > { %6920 = vmatmul.mubr.bf16.gmra.mrb[28].mxu1 %v1653_v62  ;;  %v4578_v62 = vrot.slane %v4576_v53, 2  ;;  %v4574_v5 = vsel %vm4431_vm4, %v4564_v54, %v4573_v57  ;;  %v7781_v53 = vld [vmem:[%s7923_s20 + $0x70] sm:$0xff]   ;;  %v5107_v54 = vsel %vm5100_vm5, %v5104_v44, %v5106_v46 }
  0xf0   : > { %7164 = vmatmul.mubr.bf16.gmra.mrb[12].mxu0 %v4511_v1  ;;  %6923 = vmatprep.mubr.bf16.mxu1 %v1655_v2  ;;  %v4581_v1 = vrot.slane %v4579_v23, 3  ;;  %v7813_v2 = vld [vmem:[%s8585_s1 + $0x110] sm:$0xff]  }
  0xf1   : > { %7167 = vmatprep.mubr.bf16.mxu0 %v4520_v6  ;;  %7200 = vmatpush3.bf16.msra.mxu0 %v7766_v59  ;;  %v4588_v59 = vshll.u32 %v7768_v49, 16  ;;  %v4587_v6 = vrot.slane %v4585_v58, 2  ;;  %v7779_v49 = vld [vmem:[%s7923_s20 + $0x68] sm:$0xff]  }
  0xf2   : > { %7201 = vmatprep.subr.bf16.mxu0 %v7771_v8  ;;  %v4582_v9 = vor.u32 %v4581_v1, %v4578_v62  ;;  %v2179_v23 = vrot.slane %v7779_v49, 1  ;;  %v7786_v1 = vld [vmem:[%s7923_s20 + $0x48] sm:$0xff]   ;;  %v7796_v49 = vld [vmem:[%s7923_s20 + $0x70] sm:$0xff]  }
  0xf3   : > { %v4590_v7 = vrot.slane %v4588_v59, 3 }
  0xf4   : > { %v4583_v17 = vsel %vm4431_vm4, %v4573_v57, %v4582_v9  ;;  %v2181_v57 = vrot.slane %v7781_v53, 1 }
  0xf5   : > { %7202 = vmatpush3.bf16.msra.mxu0 %v7771_v8  ;;  %v2167_v8 = vrot.slane %v7764_v60, 1  ;;  %v4591_v11 = vor.u32 %v4590_v7, %v4587_v6  ;;  %v7783_v60 = vld [vmem:[%s7923_s20 + $0x78] sm:$0xff]   ;;  %v5114_v6 = vrot.slane %v7786_v1, 3 }
  0xf6   : > { %v2182_v62 = vsel %vm1620_vm3, %v2179_v23, %v2181_v57 }
  0xf7   : > { %6924 = vmatmul.mubr.bf16.gmra.mrb[32].mxu1 %v1657_v24  ;;  %v2168_v15 = vsel %vm1620_vm3, %v2165_v55, %v2167_v8  ;;  %v2170_v18 = vsel %vm1620_vm3, %v2167_v8, %v2169_v10  ;;  %v4592_v21 = vsel %vm4431_vm4, %v4582_v9, %v4591_v11  ;;  %v7782_v55 = vld [vmem:[%s7923_s20 + $0x38] sm:$0xff]   ;;  %v7787_v8 = vld [vmem:[%s7923_s20 + $0x88] sm:$0xff]  }
  0xf8   : > { %7168 = vmatmul.mubr.bf16.gmra.mrb[16].mxu0 %v4529_v22  ;;  %6943 = vmatprep.mubr.bf16.mxu1 %v2158_v25  ;;  %v7773_v22 = vld [vmem:[%s7923_s20 + $0x10] sm:$0xf8]   ;;  %v7774_v25 = vld [vmem:[%s7923_s20 + $0x18] sm:$0xff]   ;;  %v5110_v58 = vrot.slane %v7782_v55, 3  ;;  %v2187_v16 = vrot.slane %v7787_v8, 1  ;;  %v7802_v8 = vld [vmem:[%s7923_s20 + $0x88] sm:$0xff]  }
  0xf9   : > { %7171 = vmatprep.mubr.bf16.mxu0 %v4538_v28  ;;  %v5101_v30 = vrot.slane %v7773_v22, 3  ;;  %v5102_v32 = vrot.slane %v7774_v25, 3  ;;  %v7791_v22 = vld [vmem:[%s7923_s20 + $0x98] ss:$0 sps:$4 sm:$0x11]  }
  0xfa   : > { %v7795_v25 = vld [vmem:[%s7923_s20 + $0x58] sm:$0xff]   ;;  %v2191_v35 = vrot.slane %v7791_v22, 1  ;;  %v7804_v22 = vld [vmem:[%s7923_s20 + $0x90] sm:$0xff]  }
  0xfb   : > { %v5103_v40 = vsel %vm5100_vm5, %v5101_v30, %v5102_v32 }
  0xff   : > { %6944 = vmatmul.mubr.bf16.vlgmr.msra.gmra.mrb[0].mxu1 %v2160_v42  ;;  %v7817_v42 = vld [vmem:[%s8585_s1 + $0x130] sm:$0xff]  }
 0x100   : > { %7172 = vmatmul.mubr.bf16.gmra.mrb[20].mxu0 %v4547_v45  ;;  %7247 = vmatpush3.bf16.msra.mxu1 %v8302_v3  ;;  %v7770_v3 = vld [vmem:[%s7923_s20 + $0xa0] ss:$0 sps:$4 sm:$0x77]   ;;  %v2177_v45 = vrot.slane %v7777_v39, 1 }
 0x101   : > { %6947 = vmatprep.mubr.bf16.mxu1 %v2162_v50  ;;  %7175 = vmatprep.mubr.bf16.mxu0 %v4556_v51  ;;  %v4594_v12 = vshrl.u32 %v7770_v3, 16  ;;  %v4597_v13 = vshll.u32 %v7770_v3, 16  ;;  %v5105_v50 = vsel %vm5100_vm5, %v5102_v32, %v5104_v44  ;;  %v7784_v3 = vld [vmem:[%s7923_s20 + $0x40] sm:$0xff]  }
 0x102   : > { %7240 = vmatprep.subr.bf16.mxu1 %v7812_v56  ;;  %v2178_v51 = vsel %vm1620_vm3, %v2175_v43, %v2177_v45  ;;  %v2180_v59 = vsel %vm1620_vm3, %v2177_v45, %v2179_v23  ;;  %v5112_v4 = vrot.slane %v7784_v3, 3  ;;  %v7797_v32 = vld [vmem:[%s7923_s20 + $0x60] sm:$0xff]  }
 0x103   : > { %v4596_v24 = vrot.slane %v4594_v12, 2  ;;  %v4599_v19 = vrot.slane %v4597_v13, 3  ;;  %v7788_v12 = vld [vmem:[%s7923_s20 + $0x50] sm:$0xff]   ;;  %v2794_v41 = vshll.u32 %v7797_v32, 16 }
 0x104   : > { %7248 = vmatpush3.bf16.msra.mxu1 %v7812_v56  ;;  %v5108_v56 = vrot.slane %v7780_v52, 3  ;;  %v5113_v9 = vsel %vm5100_vm5, %v5110_v58, %v5112_v4  ;;  %v7789_v13 = vld [vmem:[%s7923_s20 + $0x90] sm:$0xff]  }
 0x105   : > { %7241 = vmatprep.subr.bf16.mxu1 %v7813_v2  ;;  %v4600_v28 = vor.u32 %v4599_v19, %v4596_v24  ;;  %v7801_v52 = vld [vmem:[%s7923_s20 + $0x70] sm:$0xff]  }
 0x107   : > { %6948 = vmatmul.mubr.bf16.gmra.mrb[4].mxu1 %v2164_v61  ;;  %v4601_v36 = vsel %vm4431_vm4, %v4591_v11, %v4600_v28  ;;  %v5109_v61 = vsel %vm5100_vm5, %v5106_v46, %v5108_v56  ;;  %v7793_v11 = vld [vmem:[%s7923_s20 + $0x50] sm:$0xff]   ;;  %v7792_v28 = vld [vmem:[%s7923_s20 + $0x60] sm:$0xff]   ;;  %v7799_v46 = vld [vmem:[%s7923_s20 + $0x68] sm:$0xff]  }
 0x108   : > { %7176 = vmatmul.mubr.bf16.gmra.mrb[24].mxu0 %v4565_v63  ;;  %6951 = vmatprep.mubr.bf16.mxu1 %v2166_v0  ;;  %v7785_v63 = vld [vmem:[%s7923_s20 + $0x80] sm:$0xff]   ;;  %v5111_v0 = vsel %vm5100_vm5, %v5108_v56, %v5110_v58  ;;  %v2773_v24 = vshrl.u32 %v7793_v11, 16  ;;  %v2776_v19 = vshll.u32 %v7793_v11, 16  ;;  %v5120_v38 = vrot.slane %v7792_v28, 3 }
 0x109   : > { %7179 = vmatprep.mubr.bf16.mxu0 %v4574_v5  ;;  %7249 = vmatpush3.bf16.msra.mxu1 %v7813_v2  ;;  %v2183_v2 = vrot.slane %v7783_v60, 1  ;;  %v2185_v5 = vrot.slane %v7785_v63, 1  ;;  %v2800_v23 = vshrl.u32 %v7799_v46, 16  ;;  %v2803_v56 = vshll.u32 %v7799_v46, 16  ;;  %v7803_v63 = vld [vmem:[%s7923_s20 + $0x78] sm:$0xff]  }
 0x10a   : > { %7242 = vmatprep.subr.bf16.mxu1 %v7814_v14  ;;  %v2775_v29 = vrot.slane %v2773_v24, 1  ;;  %v2778_v30 = vrot.slane %v2776_v19, 2  ;;  %v2809_v58 = vshrl.u32 %v7801_v52, 16  ;;  %v7807_v19 = vld [vmem:[%s7923_s20 + $0x88] sm:$0xff]  }
 0x10b   : > { %v2184_v7 = vsel %vm1620_vm3, %v2181_v57, %v2183_v2  ;;  %v2186_v10 = vsel %vm1620_vm3, %v2183_v2, %v2185_v5  ;;  %v5124_v57 = vrot.slane %v7796_v49, 3  ;;  %v2805_v3 = vrot.slane %v2803_v56, 2  ;;  %v7800_v2 = vld [vmem:[%s7923_s20 + $0x80] sm:$0xff]  }
 0x10c   : > { %v2779_v39 = vor.u32 %v2778_v30, %v2775_v29  ;;  %v7806_v29 = vld [vmem:[%s7923_s20 + $0x98] sm:$0xff]  }
 0x10d   : > { %7250 = vmatpush3.bf16.msra.mxu1 %v7814_v14  ;;  %v5115_v14 = vsel %vm5100_vm5, %v5112_v4, %v5114_v6  ;;  %v2811_v4 = vrot.slane %v2809_v58, 1 }
 0x10e   : > { %7243 = vmatprep.subr.bf16.mxu1 %v7815_v26 }
 0x10f   : > { %6952 = vmatmul.mubr.bf16.gmra.mrb[8].mxu1 %v2168_v15  ;;  %v7790_v15 = vld [vmem:[%s7923_s20 + $0x58] sm:$0xff]  }
 0x110   : > { %7180 = vmatmul.mubr.bf16.gmra.mrb[28].mxu0 %v4583_v17  ;;  %6955 = vmatprep.mubr.bf16.mxu1 %v2170_v18  ;;  %v5116_v17 = vrot.slane %v7788_v12, 3  ;;  %v2189_v18 = vrot.slane %v7789_v13, 1  ;;  %v5118_v20 = vrot.slane %v7790_v15, 3  ;;  %v2821_v12 = vshll.u32 %v7803_v63, 16 }
 0x111   : > { %7183 = vmatprep.mubr.bf16.mxu0 %v4592_v21  ;;  %7251 = vmatpush3.bf16.msra.mxu1 %v7815_v26  ;;  %v2188_v21 = vsel %vm1620_vm3, %v2185_v5, %v2187_v16  ;;  %v5128_v13 = vrot.slane %v7800_v2, 3 }
 0x112   : > { %7244 = vmatprep.subr.bf16.mxu1 %v7816_v33  ;;  %v5117_v26 = vsel %vm5100_vm5, %v5114_v6, %v5116_v17  ;;  %v2190_v27 = vsel %vm1620_vm3, %v2187_v16, %v2189_v18  ;;  %v2192_v43 = vsel %vm1620_vm3, %v2189_v18, %v2191_v35  ;;  %v7805_v6 = vld [vmem:[%s7923_s20 + $0x80] sm:$0xff]   ;;  %v5130_v16 = vrot.slane %v7802_v8, 3 }
 0x113   : > { %v2830_v15 = vshll.u32 %v7805_v6, 16  ;;  %v2823_v24 = vrot.slane %v2821_v12, 2 }
 0x114   : > { %v5131_v28 = vsel %vm5100_vm5, %v5128_v13, %v5130_v16 }
 0x115   : > { %7252 = vmatpush3.bf16.msra.mxu1 %v7816_v33  ;;  %v5119_v33 = vsel %vm5100_vm5, %v5116_v17, %v5118_v20 }
 0x116   : > { %7245 = vmatprep.subr.bf16.mxu1 %v7817_v42 }
 0x117   : > { %6956 = vmatmul.mubr.bf16.gmra.mrb[12].mxu1 %v2172_v34  ;;  %v7794_v34 = vld [vmem:[%s7923_s20 + $0x68] sm:$0xff]  }
 0x118   : > { %7184 = vmatmul.mubr.bf16.gmra.mrb[32].mxu0 %v4601_v36  ;;  %6959 = vmatprep.mubr.bf16.mxu1 %v2174_v37  ;;  %v2782_v36 = vshrl.u32 %v7795_v25, 16  ;;  %v2785_v37 = vshll.u32 %v7795_v25, 16 }
 0x119   : > { %7203 = vmatprep.mubr.bf16.mxu0 %v5103_v40  ;;  %7253 = vmatpush3.bf16.msra.mxu1 %v7817_v42  ;;  %v2791_v40 = vshrl.u32 %v7797_v32, 16  ;;  %v5122_v42 = vrot.slane %v7794_v34, 3  ;;  %v2836_v32 = vshrl.u32 %v7807_v19, 16  ;;  %v5132_v34 = vrot.slane %v7804_v22, 3 }
 0x11a   : > { %7246 = vmatprep.subr.bf16.mxu1 %v7818_v47  ;;  %v2784_v44 = vrot.slane %v2782_v36, 1  ;;  %v2787_v45 = vrot.slane %v2785_v37, 2 }
 0x11b   : > { %v5123_v53 = vsel %vm5100_vm5, %v5120_v38, %v5122_v42 }
 0x11c   : > { %v2788_v55 = vor.u32 %v2787_v45, %v2784_v44  ;;  %v7808_v45 = vld [vmem:[%s7923_s20 + $0xa0] ss:$0 sps:$4 sm:$0x77]  }
 0x11d   : > { %7254 = vmatpush3.bf16.msra.mxu1 %v7818_v47  ;;  %v5121_v47 = vsel %vm5100_vm5, %v5118_v20, %v5120_v38  ;;  %v5134_v38 = vrot.slane %v7806_v29, 3 }
 0x11f   : > { %6960 = vmatmul.mubr.bf16.gmra.mrb[16].mxu1 %v2176_v48  ;;  %v2780_v48 = vsel %vm2691_vm0, %v7992_v31, %v2779_v39 }
 0x120   : > { %7204 = vmatmul.mubr.bf16.vlgmr.msra.gmra.mrb[0].mxu0 %v5105_v50  ;;  %6963 = vmatprep.mubr.bf16.mxu1 %v2178_v51  ;;  %v2793_v50 = vrot.slane %v2791_v40, 1  ;;  %v2796_v51 = vrot.slane %v2794_v41, 2  ;;  %v2838_v40 = vrot.slane %v2836_v32, 1 }
 0x121   : > { %7207 = vmatprep.mubr.bf16.mxu0 %v5107_v54  ;;  %v7798_v54 = vld [vmem:[%s7923_s20 + $0x78] sm:$0xff]  }
 0x122   : > { %v2797_v31 = vor.u32 %v2796_v51, %v2793_v50  ;;  %v5126_v60 = vrot.slane %v7798_v54, 3 }
 0x124   : > { %v2798_v1 = vsel %vm2691_vm0, %v2788_v55, %v2797_v31  ;;  %v5129_v20 = vsel %vm5100_vm5, %v5126_v60, %v5128_v13 }
 0x127   : > { %6964 = vmatmul.mubr.bf16.gmra.mrb[20].mxu1 %v2180_v59  ;;  %v2812_v59 = vshll.u32 %v7801_v52, 16  ;;  %v5136_v52 = vrot.slane %v7808_v45, 3 }
 0x128   : > { %7208 = vmatmul.mubr.bf16.gmra.mrb[4].mxu0 %v5109_v61  ;;  %6967 = vmatprep.mubr.bf16.mxu1 %v2182_v62  ;;  %v2789_v61 = vsel %vm2691_vm0, %v2779_v39, %v2788_v55  ;;  %v2802_v62 = vrot.slane %v2800_v23, 1 }
 0x129   : > { %7211 = vmatprep.mubr.bf16.mxu0 %v5111_v0  ;;  %v5125_v0 = vsel %vm5100_vm5, %v5122_v42, %v5124_v57  ;;  %v2814_v5 = vrot.slane %v2812_v59, 2  ;;  %v7810_v42 = vld [vmem:[%s7923_s20 + $0x98] ss:$0 sps:$4 sm:$0x33]   ;;  %v5137_v56 = vsel %vm5100_vm5, %v5134_v38, %v5136_v52 }
 0x12a   : > { %v2854_v50 = vshrl.u32 %v7810_v42, 16  ;;  %v2857_v51 = vshll.u32 %v7810_v42, 16 }
 0x12b   : > { %v2815_v11 = vor.u32 %v2814_v5, %v2811_v4 }
 0x12c   : > { %v2856_v55 = vrot.slane %v2854_v50, 1  ;;  %v2859_v23 = vrot.slane %v2857_v51, 2 }
 0x12f   : > { %6968 = vmatmul.mubr.bf16.gmra.mrb[24].mxu1 %v2184_v7  ;;  %v5127_v7 = vsel %vm5100_vm5, %v5124_v57, %v5126_v60 }
 0x130   : > { %7212 = vmatmul.mubr.bf16.gmra.mrb[8].mxu0 %v5113_v9  ;;  %6971 = vmatprep.mubr.bf16.mxu1 %v2186_v10  ;;  %v2806_v9 = vor.u32 %v2805_v3, %v2802_v62  ;;  %v2818_v10 = vshrl.u32 %v7803_v63, 16 }
 0x131   : > { %7215 = vmatprep.mubr.bf16.mxu0 %v5115_v14  ;;  %v2827_v14 = vshrl.u32 %v7805_v6, 16 }
 0x132   : > { %v2807_v17 = vsel %vm2691_vm0, %v2797_v31, %v2806_v9  ;;  %v2820_v18 = vrot.slane %v2818_v10, 1  ;;  %v2860_v31 = vor.u32 %v2859_v23, %v2856_v55 }
 0x133   : > { %v2829_v25 = vrot.slane %v2827_v14, 1  ;;  %v8505_v14 = vld [vmem:[%s8586_s2] ss:$0 sm:$0xff] }
 0x134   : > { %v2824_v30 = vor.u32 %v2823_v24, %v2820_v18 }
 0x136   : > { %v2825_v39 = vsel %vm2691_vm0, %v2815_v11, %v2824_v30 }
 0x137   : > { %6972 = vmatmul.mubr.bf16.gmra.mrb[28].mxu1 %v2188_v21  ;;  %v2816_v21 = vsel %vm2691_vm0, %v2806_v9, %v2815_v11 }
 0x138   : > { %7216 = vmatmul.mubr.bf16.gmra.mrb[12].mxu0 %v5117_v26  ;;  %6975 = vmatprep.mubr.bf16.mxu1 %v2190_v27  ;;  %v2832_v26 = vrot.slane %v2830_v15, 2  ;;  %v7809_v27 = vld [vmem:[%s7923_s20 + $0x90] sm:$0xff]  }
 0x139   : > { %7219 = vmatprep.mubr.bf16.mxu0 %v5119_v33  ;;  %v2839_v33 = vshll.u32 %v7807_v19, 16  ;;  %v2845_v36 = vshrl.u32 %v7809_v27, 16  ;;  %v2848_v37 = vshll.u32 %v7809_v27, 16 }
 0x13a   : > { %v2833_v35 = vor.u32 %v2832_v26, %v2829_v25 }
 0x13b   : > { %v2841_v41 = vrot.slane %v2839_v33, 2  ;;  %v2847_v46 = vrot.slane %v2845_v36, 1 }
 0x13c   : > { %v2834_v44 = vsel %vm2691_vm0, %v2824_v30, %v2833_v35 }
 0x13d   : > { %v2842_v49 = vor.u32 %v2841_v41, %v2838_v40 }
 0x13f   : > { %6976 = vmatmul.mubr.bf16.gmra.mrb[32].mxu1 %v2192_v43  ;;  %v5133_v43 = vsel %vm5100_vm5, %v5130_v16, %v5132_v34  ;;  %v2843_v54 = vsel %vm2691_vm0, %v2833_v35, %v2842_v49 }
 0x140   : > { %7220 = vmatmul.mubr.bf16.gmra.mrb[16].mxu0 %v5121_v47  ;;  %7011 = vmatprep.mubr.bf16.mxu1 %v2780_v48  ;;  %v2850_v47 = vrot.slane %v2848_v37, 2  ;;  %v5135_v48 = vsel %vm5100_vm5, %v5132_v34, %v5134_v38 }
 0x141   : > { %7223 = vmatprep.mubr.bf16.mxu0 %v5123_v53 }
 0x142   : > { %v2851_v53 = vor.u32 %v2850_v47, %v2847_v46 }
 0x144   : > { %v2852_v57 = vsel %vm2691_vm0, %v2842_v49, %v2851_v53  ;;  %v2861_v58 = vsel %vm2691_vm0, %v2851_v53, %v2860_v31 }
 0x147   : > { %7012 = vmatmul.mubr.bf16.vlgmr.msra.gmra.mrb[16].mxu1 %v2789_v61 }
 0x148   : > { %7224 = vmatmul.mubr.bf16.gmra.mrb[20].mxu0 %v5125_v0  ;;  %7015 = vmatprep.mubr.bf16.mxu1 %v2798_v1 }
 0x149   : > { %7227 = vmatprep.mubr.bf16.mxu0 %v5127_v7 }
 0x14f   : > { %7016 = vmatmul.mubr.bf16.gmra.mrb[20].mxu1 %v2807_v17 }
 0x150   : > { %7228 = vmatmul.mubr.bf16.gmra.mrb[24].mxu0 %v5129_v20  ;;  %7019 = vmatprep.mubr.bf16.mxu1 %v2816_v21 }
 0x151   : > { %7231 = vmatprep.mubr.bf16.mxu0 %v5131_v28 }
 0x157   : > { %7020 = vmatmul.mubr.bf16.gmra.mrb[24].mxu1 %v2825_v39 }
 0x158   : > { %7232 = vmatmul.mubr.bf16.gmra.mrb[28].mxu0 %v5133_v43  ;;  %7023 = vmatprep.mubr.bf16.mxu1 %v2834_v44 }
 0x159   : > { %7235 = vmatprep.mubr.bf16.mxu0 %v5135_v48 }
 0x15f   : > { %7024 = vmatmul.mubr.bf16.gmra.mrb[28].mxu1 %v2843_v54 }
 0x160   : > { %7236 = vmatmul.mubr.bf16.gmra.mrb[32].mxu0 %v5137_v56  ;;  %7027 = vmatprep.mubr.bf16.mxu1 %v2852_v57 }
 0x167   : > { %7028 = vmatmul.mubr.bf16.gmra.mrb[32].mxu1 %v2861_v58 }
 0x1d2   : > { %v6945_v59 = vpop.f32.mrb[0].mxu1 }
 0x1d3   : > { %v2293_v60 = vpop.f32.mrb[1].mxu1 }
 0x1d4   : > { %v6946_v61 = vpop.f32.mrb[2].mxu1 }
 0x1d5   : > { %v2296_v62 = vpop.f32.mrb[3].mxu1 }
 0x1da   : > { %v6949_v3 = vpop.f32.mrb[4].mxu1 }
 0x1db   : > { %v2309_v63 = vpop.f32.mrb[5].mxu1 }
 0x1dc   : > { %v6950_v0 = vpop.f32.mrb[6].mxu1 }
 0x1dd   : > { %v2312_v1 = vpop.f32.mrb[7].mxu1 }
 0x1e2   : > { %v8486_v2 = vpop.f32.mrb[8].mxu1 }
 0x1e3   : > { %v8488_v4 = vpop.f32.mrb[9].mxu1 }
 0x1e4   : > { %v8490_v5 = vpop.f32.mrb[10].mxu1 }
 0x1e5   : > { %v8492_v6 = vpop.f32.mrb[11].mxu1 }
 0x1ea   : > { %v8494_v7 = vpop.f32.mrb[12].mxu1 }
 0x1eb   : > { %v8496_v8 = vpop.f32.mrb[13].mxu1 }
 0x1ec   : > { %v8498_v9 = vpop.f32.mrb[14].mxu1 }
 0x1ed   : > { %v8500_v10 = vpop.f32.mrb[15].mxu1 }
 0x1f3   : > { %v7205_v12 = vpop.f32.mrb[0].mxu0 }
 0x1f4   : > { %v7255_v13 = vadd.f32 %v7205_v12, %v6945_v59  ;;  %v5238_v11 = vpop.f32.mrb[1].mxu0 }
 0x1f5   : > { %v7256_v15 = vadd.f32 %v5238_v11, %v2293_v60  ;;  %v7206_v16 = vpop.f32.mrb[2].mxu0 }
 0x1f6   : > { %v5494_v17 = vmul.f32 0.11785113, %v7255_v13  ;;  %v7257_v18 = vadd.f32 %v7206_v16, %v6946_v61  ;;  %v5241_v24 = vpop.f32.mrb[3].mxu0 }
 0x1f7   : > { %v5492_v19 = vmul.f32 0.11785113, %v7256_v15  ;;  %v7258_v20 = vadd.f32 %v5241_v24, %v2296_v62 }
 0x1f8   : > { %v5537_v21 = vadd.f32 %v8505_v14, %v5494_v17  ;;  %v5495_v22 = vmul.f32 0.11785113, %v7257_v18 }
 0x1f9   : > { %v5535_v25 = vadd.f32 %v8505_v14, %v5492_v19  ;;  %v5493_v26 = vmul.f32 0.11785113, %v7258_v20 }
 0x1fa   : > { %vm5573_vm6 = vcmp.ge.f32.partialorder %v5537_v21, 0.0  ;;  %v5609_v27 = vmul.f32 0.2, %v5537_v21  ;;  %v5538_v28 = vadd.f32 %v8505_v14, %v5495_v22 }
 0x1fb   : > { %vm5571_vm7 = vcmp.ge.f32.partialorder %v5535_v25, 0.0  ;;  %v5607_v29 = vmul.f32 0.2, %v5535_v25  ;;  %v5536_v30 = vadd.f32 %v8505_v14, %v5493_v26  ;;  %v7209_v32 = vpop.f32.mrb[4].mxu0 }
 0x1fc   : > { %vm5574_vm8 = vcmp.ge.f32.partialorder %v5538_v28, 0.0  ;;  %v5610_v33 = vmul.f32 0.2, %v5538_v28  ;;  %v7259_v34 = vadd.f32 %v7209_v32, %v6949_v3  ;;  %v5254_v35 = vpop.f32.mrb[5].mxu0  ;;  %v5645_v36 = vsel %vm5573_vm6, %v5537_v21, %v5609_v27 }
 0x1fd   : > { %vm5572_vm9 = vcmp.ge.f32.partialorder %v5536_v30, 0.0  ;;  %v5608_v37 = vmul.f32 0.2, %v5536_v30  ;;  %v7260_v38 = vadd.f32 %v5254_v35, %v2309_v63  ;;  %v7210_v39 = vpop.f32.mrb[6].mxu0  ;;  %v5643_v40 = vsel %vm5571_vm7, %v5535_v25, %v5607_v29 }
 0x1fe   : > { %v5646_v41 = vsel %vm5574_vm8, %v5538_v28, %v5610_v33  ;;  %v5498_v42 = vmul.f32 0.11785113, %v7259_v34  ;;  %v7261_v43 = vadd.f32 %v7210_v39, %v6950_v0  ;;  %v5257_v44 = vpop.f32.mrb[7].mxu0 }
 0x1ff   : > { %v6438_v45 = vpack.c.bf16 %v5646_v41, %v5645_v36  ;;  %v5644_v46 = vsel %vm5572_vm9, %v5536_v30, %v5608_v37  ;;  %v5496_v47 = vmul.f32 0.11785113, %v7260_v38  ;;  %v7262_v48 = vadd.f32 %v5257_v44, %v2312_v1 }
 0x200   : > { %v6433_v49 = vpack.c.bf16 %v5644_v46, %v5643_v40  ;;  %v5541_v50 = vadd.f32 %v8505_v14, %v5498_v42  ;;  %v5499_v51 = vmul.f32 0.11785113, %v7261_v43 }
 0x201   : > { %6520 = vst [vmem:[%s8515_s12 + $0x8] sm:$0xff] %v6438_v45   ;;  %v5539_v52 = vadd.f32 %v8505_v14, %v5496_v47  ;;  %v5497_v53 = vmul.f32 0.11785113, %v7262_v48 }
 0x202   : > { %6434 = vst [vmem:[%s8515_s12] sm:$0xff] %v6433_v49   ;;  %vm5577_vm10 = vcmp.ge.f32.partialorder %v5541_v50, 0.0  ;;  %v5613_v54 = vmul.f32 0.2, %v5541_v50  ;;  %v5542_v55 = vadd.f32 %v8505_v14, %v5499_v51 }
 0x203   : > { %vm5575_vm11 = vcmp.ge.f32.partialorder %v5539_v52, 0.0  ;;  %v5611_v23 = vmul.f32 0.2, %v5539_v52  ;;  %v5540_v56 = vadd.f32 %v8505_v14, %v5497_v53  ;;  %v7213_v57 = vpop.f32.mrb[8].mxu0 }
 0x204   : > { %vm5578_vm12 = vcmp.ge.f32.partialorder %v5542_v55, 0.0  ;;  %v5614_v31 = vmul.f32 0.2, %v5542_v55  ;;  %v7263_v58 = vadd.f32 %v7213_v57, %v8486_v2  ;;  %v5270_v59 = vpop.f32.mrb[9].mxu0  ;;  %v5649_v60 = vsel %vm5577_vm10, %v5541_v50, %v5613_v54 }
 0x205   : > { %vm5576_vm13 = vcmp.ge.f32.partialorder %v5540_v56, 0.0  ;;  %v5612_v61 = vmul.f32 0.2, %v5540_v56  ;;  %v7264_v62 = vadd.f32 %v5270_v59, %v8488_v4  ;;  %v7214_v3 = vpop.f32.mrb[10].mxu0  ;;  %v5647_v63 = vsel %vm5575_vm11, %v5539_v52, %v5611_v23 }
 0x206   : > { %v5650_v0 = vsel %vm5578_vm12, %v5542_v55, %v5614_v31  ;;  %v5502_v1 = vmul.f32 0.11785113, %v7263_v58  ;;  %v7265_v12 = vadd.f32 %v7214_v3, %v8490_v5  ;;  %v5273_v13 = vpop.f32.mrb[11].mxu0 }
 0x207   : > { %v6448_v11 = vpack.c.bf16 %v5650_v0, %v5649_v60  ;;  %v5648_v15 = vsel %vm5576_vm13, %v5540_v56, %v5612_v61  ;;  %v5500_v16 = vmul.f32 0.11785113, %v7264_v62  ;;  %v7266_v2 = vadd.f32 %v5273_v13, %v8492_v6 }
 0x208   : > { %v6443_v17 = vpack.c.bf16 %v5648_v15, %v5647_v63  ;;  %v5545_v18 = vadd.f32 %v8505_v14, %v5502_v1  ;;  %v5503_v24 = vmul.f32 0.11785113, %v7265_v12 }
 0x209   : > { %6522 = vst [vmem:[%s8515_s12 + $0x18] sm:$0xff] %v6448_v11   ;;  %v5543_v4 = vadd.f32 %v8505_v14, %v5500_v16  ;;  %v5501_v19 = vmul.f32 0.11785113, %v7266_v2 }
 0x20a   : > { %6521 = vst [vmem:[%s8515_s12 + $0x10] sm:$0xff] %v6443_v17   ;;  %vm5581_vm14 = vcmp.ge.f32.partialorder %v5545_v18, 0.0  ;;  %v5617_v20 = vmul.f32 0.2, %v5545_v18  ;;  %v5546_v21 = vadd.f32 %v8505_v14, %v5503_v24 }
 0x20b   : > { %vm5579_vm15 = vcmp.ge.f32.partialorder %v5543_v4, 0.0  ;;  %v5615_v5 = vmul.f32 0.2, %v5543_v4  ;;  %v5544_v22 = vadd.f32 %v8505_v14, %v5501_v19  ;;  %v7217_v25 = vpop.f32.mrb[12].mxu0 }
 0x20c   : > { %vm5582_vm0 = vcmp.ge.f32.partialorder %v5546_v21, 0.0  ;;  %v5618_v6 = vmul.f32 0.2, %v5546_v21  ;;  %v7267_v26 = vadd.f32 %v7217_v25, %v8494_v7  ;;  %v5286_v27 = vpop.f32.mrb[13].mxu0  ;;  %v5653_v28 = vsel %vm5581_vm14, %v5545_v18, %v5617_v20 }
 0x20d   : > { %vm5580_vm1 = vcmp.ge.f32.partialorder %v5544_v22, 0.0  ;;  %v5616_v29 = vmul.f32 0.2, %v5544_v22  ;;  %v7268_v30 = vadd.f32 %v5286_v27, %v8496_v8  ;;  %v7218_v32 = vpop.f32.mrb[14].mxu0  ;;  %v5651_v33 = vsel %vm5579_vm15, %v5543_v4, %v5615_v5 }
 0x20e   : > { %v5654_v34 = vsel %vm5582_vm0, %v5546_v21, %v5618_v6  ;;  %v5506_v35 = vmul.f32 0.11785113, %v7267_v26  ;;  %v7269_v36 = vadd.f32 %v7218_v32, %v8498_v9  ;;  %v5289_v37 = vpop.f32.mrb[15].mxu0 }
 0x20f   : > { %v6458_v38 = vpack.c.bf16 %v5654_v34, %v5653_v28  ;;  %v5652_v39 = vsel %vm5580_vm1, %v5544_v22, %v5616_v29  ;;  %v5504_v40 = vmul.f32 0.11785113, %v7268_v30  ;;  %v7270_v7 = vadd.f32 %v5289_v37, %v8500_v10 }
 0x210   : > { %v6453_v41 = vpack.c.bf16 %v5652_v39, %v5651_v33  ;;  %v5549_v42 = vadd.f32 %v8505_v14, %v5506_v35  ;;  %v5507_v43 = vmul.f32 0.11785113, %v7269_v36 }
 0x211   : > { %6524 = vst [vmem:[%s8515_s12 + $0x28] sm:$0xff] %v6458_v38   ;;  %v5547_v8 = vadd.f32 %v8505_v14, %v5504_v40  ;;  %v5505_v44 = vmul.f32 0.11785113, %v7270_v7 }
 0x212   : > { %6523 = vst [vmem:[%s8515_s12 + $0x20] sm:$0xff] %v6453_v41   ;;  %v5621_v45 = vmul.f32 0.2, %v5549_v42  ;;  %v5550_v46 = vadd.f32 %v8505_v14, %v5507_v43  ;;  %vm5585_vm2 = vcmp.ge.f32.partialorder %v5549_v42, 0.0 }
 0x213   : > { %v5619_v9 = vmul.f32 0.2, %v5547_v8  ;;  %v5548_v47 = vadd.f32 %v8505_v14, %v5505_v44  ;;  %v7221_v48 = vpop.f32.mrb[16].mxu0  ;;  %vm5583_vm3 = vcmp.ge.f32.partialorder %v5547_v8, 0.0 }
 0x214   : > { %vm5586_vm4 = vcmp.ge.f32.partialorder %v5550_v46, 0.0  ;;  %v5622_v10 = vmul.f32 0.2, %v5550_v46  ;;  %v5302_v49 = vpop.f32.mrb[17].mxu0  ;;  %v5657_v52 = vsel %vm5585_vm2, %v5549_v42, %v5621_v45 }
 0x215   : > { %vm5584_vm5 = vcmp.ge.f32.partialorder %v5548_v47, 0.0  ;;  %v5620_v50 = vmul.f32 0.2, %v5548_v47  ;;  %v7222_v51 = vpop.f32.mrb[18].mxu0  ;;  %v5655_v55 = vsel %vm5583_vm3, %v5547_v8, %v5619_v9 }
 0x216   : > { %v5658_v53 = vsel %vm5586_vm4, %v5550_v46, %v5622_v10  ;;  %v5305_v54 = vpop.f32.mrb[19].mxu0 }
 0x217   : > { %v6468_v23 = vpack.c.bf16 %v5658_v53, %v5657_v52  ;;  %v5656_v56 = vsel %vm5584_vm5, %v5548_v47, %v5620_v50 }
 0x218   : > { %v6463_v57 = vpack.c.bf16 %v5656_v56, %v5655_v55 }
 0x219   : > { %6526 = vst [vmem:[%s8515_s12 + $0x38] sm:$0xff] %v6468_v23  }
 0x21a   : > { %6525 = vst [vmem:[%s8515_s12 + $0x30] sm:$0xff] %v6463_v57   ;;  %v7013_v31 = vpop.f32.mrb[16].mxu1 }
 0x21b   : > { %v7271_v58 = vadd.f32 %v7221_v48, %v7013_v31  ;;  %v7225_v59 = vpop.f32.mrb[20].mxu0  ;;  %v3026_v60 = vpop.f32.mrb[17].mxu1 }
 0x21c   : > { %v7272_v61 = vadd.f32 %v5302_v49, %v3026_v60  ;;  %v5318_v62 = vpop.f32.mrb[21].mxu0  ;;  %v7014_v3 = vpop.f32.mrb[18].mxu1 }
 0x21d   : > { %v5510_v63 = vmul.f32 0.11785113, %v7271_v58  ;;  %v7273_v0 = vadd.f32 %v7222_v51, %v7014_v3  ;;  %v7226_v1 = vpop.f32.mrb[22].mxu0  ;;  %v3029_v12 = vpop.f32.mrb[19].mxu1 }
 0x21e   : > { %v5508_v13 = vmul.f32 0.11785113, %v7272_v61  ;;  %v7274_v11 = vadd.f32 %v5305_v54, %v3029_v12  ;;  %v5321_v15 = vpop.f32.mrb[23].mxu0 }
 0x21f   : > { %v5553_v16 = vadd.f32 %v8505_v14, %v5510_v63  ;;  %v5511_v2 = vmul.f32 0.11785113, %v7273_v0 }
 0x220   : > { %v5551_v17 = vadd.f32 %v8505_v14, %v5508_v13  ;;  %v5509_v18 = vmul.f32 0.11785113, %v7274_v11 }
 0x221   : > { %vm5589_vm6 = vcmp.ge.f32.partialorder %v5553_v16, 0.0  ;;  %v5625_v24 = vmul.f32 0.2, %v5553_v16  ;;  %v5554_v4 = vadd.f32 %v8505_v14, %v5511_v2 }
 0x222   : > { %vm5587_vm7 = vcmp.ge.f32.partialorder %v5551_v17, 0.0  ;;  %v5623_v19 = vmul.f32 0.2, %v5551_v17  ;;  %v5552_v20 = vadd.f32 %v8505_v14, %v5509_v18  ;;  %v7017_v21 = vpop.f32.mrb[20].mxu1 }
 0x223   : > { %vm5590_vm8 = vcmp.ge.f32.partialorder %v5554_v4, 0.0  ;;  %v5626_v5 = vmul.f32 0.2, %v5554_v4  ;;  %v7275_v22 = vadd.f32 %v7225_v59, %v7017_v21  ;;  %v7229_v25 = vpop.f32.mrb[24].mxu0  ;;  %v3042_v6 = vpop.f32.mrb[21].mxu1  ;;  %v5661_v26 = vsel %vm5589_vm6, %v5553_v16, %v5625_v24 }
 0x224   : > { %vm5588_vm9 = vcmp.ge.f32.partialorder %v5552_v20, 0.0  ;;  %v5624_v27 = vmul.f32 0.2, %v5552_v20  ;;  %v7276_v28 = vadd.f32 %v5318_v62, %v3042_v6  ;;  %v5334_v29 = vpop.f32.mrb[25].mxu0  ;;  %v7018_v30 = vpop.f32.mrb[22].mxu1  ;;  %v5659_v32 = vsel %vm5587_vm7, %v5551_v17, %v5623_v19 }
 0x225   : > { %v5662_v33 = vsel %vm5590_vm8, %v5554_v4, %v5626_v5  ;;  %v5514_v34 = vmul.f32 0.11785113, %v7275_v22  ;;  %v7277_v35 = vadd.f32 %v7226_v1, %v7018_v30  ;;  %v7230_v36 = vpop.f32.mrb[26].mxu0  ;;  %v3045_v37 = vpop.f32.mrb[23].mxu1 }
 0x226   : > { %v6478_v38 = vpack.c.bf16 %v5662_v33, %v5661_v26  ;;  %v5660_v39 = vsel %vm5588_vm9, %v5552_v20, %v5624_v27  ;;  %v5512_v40 = vmul.f32 0.11785113, %v7276_v28  ;;  %v7278_v7 = vadd.f32 %v5321_v15, %v3045_v37  ;;  %v5337_v41 = vpop.f32.mrb[27].mxu0 }
 0x227   : > { %v6473_v42 = vpack.c.bf16 %v5660_v39, %v5659_v32  ;;  %v5557_v43 = vadd.f32 %v8505_v14, %v5514_v34  ;;  %v5515_v8 = vmul.f32 0.11785113, %v7277_v35 }
 0x228   : > { %6528 = vst [vmem:[%s8515_s12 + $0x48] sm:$0xff] %v6478_v38   ;;  %v5555_v44 = vadd.f32 %v8505_v14, %v5512_v40  ;;  %v5513_v45 = vmul.f32 0.11785113, %v7278_v7 }
 0x229   : > { %6527 = vst [vmem:[%s8515_s12 + $0x40] sm:$0xff] %v6473_v42   ;;  %vm5593_vm10 = vcmp.ge.f32.partialorder %v5557_v43, 0.0  ;;  %v5629_v46 = vmul.f32 0.2, %v5557_v43  ;;  %v5558_v9 = vadd.f32 %v8505_v14, %v5515_v8 }
 0x22a   : > { %vm5591_vm11 = vcmp.ge.f32.partialorder %v5555_v44, 0.0  ;;  %v5627_v47 = vmul.f32 0.2, %v5555_v44  ;;  %v5556_v48 = vadd.f32 %v8505_v14, %v5513_v45  ;;  %v7021_v10 = vpop.f32.mrb[24].mxu1 }
 0x22b   : > { %vm5594_vm12 = vcmp.ge.f32.partialorder %v5558_v9, 0.0  ;;  %v5630_v49 = vmul.f32 0.2, %v5558_v9  ;;  %v7279_v50 = vadd.f32 %v7229_v25, %v7021_v10  ;;  %v7233_v51 = vpop.f32.mrb[28].mxu0  ;;  %v3058_v52 = vpop.f32.mrb[25].mxu1  ;;  %v5665_v53 = vsel %vm5593_vm10, %v5557_v43, %v5629_v46 }
 0x22c   : > { %vm5592_vm13 = vcmp.ge.f32.partialorder %v5556_v48, 0.0  ;;  %v5628_v54 = vmul.f32 0.2, %v5556_v48  ;;  %v7280_v55 = vadd.f32 %v5334_v29, %v3058_v52  ;;  %v5350_v23 = vpop.f32.mrb[29].mxu0  ;;  %v7022_v56 = vpop.f32.mrb[26].mxu1  ;;  %v5663_v57 = vsel %vm5591_vm11, %v5555_v44, %v5627_v47 }
 0x22d   : > { %v5666_v31 = vsel %vm5594_vm12, %v5558_v9, %v5630_v49  ;;  %v5518_v58 = vmul.f32 0.11785113, %v7279_v50  ;;  %v7281_v59 = vadd.f32 %v7230_v36, %v7022_v56  ;;  %v7234_v60 = vpop.f32.mrb[30].mxu0  ;;  %v3061_v61 = vpop.f32.mrb[27].mxu1 }
 0x22e   : > { %v6488_v62 = vpack.c.bf16 %v5666_v31, %v5665_v53  ;;  %v5664_v3 = vsel %vm5592_vm13, %v5556_v48, %v5628_v54  ;;  %v5516_v63 = vmul.f32 0.11785113, %v7280_v55  ;;  %v7282_v0 = vadd.f32 %v5337_v41, %v3061_v61  ;;  %v5353_v1 = vpop.f32.mrb[31].mxu0 }
 0x22f   : > { %v6483_v12 = vpack.c.bf16 %v5664_v3, %v5663_v57  ;;  %v5561_v13 = vadd.f32 %v8505_v14, %v5518_v58  ;;  %v5519_v11 = vmul.f32 0.11785113, %v7281_v59 }
 0x230   : > { %6530 = vst [vmem:[%s8515_s12 + $0x58] sm:$0xff] %v6488_v62   ;;  %v5559_v15 = vadd.f32 %v8505_v14, %v5516_v63  ;;  %v5517_v16 = vmul.f32 0.11785113, %v7282_v0 }
 0x231   : > { %6529 = vst [vmem:[%s8515_s12 + $0x50] sm:$0xff] %v6483_v12   ;;  %vm5597_vm14 = vcmp.ge.f32.partialorder %v5561_v13, 0.0  ;;  %v5633_v2 = vmul.f32 0.2, %v5561_v13  ;;  %v5562_v17 = vadd.f32 %v8505_v14, %v5519_v11 }
 0x232   : > { %vm5595_vm15 = vcmp.ge.f32.partialorder %v5559_v15, 0.0  ;;  %v5631_v18 = vmul.f32 0.2, %v5559_v15  ;;  %v5560_v24 = vadd.f32 %v8505_v14, %v5517_v16  ;;  %v7025_v4 = vpop.f32.mrb[28].mxu1 }
 0x233   : > { %vm5598_vm0 = vcmp.ge.f32.partialorder %v5562_v17, 0.0  ;;  %v5634_v19 = vmul.f32 0.2, %v5562_v17  ;;  %v7283_v20 = vadd.f32 %v7233_v51, %v7025_v4  ;;  %v7237_v21 = vpop.f32.mrb[32].mxu0  ;;  %v3074_v5 = vpop.f32.mrb[29].mxu1  ;;  %v5669_v22 = vsel %vm5597_vm14, %v5561_v13, %v5633_v2 }
 0x234   : > { %vm5596_vm1 = vcmp.ge.f32.partialorder %v5560_v24, 0.0  ;;  %v5632_v25 = vmul.f32 0.2, %v5560_v24  ;;  %v7284_v6 = vadd.f32 %v5350_v23, %v3074_v5  ;;  %v5366_v26 = vpop.f32.mrb[33].mxu0  ;;  %v7026_v27 = vpop.f32.mrb[30].mxu1  ;;  %v5667_v28 = vsel %vm5595_vm15, %v5559_v15, %v5631_v18 }
 0x235   : > { %v5670_v29 = vsel %vm5598_vm0, %v5562_v17, %v5634_v19  ;;  %v5522_v30 = vmul.f32 0.11785113, %v7283_v20  ;;  %v7285_v32 = vadd.f32 %v7234_v60, %v7026_v27  ;;  %v7238_v33 = vpop.f32.mrb[34].mxu0  ;;  %v3077_v34 = vpop.f32.mrb[31].mxu1 }
 0x236   : > { %v6498_v35 = vpack.c.bf16 %v5670_v29, %v5669_v22  ;;  %v5668_v36 = vsel %vm5596_vm1, %v5560_v24, %v5632_v25  ;;  %v5520_v37 = vmul.f32 0.11785113, %v7284_v6  ;;  %v7286_v38 = vadd.f32 %v5353_v1, %v3077_v34  ;;  %v5369_v39 = vpop.f32.mrb[35].mxu0 }
 0x237   : > { %v6493_v40 = vpack.c.bf16 %v5668_v36, %v5667_v28  ;;  %v5565_v7 = vadd.f32 %v8505_v14, %v5522_v30  ;;  %v5523_v41 = vmul.f32 0.11785113, %v7285_v32 }
 0x238   : > { %6532 = vst [vmem:[%s8515_s12 + $0x68] sm:$0xff] %v6498_v35   ;;  %v5563_v42 = vadd.f32 %v8505_v14, %v5520_v37  ;;  %v5521_v43 = vmul.f32 0.11785113, %v7286_v38 }
 0x239   : > { %6531 = vst [vmem:[%s8515_s12 + $0x60] sm:$0xff] %v6493_v40   ;;  %vm5601_vm2 = vcmp.ge.f32.partialorder %v5565_v7, 0.0  ;;  %v5637_v8 = vmul.f32 0.2, %v5565_v7  ;;  %v5566_v44 = vadd.f32 %v8505_v14, %v5523_v41 }
 0x23a   : > { %vm5599_vm3 = vcmp.ge.f32.partialorder %v5563_v42, 0.0  ;;  %v5635_v45 = vmul.f32 0.2, %v5563_v42  ;;  %v5564_v46 = vadd.f32 %v8505_v14, %v5521_v43  ;;  %v7029_v9 = vpop.f32.mrb[32].mxu1 }
 0x23b   : > { %vm5602_vm4 = vcmp.ge.f32.partialorder %v5566_v44, 0.0  ;;  %v5638_v47 = vmul.f32 0.2, %v5566_v44  ;;  %v7287_v48 = vadd.f32 %v7237_v21, %v7029_v9  ;;  %v3090_v10 = vpop.f32.mrb[33].mxu1  ;;  %v5673_v49 = vsel %vm5601_vm2, %v5565_v7, %v5637_v8 }
 0x23c   : > { %vm5600_vm5 = vcmp.ge.f32.partialorder %v5564_v46, 0.0  ;;  %v5636_v50 = vmul.f32 0.2, %v5564_v46  ;;  %v7288_v51 = vadd.f32 %v5366_v26, %v3090_v10  ;;  %v7030_v52 = vpop.f32.mrb[34].mxu1  ;;  %v5671_v53 = vsel %vm5599_vm3, %v5563_v42, %v5635_v45 }
 0x23d   : > { %v5674_v54 = vsel %vm5602_vm4, %v5566_v44, %v5638_v47  ;;  %v5526_v55 = vmul.f32 0.11785113, %v7287_v48  ;;  %v7289_v23 = vadd.f32 %v7238_v33, %v7030_v52  ;;  %v3093_v56 = vpop.f32.mrb[35].mxu1 }
 0x23e   : > { %v6508_v57 = vpack.c.bf16 %v5674_v54, %v5673_v49  ;;  %v5672_v31 = vsel %vm5600_vm5, %v5564_v46, %v5636_v50  ;;  %v5524_v58 = vmul.f32 0.11785113, %v7288_v51  ;;  %v7290_v59 = vadd.f32 %v5369_v39, %v3093_v56 }
 0x23f   : > { %v6503_v60 = vpack.c.bf16 %v5672_v31, %v5671_v53  ;;  %v5569_v61 = vadd.f32 %v8505_v14, %v5526_v55  ;;  %v5527_v62 = vmul.f32 0.11785113, %v7289_v23 }
 0x240   : > { %6534 = vst [vmem:[%s8515_s12 + $0x78] sm:$0xff] %v6508_v57   ;;  %v5567_v3 = vadd.f32 %v8505_v14, %v5524_v58  ;;  %v5525_v63 = vmul.f32 0.11785113, %v7290_v59 }
 0x241   : > { %6533 = vst [vmem:[%s8515_s12 + $0x70] sm:$0xff] %v6503_v60   ;;  %v5641_v0 = vmul.f32 0.2, %v5569_v61  ;;  %v5570_v1 = vadd.f32 %v8505_v14, %v5527_v62  ;;  %vm5605_vm6 = vcmp.ge.f32.partialorder %v5569_v61, 0.0 }
 0x242   : > { %v5639_v12 = vmul.f32 0.2, %v5567_v3  ;;  %v5568_v13 = vadd.f32 %v8505_v14, %v5525_v63  ;;  %vm5603_vm7 = vcmp.ge.f32.partialorder %v5567_v3, 0.0 }
 0x243   : > { %vm5606_vm8 = vcmp.ge.f32.partialorder %v5570_v1, 0.0  ;;  %v5642_v11 = vmul.f32 0.2, %v5570_v1  ;;  %v5677_v16 = vsel %vm5605_vm6, %v5569_v61, %v5641_v0 }
 0x244   : > { %vm5604_vm9 = vcmp.ge.f32.partialorder %v5568_v13, 0.0  ;;  %v5640_v15 = vmul.f32 0.2, %v5568_v13  ;;  %v5675_v17 = vsel %vm5603_vm7, %v5567_v3, %v5639_v12 }
 0x245   : > { %v5678_v2 = vsel %vm5606_vm8, %v5570_v1, %v5642_v11 }
 0x246   : > { %v6518_v18 = vpack.c.bf16 %v5678_v2, %v5677_v16  ;;  %v5676_v24 = vsel %vm5604_vm9, %v5568_v13, %v5640_v15 }
 0x247   : > { %v6513_v4 = vpack.c.bf16 %v5676_v24, %v5675_v17 }
 0x248   : > { %6536 = vst [vmem:[%s8515_s12 + $0x88] sm:$0xff] %v6518_v18  }
 0x249   : > { %6535 = vst [vmem:[%s8515_s12 + $0x80] sm:$0xff] %v6513_v4  }
 0x24a PF: > { %s13_s14 = sadd.s32 1, %s7841_s14   ;;  %s8588_s12 = smov %s7837_s13 }
 0x24b   : > { %p10_p5 = scmp.ge.s32.totalorder %s13_s14, 4   ;;  %s8589_s13 = smov %s8591_s15 }
 0x24d   :  { %12 = sbr.rel (!%p10_p5) target bundleno = 2 (0x2), region = 84 }

// kernel: sg2_discriminator_forward.15
= control target key start
LH: loop header
LB: loop body
LE: loop exit
PB: predicated region body
PF: predicated region fallthrough
CT: control target
= control target key end

     0   :  { %s3738_s12 = smov 0   ;;  %s3740_s13 = smov 0   ;;  %s4294_s0 = inlined_call_operand.vmem [shape: bf16[2,110,128], index: 0, kind: input, shape index: {}]   ;;  %s4295_s1 = inlined_call_operand.vmem [shape: bf16[9,128,128], index: 1, kind: input, shape index: {}]   ;;  %s4296_s2 = inlined_call_operand.vmem [shape: f32[1,128], index: 2, kind: input, shape index: {}]   ;;  %s4297_s3 = inlined_call_operand.vmem [shape: bf16[2,80,128], index: 3, kind: output, shape index: {}]  }
   0x1   :  { %s3742_s14 = smov 0  }
   0x2 LB: > { %s32_s15 = sadd.s32 1, %s3710_s13  ;;  %p2628_p0 = scmp.ge.s32.totalorder %s3714_s14, 1  ;;  %s3714_s14 = sphi %s3742_s14, %s13_s14   ;;  %s3710_s13 = sphi %s3740_s13, %s4299_s13   ;;  %s3706_s12 = sphi %s3738_s12, %s4298_s12  }
   0x3   : > { %p34_p1 = scmp.ge.s32.totalorder %s32_s15, 2  ;;  %p187_p2 = scmp.lt.s32.totalorder %s3714_s14, 3 }
   0x5   : > { %s4301_s15 = smov (%p34_p1, %s32_s15), 0  ;;  %p188_p3 = pnand %p2628_p0, %p187_p2 }
   0x6   : > { %v3567_v0 = vld [vmem:[%s4295_s1] sm:$0xff] (!%p188_p3)   ;;  %v3716_v1 = vmov (!%p188_p3), 0.0   ;;  %v3569_v3 = vld [vmem:[%s4295_s1 + $0x8] sm:$0xff] (!%p188_p3)   ;;  %vm3717_vm0 = vmmov (!%p188_p3), 0   ;;  %p228_p4 = scmp.lt.s32.totalorder (!%p188_p3), %s3706_s12, 1  ;;  %v3571_v5 = vld [vmem:[%s4295_s1 + $0x10] sm:$0xff] (!%p188_p3)  }
   0x7   : > { %191 = sbr.rel (%p188_p3) target bundleno = 442 (0x1ba), region = 32  ;;  %3053 = vmatprep.subr.bf16.mxu1 (!%p188_p3), %v3716_v1  ;;  %3197 = vmatprep.subr.bf16.mxu0 (!%p188_p3), %v3716_v1  ;;  %v3568_v2 = vld [vmem:[%s4295_s1 + $0x100] sm:$0xff] (!%p188_p3)   ;;  %v3570_v4 = vld [vmem:[%s4295_s1 + $0x108] sm:$0xff] (!%p188_p3)   ;;  %v3572_v6 = vld [vmem:[%s4295_s1 + $0x110] sm:$0xff] (!%p188_p3)   ;;  %vm1248_vm1 = vsmask.f32 (!%p188_p3), 6400 }
   0x8   : > { %3054 = vmatpush3.bf16.msra.mxu1 (!%p188_p3), %v3567_v0  ;;  %3069 = vmatprep.mubr.msk.bf16.mxu1 (!%p188_p3), %vm3717_vm0, %v3716_v1  ;;  %v3573_v7 = vld [vmem:[%s4295_s1 + $0x18] sm:$0xff] (!%p188_p3)   ;;  %v3575_v9 = vld [vmem:[%s4295_s1 + $0x20] sm:$0xff] (!%p188_p3)   ;;  %v3577_v11 = vld [vmem:[%s4295_s1 + $0x28] sm:$0xff] (!%p188_p3)   ;;  %vm544_vm2 = vsmask.f32 (!%p188_p3), 7424  ;;  %vm1514_vm3 = vcmask (!%p188_p3), 1045504  }
   0x9   : > { %3198 = vmatpush3.bf16.msra.mxu0 (!%p188_p3), %v3568_v2  ;;  %3055 = vmatprep.subr.bf16.mxu1 (!%p188_p3), %v3716_v1  ;;  %v3574_v8 = vld [vmem:[%s4295_s1 + $0x118] sm:$0xff] (!%p188_p3)   ;;  %v3576_v10 = vld [vmem:[%s4295_s1 + $0x120] sm:$0xff] (!%p188_p3)   ;;  %v3578_v14 = vld [vmem:[%s4295_s1 + $0x128] sm:$0xff] (!%p188_p3)   ;;  %vm801_vm4 = vcmask (!%p188_p3), 1046528   ;;  %vm1961_vm5 = vsmask.f32 (!%p188_p3), 5376 }
   0xa   : > { %3199 = vmatprep.subr.bf16.mxu0 (!%p188_p3), %v3716_v1  ;;  %3213 = vmatprep.mubr.msk.bf16.mxu0 (!%p188_p3), %vm3717_vm0, %v3716_v1  ;;  %v3579_v19 = vld [vmem:[%s4295_s1 + $0x30] sm:$0xff] (!%p188_p3)   ;;  %v3581_v26 = vld [vmem:[%s4295_s1 + $0x38] sm:$0xff] (!%p188_p3)   ;;  %v3586_v33 = vld [vmem:[%s4295_s1 + $0x140] sm:$0xff] (!%p188_p3)   ;;  %vm2227_vm6 = vcmask (!%p188_p3), 1044480  }
   0xb   : > { %v3580_v20 = vld [vmem:[%s4295_s1 + $0x130] sm:$0xff] (!%p188_p3)   ;;  %v3582_v27 = vld [vmem:[%s4295_s1 + $0x138] sm:$0xff] (!%p188_p3)   ;;  %v3590_v38 = vld [vmem:[%s4295_s1 + $0x40] sm:$0xff] (!%p188_p3)  }
   0xc   : > { %3056 = vmatpush3.bf16.msra.mxu1 (!%p188_p3), %v3569_v3  ;;  %v3587_v39 = vld [vmem:[%s4295_s1 + $0x148] sm:$0xff] (!%p188_p3)   ;;  %v3591_v47 = vld [vmem:[%s4295_s1 + $0x150] sm:$0xff] (!%p188_p3)   ;;  %v3595_v55 = vld [vmem:[%s4295_s1 + $0x158] sm:$0xff] (!%p188_p3)  }
   0xd   : > { %3200 = vmatpush3.bf16.msra.mxu0 (!%p188_p3), %v3570_v4  ;;  %3057 = vmatprep.subr.bf16.mxu1 (!%p188_p3), %v3716_v1  ;;  %v3592_v43 = vld [vmem:[%s4295_s1 + $0x48] sm:$0xff] (!%p188_p3)   ;;  %v3596_v50 = vld [vmem:[%s4295_s1 + $0x50] sm:$0xff] (!%p188_p3)   ;;  %v3597_v56 = vld [vmem:[%s4295_s1 + $0x58] sm:$0xff] (!%p188_p3)  }
   0xe   : > { %s4303_s12 = smov (!%p228_p4, %s3706_s12), 1  ;;  %3201 = vmatprep.subr.bf16.mxu0 %v3716_v1  ;;  %v3598_v57 = vld [vmem:[%s4295_s1 + $0x160] sm:$0xff]   ;;  %v3602_v63 = vld [vmem:[%s4295_s1 + $0x168] sm:$0xff]  }
   0xf   : > { %s3539_s5 = smul.u32 56, %s4303_s12  ;;  %v3601_v62 = vld [vmem:[%s4295_s1 + $0x60] sm:$0xff]  }
  0x10   : > { %3058 = vmatpush3.bf16.msra.mxu1 %v3571_v5  ;;  %v3603_v5 = vld [vmem:[%s4295_s1 + $0x68] sm:$0xff]  }
  0x11   : > { %3202 = vmatpush3.bf16.msra.mxu0 %v3572_v6  ;;  %3059 = vmatprep.subr.bf16.mxu1 %v3716_v1  ;;  %s3809_s16 = scalar_lea.vmem %s4294_s0, %s3539_s5  ;;  %v3604_v6 = vld [vmem:[%s4295_s1 + $0x170] sm:$0xff]   ;;  %s3540_s5 = smul.u32 40, %s4303_s12 }
  0x12   : > { %3203 = vmatprep.subr.bf16.mxu0 %v3716_v1  ;;  %v3584_v12 = vld [vmem:[%s3809_s16 + $0x4] sm:$0xfe]   ;;  %v3585_v13 = vld [vmem:[%s3809_s16 + $0xc] sm:$0xff]   ;;  %v3589_v25 = vld [vmem:[%s3809_s16 + $0x14] sm:$0xff]  }
  0x13   : > { %v1250_v15 = vshrl.u32 %v3584_v12, 16  ;;  %v1253_v16 = vshll.u32 %v3584_v12, 16  ;;  %v1258_v17 = vshrl.u32 %v3585_v13, 16  ;;  %v1261_v18 = vshll.u32 %v3585_v13, 16  ;;  %v3583_v32 = vld [vmem:[%s3809_s16] sm:$0xff]   ;;  %v3588_v44 = vld [vmem:[%s3809_s16 + $0x8] sm:$0xff]   ;;  %s4269_s7 = scalar_lea.vmem %s4297_s3, %s3540_s5 }
  0x14   : > { %3060 = vmatpush3.bf16.msra.mxu1 %v3573_v7  ;;  %v1267_v28 = vshrl.u32 %v3589_v25, 16  ;;  %v1270_v29 = vshll.u32 %v3589_v25, 16  ;;  %v3594_v36 = vld [vmem:[%s3809_s16 + $0x1c] sm:$0xff]   ;;  %v3600_v45 = vld [vmem:[%s3809_s16 + $0x24] sm:$0xff]   ;;  %v3593_v53 = vld [vmem:[%s3809_s16 + $0x10] sm:$0xff]  }
  0x15   : > { %3204 = vmatpush3.bf16.msra.mxu0 %v3574_v8  ;;  %3061 = vmatprep.subr.bf16.mxu1 %v3716_v1  ;;  %v1252_v21 = vrot.slane %v1250_v15, 1  ;;  %v1255_v22 = vrot.slane %v1253_v16, 2  ;;  %v1260_v23 = vrot.slane %v1258_v17, 1  ;;  %v1263_v24 = vrot.slane %v1261_v18, 2  ;;  %v3599_v0 = vld [vmem:[%s3809_s16 + $0x18] sm:$0xff]   ;;  %v3610_v7 = vld [vmem:[%s3809_s16] sm:$0xff]  }
  0x16   : > { %3205 = vmatprep.subr.bf16.mxu0 %v3716_v1  ;;  %v1269_v34 = vrot.slane %v1267_v28, 1  ;;  %v1272_v35 = vrot.slane %v1270_v29, 2  ;;  %v1276_v41 = vshrl.u32 %v3594_v36, 16  ;;  %v1279_v42 = vshll.u32 %v3594_v36, 16  ;;  %v3611_v12 = vld [vmem:[%s3809_s16 + $0x8] sm:$0xff]   ;;  %v3608_v16 = vld [vmem:[%s4295_s1 + $0x178] sm:$0xff]  }
  0x17   : > { %v1256_v30 = vor.u32 %v1255_v22, %v1252_v21  ;;  %v1264_v31 = vor.u32 %v1263_v24, %v1260_v23  ;;  %v1285_v51 = vshrl.u32 %v3600_v45, 16  ;;  %v1288_v52 = vshll.u32 %v3600_v45, 16  ;;  %v3606_v60 = vld [vmem:[%s3809_s16 + $0x2c] ss:$0 sps:$4 sm:$0x33]   ;;  %v3609_v17 = vld [vmem:[%s4295_s1 + $0x78] sm:$0xff]  }
  0x18   : > { %3062 = vmatpush3.bf16.msra.mxu1 %v3575_v9  ;;  %v1273_v40 = vor.u32 %v1272_v35, %v1269_v34  ;;  %v1278_v48 = vrot.slane %v1276_v41, 1  ;;  %v1281_v49 = vrot.slane %v1279_v42, 2  ;;  %v1294_v3 = vshrl.u32 %v3606_v60, 16  ;;  %v3613_v23 = vld [vmem:[%s3809_s16 + $0xc] sm:$0xff]   ;;  %v3617_v34 = vld [vmem:[%s3809_s16 + $0x14] sm:$0xff]   ;;  %v3618_v35 = vld [vmem:[%s4295_s1 + $0x80] sm:$0xff]  }
  0x19   : > { %3206 = vmatpush3.bf16.msra.mxu0 %v3576_v10  ;;  %3063 = vmatprep.subr.bf16.mxu1 %v3716_v1  ;;  %v1265_v37 = vsel %vm1248_vm1, %v1256_v30, %v1264_v31  ;;  %v1287_v58 = vrot.slane %v1285_v51, 1  ;;  %v1290_v59 = vrot.slane %v1288_v52, 2  ;;  %v1297_v4 = vshll.u32 %v3606_v60, 16  ;;  %v3616_v24 = vld [vmem:[%s3809_s16 + $0x10] sm:$0xff]   ;;  %v3620_v41 = vld [vmem:[%s4295_s1 + $0x88] sm:$0xff]   ;;  %v3627_v51 = vld [vmem:[%s3809_s16 + $0x20] sm:$0xff]  }
  0x1a   : > { %3207 = vmatprep.subr.bf16.mxu0 %v3716_v1  ;;  %v1274_v46 = vsel %vm1248_vm1, %v1264_v31, %v1273_v40  ;;  %v1282_v54 = vor.u32 %v1281_v49, %v1278_v48  ;;  %v1296_v9 = vrot.slane %v1294_v3, 1  ;;  %v548_v13 = vshll.u32 %v3610_v7, 16  ;;  %v3614_v31 = vld [vmem:[%s4295_s1 + $0x180] sm:$0xff]   ;;  %v3619_v42 = vld [vmem:[%s4295_s1 + $0x190] sm:$0xff]   ;;  %v3630_v3 = vld [vmem:[%s4295_s1 + $0x1a8] sm:$0xff]  }
  0x1b   : > { %v1291_v2 = vor.u32 %v1290_v59, %v1287_v58  ;;  %v1299_v10 = vrot.slane %v1297_v4, 2  ;;  %v546_v18 = vshrl.u32 %v3610_v7, 16  ;;  %v553_v21 = vshll.u32 %v3611_v12, 16  ;;  %v3624_v48 = vld [vmem:[%s4295_s1 + $0x90] sm:$0xff]   ;;  %v3628_v60 = vld [vmem:[%s3809_s16 + $0x24] sm:$0xff]  }
  0x1c   : > { %3064 = vmatpush3.bf16.msra.mxu1 %v3577_v11  ;;  %v1283_v61 = vsel %vm1248_vm1, %v1273_v40, %v1282_v54  ;;  %v3607_v11 = vld [vmem:[%s4295_s1 + $0x70] sm:$0xff]   ;;  %v1516_v28 = vrot.slane %v3613_v23, 2  ;;  %v561_v29 = vshll.u32 %v3616_v24, 16  ;;  %v1518_v40 = vrot.slane %v3617_v34, 2  ;;  %v3631_v4 = vld [vmem:[%s4295_s1 + $0xa8] sm:$0xff]  }
  0x1d   : > { %3208 = vmatpush3.bf16.msra.mxu0 %v3578_v14  ;;  %3065 = vmatprep.subr.bf16.mxu1 %v3716_v1  ;;  %v1292_v8 = vsel %vm1248_vm1, %v1282_v54, %v1291_v2  ;;  %v3605_v14 = vld [vmem:[%s3809_s16 + $0x20] sm:$0xff]   ;;  %v1300_v15 = vor.u32 %v1299_v10, %v1296_v9  ;;  %v3625_v54 = vld [vmem:[%s4295_s1 + $0x98] sm:$0xff]   ;;  %v577_v58 = vshll.u32 %v3627_v51, 16  ;;  %v581_v7 = vshrl.u32 %v3627_v51, 16  ;;  %v3632_v10 = vld [vmem:[%s4295_s1 + $0x1b0] sm:$0xff]  }
  0x1e   : > { %3209 = vmatprep.subr.bf16.mxu0 %v3716_v1  ;;  %v563_v36 = vrot.slane %v561_v29, 1  ;;  %v3644_v29 = vld [vmem:[%s3809_s16 + $0x10] sm:$0xff]   ;;  %v3643_v34 = vld [vmem:[%s4295_s1 + $0x1c8] sm:$0xff]  }
  0x1f   : > { %v1301_v22 = vsel %vm1248_vm1, %v1291_v2, %v1300_v15  ;;  %v1522_v2 = vrot.slane %v3628_v60, 2  ;;  %v3656_v51 = vld [vmem:[%s3809_s16 + $0x28] sm:$0xff]  }
  0x20   : > { %3066 = vmatpush3.bf16.msra.mxu1 %v3579_v19  ;;  %v3612_v19 = vld [vmem:[%s3809_s16 + $0x4] sm:$0xfc]  }
  0x21   : > { %3210 = vmatpush3.bf16.msra.mxu0 %v3580_v20  ;;  %3067 = vmatprep.subr.bf16.mxu1 %v3716_v1  ;;  %v550_v20 = vrot.slane %v548_v13, 1 }
  0x22   : > { %3211 = vmatprep.subr.bf16.mxu0 %v3716_v1 }
  0x23   : > { %v551_v25 = vor.u32 %v550_v20, %v546_v18  ;;  %v3641_v18 = vld [vmem:[%s3809_s16 + $0x10] sm:$0xff]   ;;  %v3638_v20 = vld [vmem:[%s3809_s16] sm:$0xfe]  }
  0x24   : > { %3068 = vmatpush3.bf16.msra.mxu1 %v3581_v26  ;;  %v555_v26 = vrot.slane %v553_v21, 1  ;;  %v3640_v21 = vld [vmem:[%s3809_s16 + $0x8] sm:$0xfc]   ;;  %v802_v23 = vrot.slane %v3638_v20, 1 }
  0x25   : > { %3212 = vmatpush3.bf16.msra.mxu0 %v3582_v27  ;;  %3089 = vmatprep.subr.bf16.mxu1 %v3716_v1  ;;  %v1515_v27 = vrot.slane %v3612_v19, 2 }
  0x26   : > { %3233 = vmatprep.subr.bf16.mxu0 %v3716_v1  ;;  %v556_v30 = vsel %vm544_vm2, %v551_v25, %v555_v26  ;;  %v1738_v25 = vrot.slane %v3640_v21, 2 }
  0x27   : > { %3070 = vmatmul.mubr.bf16.vlgmr.msra.gmra.mrb[0].mxu1 %v3583_v32  ;;  %v557_v32 = vshrl.u32 %v3611_v12, 16 }
  0x28   : > { %3214 = vmatmul.mubr.bf16.vlgmr.msra.gmra.mrb[0].mxu0 %v1265_v37  ;;  %3073 = vmatprep.mubr.msk.bf16.mxu1 %vm3717_vm0, %v3716_v1  ;;  %v3621_v37 = vld [vmem:[%s3809_s16 + $0x18] sm:$0xff]  }
  0x29   : > { %3234 = vmatpush3.bf16.msra.mxu0 %v3586_v33  ;;  %3217 = vmatprep.mubr.msk.bf16.mxu0 %vm3717_vm0, %v3716_v1  ;;  %v1517_v33 = vsel %vm1514_vm3, %v1515_v27, %v1516_v28  ;;  %v3642_v27 = vld [vmem:[%s4295_s1 + $0x1c0] sm:$0xff]  }
  0x2a   : > { %3235 = vmatprep.subr.bf16.mxu0 %v3716_v1  ;;  %3090 = vmatpush3.bf16.msra.mxu1 %v3590_v38  ;;  %v559_v38 = vor.u32 %v557_v32, %v555_v26  ;;  %v1739_v26 = vrot.slane %v3641_v18, 2  ;;  %v3646_v32 = vld [vmem:[%s4295_s1 + $0xc0] sm:$0xff]   ;;  %v3673_v18 = vld [vmem:[%s3809_s16 + $0x18] sm:$0xff]  }
  0x2b   : > { %3091 = vmatprep.subr.bf16.mxu1 %v3716_v1 }
  0x2c   : > { %v564_v45 = vsel %vm544_vm2, %v559_v38, %v563_v36  ;;  %v3647_v38 = vld [vmem:[%s4295_s1 + $0x1d0] sm:$0xff]  }
  0x2d   : > { %3236 = vmatpush3.bf16.msra.mxu0 %v3587_v39  ;;  %v3615_v39 = vld [vmem:[%s4295_s1 + $0x188] sm:$0xff]  }
  0x2e   : > { %3237 = vmatprep.subr.bf16.mxu0 %v3716_v1  ;;  %3092 = vmatpush3.bf16.msra.mxu1 %v3592_v43  ;;  %v565_v43 = vshrl.u32 %v3616_v24, 16 }
  0x2f   : > { %3074 = vmatmul.mubr.bf16.gmra.mrb[4].mxu1 %v3588_v44  ;;  %3093 = vmatprep.subr.bf16.mxu1 %v3716_v1  ;;  %v569_v44 = vshll.u32 %v3621_v37, 16 }
  0x30   : > { %3218 = vmatmul.mubr.bf16.gmra.mrb[4].mxu0 %v1274_v46  ;;  %3077 = vmatprep.mubr.msk.bf16.mxu1 %vm3717_vm0, %v3716_v1  ;;  %v1519_v46 = vsel %vm1514_vm3, %v1516_v28, %v1518_v40  ;;  %v567_v49 = vor.u32 %v565_v43, %v563_v36  ;;  %v3648_v36 = vld [vmem:[%s4295_s1 + $0xc8] sm:$0xff]  }
  0x31   : > { %3238 = vmatpush3.bf16.msra.mxu0 %v3591_v47  ;;  %3221 = vmatprep.mubr.msk.bf16.mxu0 %vm3717_vm0, %v3716_v1  ;;  %v3622_v47 = vld [vmem:[%s3809_s16 + $0x1c] sm:$0xff]  }
  0x32   : > { %3239 = vmatprep.subr.bf16.mxu0 %v3716_v1  ;;  %3094 = vmatpush3.bf16.msra.mxu1 %v3596_v50  ;;  %v571_v50 = vrot.slane %v569_v44, 1  ;;  %v1520_v52 = vrot.slane %v3622_v47, 2  ;;  %v3654_v47 = vld [vmem:[%s4295_s1 + $0x1e0] sm:$0xff]  }
  0x33   : > { %3095 = vmatprep.subr.bf16.mxu1 %v3716_v1 }
  0x34   : > { %v1521_v59 = vsel %vm1514_vm3, %v1518_v40, %v1520_v52  ;;  %v1523_v9 = vsel %vm1514_vm3, %v1520_v52, %v1522_v2  ;;  %v3657_v52 = vld [vmem:[%s4295_s1 + $0xe0] sm:$0xff]  }
  0x35   : > { %3240 = vmatpush3.bf16.msra.mxu0 %v3595_v55  ;;  %v3626_v55 = vld [vmem:[%s4295_s1 + $0x1a0] sm:$0xff]  }
  0x36   : > { %3241 = vmatprep.subr.bf16.mxu0 %v3716_v1  ;;  %3096 = vmatpush3.bf16.msra.mxu1 %v3597_v56  ;;  %v572_v56 = vsel %vm544_vm2, %v567_v49, %v571_v50 }
  0x37   : > { %3078 = vmatmul.mubr.bf16.gmra.mrb[8].mxu1 %v3593_v53  ;;  %3097 = vmatprep.subr.bf16.mxu1 %v3716_v1  ;;  %v3623_v53 = vld [vmem:[%s4295_s1 + $0x198] sm:$0xff]  }
  0x38   : > { %3222 = vmatmul.mubr.bf16.gmra.mrb[8].mxu0 %v1283_v61  ;;  %3081 = vmatprep.mubr.msk.bf16.mxu1 %vm3717_vm0, %v3716_v1  ;;  %v3629_v61 = vld [vmem:[%s4295_s1 + $0xa0] sm:$0xff]  }
  0x39   : > { %3242 = vmatpush3.bf16.msra.mxu0 %v3598_v57  ;;  %3225 = vmatprep.mubr.msk.bf16.mxu0 %vm3717_vm0, %v3716_v1  ;;  %v573_v57 = vshrl.u32 %v3621_v37, 16 }
  0x3a   : > { %3098 = vmatpush3.bf16.msra.mxu1 %v3601_v62  ;;  %3243 = vmatprep.subr.bf16.mxu0 %v3716_v1  ;;  %v3633_v62 = vld [vmem:[%s3809_s16 + $0x28] ss:$0 sps:$4 sm:$0x11]  }
  0x3b   : > { %3099 = vmatprep.subr.bf16.mxu1 %v3716_v1 }
  0x3d   : > { %3244 = vmatpush3.bf16.msra.mxu0 %v3602_v63  ;;  %v575_v63 = vor.u32 %v573_v57, %v571_v50 }
  0x3e   : > { %3100 = vmatpush3.bf16.msra.mxu1 %v3603_v5  ;;  %3245 = vmatprep.subr.bf16.mxu0 %v3716_v1  ;;  %v3634_v5 = vld [vmem:[%s3809_s16 + $0x2c] ss:$0 sps:$4 sm:$0x33]  }
  0x3f   : > { %3082 = vmatmul.mubr.bf16.gmra.mrb[12].mxu1 %v3599_v0  ;;  %3101 = vmatprep.subr.bf16.mxu1 %v3716_v1  ;;  %v579_v0 = vrot.slane %v577_v58, 1  ;;  %v1524_v15 = vrot.slane %v3634_v5, 2  ;;  %v3661_v58 = vld [vmem:[%s3809_s16 + $0x28] ss:$0 sps:$4 sm:$0x11]  }
  0x40   : > { %3226 = vmatmul.mubr.bf16.gmra.mrb[12].mxu0 %v1292_v8  ;;  %3085 = vmatprep.mubr.msk.bf16.mxu1 %vm3717_vm0, %v3716_v1  ;;  %v585_v8 = vshll.u32 %v3633_v62, 16  ;;  %v3668_v62 = vld [vmem:[%s3809_s16 + $0x8] sm:$0xfc]  }
  0x41   : > { %3229 = vmatprep.mubr.msk.bf16.mxu0 %vm3717_vm0, %v3716_v1  ;;  %3246 = vmatpush3.bf16.msra.mxu0 %v3604_v6  ;;  %v580_v6 = vsel %vm544_vm2, %v575_v63, %v579_v0  ;;  %v583_v12 = vor.u32 %v581_v7, %v579_v0  ;;  %v3669_v63 = vld [vmem:[%s3809_s16 + $0x10] sm:$0xff]   ;;  %v1963_v5 = vshrl.u32 %v3668_v62, 16 }
  0x42   : > { %3102 = vmatpush3.bf16.msra.mxu1 %v3607_v11  ;;  %3247 = vmatprep.subr.bf16.mxu0 %v3716_v1  ;;  %v3635_v11 = vld [vmem:[%s4295_s1 + $0xb0] sm:$0xff]   ;;  %v587_v13 = vrot.slane %v585_v8, 1  ;;  %v1971_v7 = vshrl.u32 %v3669_v63, 16  ;;  %v1974_v8 = vshll.u32 %v3669_v63, 16 }
  0x43   : > { %3103 = vmatprep.subr.bf16.mxu1 %v3716_v1  ;;  %v3663_v0 = vld [vmem:[%s4295_s1 + $0xf0] sm:$0xff]  }
  0x44   : > { %v588_v19 = vsel %vm544_vm2, %v583_v12, %v587_v13  ;;  %v3666_v12 = vld [vmem:[%s3809_s16 + $0x4] sm:$0xfe]   ;;  %v3667_v13 = vld [vmem:[%s3809_s16 + $0xc] sm:$0xff]  }
  0x45   : > { %3248 = vmatpush3.bf16.msra.mxu0 %v3608_v16  ;;  %v3637_v16 = vld [vmem:[%s4295_s1 + $0xb8] sm:$0xff]   ;;  %v1026_v20 = vrot.slane %v3667_v13, 1 }
  0x46   : > { %3104 = vmatpush3.bf16.msra.mxu1 %v3609_v17  ;;  %3269 = vmatprep.subr.bf16.mxu0 %v3716_v1  ;;  %v3639_v17 = vld [vmem:[%s3809_s16 + $0x8] sm:$0xff]  }
  0x47   : > { %3086 = vmatmul.mubr.bf16.gmra.mrb[16].mxu1 %v3605_v14  ;;  %3125 = vmatprep.subr.bf16.mxu1 %v3716_v1  ;;  %v3636_v14 = vld [vmem:[%s4295_s1 + $0x1b8] sm:$0xff]   ;;  %v803_v24 = vrot.slane %v3639_v17, 1  ;;  %v1976_v17 = vrot.slane %v1974_v8, 3  ;;  %v3688_v8 = vld [vmem:[%s3809_s16 + $0x20] sm:$0xff]  }
  0x48   : > { %3230 = vmatmul.mubr.bf16.gmra.mrb[16].mxu0 %v1301_v22  ;;  %3105 = vmatprep.mubr.msk.bf16.mxu1 %vm3717_vm0, %v3716_v1  ;;  %v1525_v22 = vsel %vm1514_vm3, %v1522_v2, %v1524_v15  ;;  %v811_v2 = vrot.slane %v3661_v58, 1  ;;  %v3681_v58 = vld [vmem:[%s4295_s1 + $0x228] sm:$0xff]   ;;  %v2233_v13 = vrot.slane %v3688_v8, 3 }
  0x49   : > { %3249 = vmatprep.mubr.msk.bf16.mxu0 %vm3717_vm0, %v3716_v1  ;;  %v804_v28 = vsel %vm801_vm4, %v802_v23, %v803_v24  ;;  %v1980_v23 = vshrl.u32 %v3673_v18, 16 }
  0x4f   : > { %3106 = vmatmul.mubr.bf16.vlgmr.msra.gmra.mrb[0].mxu1 %v556_v30  ;;  %v1740_v30 = vsel %vm1514_vm3, %v1738_v25, %v1739_v26 }
  0x50   : > { %3250 = vmatmul.mubr.bf16.vlgmr.msra.gmra.mrb[0].mxu0 %v1517_v33  ;;  %3109 = vmatprep.mubr.msk.bf16.mxu1 %vm3717_vm0, %v3716_v1  ;;  %v805_v33 = vrot.slane %v3644_v29, 1  ;;  %v1982_v29 = vrot.slane %v1980_v23, 2 }
  0x51   : > { %3270 = vmatpush3.bf16.msra.mxu0 %v3614_v31  ;;  %3253 = vmatprep.mubr.msk.bf16.mxu0 %vm3717_vm0, %v3716_v1  ;;  %v3645_v31 = vld [vmem:[%s3809_s16 + $0x18] sm:$0xff]  }
  0x52   : > { %3271 = vmatprep.subr.bf16.mxu0 %v3716_v1  ;;  %3126 = vmatpush3.bf16.msra.mxu1 %v3618_v35  ;;  %v1741_v35 = vrot.slane %v3645_v31, 2  ;;  %v806_v37 = vsel %vm801_vm4, %v803_v24, %v805_v33  ;;  %v1983_v24 = vshll.u32 %v3673_v18, 16  ;;  %v3676_v31 = vld [vmem:[%s3809_s16 + $0x20] sm:$0xff]   ;;  %v3691_v18 = vld [vmem:[%s3809_s16 + $0x30] ss:$0 sps:$4 sm:$0x77]  }
  0x53   : > { %3127 = vmatprep.subr.bf16.mxu1 %v3716_v1 }
  0x54   : > { %v1742_v40 = vsel %vm1514_vm3, %v1739_v26, %v1741_v35  ;;  %v3672_v26 = vld [vmem:[%s3809_s16 + $0x14] sm:$0xff]  }
  0x55   : > { %3272 = vmatpush3.bf16.msra.mxu0 %v3615_v39  ;;  %v3649_v39 = vld [vmem:[%s3809_s16 + $0x18] sm:$0xff]  }
  0x56   : > { %3273 = vmatprep.subr.bf16.mxu0 %v3716_v1  ;;  %3128 = vmatpush3.bf16.msra.mxu1 %v3620_v41  ;;  %v3650_v41 = vld [vmem:[%s3809_s16 + $0x20] sm:$0xff]   ;;  %v807_v43 = vrot.slane %v3649_v39, 1 }
  0x57   : > { %3110 = vmatmul.mubr.bf16.gmra.mrb[4].mxu1 %v564_v45  ;;  %3129 = vmatprep.subr.bf16.mxu1 %v3716_v1  ;;  %v1743_v44 = vrot.slane %v3650_v41, 2  ;;  %v3651_v45 = vld [vmem:[%s4295_s1 + $0x1d8] sm:$0xff]  }
  0x58   : > { %3254 = vmatmul.mubr.bf16.gmra.mrb[4].mxu0 %v1519_v46  ;;  %3113 = vmatprep.mubr.msk.bf16.mxu1 %vm3717_vm0, %v3716_v1  ;;  %v3653_v46 = vld [vmem:[%s4295_s1 + $0xd8] sm:$0xff]   ;;  %v808_v49 = vsel %vm801_vm4, %v805_v33, %v807_v43  ;;  %v3671_v33 = vld [vmem:[%s4295_s1 + $0x208] sm:$0xff]  }
  0x59   : > { %3274 = vmatpush3.bf16.msra.mxu0 %v3619_v42  ;;  %3257 = vmatprep.mubr.msk.bf16.mxu0 %vm3717_vm0, %v3716_v1  ;;  %v3652_v42 = vld [vmem:[%s4295_s1 + $0xd0] sm:$0xff]   ;;  %v1744_v50 = vsel %vm1514_vm3, %v1741_v35, %v1743_v44  ;;  %v1989_v35 = vshrl.u32 %v3676_v31, 16 }
  0x5a   : > { %3275 = vmatprep.subr.bf16.mxu0 %v3716_v1  ;;  %3130 = vmatpush3.bf16.msra.mxu1 %v3624_v48  ;;  %v3655_v48 = vld [vmem:[%s3809_s16 + $0x20] sm:$0xff]  }
  0x5b   : > { %3131 = vmatprep.subr.bf16.mxu1 %v3716_v1  ;;  %v1991_v41 = vrot.slane %v1989_v35, 2 }
  0x5d   : > { %3276 = vmatpush3.bf16.msra.mxu0 %v3623_v53  ;;  %v809_v53 = vrot.slane %v3655_v48, 1 }
  0x5e   : > { %3277 = vmatprep.subr.bf16.mxu0 %v3716_v1  ;;  %3132 = vmatpush3.bf16.msra.mxu1 %v3625_v54  ;;  %v1745_v54 = vrot.slane %v3656_v51, 2 }
  0x5f   : > { %3114 = vmatmul.mubr.bf16.gmra.mrb[8].mxu1 %v572_v56  ;;  %3133 = vmatprep.subr.bf16.mxu1 %v3716_v1  ;;  %v3659_v56 = vld [vmem:[%s4295_s1 + $0xe8] sm:$0xff]   ;;  %v810_v57 = vsel %vm801_vm4, %v807_v43, %v809_v53 }
  0x60   : > { %3258 = vmatmul.mubr.bf16.gmra.mrb[8].mxu0 %v1521_v59  ;;  %3117 = vmatprep.mubr.msk.bf16.mxu1 %vm3717_vm0, %v3716_v1  ;;  %v3662_v59 = vld [vmem:[%s3809_s16 + $0x30] ss:$0 sps:$4 sm:$0x33]   ;;  %v1746_v60 = vsel %vm1514_vm3, %v1743_v44, %v1745_v54  ;;  %v3680_v43 = vld [vmem:[%s3809_s16 + $0x28] sm:$0xff]  }
  0x61   : > { %3278 = vmatpush3.bf16.msra.mxu0 %v3626_v55  ;;  %3261 = vmatprep.mubr.msk.bf16.mxu0 %vm3717_vm0, %v3716_v1  ;;  %v3658_v55 = vld [vmem:[%s4295_s1 + $0x1e8] sm:$0xff]   ;;  %v2001_v48 = vshll.u32 %v3680_v43, 16 }
  0x62   : > { %3134 = vmatpush3.bf16.msra.mxu1 %v3629_v61  ;;  %3279 = vmatprep.subr.bf16.mxu0 %v3716_v1  ;;  %v3660_v61 = vld [vmem:[%s4295_s1 + $0x1f0] sm:$0xff]  }
  0x63   : > { %3135 = vmatprep.subr.bf16.mxu1 %v3716_v1 }
  0x65   : > { %3280 = vmatpush3.bf16.msra.mxu0 %v3630_v3  ;;  %v1747_v3 = vrot.slane %v3662_v59, 2 }
  0x66   : > { %3136 = vmatpush3.bf16.msra.mxu1 %v3631_v4  ;;  %3281 = vmatprep.subr.bf16.mxu0 %v3716_v1  ;;  %v3664_v4 = vld [vmem:[%s4295_s1 + $0x1f8] sm:$0xff]  }
  0x67   : > { %3118 = vmatmul.mubr.bf16.gmra.mrb[12].mxu1 %v580_v6  ;;  %3137 = vmatprep.subr.bf16.mxu1 %v3716_v1  ;;  %v1966_v6 = vshll.u32 %v3668_v62, 16  ;;  %v3683_v62 = vld [vmem:[%s3809_s16 + $0x2c] ss:$0 sps:$4 sm:$0x11]  }
  0x68   : > { %3262 = vmatmul.mubr.bf16.gmra.mrb[12].mxu0 %v1523_v9  ;;  %3121 = vmatprep.mubr.msk.bf16.mxu1 %vm3717_vm0, %v3716_v1  ;;  %v3665_v9 = vld [vmem:[%s4295_s1 + $0xf8] sm:$0xff]  }
  0x69   : > { %3265 = vmatprep.mubr.msk.bf16.mxu0 %vm3717_vm0, %v3716_v1  ;;  %3282 = vmatpush3.bf16.msra.mxu0 %v3632_v10  ;;  %v812_v10 = vsel %vm801_vm4, %v809_v53, %v811_v2  ;;  %v1968_v15 = vrot.slane %v1966_v6, 3  ;;  %v3685_v6 = vld [vmem:[%s4295_s1 + $0x238] sm:$0xff]  }
  0x6a   : > { %3138 = vmatpush3.bf16.msra.mxu1 %v3635_v11  ;;  %3283 = vmatprep.subr.bf16.mxu0 %v3716_v1  ;;  %v1748_v11 = vsel %vm1514_vm3, %v1745_v54, %v1747_v3  ;;  %v2003_v54 = vrot.slane %v2001_v48, 3 }
  0x6b   : > { %3139 = vmatprep.subr.bf16.mxu1 %v3716_v1 }
  0x6d   : > { %3284 = vmatpush3.bf16.msra.mxu0 %v3636_v14  ;;  %v1965_v14 = vrot.slane %v1963_v5, 2 }
  0x6e   : > { %3140 = vmatpush3.bf16.msra.mxu1 %v3637_v16  ;;  %3305 = vmatprep.subr.bf16.mxu0 %v3716_v1  ;;  %v1973_v16 = vrot.slane %v1971_v7, 2 }
  0x6f   : > { %3122 = vmatmul.mubr.bf16.gmra.mrb[16].mxu1 %v588_v19  ;;  %3161 = vmatprep.subr.bf16.mxu1 %v3716_v1  ;;  %v1025_v19 = vrot.slane %v3666_v12, 1  ;;  %v1969_v21 = vor.u32 %v1968_v15, %v1965_v14  ;;  %v3687_v12 = vld [vmem:[%s3809_s16 + $0x10] sm:$0xff]  }
  0x70   : > { %3266 = vmatmul.mubr.bf16.gmra.mrb[16].mxu0 %v1525_v22  ;;  %3141 = vmatprep.mubr.msk.bf16.mxu1 %vm3717_vm0, %v3716_v1  ;;  %v1977_v22 = vor.u32 %v1976_v17, %v1973_v16  ;;  %v2229_v16 = vrot.slane %v3687_v12, 3 }
  0x71   : > { %3285 = vmatprep.mubr.msk.bf16.mxu0 %vm3717_vm0, %v3716_v1  ;;  %v1027_v25 = vsel %vm801_vm4, %v1025_v19, %v1026_v20 }
  0x77   : > { %3142 = vmatmul.mubr.bf16.vlgmr.msra.gmra.mrb[0].mxu1 %v804_v28  ;;  %v3670_v28 = vld [vmem:[%s4295_s1 + $0x200] sm:$0xff]  }
  0x78   : > { %3286 = vmatmul.mubr.bf16.vlgmr.msra.gmra.mrb[0].mxu0 %v1740_v30  ;;  %3145 = vmatprep.mubr.msk.bf16.mxu1 %vm3717_vm0, %v3716_v1  ;;  %v1985_v30 = vrot.slane %v1983_v24, 3 }
  0x79   : > { %3306 = vmatpush3.bf16.msra.mxu0 %v3642_v27  ;;  %3289 = vmatprep.mubr.msk.bf16.mxu0 %vm3717_vm0, %v3716_v1  ;;  %v1978_v27 = vsel %vm1961_vm5, %v1969_v21, %v1977_v22  ;;  %v2237_v21 = vrot.slane %v3691_v18, 3 }
  0x7a   : > { %3307 = vmatprep.subr.bf16.mxu0 %v3716_v1  ;;  %3162 = vmatpush3.bf16.msra.mxu1 %v3646_v32  ;;  %v1028_v32 = vrot.slane %v3672_v26, 1 }
  0x7b   : > { %3163 = vmatprep.subr.bf16.mxu1 %v3716_v1 }
  0x7d   : > { %3308 = vmatpush3.bf16.msra.mxu0 %v3643_v34  ;;  %v1986_v34 = vor.u32 %v1985_v30, %v1982_v29 }
  0x7e   : > { %3309 = vmatprep.subr.bf16.mxu0 %v3716_v1  ;;  %3164 = vmatpush3.bf16.msra.mxu1 %v3648_v36  ;;  %v1992_v36 = vshll.u32 %v3676_v31, 16 }
  0x7f   : > { %3146 = vmatmul.mubr.bf16.gmra.mrb[4].mxu1 %v806_v37  ;;  %3165 = vmatprep.subr.bf16.mxu1 %v3716_v1  ;;  %v1029_v37 = vsel %vm801_vm4, %v1026_v20, %v1028_v32  ;;  %v1987_v39 = vsel %vm1961_vm5, %v1977_v22, %v1986_v34  ;;  %v3690_v20 = vld [vmem:[%s3809_s16 + $0x18] sm:$0xff]  }
  0x80   : > { %3290 = vmatmul.mubr.bf16.gmra.mrb[4].mxu0 %v1742_v40  ;;  %3149 = vmatprep.mubr.msk.bf16.mxu1 %vm3717_vm0, %v3716_v1  ;;  %v3674_v40 = vld [vmem:[%s4295_s1 + $0x210] sm:$0xff]   ;;  %v2231_v22 = vrot.slane %v3690_v20, 3 }
  0x81   : > { %3310 = vmatpush3.bf16.msra.mxu0 %v3647_v38  ;;  %3293 = vmatprep.mubr.msk.bf16.mxu0 %vm3717_vm0, %v3716_v1  ;;  %v3675_v38 = vld [vmem:[%s3809_s16 + $0x1c] sm:$0xff]  }
  0x82   : > { %3311 = vmatprep.subr.bf16.mxu0 %v3716_v1  ;;  %3166 = vmatpush3.bf16.msra.mxu1 %v3652_v42  ;;  %v1994_v42 = vrot.slane %v1992_v36, 3  ;;  %v1030_v44 = vrot.slane %v3675_v38, 1  ;;  %v2232_v24 = vsel %vm2227_vm6, %v2229_v16, %v2231_v22 }
  0x83   : > { %3167 = vmatprep.subr.bf16.mxu1 %v3716_v1 }
  0x85   : > { %3312 = vmatpush3.bf16.msra.mxu0 %v3651_v45  ;;  %v1995_v45 = vor.u32 %v1994_v42, %v1991_v41 }
  0x86   : > { %3313 = vmatprep.subr.bf16.mxu0 %v3716_v1  ;;  %3168 = vmatpush3.bf16.msra.mxu1 %v3653_v46  ;;  %v3677_v46 = vld [vmem:[%s4295_s1 + $0x218] sm:$0xff]  }
  0x87   : > { %3150 = vmatmul.mubr.bf16.gmra.mrb[8].mxu1 %v808_v49  ;;  %3169 = vmatprep.subr.bf16.mxu1 %v3716_v1  ;;  %v1031_v49 = vsel %vm801_vm4, %v1028_v32, %v1030_v44  ;;  %v1996_v51 = vsel %vm1961_vm5, %v1986_v34, %v1995_v45 }
  0x88   : > { %3294 = vmatmul.mubr.bf16.gmra.mrb[8].mxu0 %v1744_v50  ;;  %3153 = vmatprep.mubr.msk.bf16.mxu1 %vm3717_vm0, %v3716_v1  ;;  %v3679_v50 = vld [vmem:[%s3809_s16 + $0x24] sm:$0xff]  }
  0x89   : > { %3314 = vmatpush3.bf16.msra.mxu0 %v3654_v47  ;;  %3297 = vmatprep.mubr.msk.bf16.mxu0 %vm3717_vm0, %v3716_v1  ;;  %v1998_v47 = vshrl.u32 %v3680_v43, 16 }
  0x8a   : > { %3170 = vmatpush3.bf16.msra.mxu1 %v3657_v52  ;;  %3315 = vmatprep.subr.bf16.mxu0 %v3716_v1  ;;  %v3678_v52 = vld [vmem:[%s4295_s1 + $0x220] sm:$0xff]  }
  0x8b   : > { %3171 = vmatprep.subr.bf16.mxu1 %v3716_v1  ;;  %v2000_v53 = vrot.slane %v1998_v47, 2 }
  0x8d   : > { %3316 = vmatpush3.bf16.msra.mxu0 %v3658_v55  ;;  %v3684_v55 = vld [vmem:[%s3809_s16 + $0x30] ss:$0 sps:$4 sm:$0x77]  }
  0x8e   : > { %3172 = vmatpush3.bf16.msra.mxu1 %v3659_v56  ;;  %3317 = vmatprep.subr.bf16.mxu0 %v3716_v1  ;;  %v1032_v56 = vrot.slane %v3679_v50, 1  ;;  %v2007_v59 = vshrl.u32 %v3684_v55, 16 }
  0x8f   : > { %3154 = vmatmul.mubr.bf16.gmra.mrb[12].mxu1 %v810_v57  ;;  %3173 = vmatprep.subr.bf16.mxu1 %v3716_v1  ;;  %v2004_v57 = vor.u32 %v2003_v54, %v2000_v53 }
  0x90   : > { %3298 = vmatmul.mubr.bf16.gmra.mrb[12].mxu0 %v1746_v60  ;;  %3157 = vmatprep.mubr.msk.bf16.mxu1 %vm3717_vm0, %v3716_v1  ;;  %v2010_v60 = vshll.u32 %v3684_v55, 16  ;;  %v2009_v2 = vrot.slane %v2007_v59, 2 }
  0x91   : > { %3301 = vmatprep.mubr.msk.bf16.mxu0 %vm3717_vm0, %v3716_v1  ;;  %3318 = vmatpush3.bf16.msra.mxu0 %v3660_v61  ;;  %v1033_v61 = vsel %vm801_vm4, %v1030_v44, %v1032_v56  ;;  %v2005_v63 = vsel %vm1961_vm5, %v1995_v45, %v2004_v57 }
  0x92   : > { %3174 = vmatpush3.bf16.msra.mxu1 %v3663_v0  ;;  %3319 = vmatprep.subr.bf16.mxu0 %v3716_v1  ;;  %v3682_v0 = vld [vmem:[%s4295_s1 + $0x230] sm:$0xff]   ;;  %v2012_v3 = vrot.slane %v2010_v60, 3 }
  0x93   : > { %3175 = vmatprep.subr.bf16.mxu1 %v3716_v1 }
  0x94   : > { %v2013_v5 = vor.u32 %v2012_v3, %v2009_v2 }
  0x95   : > { %3320 = vmatpush3.bf16.msra.mxu0 %v3664_v4  ;;  %v1034_v4 = vrot.slane %v3683_v62, 1  ;;  %v4258_v62 = vld [vmem:[%s4296_s2] ss:$0 sm:$0xff] }
  0x96   : > { %3176 = vmatpush3.bf16.msra.mxu1 %v3665_v9  ;;  %3341 = vmatprep.subr.bf16.mxu0 %v3716_v1  ;;  %v3689_v9 = vld [vmem:[%s3809_s16 + $0x28] sm:$0xff]  }
  0x97   : > { %3158 = vmatmul.mubr.bf16.gmra.mrb[16].mxu1 %v812_v10  ;;  %3377 = vmatprep.subr.bf16.mxu1 %v3716_v1  ;;  %v1035_v7 = vsel %vm801_vm4, %v1032_v56, %v1034_v4  ;;  %v2014_v10 = vsel %vm1961_vm5, %v2004_v57, %v2013_v5  ;;  %v2235_v14 = vrot.slane %v3689_v9, 3 }
  0x98   : > { %3302 = vmatmul.mubr.bf16.gmra.mrb[16].mxu0 %v1748_v11  ;;  %3177 = vmatprep.mubr.msk.bf16.mxu1 %vm3717_vm0, %v3716_v1  ;;  %v3686_v11 = vld [vmem:[%s3809_s16 + $0x8] sm:$0xf8]  }
  0x99   : > { %3321 = vmatprep.mubr.msk.bf16.mxu0 %vm3717_vm0, %v3716_v1  ;;  %v2228_v15 = vrot.slane %v3686_v11, 3  ;;  %v2236_v17 = vsel %vm2227_vm6, %v2233_v13, %v2235_v14  ;;  %v2238_v23 = vsel %vm2227_vm6, %v2235_v14, %v2237_v21 }
  0x9b   : > { %v2230_v19 = vsel %vm2227_vm6, %v2228_v15, %v2229_v16 }
  0x9f   : > { %3178 = vmatmul.mubr.bf16.vlgmr.msra.gmra.mrb[0].mxu1 %v1027_v25  ;;  %v2234_v25 = vsel %vm2227_vm6, %v2231_v22, %v2233_v13 }
  0xa0   : > { %3322 = vmatmul.mubr.bf16.vlgmr.msra.gmra.mrb[0].mxu0 %v1978_v27  ;;  %3181 = vmatprep.mubr.msk.bf16.mxu1 %vm3717_vm0, %v3716_v1 }
  0xa1   : > { %3342 = vmatpush3.bf16.msra.mxu0 %v3670_v28  ;;  %3325 = vmatprep.mubr.msk.bf16.mxu0 %vm3717_vm0, %v3716_v1 }
  0xa2   : > { %3343 = vmatprep.subr.bf16.mxu0 %v3716_v1  ;;  %3385 = vmatpush3.bf16.msra.mxu1 %v3670_v28 }
  0xa3   : > { %3378 = vmatprep.subr.bf16.mxu1 %v3716_v1 }
  0xa5   : > { %3344 = vmatpush3.bf16.msra.mxu0 %v3671_v33 }
  0xa6   : > { %3345 = vmatprep.subr.bf16.mxu0 %v3716_v1  ;;  %3386 = vmatpush3.bf16.msra.mxu1 %v3671_v33 }
  0xa7   : > { %3182 = vmatmul.mubr.bf16.gmra.mrb[4].mxu1 %v1029_v37  ;;  %3379 = vmatprep.subr.bf16.mxu1 %v3716_v1 }
  0xa8   : > { %3326 = vmatmul.mubr.bf16.gmra.mrb[4].mxu0 %v1987_v39  ;;  %3185 = vmatprep.mubr.msk.bf16.mxu1 %vm3717_vm0, %v3716_v1 }
  0xa9   : > { %3346 = vmatpush3.bf16.msra.mxu0 %v3674_v40  ;;  %3329 = vmatprep.mubr.msk.bf16.mxu0 %vm3717_vm0, %v3716_v1 }
  0xaa   : > { %3347 = vmatprep.subr.bf16.mxu0 %v3716_v1  ;;  %3387 = vmatpush3.bf16.msra.mxu1 %v3674_v40 }
  0xab   : > { %3380 = vmatprep.subr.bf16.mxu1 %v3716_v1 }
  0xad   : > { %3348 = vmatpush3.bf16.msra.mxu0 %v3677_v46 }
  0xae   : > { %3349 = vmatprep.subr.bf16.mxu0 %v3716_v1  ;;  %3388 = vmatpush3.bf16.msra.mxu1 %v3677_v46 }
  0xaf   : > { %3186 = vmatmul.mubr.bf16.gmra.mrb[8].mxu1 %v1031_v49  ;;  %3381 = vmatprep.subr.bf16.mxu1 %v3716_v1 }
  0xb0   : > { %3330 = vmatmul.mubr.bf16.gmra.mrb[8].mxu0 %v1996_v51  ;;  %3189 = vmatprep.mubr.msk.bf16.mxu1 %vm3717_vm0, %v3716_v1 }
  0xb1   : > { %3350 = vmatpush3.bf16.msra.mxu0 %v3678_v52  ;;  %3333 = vmatprep.mubr.msk.bf16.mxu0 %vm3717_vm0, %v3716_v1 }
  0xb2   : > { %3389 = vmatpush3.bf16.msra.mxu1 %v3678_v52  ;;  %3351 = vmatprep.subr.bf16.mxu0 %v3716_v1 }
  0xb3   : > { %3382 = vmatprep.subr.bf16.mxu1 %v3716_v1 }
  0xb5   : > { %3352 = vmatpush3.bf16.msra.mxu0 %v3681_v58 }
  0xb6   : > { %3390 = vmatpush3.bf16.msra.mxu1 %v3681_v58  ;;  %3353 = vmatprep.subr.bf16.mxu0 %v3716_v1 }
  0xb7   : > { %3190 = vmatmul.mubr.bf16.gmra.mrb[12].mxu1 %v1033_v61  ;;  %3383 = vmatprep.subr.bf16.mxu1 %v3716_v1 }
  0xb8   : > { %3334 = vmatmul.mubr.bf16.gmra.mrb[12].mxu0 %v2005_v63  ;;  %3193 = vmatprep.mubr.msk.bf16.mxu1 %vm3717_vm0, %v3716_v1 }
  0xb9   : > { %3337 = vmatprep.mubr.msk.bf16.mxu0 %vm3717_vm0, %v3716_v1  ;;  %3354 = vmatpush3.bf16.msra.mxu0 %v3682_v0 }
  0xba   : > { %3391 = vmatpush3.bf16.msra.mxu1 %v3682_v0  ;;  %3355 = vmatprep.subr.bf16.mxu0 %v3716_v1 }
  0xbb   : > { %3384 = vmatprep.subr.bf16.mxu1 %v3716_v1 }
  0xbd   : > { %3356 = vmatpush3.bf16.msra.mxu0 %v3685_v6 }
  0xbe   : > { %3392 = vmatpush3.bf16.msra.mxu1 %v3685_v6 }
  0xbf   : > { %3194 = vmatmul.mubr.bf16.gmra.mrb[16].mxu1 %v1035_v7 }
  0xc0   : > { %3338 = vmatmul.mubr.bf16.gmra.mrb[16].mxu0 %v2014_v10  ;;  %3369 = vmatprep.mubr.msk.bf16.mxu1 %vm3717_vm0, %v3716_v1 }
  0xc1   : > { %3357 = vmatprep.mubr.msk.bf16.mxu0 %vm3717_vm0, %v3716_v1 }
  0xc7   : > { %3370 = vmatmul.mubr.bf16.vlgmr.msra.gmra.mrb[20].mxu1 %v2236_v17 }
  0xc8   : > { %3358 = vmatmul.mubr.bf16.vlgmr.msra.gmra.mrb[0].mxu0 %v2230_v19  ;;  %3373 = vmatprep.mubr.msk.bf16.mxu1 %vm3717_vm0, %v3716_v1 }
  0xc9   : > { %3361 = vmatprep.mubr.msk.bf16.mxu0 %vm3717_vm0, %v3716_v1 }
  0xcf   : > { %3374 = vmatmul.mubr.bf16.gmra.mrb[24].mxu1 %v2238_v23 }
  0xd0   : > { %3362 = vmatmul.mubr.bf16.gmra.mrb[4].mxu0 %v2232_v24 }
  0xd1   : > { %3365 = vmatprep.mubr.msk.bf16.mxu0 %vm3717_vm0, %v3716_v1 }
  0xd8   : > { %3366 = vmatmul.mubr.bf16.gmra.mrb[8].mxu0 %v2234_v25 }
 0x172   : > { %v1123_v26 = vpop.f32.mrb[0].mxu1 }
 0x173   : > { %v3179_v27 = vpop.f32.mrb[1].mxu1 }
 0x174   : > { %v1126_v28 = vpop.f32.mrb[2].mxu1 }
 0x175   : > { %v3180_v29 = vpop.f32.mrb[3].mxu1 }
 0x17a   : > { %v4247_v30 = vpop.f32.mrb[4].mxu1 }
 0x17b   : > { %v3183_v31 = vpop.f32.mrb[5].mxu1 }
 0x17c   : > { %v4249_v32 = vpop.f32.mrb[6].mxu1 }
 0x17d   : > { %v3184_v33 = vpop.f32.mrb[7].mxu1 }
 0x182   : > { %v4251_v34 = vpop.f32.mrb[8].mxu1 }
 0x183   : > { %v3187_v35 = vpop.f32.mrb[9].mxu1 }
 0x184   : > { %v4253_v36 = vpop.f32.mrb[10].mxu1 }
 0x185   : > { %v3188_v37 = vpop.f32.mrb[11].mxu1 }
 0x18a   : > { %v1147_v1 = vpop.f32.mrb[12].mxu1 }
 0x18b   : > { %v2126_v38 = vpop.f32.mrb[12].mxu0  ;;  %v3191_v39 = vpop.f32.mrb[13].mxu1 }
 0x18c   : > { %v3399_v40 = vadd.f32 %v2126_v38, %v1147_v1  ;;  %v3335_v41 = vpop.f32.mrb[13].mxu0  ;;  %v1150_v42 = vpop.f32.mrb[14].mxu1 }
 0x18d   : > { %v2129_v43 = vpop.f32.mrb[14].mxu0  ;;  %v3192_v44 = vpop.f32.mrb[15].mxu1 }
 0x18e   : > { %v3401_v45 = vadd.f32 %v2129_v43, %v1150_v42  ;;  %v3336_v46 = vpop.f32.mrb[15].mxu0 }
 0x192   : > { %v1155_v47 = vpop.f32.mrb[16].mxu1 }
 0x193   : > { %v2134_v48 = vpop.f32.mrb[16].mxu0  ;;  %v3195_v49 = vpop.f32.mrb[17].mxu1 }
 0x194   : > { %v3403_v50 = vadd.f32 %v2134_v48, %v1155_v47  ;;  %v3339_v51 = vpop.f32.mrb[17].mxu0  ;;  %v1158_v52 = vpop.f32.mrb[18].mxu1 }
 0x195   : > { %v2137_v53 = vpop.f32.mrb[18].mxu0  ;;  %v3196_v54 = vpop.f32.mrb[19].mxu1 }
 0x196   : > { %v3405_v55 = vadd.f32 %v2137_v53, %v1158_v52  ;;  %v3340_v56 = vpop.f32.mrb[19].mxu0 }
 0x19a   : > { %v2350_v57 = vpop.f32.mrb[20].mxu1 }
 0x19b   : > { %v2326_v58 = vpop.f32.mrb[0].mxu0  ;;  %v3400_v59 = vadd.f32 %v3399_v40, %v2350_v57  ;;  %v3371_v60 = vpop.f32.mrb[21].mxu1 }
 0x19c   : > { %v3393_v61 = vadd.f32 %v2326_v58, %v1123_v26  ;;  %v3359_v63 = vpop.f32.mrb[1].mxu0  ;;  %v2353_v0 = vpop.f32.mrb[22].mxu1 }
 0x19d   : > { %v2404_v2 = vmul.f32 0.083333336, %v3400_v59  ;;  %v2329_v3 = vpop.f32.mrb[2].mxu0  ;;  %v3402_v4 = vadd.f32 %v3401_v45, %v2353_v0  ;;  %v3372_v5 = vpop.f32.mrb[23].mxu1 }
 0x19e   : > { %v2398_v6 = vmul.f32 0.083333336, %v3393_v61  ;;  %v3394_v7 = vadd.f32 %v2329_v3, %v1126_v28  ;;  %v3360_v8 = vpop.f32.mrb[3].mxu0 }
 0x19f   : > { %v2421_v9 = vadd.f32 %v4258_v62, %v2404_v2  ;;  %v2405_v10 = vmul.f32 0.083333336, %v3402_v4 }
 0x1a0   : > { %v2415_v11 = vadd.f32 %v4258_v62, %v2398_v6  ;;  %v2399_v12 = vmul.f32 0.083333336, %v3394_v7 }
 0x1a1   : > { %vm2431_vm7 = vcmp.ge.f32.partialorder %v2421_v9, 0.0  ;;  %v2441_v13 = vmul.f32 0.2, %v2421_v9  ;;  %v2422_v14 = vadd.f32 %v4258_v62, %v2405_v10 }
 0x1a2   : > { %vm2425_vm8 = vcmp.ge.f32.partialorder %v2415_v11, 0.0  ;;  %v2435_v15 = vmul.f32 0.2, %v2415_v11  ;;  %v2416_v16 = vadd.f32 %v4258_v62, %v2399_v12  ;;  %v2358_v17 = vpop.f32.mrb[24].mxu1 }
 0x1a3   : > { %vm2432_vm9 = vcmp.ge.f32.partialorder %v2422_v14, 0.0  ;;  %v2442_v18 = vmul.f32 0.2, %v2422_v14  ;;  %v2334_v19 = vpop.f32.mrb[4].mxu0  ;;  %v3404_v20 = vadd.f32 %v3403_v50, %v2358_v17  ;;  %v3375_v21 = vpop.f32.mrb[25].mxu1  ;;  %v2451_v22 = vsel %vm2431_vm7, %v2421_v9, %v2441_v13 }
 0x1a4   : > { %vm2426_vm10 = vcmp.ge.f32.partialorder %v2416_v16, 0.0  ;;  %v2436_v23 = vmul.f32 0.2, %v2416_v16  ;;  %v3395_v24 = vadd.f32 %v2334_v19, %v4247_v30  ;;  %v3363_v25 = vpop.f32.mrb[5].mxu0  ;;  %v2361_v26 = vpop.f32.mrb[26].mxu1  ;;  %v2445_v27 = vsel %vm2425_vm8, %v2415_v11, %v2435_v15 }
 0x1a5   : > { %v2452_v28 = vsel %vm2432_vm9, %v2422_v14, %v2442_v18  ;;  %v2406_v29 = vmul.f32 0.083333336, %v3404_v20  ;;  %v2337_v31 = vpop.f32.mrb[6].mxu0  ;;  %v3406_v33 = vadd.f32 %v3405_v55, %v2361_v26  ;;  %v3376_v35 = vpop.f32.mrb[27].mxu1 }
 0x1a6   : > { %v2446_v37 = vsel %vm2426_vm10, %v2416_v16, %v2436_v23  ;;  %v2925_v1 = vpack.c.bf16 %v2452_v28, %v2451_v22  ;;  %v2400_v38 = vmul.f32 0.083333336, %v3395_v24  ;;  %v3396_v30 = vadd.f32 %v2337_v31, %v4249_v32  ;;  %v3364_v39 = vpop.f32.mrb[7].mxu0 }
 0x1a7   : > { %v2910_v40 = vpack.c.bf16 %v2446_v37, %v2445_v27  ;;  %v2423_v41 = vadd.f32 %v4258_v62, %v2406_v29  ;;  %v2407_v42 = vmul.f32 0.083333336, %v3406_v33 }
 0x1a8   : > { %2934 = vst [vmem:[%s4269_s7 + $0x18] sm:$0xff] %v2925_v1   ;;  %v2417_v43 = vadd.f32 %v4258_v62, %v2400_v38  ;;  %v2401_v44 = vmul.f32 0.083333336, %v3396_v30 }
 0x1a9   : > { %2911 = vst [vmem:[%s4269_s7] sm:$0xff] %v2910_v40   ;;  %v2443_v45 = vmul.f32 0.2, %v2423_v41  ;;  %v2424_v46 = vadd.f32 %v4258_v62, %v2407_v42  ;;  %vm2433_vm12 = vcmp.ge.f32.partialorder %v2423_v41, 0.0 }
 0x1aa   : > { %vm2427_vm11 = vcmp.ge.f32.partialorder %v2417_v43, 0.0  ;;  %v2437_v47 = vmul.f32 0.2, %v2417_v43  ;;  %v2418_v48 = vadd.f32 %v4258_v62, %v2401_v44 }
 0x1ab   : > { %vm2434_vm13 = vcmp.ge.f32.partialorder %v2424_v46, 0.0  ;;  %v2444_v32 = vmul.f32 0.2, %v2424_v46  ;;  %v2342_v49 = vpop.f32.mrb[8].mxu0  ;;  %v2453_v54 = vsel %vm2433_vm12, %v2423_v41, %v2443_v45 }
 0x1ac   : > { %vm2428_vm14 = vcmp.ge.f32.partialorder %v2418_v48, 0.0  ;;  %v2438_v50 = vmul.f32 0.2, %v2418_v48  ;;  %v3397_v51 = vadd.f32 %v2342_v49, %v4251_v34  ;;  %v3367_v52 = vpop.f32.mrb[9].mxu0  ;;  %v2447_v53 = vsel %vm2427_vm11, %v2417_v43, %v2437_v47 }
 0x1ad   : > { %v2454_v55 = vsel %vm2434_vm13, %v2424_v46, %v2444_v32  ;;  %v2345_v56 = vpop.f32.mrb[10].mxu0 }
 0x1ae   : > { %v2448_v57 = vsel %vm2428_vm14, %v2418_v48, %v2438_v50  ;;  %v2930_v58 = vpack.c.bf16 %v2454_v55, %v2453_v54  ;;  %v2402_v59 = vmul.f32 0.083333336, %v3397_v51  ;;  %v3398_v60 = vadd.f32 %v2345_v56, %v4253_v36  ;;  %v3368_v61 = vpop.f32.mrb[11].mxu0 }
 0x1af   : > { %v2915_v63 = vpack.c.bf16 %v2448_v57, %v2447_v53 }
 0x1b0   : > { %2935 = vst [vmem:[%s4269_s7 + $0x20] sm:$0xff] %v2930_v58   ;;  %v2419_v0 = vadd.f32 %v4258_v62, %v2402_v59  ;;  %v2403_v2 = vmul.f32 0.083333336, %v3398_v60 }
 0x1b1   : > { %2932 = vst [vmem:[%s4269_s7 + $0x8] sm:$0xff] %v2915_v63  }
 0x1b2   : > { %v2439_v3 = vmul.f32 0.2, %v2419_v0  ;;  %v2420_v34 = vadd.f32 %v4258_v62, %v2403_v2  ;;  %vm2429_vm15 = vcmp.ge.f32.partialorder %v2419_v0, 0.0 }
 0x1b4   : > { %vm2430_vm0 = vcmp.ge.f32.partialorder %v2420_v34, 0.0  ;;  %v2440_v4 = vmul.f32 0.2, %v2420_v34  ;;  %v2449_v5 = vsel %vm2429_vm15, %v2419_v0, %v2439_v3 }
 0x1b6   : > { %v2450_v6 = vsel %vm2430_vm0, %v2420_v34, %v2440_v4 }
 0x1b7   : > { %v2920_v7 = vpack.c.bf16 %v2450_v6, %v2449_v5 }
 0x1b9   : > { %2933 = vst [vmem:[%s4269_s7 + $0x10] sm:$0xff] %v2920_v7  }
 0x1ba PF: > { %s13_s14 = sadd.s32 1, %s3714_s14   ;;  %s4298_s12 = smov %s3710_s13 }
 0x1bb   : > { %p10_p5 = scmp.ge.s32.totalorder %s13_s14, 4   ;;  %s4299_s13 = smov %s4301_s15 }
 0x1bd   :  { %12 = sbr.rel (!%p10_p5) target bundleno = 2 (0x2), region = 84 }

// kernel: sg2_discriminator_forward.20
= control target key start
LH: loop header
LB: loop body
LE: loop exit
PB: predicated region body
PF: predicated region fallthrough
CT: control target
= control target key end

     0   :  { %s765_s15 = smov 0   ;;  %s767_s16 = smov 0   ;;  %s833_s0 = inlined_call_operand.vmem [shape: bf16[2,16,128], index: 0, kind: input, shape index: {}]   ;;  %s834_s1 = inlined_call_operand.vmem [shape: bf16[1,128,128], index: 1, kind: input, shape index: {}]   ;;  %s835_s2 = inlined_call_operand.vmem [shape: f32[1,128], index: 2, kind: input, shape index: {}]   ;;  %s836_s3 = inlined_call_operand.vmem [shape: bf16[2,16,128], index: 3, kind: input, shape index: {}]   ;;  %s837_s4 = inlined_call_operand.vmem [shape: bf16[2,16,128], index: 4, kind: output, shape index: {}]  }
   0x1   :  { %s769_s17 = smov 0  }
   0x2 LB: > { %s33_s18 = sadd.s32 1, %s732_s16  ;;  %p615_p0 = scmp.ge.s32.totalorder %s736_s17, 1  ;;  %s736_s17 = sphi %s769_s17, %s14_s17   ;;  %s732_s16 = sphi %s767_s16, %s839_s16   ;;  %s728_s15 = sphi %s765_s15, %s838_s15  }
   0x3   : > { %p35_p1 = scmp.ge.s32.totalorder %s33_s18, 2  ;;  %p227_p2 = scmp.lt.s32.totalorder %s736_s17, 3 }
   0x5   : > { %s841_s18 = smov (%p35_p1, %s33_s18), 0  ;;  %p228_p3 = pnand %p615_p0, %p227_p2 }
   0x6   : > { %v705_v0 = vld [vmem:[%s834_s1] sm:$0xff] (!%p228_p3)   ;;  %v738_v1 = vmov (!%p228_p3), 0.0   ;;  %v706_v2 = vld [vmem:[%s834_s1 + $0x8] sm:$0xff] (!%p228_p3)   ;;  %vm739_vm0 = vmmov (!%p228_p3), 0   ;;  %p278_p4 = scmp.lt.s32.totalorder (!%p228_p3), %s728_s15, 1  ;;  %v707_v3 = vld [vmem:[%s834_s1 + $0x10] sm:$0xff] (!%p228_p3)  }
   0x7   : > { %231 = sbr.rel (%p228_p3) target bundleno = 264 (0x108), region = 36  ;;  %659 = vmatprep.subr.bf16.mxu0 (!%p228_p3), %v738_v1  ;;  %675 = vmatprep.mubr.msk.bf16.mxu0 (!%p228_p3), %vm739_vm0, %v738_v1  ;;  %v708_v4 = vld [vmem:[%s834_s1 + $0x18] sm:$0xff] (!%p228_p3)   ;;  %v709_v5 = vld [vmem:[%s834_s1 + $0x20] sm:$0xff] (!%p228_p3)   ;;  %v710_v6 = vld [vmem:[%s834_s1 + $0x28] sm:$0xff] (!%p228_p3)  }
   0x8   : > { %660 = vmatpush3.bf16.msra.mxu0 (!%p228_p3), %v705_v0  ;;  %v711_v7 = vld [vmem:[%s834_s1 + $0x30] sm:$0xff] (!%p228_p3)   ;;  %v712_v8 = vld [vmem:[%s834_s1 + $0x38] sm:$0xff] (!%p228_p3)   ;;  %v631_v12 = vld [vmem:[%s835_s2] ss:$0 sm:$0xff] (!%p228_p3) }
   0x9   : > { %661 = vmatprep.subr.bf16.mxu0 (!%p228_p3), %v738_v1 }
   0xc   : > { %662 = vmatpush3.bf16.msra.mxu0 (!%p228_p3), %v706_v2 }
   0xd   : > { %663 = vmatprep.subr.bf16.mxu0 (!%p228_p3), %v738_v1 }
   0xe   : > { %s843_s15 = smov (!%p278_p4, %s728_s15), 1 }
   0xf   : > { %s792_s25 = sshll.u32 %s843_s15, 3 }
  0x10   : > { %s285_s28 = scalar_lea.vmem %s833_s0, %s792_s25  ;;  %664 = vmatpush3.bf16.msra.mxu0 %v707_v3  ;;  %s305_s15 = scalar_lea.vmem %s836_s3, %s792_s25 }
  0x11   : > { %665 = vmatprep.subr.bf16.mxu0 %v738_v1  ;;  %v713_v9 = vld [vmem:[%s285_s28] sm:$0xff]   ;;  %s313_s23 = scalar_lea.vmem %s837_s4, %s792_s25 }
  0x12   : > { %v642_v10 = vld [vmem:[%s305_s15] sm:$0xff]  }
  0x13   : > { %v643_v14 = vunpack.c.l.bf16 %v642_v10  ;;  %v644_v19 = vunpack.c.h.bf16 %v642_v10 }
  0x14   : > { %666 = vmatpush3.bf16.msra.mxu0 %v708_v4 }
  0x15   : > { %667 = vmatprep.subr.bf16.mxu0 %v738_v1 }
  0x18   : > { %668 = vmatpush3.bf16.msra.mxu0 %v709_v5 }
  0x19   : > { %669 = vmatprep.subr.bf16.mxu0 %v738_v1 }
  0x1c   : > { %670 = vmatpush3.bf16.msra.mxu0 %v710_v6 }
  0x1d   : > { %671 = vmatprep.subr.bf16.mxu0 %v738_v1 }
  0x20   : > { %672 = vmatpush3.bf16.msra.mxu0 %v711_v7 }
  0x21   : > { %673 = vmatprep.subr.bf16.mxu0 %v738_v1 }
  0x24   : > { %674 = vmatpush3.bf16.msra.mxu0 %v712_v8 }
  0x27   : > { %676 = vmatmul.mubr.bf16.vlgmr.msra.gmra.mrb[0].mxu0 %v713_v9 }
  0xfa   : > { %v429_v11 = vpop.f32.mrb[0].mxu0 }
  0xfb   : > { %v445_v13 = vmul.f32 0.24253562, %v429_v11  ;;  %v677_v15 = vpop.f32.mrb[1].mxu0 }
  0xfc   : > { %v432_v16 = vpop.f32.mrb[2].mxu0 }
  0xfd   : > { %v454_v17 = vadd.f32 %v631_v12, %v445_v13  ;;  %v446_v18 = vmul.f32 0.24253562, %v432_v16  ;;  %v678_v20 = vpop.f32.mrb[3].mxu0 }
  0xff   : > { %v460_v21 = vadd.f32 %v643_v14, %v454_v17  ;;  %v455_v22 = vadd.f32 %v631_v12, %v446_v18 }
 0x101   : > { %v461_v23 = vadd.f32 %v644_v19, %v455_v22  ;;  %v462_v24 = vmul.f32 0.70710677, %v460_v21 }
 0x103   : > { %v463_v25 = vmul.f32 0.70710677, %v461_v23 }
 0x105   : > { %v648_v26 = vpack.c.bf16 %v463_v25, %v462_v24 }
 0x107   : > { %649 = vst [vmem:[%s313_s23] sm:$0xff] %v648_v26  }
 0x108 PF: > { %s14_s17 = sadd.s32 1, %s736_s17   ;;  %s838_s15 = smov %s732_s16 }
 0x109   : > { %p11_p5 = scmp.ge.s32.totalorder %s14_s17, 4   ;;  %s839_s16 = smov %s841_s18 }
 0x10b   :  { %13 = sbr.rel (!%p11_p5) target bundleno = 2 (0x2), region = 83 }

// kernel: sg2_discriminator_forward.18
= control target key start
LH: loop header
LB: loop body
LE: loop exit
PB: predicated region body
PF: predicated region fallthrough
CT: control target
= control target key end

     0   :  { %s2429_s12 = smov 0   ;;  %s2431_s13 = smov 0   ;;  %s2734_s0 = inlined_call_operand.vmem [shape: bf16[2,42,128], index: 0, kind: input, shape index: {}]   ;;  %s2735_s1 = inlined_call_operand.vmem [shape: bf16[9,128,128], index: 1, kind: input, shape index: {}]   ;;  %s2736_s2 = inlined_call_operand.vmem [shape: f32[1,128], index: 2, kind: input, shape index: {}]   ;;  %s2737_s3 = inlined_call_operand.vmem [shape: bf16[2,24,128], index: 3, kind: output, shape index: {}]  }
   0x1   :  { %s2433_s14 = smov 0  }
   0x2 LB: > { %s32_s15 = sadd.s32 1, %s2403_s13  ;;  %p1733_p0 = scmp.ge.s32.totalorder %s2407_s14, 1  ;;  %s2407_s14 = sphi %s2433_s14, %s13_s14   ;;  %s2403_s13 = sphi %s2431_s13, %s2739_s13   ;;  %s2399_s12 = sphi %s2429_s12, %s2738_s12  }
   0x3   : > { %p34_p1 = scmp.ge.s32.totalorder %s32_s15, 2  ;;  %p187_p2 = scmp.lt.s32.totalorder %s2407_s14, 3 }
   0x5   : > { %s2741_s15 = smov (%p34_p1, %s32_s15), 0  ;;  %p188_p3 = pnand %p1733_p0, %p187_p2 }
   0x6   : > { %v2295_v0 = vld [vmem:[%s2735_s1] sm:$0xff] (!%p188_p3)   ;;  %v2297_v2 = vld [vmem:[%s2735_s1 + $0x8] sm:$0xff] (!%p188_p3)   ;;  %p228_p4 = scmp.lt.s32.totalorder (!%p188_p3), %s2399_s12, 1  ;;  %v2299_v4 = vld [vmem:[%s2735_s1 + $0x10] sm:$0xff] (!%p188_p3)   ;;  %vm870_vm0 = vsmask.f32 (!%p188_p3), 4352 }
   0x7   : > { %191 = sbr.rel (%p188_p3) target bundleno = 395 (0x18b), region = 32  ;;  %v2296_v1 = vld [vmem:[%s2735_s1 + $0x100] sm:$0xff] (!%p188_p3)   ;;  %2058 = vmatprep.subr.bf16.mxu1 (!%p188_p3), %v2295_v0  ;;  %v2298_v3 = vld [vmem:[%s2735_s1 + $0x108] sm:$0xff] (!%p188_p3)   ;;  %v2300_v5 = vld [vmem:[%s2735_s1 + $0x110] sm:$0xff] (!%p188_p3)   ;;  %vm432_vm1 = vsmask.f32 (!%p188_p3), 7424 }
   0x8   : > { %2138 = vmatprep.subr.bf16.mxu0 (!%p188_p3), %v2296_v1  ;;  %2059 = vmatpush3.bf16.msra.mxu1 (!%p188_p3), %v2295_v0  ;;  %v2301_v6 = vld [vmem:[%s2735_s1 + $0x18] sm:$0xff] (!%p188_p3)   ;;  %v2303_v8 = vld [vmem:[%s2735_s1 + $0x20] sm:$0xff] (!%p188_p3)   ;;  %v2305_v10 = vld [vmem:[%s2735_s1 + $0x28] sm:$0xff] (!%p188_p3)   ;;  %vm586_vm2 = vcmask (!%p188_p3), 1046528   ;;  %vm1161_vm3 = vcmask (!%p188_p3), 1045504   ;;  %vm728_vm4 = vcmask (!%p188_p3), 1044480  }
   0x9   : > { %2139 = vmatpush3.bf16.msra.mxu0 (!%p188_p3), %v2296_v1  ;;  %2060 = vmatprep.subr.bf16.mxu1 (!%p188_p3), %v2297_v2  ;;  %v2302_v7 = vld [vmem:[%s2735_s1 + $0x118] sm:$0xff] (!%p188_p3)   ;;  %v2304_v9 = vld [vmem:[%s2735_s1 + $0x120] sm:$0xff] (!%p188_p3)   ;;  %v2306_v12 = vld [vmem:[%s2735_s1 + $0x128] sm:$0xff] (!%p188_p3)   ;;  %vm1303_vm5 = vsmask.f32 (!%p188_p3), 5376 }
   0xa   : > { %2140 = vmatprep.subr.bf16.mxu0 (!%p188_p3), %v2298_v3  ;;  %v2307_v15 = vld [vmem:[%s2735_s1 + $0x30] sm:$0xff] (!%p188_p3)   ;;  %v2309_v21 = vld [vmem:[%s2735_s1 + $0x38] sm:$0xff] (!%p188_p3)   ;;  %v2312_v30 = vld [vmem:[%s2735_s1 + $0x40] sm:$0xff] (!%p188_p3)  }
   0xb   : > { %v2308_v16 = vld [vmem:[%s2735_s1 + $0x130] sm:$0xff] (!%p188_p3)   ;;  %v2310_v26 = vld [vmem:[%s2735_s1 + $0x138] sm:$0xff] (!%p188_p3)   ;;  %v2315_v31 = vld [vmem:[%s2735_s1 + $0x140] sm:$0xff] (!%p188_p3)  }
   0xc   : > { %2061 = vmatpush3.bf16.msra.mxu1 (!%p188_p3), %v2297_v2  ;;  %v2317_v33 = vld [vmem:[%s2735_s1 + $0x48] sm:$0xff] (!%p188_p3)   ;;  %v2319_v35 = vld [vmem:[%s2735_s1 + $0x50] sm:$0xff] (!%p188_p3)   ;;  %v2321_v39 = vld [vmem:[%s2735_s1 + $0x58] sm:$0xff] (!%p188_p3)  }
   0xd   : > { %2141 = vmatpush3.bf16.msra.mxu0 (!%p188_p3), %v2298_v3  ;;  %2062 = vmatprep.subr.bf16.mxu1 (!%p188_p3), %v2299_v4  ;;  %v2318_v34 = vld [vmem:[%s2735_s1 + $0x148] sm:$0xff] (!%p188_p3)   ;;  %v2320_v36 = vld [vmem:[%s2735_s1 + $0x150] sm:$0xff] (!%p188_p3)   ;;  %v2322_v40 = vld [vmem:[%s2735_s1 + $0x158] sm:$0xff] (!%p188_p3)  }
   0xe   : > { %s2743_s12 = smov (!%p228_p4, %s2399_s12), 1  ;;  %2142 = vmatprep.subr.bf16.mxu0 %v2300_v5  ;;  %v2323_v45 = vld [vmem:[%s2735_s1 + $0x60] sm:$0xff]   ;;  %v2325_v51 = vld [vmem:[%s2735_s1 + $0x68] sm:$0xff]   ;;  %v2327_v53 = vld [vmem:[%s2735_s1 + $0x70] sm:$0xff]  }
   0xf   : > { %s2269_s5 = smul.u32 24, %s2743_s12  ;;  %v2324_v49 = vld [vmem:[%s2735_s1 + $0x160] sm:$0xff]   ;;  %v2326_v52 = vld [vmem:[%s2735_s1 + $0x168] sm:$0xff]   ;;  %v2328_v54 = vld [vmem:[%s2735_s1 + $0x170] sm:$0xff]  }
  0x10   : > { %2063 = vmatpush3.bf16.msra.mxu1 %v2299_v4  ;;  %v2329_v55 = vld [vmem:[%s2735_s1 + $0x78] sm:$0xff]   ;;  %v2333_v58 = vld [vmem:[%s2735_s1 + $0x80] sm:$0xff]   ;;  %v2337_v4 = vld [vmem:[%s2735_s1 + $0x88] sm:$0xff]  }
  0x11   : > { %2143 = vmatpush3.bf16.msra.mxu0 %v2300_v5  ;;  %2064 = vmatprep.subr.bf16.mxu1 %v2301_v6  ;;  %s2486_s18 = scalar_lea.vmem %s2734_s0, %s2269_s5  ;;  %v2330_v56 = vld [vmem:[%s2735_s1 + $0x178] sm:$0xff]   ;;  %v2335_v61 = vld [vmem:[%s2735_s1 + $0x180] sm:$0xff]   ;;  %v2338_v5 = vld [vmem:[%s2735_s1 + $0x188] sm:$0xff]   ;;  %s2270_s5 = smul.u32 12, %s2743_s12 }
  0x12   : > { %2144 = vmatprep.subr.bf16.mxu0 %v2302_v7  ;;  %v2311_v11 = vld [vmem:[%s2486_s18] sm:$0xff]   ;;  %v2314_v14 = vld [vmem:[%s2486_s18 + $0x8] sm:$0xff]  }
  0x13   : > { %2074 = vmatprep.mubr.bf16.mxu1 %v2311_v11  ;;  %v2313_v13 = vld [vmem:[%s2486_s18] sm:$0xf8]   ;;  %v880_v19 = vshrl.u32 %v2314_v14, 16  ;;  %v883_v20 = vshll.u32 %v2314_v14, 16  ;;  %v2316_v32 = vld [vmem:[%s2486_s18 + $0x8] ss:$0 sps:$4 sm:$0xff]   ;;  %s255_s8 = scalar_lea.vmem %s2737_s3, %s2270_s5 }
  0x14   : > { %2065 = vmatpush3.bf16.msra.mxu1 %v2301_v6  ;;  %v872_v17 = vshrl.u32 %v2313_v13, 16  ;;  %v875_v18 = vshll.u32 %v2313_v13, 16  ;;  %v2331_v37 = vld [vmem:[%s2486_s18] sm:$0xff]   ;;  %v2332_v38 = vld [vmem:[%s2486_s18 + $0x8] sm:$0x1f]   ;;  %v2340_v11 = vld [vmem:[%s2735_s1 + $0x190] sm:$0xff]  }
  0x15   : > { %2145 = vmatpush3.bf16.msra.mxu0 %v2302_v7  ;;  %2066 = vmatprep.subr.bf16.mxu1 %v2303_v8  ;;  %v882_v24 = vrot.slane %v880_v19, 3  ;;  %v885_v25 = vrot.slane %v883_v20, 4  ;;  %v434_v41 = vshrl.u32 %v2331_v37, 16  ;;  %v436_v42 = vshll.u32 %v2331_v37, 16  ;;  %v2334_v44 = vld [vmem:[%s2486_s18 + $0x4] sm:$0xff]   ;;  %v2342_v13 = vld [vmem:[%s2735_s1 + $0x198] sm:$0xff]  }
  0x16   : > { %2146 = vmatprep.subr.bf16.mxu0 %v2304_v9  ;;  %v874_v22 = vrot.slane %v872_v17, 3  ;;  %v877_v23 = vrot.slane %v875_v18, 4  ;;  %v441_v43 = vshll.u32 %v2332_v38, 16  ;;  %v445_v57 = vshrl.u32 %v2332_v38, 16  ;;  %v2351_v59 = vld [vmem:[%s2486_s18] sm:$0xfe]  }
  0x17   : > { %v886_v28 = vor.u32 %v885_v25, %v882_v24  ;;  %v438_v46 = vrot.slane %v436_v42, 1  ;;  %v2563_v60 = vld [vmem:[%s2486_s18 + $0x8] sm:$0x1f]   ;;  %v587_v63 = vrot.slane %v2351_v59, 1  ;;  %v2343_v14 = vld [vmem:[%s2735_s1 + $0xa0] sm:$0xff]   ;;  %v2347_v20 = vld [vmem:[%s2735_s1 + $0xb0] sm:$0xff]  }
  0x18   : > { %2067 = vmatpush3.bf16.msra.mxu1 %v2303_v8  ;;  %v878_v27 = vor.u32 %v877_v23, %v874_v22  ;;  %v443_v47 = vrot.slane %v441_v43, 1  ;;  %v2336_v62 = vld [vmem:[%s2486_s18 + $0xc] ss:$0 sps:$4 sm:$0xff]   ;;  %v588_v0 = vrot.slane %v2563_v60, 1  ;;  %v2354_v2 = vld [vmem:[%s2486_s18 + $0x4] sm:$0xfc]  }
  0x19   : > { %2147 = vmatpush3.bf16.msra.mxu0 %v2304_v9  ;;  %2068 = vmatprep.subr.bf16.mxu1 %v2305_v10  ;;  %v439_v48 = vor.u32 %v438_v46, %v434_v41  ;;  %v2572_v3 = vld [vmem:[%s2486_s18 + $0xc] sm:$0x3f]   ;;  %v1162_v6 = vrot.slane %v2354_v2, 2  ;;  %v2373_v18 = vld [vmem:[%s2486_s18 + $0x4] sm:$0xfc]   ;;  %v2349_v24 = vld [vmem:[%s2735_s1 + $0xb8] sm:$0xff]  }
  0x1a   : > { %2148 = vmatprep.subr.bf16.mxu0 %v2306_v12  ;;  %v887_v29 = vsel %vm870_vm0, %v878_v27, %v886_v28  ;;  %v447_v1 = vor.u32 %v445_v57, %v443_v47  ;;  %v1163_v7 = vrot.slane %v2572_v3, 2  ;;  %v589_v8 = vsel %vm586_vm2, %v587_v63, %v588_v0  ;;  %v2346_v17 = vld [vmem:[%s2735_s1 + $0x1a8] sm:$0xff]   ;;  %v2350_v27 = vld [vmem:[%s2735_s1 + $0x1b8] sm:$0xff]   ;;  %v2377_v63 = vld [vmem:[%s2735_s1 + $0x210] sm:$0xff]  }
  0x1b   : > { %2154 = vmatprep.mubr.bf16.mxu0 %v887_v29  ;;  %v444_v50 = vsel %vm432_vm1, %v439_v48, %v443_v47  ;;  %v2374_v19 = vld [vmem:[%s2486_s18 + $0xc] sm:$0x7f]   ;;  %v1305_v22 = vshrl.u32 %v2373_v18, 16  ;;  %v1308_v23 = vshll.u32 %v2373_v18, 16  ;;  %v2361_v46 = vld [vmem:[%s2735_s1 + $0xd8] sm:$0xff]   ;;  %v2363_v48 = vld [vmem:[%s2735_s1 + $0xe0] sm:$0xff]  }
  0x1c   : > { %2069 = vmatpush3.bf16.msra.mxu1 %v2305_v10  ;;  %v1164_v9 = vsel %vm1161_vm3, %v1162_v6, %v1163_v7  ;;  %v2339_v10 = vld [vmem:[%s2735_s1 + $0x90] sm:$0xff]   ;;  %v1313_v25 = vshrl.u32 %v2374_v19, 16  ;;  %v2627_v29 = vld [vmem:[%s2486_s18 + $0x8] sm:$0x7f]   ;;  %v2362_v47 = vld [vmem:[%s2735_s1 + $0x1d8] sm:$0xff]  }
  0x1d   : > { %2149 = vmatpush3.bf16.msra.mxu0 %v2306_v12  ;;  %2070 = vmatprep.subr.bf16.mxu1 %v2307_v15  ;;  %v2341_v12 = vld [vmem:[%s2735_s1 + $0x98] sm:$0xff]   ;;  %v730_v37 = vrot.slane %v2627_v29, 3  ;;  %v2358_v41 = vld [vmem:[%s2735_s1 + $0x1c8] sm:$0xff]   ;;  %v2381_v3 = vld [vmem:[%s2735_s1 + $0x230] sm:$0xff]  }
  0x1e   : > { %2150 = vmatprep.subr.bf16.mxu0 %v2308_v16  ;;  %v2384_v57 = vld [vmem:[%s2486_s18 + $0xc] sm:$0x7f]  }
  0x1f   : > { %v1460_v60 = vrot.slane %v2384_v57, 3  ;;  %v2380_v2 = vld [vmem:[%s2735_s1 + $0x228] sm:$0xff]  }
  0x20   : > { %2071 = vmatpush3.bf16.msra.mxu1 %v2307_v15  ;;  %v2344_v15 = vld [vmem:[%s2735_s1 + $0x1a0] sm:$0xff]  }
  0x21   : > { %2151 = vmatpush3.bf16.msra.mxu0 %v2308_v16  ;;  %2072 = vmatprep.subr.bf16.mxu1 %v2309_v21  ;;  %v2345_v16 = vld [vmem:[%s2735_s1 + $0xa8] sm:$0xff]  }
  0x22   : > { %2152 = vmatprep.subr.bf16.mxu0 %v2310_v26 }
  0x24   : > { %2073 = vmatpush3.bf16.msra.mxu1 %v2309_v21  ;;  %v2348_v21 = vld [vmem:[%s2735_s1 + $0x1b0] sm:$0xff]  }
  0x25   : > { %2153 = vmatpush3.bf16.msra.mxu0 %v2310_v26  ;;  %2078 = vmatprep.subr.bf16.mxu1 %v2312_v30  ;;  %v1316_v26 = vshll.u32 %v2374_v19, 16 }
  0x26   : > { %2158 = vmatprep.subr.bf16.mxu0 %v2315_v31 }
  0x27   : > { %2075 = vmatmul.mubr.bf16.vlgmr.msra.gmra.mrb[0].mxu1 %v2316_v32  ;;  %v1315_v32 = vrot.slane %v1313_v25, 2 }
  0x28   : > { %2079 = vmatpush3.bf16.msra.mxu1 %v2312_v30  ;;  %2155 = vmatmul.mubr.bf16.vlgmr.msra.gmra.mrb[0].mxu0 %v886_v28  ;;  %v2371_v28 = vld [vmem:[%s2486_s18] sm:$0xf8]   ;;  %v1307_v30 = vrot.slane %v1305_v22, 2 }
  0x29   : > { %2159 = vmatpush3.bf16.msra.mxu0 %v2315_v31  ;;  %2080 = vmatprep.subr.bf16.mxu1 %v2317_v33  ;;  %v1310_v31 = vrot.slane %v1308_v23, 3 }
  0x2a   : > { %2160 = vmatprep.subr.bf16.mxu0 %v2318_v34  ;;  %2174 = vmatprep.mubr.bf16.mxu0 %v2334_v44  ;;  %v2359_v44 = vld [vmem:[%s2735_s1 + $0xd0] sm:$0xff]  }
  0x2b   : > { %2094 = vmatprep.mubr.bf16.mxu1 %v444_v50  ;;  %v1311_v38 = vor.u32 %v1310_v31, %v1307_v30  ;;  %v2365_v50 = vld [vmem:[%s2735_s1 + $0xe8] sm:$0xff]  }
  0x2c   : > { %2081 = vmatpush3.bf16.msra.mxu1 %v2317_v33  ;;  %v1318_v33 = vrot.slane %v1316_v26, 3 }
  0x2d   : > { %2161 = vmatpush3.bf16.msra.mxu0 %v2318_v34  ;;  %2082 = vmatprep.subr.bf16.mxu1 %v2319_v35  ;;  %v2353_v34 = vld [vmem:[%s2735_s1 + $0xc0] sm:$0xff]  }
  0x2e   : > { %2162 = vmatprep.subr.bf16.mxu0 %v2320_v36 }
  0x30   : > { %2083 = vmatpush3.bf16.msra.mxu1 %v2319_v35  ;;  %v2356_v35 = vld [vmem:[%s2735_s1 + $0x1c0] sm:$0xff]  }
  0x31   : > { %2163 = vmatpush3.bf16.msra.mxu0 %v2320_v36  ;;  %2084 = vmatprep.subr.bf16.mxu1 %v2321_v39  ;;  %v729_v36 = vrot.slane %v2371_v28, 3 }
  0x32   : > { %2164 = vmatprep.subr.bf16.mxu0 %v2322_v40 }
  0x33   : > { %v731_v42 = vsel %vm728_vm4, %v729_v36, %v730_v37 }
  0x34   : > { %2085 = vmatpush3.bf16.msra.mxu1 %v2321_v39  ;;  %v2636_v39 = vor.u32 %v1318_v33, %v1315_v32 }
  0x35   : > { %2165 = vmatpush3.bf16.msra.mxu0 %v2322_v40  ;;  %2086 = vmatprep.subr.bf16.mxu1 %v2323_v45  ;;  %v2357_v40 = vld [vmem:[%s2735_s1 + $0xc8] sm:$0xff]  }
  0x36   : > { %2166 = vmatprep.subr.bf16.mxu0 %v2324_v49  ;;  %v1320_v43 = vsel %vm1303_vm5, %v1311_v38, %v2636_v39 }
  0x38   : > { %2087 = vmatpush3.bf16.msra.mxu1 %v2323_v45  ;;  %v2360_v45 = vld [vmem:[%s2735_s1 + $0x1d0] sm:$0xff]  }
  0x39   : > { %2167 = vmatpush3.bf16.msra.mxu0 %v2324_v49  ;;  %2088 = vmatprep.subr.bf16.mxu1 %v2325_v51  ;;  %v2364_v49 = vld [vmem:[%s2735_s1 + $0x1e0] sm:$0xff]  }
  0x3a   : > { %2168 = vmatprep.subr.bf16.mxu0 %v2326_v52 }
  0x3c   : > { %2089 = vmatpush3.bf16.msra.mxu1 %v2325_v51  ;;  %v2366_v51 = vld [vmem:[%s2735_s1 + $0x1e8] sm:$0xff]  }
  0x3d   : > { %2169 = vmatpush3.bf16.msra.mxu0 %v2326_v52  ;;  %2090 = vmatprep.subr.bf16.mxu1 %v2327_v53  ;;  %v2367_v52 = vld [vmem:[%s2735_s1 + $0xf0] sm:$0xff]  }
  0x3e   : > { %2170 = vmatprep.subr.bf16.mxu0 %v2328_v54 }
  0x40   : > { %2091 = vmatpush3.bf16.msra.mxu1 %v2327_v53  ;;  %v2368_v53 = vld [vmem:[%s2735_s1 + $0x1f0] sm:$0xff]  }
  0x41   : > { %2171 = vmatpush3.bf16.msra.mxu0 %v2328_v54  ;;  %2092 = vmatprep.subr.bf16.mxu1 %v2329_v55  ;;  %v2369_v54 = vld [vmem:[%s2735_s1 + $0xf8] sm:$0xff]  }
  0x42   : > { %2172 = vmatprep.subr.bf16.mxu0 %v2330_v56 }
  0x44   : > { %2093 = vmatpush3.bf16.msra.mxu1 %v2329_v55  ;;  %v2370_v55 = vld [vmem:[%s2735_s1 + $0x1f8] sm:$0xff]  }
  0x45   : > { %2173 = vmatpush3.bf16.msra.mxu0 %v2330_v56  ;;  %2098 = vmatprep.subr.bf16.mxu1 %v2333_v58  ;;  %v2383_v56 = vld [vmem:[%s2486_s18 + $0x4] sm:$0xf8]  }
  0x46   : > { %2178 = vmatprep.subr.bf16.mxu0 %v2335_v61  ;;  %v1459_v59 = vrot.slane %v2383_v56, 3 }
  0x47   : > { %2095 = vmatmul.mubr.bf16.vlgmr.msra.gmra.mrb[0].mxu1 %v447_v1  ;;  %v2379_v1 = vld [vmem:[%s2735_s1 + $0x220] sm:$0xff]  }
  0x48   : > { %2099 = vmatpush3.bf16.msra.mxu1 %v2333_v58  ;;  %2175 = vmatmul.mubr.bf16.vlgmr.msra.gmra.mrb[0].mxu0 %v2336_v62  ;;  %v2375_v58 = vld [vmem:[%s2735_s1 + $0x200] sm:$0xff]   ;;  %v1461_v62 = vsel %vm728_vm4, %v1459_v59, %v1460_v60 }
  0x49   : > { %2179 = vmatpush3.bf16.msra.mxu0 %v2335_v61  ;;  %2100 = vmatprep.subr.bf16.mxu1 %v2337_v4  ;;  %v2376_v61 = vld [vmem:[%s2735_s1 + $0x208] sm:$0xff]  }
  0x4a   : > { %2180 = vmatprep.subr.bf16.mxu0 %v2338_v5  ;;  %2114 = vmatprep.mubr.bf16.mxu1 %v589_v8 }
  0x4b   : > { %2194 = vmatprep.mubr.bf16.mxu0 %v1164_v9 }
  0x4c   : > { %2101 = vmatpush3.bf16.msra.mxu1 %v2337_v4  ;;  %v2382_v4 = vld [vmem:[%s2735_s1 + $0x238] sm:$0xff]  }
  0x4d   : > { %2181 = vmatpush3.bf16.msra.mxu0 %v2338_v5  ;;  %2102 = vmatprep.subr.bf16.mxu1 %v2339_v10 }
  0x4e   : > { %2182 = vmatprep.subr.bf16.mxu0 %v2340_v11 }
  0x50   : > { %2103 = vmatpush3.bf16.msra.mxu1 %v2339_v10 }
  0x51   : > { %2183 = vmatpush3.bf16.msra.mxu0 %v2340_v11  ;;  %2104 = vmatprep.subr.bf16.mxu1 %v2341_v12 }
  0x52   : > { %2184 = vmatprep.subr.bf16.mxu0 %v2342_v13 }
  0x54   : > { %2105 = vmatpush3.bf16.msra.mxu1 %v2341_v12  ;;  %v1954_v12 = vld [vmem:[%s2736_s2] ss:$0 sm:$0xff] }
  0x55   : > { %2185 = vmatpush3.bf16.msra.mxu0 %v2342_v13  ;;  %2106 = vmatprep.subr.bf16.mxu1 %v2343_v14 }
  0x56   : > { %2186 = vmatprep.subr.bf16.mxu0 %v2344_v15 }
  0x58   : > { %2107 = vmatpush3.bf16.msra.mxu1 %v2343_v14 }
  0x59   : > { %2187 = vmatpush3.bf16.msra.mxu0 %v2344_v15  ;;  %2108 = vmatprep.subr.bf16.mxu1 %v2345_v16 }
  0x5a   : > { %2188 = vmatprep.subr.bf16.mxu0 %v2346_v17 }
  0x5c   : > { %2109 = vmatpush3.bf16.msra.mxu1 %v2345_v16 }
  0x5d   : > { %2189 = vmatpush3.bf16.msra.mxu0 %v2346_v17  ;;  %2110 = vmatprep.subr.bf16.mxu1 %v2347_v20 }
  0x5e   : > { %2190 = vmatprep.subr.bf16.mxu0 %v2348_v21 }
  0x60   : > { %2111 = vmatpush3.bf16.msra.mxu1 %v2347_v20 }
  0x61   : > { %2191 = vmatpush3.bf16.msra.mxu0 %v2348_v21  ;;  %2112 = vmatprep.subr.bf16.mxu1 %v2349_v24 }
  0x62   : > { %2192 = vmatprep.subr.bf16.mxu0 %v2350_v27 }
  0x64   : > { %2113 = vmatpush3.bf16.msra.mxu1 %v2349_v24 }
  0x65   : > { %2193 = vmatpush3.bf16.msra.mxu0 %v2350_v27  ;;  %2118 = vmatprep.subr.bf16.mxu1 %v2353_v34 }
  0x66   : > { %2198 = vmatprep.subr.bf16.mxu0 %v2356_v35 }
  0x67   : > { %2115 = vmatmul.mubr.bf16.vlgmr.msra.gmra.mrb[0].mxu1 %v588_v0  ;;  %v2378_v0 = vld [vmem:[%s2735_s1 + $0x218] sm:$0xff]  }
  0x68   : > { %2119 = vmatpush3.bf16.msra.mxu1 %v2353_v34  ;;  %2195 = vmatmul.mubr.bf16.vlgmr.msra.gmra.mrb[0].mxu0 %v1163_v7 }
  0x69   : > { %2199 = vmatpush3.bf16.msra.mxu0 %v2356_v35  ;;  %2120 = vmatprep.subr.bf16.mxu1 %v2357_v40 }
  0x6a   : > { %2200 = vmatprep.subr.bf16.mxu0 %v2358_v41  ;;  %2134 = vmatprep.mubr.bf16.mxu1 %v731_v42 }
  0x6b   : > { %2214 = vmatprep.mubr.bf16.mxu0 %v1320_v43 }
  0x6c   : > { %2121 = vmatpush3.bf16.msra.mxu1 %v2357_v40 }
  0x6d   : > { %2201 = vmatpush3.bf16.msra.mxu0 %v2358_v41  ;;  %2122 = vmatprep.subr.bf16.mxu1 %v2359_v44 }
  0x6e   : > { %2202 = vmatprep.subr.bf16.mxu0 %v2360_v45 }
  0x70   : > { %2123 = vmatpush3.bf16.msra.mxu1 %v2359_v44 }
  0x71   : > { %2203 = vmatpush3.bf16.msra.mxu0 %v2360_v45  ;;  %2124 = vmatprep.subr.bf16.mxu1 %v2361_v46 }
  0x72   : > { %2204 = vmatprep.subr.bf16.mxu0 %v2362_v47 }
  0x74   : > { %2125 = vmatpush3.bf16.msra.mxu1 %v2361_v46 }
  0x75   : > { %2205 = vmatpush3.bf16.msra.mxu0 %v2362_v47  ;;  %2126 = vmatprep.subr.bf16.mxu1 %v2363_v48 }
  0x76   : > { %2206 = vmatprep.subr.bf16.mxu0 %v2364_v49 }
  0x78   : > { %2127 = vmatpush3.bf16.msra.mxu1 %v2363_v48 }
  0x79   : > { %2207 = vmatpush3.bf16.msra.mxu0 %v2364_v49  ;;  %2128 = vmatprep.subr.bf16.mxu1 %v2365_v50 }
  0x7a   : > { %2208 = vmatprep.subr.bf16.mxu0 %v2366_v51 }
  0x7c   : > { %2129 = vmatpush3.bf16.msra.mxu1 %v2365_v50 }
  0x7d   : > { %2209 = vmatpush3.bf16.msra.mxu0 %v2366_v51  ;;  %2130 = vmatprep.subr.bf16.mxu1 %v2367_v52 }
  0x7e   : > { %2210 = vmatprep.subr.bf16.mxu0 %v2368_v53 }
  0x80   : > { %2131 = vmatpush3.bf16.msra.mxu1 %v2367_v52 }
  0x81   : > { %2211 = vmatpush3.bf16.msra.mxu0 %v2368_v53  ;;  %2132 = vmatprep.subr.bf16.mxu1 %v2369_v54 }
  0x82   : > { %2212 = vmatprep.subr.bf16.mxu0 %v2370_v55 }
  0x84   : > { %2133 = vmatpush3.bf16.msra.mxu1 %v2369_v54 }
  0x85   : > { %2213 = vmatpush3.bf16.msra.mxu0 %v2370_v55 }
  0x86   : > { %2218 = vmatprep.subr.bf16.mxu0 %v2375_v58 }
  0x87   : > { %2135 = vmatmul.mubr.bf16.vlgmr.msra.gmra.mrb[0].mxu1 %v730_v37 }
  0x88   : > { %2215 = vmatmul.mubr.bf16.vlgmr.msra.gmra.mrb[0].mxu0 %v2636_v39 }
  0x89   : > { %2219 = vmatpush3.bf16.msra.mxu0 %v2375_v58  ;;  %2234 = vmatprep.mubr.bf16.mxu0 %v1461_v62 }
  0x8a   : > { %2220 = vmatprep.subr.bf16.mxu0 %v2376_v61 }
  0x8d   : > { %2221 = vmatpush3.bf16.msra.mxu0 %v2376_v61 }
  0x8e   : > { %2222 = vmatprep.subr.bf16.mxu0 %v2377_v63 }
  0x91   : > { %2223 = vmatpush3.bf16.msra.mxu0 %v2377_v63 }
  0x92   : > { %2224 = vmatprep.subr.bf16.mxu0 %v2378_v0 }
  0x95   : > { %2225 = vmatpush3.bf16.msra.mxu0 %v2378_v0 }
  0x96   : > { %2226 = vmatprep.subr.bf16.mxu0 %v2379_v1 }
  0x99   : > { %2227 = vmatpush3.bf16.msra.mxu0 %v2379_v1 }
  0x9a   : > { %2228 = vmatprep.subr.bf16.mxu0 %v2380_v2 }
  0x9d   : > { %2229 = vmatpush3.bf16.msra.mxu0 %v2380_v2 }
  0x9e   : > { %2230 = vmatprep.subr.bf16.mxu0 %v2381_v3 }
  0xa1   : > { %2231 = vmatpush3.bf16.msra.mxu0 %v2381_v3 }
  0xa2   : > { %2232 = vmatprep.subr.bf16.mxu0 %v2382_v4 }
  0xa5   : > { %2233 = vmatpush3.bf16.msra.mxu0 %v2382_v4 }
  0xa8   : > { %2235 = vmatmul.mubr.bf16.vlgmr.msra.gmra.mrb[0].mxu0 %v1460_v60 }
 0x15a   : > { %v2136_v5 = vpop.f32.mrb[0].mxu1 }
 0x15b   : > { %v816_v6 = vpop.f32.mrb[1].mxu1 }
 0x15c   : > { %v2137_v7 = vpop.f32.mrb[2].mxu1 }
 0x15d   : > { %v819_v8 = vpop.f32.mrb[3].mxu1 }
 0x17b   : > { %v2236_v9 = vpop.f32.mrb[0].mxu0 }
 0x17c   : > { %v2238_v10 = vadd.f32 %v2236_v9, %v2136_v5  ;;  %v1546_v11 = vpop.f32.mrb[1].mxu0 }
 0x17d   : > { %v2239_v13 = vadd.f32 %v1546_v11, %v816_v6  ;;  %v2237_v14 = vpop.f32.mrb[2].mxu0 }
 0x17e   : > { %v1574_v15 = vmul.f32 0.08084521, %v2238_v10  ;;  %v1549_v16 = vpop.f32.mrb[3].mxu0 }
 0x17f   : > { %v1572_v17 = vmul.f32 0.08084521, %v2239_v13  ;;  %v2240_v18 = vadd.f32 %v1549_v16, %v819_v8 }
 0x180   : > { %v1584_v19 = vadd.f32 %v1954_v12, %v1574_v15 }
 0x181   : > { %v1582_v20 = vadd.f32 %v1954_v12, %v1572_v17  ;;  %v1573_v21 = vmul.f32 0.08084521, %v2240_v18 }
 0x182   : > { %vm1587_vm6 = vcmp.ge.f32.partialorder %v1584_v19, 0.0  ;;  %v1590_v22 = vmul.f32 0.2, %v1584_v19 }
 0x183   : > { %v1588_v23 = vmul.f32 0.2, %v1582_v20  ;;  %v1583_v24 = vadd.f32 %v1954_v12, %v1573_v21  ;;  %vm1585_vm7 = vcmp.ge.f32.partialorder %v1582_v20, 0.0 }
 0x184   : > { %v1593_v25 = vsel %vm1587_vm6, %v1584_v19, %v1590_v22 }
 0x185   : > { %v1962_v26 = vpack.c.bf16 %v1593_v25, %v1593_v25  ;;  %vm1586_vm8 = vcmp.ge.f32.partialorder %v1583_v24, 0.0  ;;  %v1589_v27 = vmul.f32 0.2, %v1583_v24  ;;  %v1591_v28 = vsel %vm1585_vm7, %v1582_v20, %v1588_v23 }
 0x187   : > { %1609 = vst [vmem:[%s255_s8 + $0x8] sm:$0xf] %v1962_v26  ;;  %v1592_v29 = vsel %vm1586_vm8, %v1583_v24, %v1589_v27 }
 0x188   : > { %v1966_v30 = vpack.c.bf16 %v1592_v29, %v1591_v28 }
 0x18a   : > { %1967 = vst [vmem:[%s255_s8] sm:$0xff] %v1966_v30  }
 0x18b PF: > { %s13_s14 = sadd.s32 1, %s2407_s14   ;;  %s2738_s12 = smov %s2403_s13 }
 0x18c   : > { %p10_p5 = scmp.ge.s32.totalorder %s13_s14, 4   ;;  %s2739_s13 = smov %s2741_s15 }
 0x18e   :  { %12 = sbr.rel (!%p10_p5) target bundleno = 2 (0x2), region = 84 }

// kernel: sg2_discriminator_forward.21
= control target key start
LH: loop header
LB: loop body
LE: loop exit
PB: predicated region body
PF: predicated region fallthrough
CT: control target
= control target key end

     0   :  { %s3346_s12 = smov 0   ;;  %s3348_s13 = smov 0   ;;  %s3949_s0 = inlined_call_operand.vmem [shape: bf16[2,20,128], index: 0, kind: input, shape index: {}]   ;;  %s3950_s1 = inlined_call_operand.vmem [shape: bf16[16,128,128], index: 1, kind: input, shape index: {}]   ;;  %s3951_s2 = inlined_call_operand.vmem [shape: f32[1,128], index: 2, kind: input, shape index: {}]   ;;  %s3952_s3 = inlined_call_operand.vmem [shape: bf16[2,4,128], index: 3, kind: output, shape index: {}]  }
   0x1   :  { %s3350_s14 = smov 0  }
   0x2 LB: > { %s32_s15 = sadd.s32 1, %s3318_s13  ;;  %p2279_p0 = scmp.ge.s32.totalorder %s3322_s14, 1  ;;  %s3322_s14 = sphi %s3350_s14, %s13_s14   ;;  %s3318_s13 = sphi %s3348_s13, %s3954_s13   ;;  %s3314_s12 = sphi %s3346_s12, %s3953_s12  }
   0x3   : > { %p34_p1 = scmp.ge.s32.totalorder %s32_s15, 2  ;;  %p187_p2 = scmp.lt.s32.totalorder %s3322_s14, 3 }
   0x5   : > { %s3956_s15 = smov (%p34_p1, %s32_s15), 0  ;;  %p188_p3 = pnand %p2279_p0, %p187_p2 }
   0x6   : > { %v3158_v0 = vld [vmem:[%s3950_s1] sm:$0xff] (!%p188_p3)   ;;  %v3324_v1 = vmov (!%p188_p3), 0.0   ;;  %v3159_v2 = vld [vmem:[%s3950_s1 + $0x8] sm:$0xff] (!%p188_p3)   ;;  %vm3325_vm0 = vmmov (!%p188_p3), 0   ;;  %p227_p4 = scmp.lt.s32.totalorder (!%p188_p3), %s3314_s12, 1  ;;  %v3161_v5 = vld [vmem:[%s3950_s1 + $0x10] sm:$0xff] (!%p188_p3)  }
   0x7   : > { %191 = sbr.rel (%p188_p3) target bundleno = 503 (0x1f7), region = 32  ;;  %2811 = vmatprep.subr.bf16.mxu0 (!%p188_p3), %v3324_v1  ;;  %259 = vst [vmem:[#allocation2] sm:$0xf] (!%p188_p3), %v3324_v1  ;;  %2831 = vmatprep.subr.bf16.mxu1 (!%p188_p3), %v3324_v1  ;;  %v3160_v3 = vld [vmem:[%s3950_s1 + $0x40] sm:$0xff] (!%p188_p3)   ;;  %v3162_v4 = vld [vmem:[%s3950_s1 + $0x48] sm:$0xff] (!%p188_p3)   ;;  %v3164_v6 = vld [vmem:[%s3950_s1 + $0x50] sm:$0xff] (!%p188_p3)  }
   0x8   : > { %2812 = vmatpush3.bf16.msra.mxu0 (!%p188_p3), %v3158_v0  ;;  %2827 = vmatprep.mubr.msk.bf16.mxu0 (!%p188_p3), %vm3325_vm0, %v3324_v1  ;;  %v3163_v7 = vld [vmem:[%s3950_s1 + $0x18] sm:$0xff] (!%p188_p3)   ;;  %v3165_v9 = vld [vmem:[%s3950_s1 + $0x20] sm:$0xff] (!%p188_p3)   ;;  %v3167_v11 = vld [vmem:[%s3950_s1 + $0x28] sm:$0xff] (!%p188_p3)  }
   0x9   : > { %2813 = vmatprep.subr.bf16.mxu0 (!%p188_p3), %v3324_v1  ;;  %2847 = vmatprep.mubr.msk.bf16.mxu1 (!%p188_p3), %vm3325_vm0, %v3324_v1  ;;  %v3166_v8 = vld [vmem:[%s3950_s1 + $0x58] sm:$0xff] (!%p188_p3)   ;;  %v3168_v10 = vld [vmem:[%s3950_s1 + $0x60] sm:$0xff] (!%p188_p3)   ;;  %v3170_v13 = vld [vmem:[%s3950_s1 + $0x68] sm:$0xff] (!%p188_p3)  }
   0xa   : > { %2832 = vmatpush3.bf16.msra.mxu1 (!%p188_p3), %v3160_v3  ;;  %v3169_v14 = vld [vmem:[%s3950_s1 + $0x30] sm:$0xff] (!%p188_p3)   ;;  %v3171_v17 = vld [vmem:[%s3950_s1 + $0x38] sm:$0xff] (!%p188_p3)   ;;  %v3173_v22 = vld [vmem:[%s3950_s1 + $0x80] sm:$0xff] (!%p188_p3)  }
   0xb   : > { %2833 = vmatprep.subr.bf16.mxu1 (!%p188_p3), %v3324_v1  ;;  %v3172_v16 = vld [vmem:[%s3950_s1 + $0x70] sm:$0xff] (!%p188_p3)   ;;  %v3174_v20 = vld [vmem:[%s3950_s1 + $0x78] sm:$0xff] (!%p188_p3)   ;;  %v3177_v24 = vld [vmem:[%s3950_s1 + $0xc0] sm:$0xff] (!%p188_p3)  }
   0xc   : > { %2814 = vmatpush3.bf16.msra.mxu0 (!%p188_p3), %v3159_v2  ;;  %v3175_v25 = vld [vmem:[%s3950_s1 + $0x88] sm:$0xff] (!%p188_p3)   ;;  %v3178_v27 = vld [vmem:[%s3950_s1 + $0x90] sm:$0xff] (!%p188_p3)   ;;  %v3180_v29 = vld [vmem:[%s3950_s1 + $0x98] sm:$0xff] (!%p188_p3)  }
   0xd   : > { %2815 = vmatprep.subr.bf16.mxu0 (!%p188_p3), %v3324_v1  ;;  %v3179_v26 = vld [vmem:[%s3950_s1 + $0xc8] sm:$0xff] (!%p188_p3)   ;;  %v3181_v28 = vld [vmem:[%s3950_s1 + $0xd0] sm:$0xff] (!%p188_p3)   ;;  %v3183_v30 = vld [vmem:[%s3950_s1 + $0xd8] sm:$0xff] (!%p188_p3)  }
   0xe   : > { %s3958_s12 = smov (!%p227_p4, %s3314_s12), 1  ;;  %2834 = vmatpush3.bf16.msra.mxu1 %v3162_v4  ;;  %v3182_v31 = vld [vmem:[%s3950_s1 + $0xa0] sm:$0xff]   ;;  %v3184_v33 = vld [vmem:[%s3950_s1 + $0xa8] sm:$0xff]   ;;  %v3186_v36 = vld [vmem:[%s3950_s1 + $0xb0] sm:$0xff]  }
   0xf   : > { %2835 = vmatprep.subr.bf16.mxu1 %v3324_v1  ;;  %s3131_s30 = smul.u32 12, %s3958_s12  ;;  %v3185_v32 = vld [vmem:[%s3950_s1 + $0xe0] sm:$0xff]   ;;  %v3187_v35 = vld [vmem:[%s3950_s1 + $0xe8] sm:$0xff]   ;;  %v3190_v40 = vld [vmem:[%s3950_s1 + $0xf0] sm:$0xff]   ;;  %s2281_s7 = sshll.u32 %s3958_s12, 1 }
  0x10   : > { %2816 = vmatpush3.bf16.msra.mxu0 %v3161_v5  ;;  %v3188_v41 = vld [vmem:[%s3950_s1 + $0xb8] sm:$0xff]   ;;  %v3191_v46 = vld [vmem:[%s3950_s1 + $0x100] sm:$0xff]   ;;  %v3193_v49 = vld [vmem:[%s3950_s1 + $0x108] sm:$0xff]   ;;  %s253_s11 = scalar_lea.vmem %s3952_s3, %s2281_s7 }
  0x11   : > { %2817 = vmatprep.subr.bf16.mxu0 %v3324_v1  ;;  %s3411_s10 = scalar_lea.vmem %s3949_s0, %s3131_s30  ;;  %v3192_v44 = vld [vmem:[%s3950_s1 + $0xf8] sm:$0xff]   ;;  %v3195_v48 = vld [vmem:[%s3950_s1 + $0x140] sm:$0xff]   ;;  %v3197_v50 = vld [vmem:[%s3950_s1 + $0x148] sm:$0xff]  }
  0x12   : > { %2836 = vmatpush3.bf16.msra.mxu1 %v3164_v6  ;;  %v3176_v12 = vld [vmem:[%s3411_s10] ss:$0 sps:$4 sm:$0x77]   ;;  %v3196_v51 = vld [vmem:[%s3950_s1 + $0x110] sm:$0xff]   ;;  %v3198_v53 = vld [vmem:[%s3950_s1 + $0x118] sm:$0xff]  }
  0x13   : > { %2837 = vmatprep.subr.bf16.mxu1 %v3324_v1  ;;  %v393_v15 = vshll.u32 %v3176_v12, 16  ;;  %v391_v18 = vshrl.u32 %v3176_v12, 16  ;;  %v260_v21 = vld [vmem:[%s3411_s10] sm:$0x3]  ;;  %v3199_v52 = vld [vmem:[%s3950_s1 + $0x150] sm:$0xff]   ;;  %v3201_v54 = vld [vmem:[%s3950_s1 + $0x158] sm:$0xff]  }
  0x14   : > { %2818 = vmatpush3.bf16.msra.mxu0 %v3163_v7  ;;  %v3194_v34 = vld [vmem:[%s3411_s10] ss:$0 sps:$4 sm:$0xee]   ;;  %v3202_v57 = vld [vmem:[%s3950_s1 + $0x128] sm:$0xff]   ;;  %v3212_v58 = vld [vmem:[%s3411_s10] sm:$0x1c]  }
  0x15   : > { %2819 = vmatprep.subr.bf16.mxu0 %v3324_v1  ;;  %v395_v19 = vrot.slane %v393_v15, 1  ;;  %v625_v37 = vshrl.u32 %v3194_v34, 16  ;;  %v628_v38 = vshll.u32 %v3194_v34, 16  ;;  %v3189_v39 = vld [vmem:[%s3411_s10] ss:$0 sps:$4 sm:$0x66]  }
  0x16   : > { %2838 = vmatpush3.bf16.msra.mxu1 %v3166_v8  ;;  %v510_v45 = vrot.slane %v3189_v39, 1  ;;  %v3200_v55 = vld [vmem:[%s3950_s1 + $0x120] sm:$0xff]   ;;  %v3205_v59 = vld [vmem:[%s3950_s1 + $0x168] sm:$0xff]   ;;  %v3204_v60 = vld [vmem:[%s3950_s1 + $0x130] sm:$0xff]   ;;  %v863_v61 = vshrl.u32 %v3212_v58, 16  ;;  %v866_v62 = vshll.u32 %v3212_v58, 16 }
  0x17   : > { %2839 = vmatprep.subr.bf16.mxu1 %v3324_v1  ;;  %v396_v23 = vor.u32 %v395_v19, %v391_v18  ;;  %v627_v42 = vrot.slane %v625_v37, 1  ;;  %v630_v43 = vrot.slane %v628_v38, 2  ;;  %v3203_v56 = vld [vmem:[%s3950_s1 + $0x160] sm:$0xff]   ;;  %v3208_v63 = vld [vmem:[%s3950_s1 + $0x170] sm:$0xff]   ;;  %v3206_v0 = vld [vmem:[%s3950_s1 + $0x138] sm:$0xff]  }
  0x18   : > { %2820 = vmatpush3.bf16.msra.mxu0 %v3165_v9  ;;  %v3207_v2 = vld [vmem:[%s3411_s10] ss:$0 sps:$4 sm:$0xcc]   ;;  %v3210_v3 = vld [vmem:[%s3950_s1 + $0x178] sm:$0xff]   ;;  %v865_v4 = vrot.slane %v863_v61, 2  ;;  %v868_v5 = vrot.slane %v866_v62, 3 }
  0x19   : > { %2821 = vmatprep.subr.bf16.mxu0 %v3324_v1  ;;  %v631_v47 = vor.u32 %v630_v43, %v627_v42  ;;  %v745_v6 = vrot.slane %v3207_v2, 2  ;;  %v3209_v7 = vld [vmem:[%s3950_s1 + $0x180] sm:$0xff]   ;;  %v3214_v12 = vld [vmem:[%s3950_s1 + $0x190] sm:$0xff]   ;;  %v3219_v15 = vld [vmem:[%s3950_s1 + $0x1d8] sm:$0xff]  }
  0x1a   : > { %2840 = vmatpush3.bf16.msra.mxu1 %v3168_v10  ;;  %v869_v8 = vor.u32 %v868_v5, %v865_v4  ;;  %v3213_v9 = vld [vmem:[%s3950_s1 + $0x1c0] sm:$0xff]   ;;  %v3211_v10 = vld [vmem:[%s3950_s1 + $0x188] sm:$0xff]   ;;  %v3235_v37 = vld [vmem:[%s3950_s1 + $0x250] sm:$0xff]  }
  0x1b   : > { %2841 = vmatprep.subr.bf16.mxu1 %v3324_v1  ;;  %v3220_v18 = vld [vmem:[%s3950_s1 + $0x1a8] sm:$0xff]   ;;  %v3230_v19 = vld [vmem:[%s3411_s10] sm:$0x38]   ;;  %v3234_v38 = vld [vmem:[%s3950_s1 + $0x218] sm:$0xff]  }
  0x1c   : > { %2822 = vmatpush3.bf16.msra.mxu0 %v3167_v11  ;;  %v3215_v11 = vld [vmem:[%s3950_s1 + $0x1c8] sm:$0xff]   ;;  %v3237_v39 = vld [vmem:[%s3950_s1 + $0x258] sm:$0xff]   ;;  %v3247_v43 = vld [vmem:[%s3411_s10 + $0x4] ss:$0 sps:$4 sm:$0x77]  }
  0x1d   : > { %2823 = vmatprep.subr.bf16.mxu0 %v3324_v1  ;;  %v3229_v34 = vld [vmem:[%s3950_s1 + $0x208] sm:$0xff]   ;;  %v3249_v58 = vld [vmem:[%s3950_s1 + $0x290] sm:$0xff]   ;;  %v3254_v61 = vld [vmem:[%s3950_s1 + $0x2d8] sm:$0xff]  }
  0x1e   : > { %2842 = vmatpush3.bf16.msra.mxu1 %v3170_v13  ;;  %v3217_v13 = vld [vmem:[%s3950_s1 + $0x1d0] sm:$0xff]   ;;  %v3238_v42 = vld [vmem:[%s3950_s1 + $0x228] sm:$0xff]   ;;  %v3253_v62 = vld [vmem:[%s3950_s1 + $0x2a0] sm:$0xff]  }
  0x1f   : > { %2843 = vmatprep.subr.bf16.mxu1 %v3324_v1  ;;  %v3265_v2 = vld [vmem:[%s3411_s10 + $0x4] ss:$0 sps:$4 sm:$0xee]   ;;  %v3257_v4 = vld [vmem:[%s3950_s1 + $0x2b0] sm:$0xff]  }
  0x20   : > { %2824 = vmatpush3.bf16.msra.mxu0 %v3169_v14  ;;  %v3216_v14 = vld [vmem:[%s3950_s1 + $0x198] sm:$0xff]   ;;  %v1568_v5 = vshrl.u32 %v3265_v2, 16 }
  0x21   : > { %2825 = vmatprep.subr.bf16.mxu0 %v3324_v1 }
  0x22   : > { %2844 = vmatpush3.bf16.msra.mxu1 %v3172_v16  ;;  %v3218_v16 = vld [vmem:[%s3950_s1 + $0x1a0] sm:$0xff]  }
  0x23   : > { %2845 = vmatprep.subr.bf16.mxu1 %v3324_v1 }
  0x24   : > { %2826 = vmatpush3.bf16.msra.mxu0 %v3171_v17  ;;  %v3221_v17 = vld [vmem:[%s3950_s1 + $0x1e0] sm:$0xff]  }
  0x25   : > { %2851 = vmatprep.subr.bf16.mxu0 %v3324_v1 }
  0x26   : > { %2846 = vmatpush3.bf16.msra.mxu1 %v3174_v20  ;;  %v3223_v20 = vld [vmem:[%s3950_s1 + $0x1e8] sm:$0xff]  }
  0x27   : > { %2828 = vmatmul.mubr.bf16.vlgmr.msra.gmra.mrb[0].mxu0 %v260_v21  ;;  %2871 = vmatprep.subr.bf16.mxu1 %v3324_v1  ;;  %v3222_v21 = vld [vmem:[%s3950_s1 + $0x1b0] sm:$0xff]  }
  0x28   : > { %2852 = vmatpush3.bf16.msra.mxu0 %v3173_v22  ;;  %2867 = vmatprep.mubr.msk.bf16.mxu0 %vm3325_vm0, %v3324_v1  ;;  %v3226_v22 = vld [vmem:[%s3950_s1 + $0x1f0] sm:$0xff]  }
  0x29   : > { %2853 = vmatprep.subr.bf16.mxu0 %v3324_v1  ;;  %2848 = vmatmul.mubr.bf16.vlgmr.msra.gmra.mrb[0].mxu1 %v396_v23  ;;  %v1104_v23 = vshrl.u32 %v3230_v19, 16 }
  0x2a   : > { %2872 = vmatpush3.bf16.msra.mxu1 %v3177_v24  ;;  %2887 = vmatprep.mubr.msk.bf16.mxu1 %vm3325_vm0, %v3324_v1  ;;  %v1107_v24 = vshll.u32 %v3230_v19, 16  ;;  %v3267_v19 = vld [vmem:[%s3950_s1 + $0x310] sm:$0xff]  }
  0x2b   : > { %2873 = vmatprep.subr.bf16.mxu1 %v3324_v1 }
  0x2c   : > { %2854 = vmatpush3.bf16.msra.mxu0 %v3175_v25  ;;  %v3225_v25 = vld [vmem:[%s3411_s10] sm:$0x18]  }
  0x2d   : > { %2855 = vmatprep.subr.bf16.mxu0 %v3324_v1 }
  0x2e   : > { %2874 = vmatpush3.bf16.msra.mxu1 %v3179_v26  ;;  %v3224_v26 = vld [vmem:[%s3950_s1 + $0x1b8] sm:$0xff]  }
  0x2f   : > { %2875 = vmatprep.subr.bf16.mxu1 %v3324_v1 }
  0x30   : > { %2856 = vmatpush3.bf16.msra.mxu0 %v3178_v27  ;;  %v1106_v27 = vrot.slane %v1104_v23, 3  ;;  %v3271_v23 = vld [vmem:[%s3950_s1 + $0x320] sm:$0xff]  }
  0x31   : > { %2857 = vmatprep.subr.bf16.mxu0 %v3324_v1 }
  0x32   : > { %2876 = vmatpush3.bf16.msra.mxu1 %v3181_v28  ;;  %v1109_v28 = vrot.slane %v1107_v24, 4  ;;  %v3274_v24 = vld [vmem:[%s3950_s1 + $0x360] sm:$0xff]  }
  0x33   : > { %2877 = vmatprep.subr.bf16.mxu1 %v3324_v1 }
  0x34   : > { %2858 = vmatpush3.bf16.msra.mxu0 %v3180_v29  ;;  %v3228_v29 = vld [vmem:[%s3950_s1 + $0x1f8] sm:$0xff]  }
  0x35   : > { %2859 = vmatprep.subr.bf16.mxu0 %v3324_v1 }
  0x36   : > { %2878 = vmatpush3.bf16.msra.mxu1 %v3183_v30  ;;  %v986_v30 = vrot.slane %v3225_v25, 3  ;;  %v3273_v25 = vld [vmem:[%s3950_s1 + $0x328] sm:$0xff]  }
  0x37   : > { %2879 = vmatprep.subr.bf16.mxu1 %v3324_v1 }
  0x38   : > { %2860 = vmatpush3.bf16.msra.mxu0 %v3182_v31  ;;  %v3227_v31 = vld [vmem:[%s3950_s1 + $0x200] sm:$0xff]  }
  0x39   : > { %2861 = vmatprep.subr.bf16.mxu0 %v3324_v1 }
  0x3a   : > { %2880 = vmatpush3.bf16.msra.mxu1 %v3185_v32  ;;  %v1110_v32 = vor.u32 %v1109_v28, %v1106_v27  ;;  %v3276_v27 = vld [vmem:[%s3950_s1 + $0x368] sm:$0xff]   ;;  %v3275_v28 = vld [vmem:[%s3950_s1 + $0x330] sm:$0xff]  }
  0x3b   : > { %2881 = vmatprep.subr.bf16.mxu1 %v3324_v1 }
  0x3c   : > { %2862 = vmatpush3.bf16.msra.mxu0 %v3184_v33  ;;  %v3231_v33 = vld [vmem:[%s3950_s1 + $0x240] sm:$0xff]  }
  0x3d   : > { %2863 = vmatprep.subr.bf16.mxu0 %v3324_v1 }
  0x3e   : > { %2882 = vmatpush3.bf16.msra.mxu1 %v3187_v35  ;;  %v3233_v35 = vld [vmem:[%s3950_s1 + $0x248] sm:$0xff]  }
  0x3f   : > { %2883 = vmatprep.subr.bf16.mxu1 %v3324_v1 }
  0x40   : > { %2864 = vmatpush3.bf16.msra.mxu0 %v3186_v36  ;;  %v3232_v36 = vld [vmem:[%s3950_s1 + $0x210] sm:$0xff]  }
  0x41   : > { %2865 = vmatprep.subr.bf16.mxu0 %v3324_v1 }
  0x42   : > { %2884 = vmatpush3.bf16.msra.mxu1 %v3190_v40  ;;  %v3236_v40 = vld [vmem:[%s3950_s1 + $0x220] sm:$0xff]  }
  0x43   : > { %2885 = vmatprep.subr.bf16.mxu1 %v3324_v1 }
  0x44   : > { %2866 = vmatpush3.bf16.msra.mxu0 %v3188_v41  ;;  %v3239_v41 = vld [vmem:[%s3950_s1 + $0x260] sm:$0xff]  }
  0x45   : > { %2891 = vmatprep.subr.bf16.mxu0 %v3324_v1 }
  0x46   : > { %2886 = vmatpush3.bf16.msra.mxu1 %v3192_v44  ;;  %v3241_v44 = vld [vmem:[%s3950_s1 + $0x268] sm:$0xff]  }
  0x47   : > { %2868 = vmatmul.mubr.bf16.vlgmr.msra.gmra.mrb[4].mxu0 %v510_v45  ;;  %2911 = vmatprep.subr.bf16.mxu1 %v3324_v1  ;;  %v3240_v45 = vld [vmem:[%s3950_s1 + $0x230] sm:$0xff]  }
  0x48   : > { %2892 = vmatpush3.bf16.msra.mxu0 %v3191_v46  ;;  %2907 = vmatprep.mubr.msk.bf16.mxu0 %vm3325_vm0, %v3324_v1  ;;  %v1336_v46 = vshll.u32 %v3247_v43, 16 }
  0x49   : > { %2893 = vmatprep.subr.bf16.mxu0 %v3324_v1  ;;  %2888 = vmatmul.mubr.bf16.vlgmr.msra.gmra.mrb[4].mxu1 %v631_v47  ;;  %v3243_v47 = vld [vmem:[%s3950_s1 + $0x270] sm:$0xff]  }
  0x4a   : > { %2912 = vmatpush3.bf16.msra.mxu1 %v3195_v48  ;;  %2927 = vmatprep.mubr.msk.bf16.mxu1 %vm3325_vm0, %v3324_v1  ;;  %v3242_v48 = vld [vmem:[%s3950_s1 + $0x238] sm:$0xff]  }
  0x4b   : > { %2913 = vmatprep.subr.bf16.mxu1 %v3324_v1 }
  0x4c   : > { %2894 = vmatpush3.bf16.msra.mxu0 %v3193_v49  ;;  %v1334_v49 = vshrl.u32 %v3247_v43, 16  ;;  %v3285_v43 = vld [vmem:[%s3950_s1 + $0x390] sm:$0xff]  }
  0x4d   : > { %2895 = vmatprep.subr.bf16.mxu0 %v3324_v1 }
  0x4e   : > { %2914 = vmatpush3.bf16.msra.mxu1 %v3197_v50  ;;  %v1338_v50 = vrot.slane %v1336_v46, 1  ;;  %v3290_v46 = vld [vmem:[%s3950_s1 + $0x3d8] sm:$0xff]  }
  0x4f   : > { %2915 = vmatprep.subr.bf16.mxu1 %v3324_v1 }
  0x50   : > { %2896 = vmatpush3.bf16.msra.mxu0 %v3196_v51  ;;  %v3245_v51 = vld [vmem:[%s3950_s1 + $0x278] sm:$0xff]  }
  0x51   : > { %2897 = vmatprep.subr.bf16.mxu0 %v3324_v1 }
  0x52   : > { %2916 = vmatpush3.bf16.msra.mxu1 %v3199_v52  ;;  %v1202_v52 = vld [vmem:[%s3411_s10 + $0x4] sm:$0x3] }
  0x53   : > { %2917 = vmatprep.subr.bf16.mxu1 %v3324_v1 }
  0x54   : > { %2898 = vmatpush3.bf16.msra.mxu0 %v3198_v53  ;;  %v3244_v53 = vld [vmem:[%s3950_s1 + $0x280] sm:$0xff]  }
  0x55   : > { %2899 = vmatprep.subr.bf16.mxu0 %v3324_v1 }
  0x56   : > { %2918 = vmatpush3.bf16.msra.mxu1 %v3201_v54  ;;  %v1339_v54 = vor.u32 %v1338_v50, %v1334_v49  ;;  %v261_v49 = vld [vmem:[#allocation2] sm:$0xf]  ;;  %v3291_v50 = vld [vmem:[%s3950_s1 + $0x3a8] sm:$0xff]  }
  0x57   : > { %2919 = vmatprep.subr.bf16.mxu1 %v3324_v1 }
  0x58   : > { %2900 = vmatpush3.bf16.msra.mxu0 %v3200_v55  ;;  %v3248_v55 = vld [vmem:[%s3950_s1 + $0x2c0] sm:$0xff]  }
  0x59   : > { %2901 = vmatprep.subr.bf16.mxu0 %v3324_v1 }
  0x5a   : > { %2920 = vmatpush3.bf16.msra.mxu1 %v3203_v56  ;;  %v3246_v56 = vld [vmem:[%s3950_s1 + $0x288] sm:$0xff]  }
  0x5b   : > { %2921 = vmatprep.subr.bf16.mxu1 %v3324_v1 }
  0x5c   : > { %2902 = vmatpush3.bf16.msra.mxu0 %v3202_v57  ;;  %v3250_v57 = vld [vmem:[%s3950_s1 + $0x2c8] sm:$0xff]  }
  0x5d   : > { %2903 = vmatprep.subr.bf16.mxu0 %v3324_v1 }
  0x5e   : > { %2922 = vmatpush3.bf16.msra.mxu1 %v3205_v59  ;;  %v3252_v59 = vld [vmem:[%s3950_s1 + $0x2d0] sm:$0xff]  }
  0x5f   : > { %2923 = vmatprep.subr.bf16.mxu1 %v3324_v1 }
  0x60   : > { %2904 = vmatpush3.bf16.msra.mxu0 %v3204_v60  ;;  %v3251_v60 = vld [vmem:[%s3950_s1 + $0x298] sm:$0xff]  }
  0x61   : > { %2905 = vmatprep.subr.bf16.mxu0 %v3324_v1 }
  0x62   : > { %2924 = vmatpush3.bf16.msra.mxu1 %v3208_v63  ;;  %v3256_v63 = vld [vmem:[%s3950_s1 + $0x2e0] sm:$0xff]  }
  0x63   : > { %2925 = vmatprep.subr.bf16.mxu1 %v3324_v1 }
  0x64   : > { %2906 = vmatpush3.bf16.msra.mxu0 %v3206_v0  ;;  %v3255_v0 = vld [vmem:[%s3950_s1 + $0x2a8] sm:$0xff]  }
  0x65   : > { %2931 = vmatprep.subr.bf16.mxu0 %v3324_v1 }
  0x66   : > { %2926 = vmatpush3.bf16.msra.mxu1 %v3210_v3  ;;  %v3258_v3 = vld [vmem:[%s3950_s1 + $0x2e8] sm:$0xff]  }
  0x67   : > { %2908 = vmatmul.mubr.bf16.vlgmr.msra.gmra.mrb[8].mxu0 %v745_v6  ;;  %2951 = vmatprep.subr.bf16.mxu1 %v3324_v1  ;;  %v1571_v6 = vshll.u32 %v3265_v2, 16 }
  0x68   : > { %2932 = vmatpush3.bf16.msra.mxu0 %v3209_v7  ;;  %2947 = vmatprep.mubr.msk.bf16.mxu0 %vm3325_vm0, %v3324_v1  ;;  %v3261_v7 = vld [vmem:[%s3950_s1 + $0x2f0] sm:$0xff]  }
  0x69   : > { %2933 = vmatprep.subr.bf16.mxu0 %v3324_v1  ;;  %2928 = vmatmul.mubr.bf16.vlgmr.msra.gmra.mrb[8].mxu1 %v869_v8  ;;  %v3260_v8 = vld [vmem:[%s3411_s10 + $0x4] ss:$0 sps:$4 sm:$0x66]  }
  0x6a   : > { %2952 = vmatpush3.bf16.msra.mxu1 %v3213_v9  ;;  %2967 = vmatprep.mubr.msk.bf16.mxu1 %vm3325_vm0, %v3324_v1  ;;  %v3259_v9 = vld [vmem:[%s3950_s1 + $0x2b8] sm:$0xff]  }
  0x6b   : > { %2953 = vmatprep.subr.bf16.mxu1 %v3324_v1 }
  0x6c   : > { %2934 = vmatpush3.bf16.msra.mxu0 %v3211_v10  ;;  %v1570_v10 = vrot.slane %v1568_v5, 1 }
  0x6d   : > { %2935 = vmatprep.subr.bf16.mxu0 %v3324_v1 }
  0x6e   : > { %2954 = vmatpush3.bf16.msra.mxu1 %v3215_v11  ;;  %v1573_v11 = vrot.slane %v1571_v6, 2 }
  0x6f   : > { %2955 = vmatprep.subr.bf16.mxu1 %v3324_v1 }
  0x70   : > { %2936 = vmatpush3.bf16.msra.mxu0 %v3214_v12  ;;  %v3263_v12 = vld [vmem:[%s3950_s1 + $0x2f8] sm:$0xff]  }
  0x71   : > { %2937 = vmatprep.subr.bf16.mxu0 %v3324_v1 }
  0x72   : > { %2956 = vmatpush3.bf16.msra.mxu1 %v3217_v13  ;;  %v1453_v13 = vrot.slane %v3260_v8, 1 }
  0x73   : > { %2957 = vmatprep.subr.bf16.mxu1 %v3324_v1 }
  0x74   : > { %2938 = vmatpush3.bf16.msra.mxu0 %v3216_v14  ;;  %v3262_v14 = vld [vmem:[%s3950_s1 + $0x300] sm:$0xff]  }
  0x75   : > { %2939 = vmatprep.subr.bf16.mxu0 %v3324_v1 }
  0x76   : > { %2958 = vmatpush3.bf16.msra.mxu1 %v3219_v15  ;;  %v1574_v15 = vor.u32 %v1573_v11, %v1570_v10 }
  0x77   : > { %2959 = vmatprep.subr.bf16.mxu1 %v3324_v1 }
  0x78   : > { %2940 = vmatpush3.bf16.msra.mxu0 %v3218_v16  ;;  %v3266_v16 = vld [vmem:[%s3950_s1 + $0x340] sm:$0xff]  }
  0x79   : > { %2941 = vmatprep.subr.bf16.mxu0 %v3324_v1 }
  0x7a   : > { %2960 = vmatpush3.bf16.msra.mxu1 %v3221_v17  ;;  %v3264_v17 = vld [vmem:[%s3950_s1 + $0x308] sm:$0xff]  }
  0x7b   : > { %2961 = vmatprep.subr.bf16.mxu1 %v3324_v1 }
  0x7c   : > { %2942 = vmatpush3.bf16.msra.mxu0 %v3220_v18  ;;  %v3268_v18 = vld [vmem:[%s3950_s1 + $0x348] sm:$0xff]  }
  0x7d   : > { %2943 = vmatprep.subr.bf16.mxu0 %v3324_v1 }
  0x7e   : > { %2962 = vmatpush3.bf16.msra.mxu1 %v3223_v20  ;;  %v3270_v20 = vld [vmem:[%s3950_s1 + $0x350] sm:$0xff]  }
  0x7f   : > { %2963 = vmatprep.subr.bf16.mxu1 %v3324_v1 }
  0x80   : > { %2944 = vmatpush3.bf16.msra.mxu0 %v3222_v21  ;;  %v3269_v21 = vld [vmem:[%s3950_s1 + $0x318] sm:$0xff]  }
  0x81   : > { %2945 = vmatprep.subr.bf16.mxu0 %v3324_v1 }
  0x82   : > { %2964 = vmatpush3.bf16.msra.mxu1 %v3226_v22  ;;  %v3272_v22 = vld [vmem:[%s3950_s1 + $0x358] sm:$0xff]  }
  0x83   : > { %2965 = vmatprep.subr.bf16.mxu1 %v3324_v1 }
  0x84   : > { %2946 = vmatpush3.bf16.msra.mxu0 %v3224_v26  ;;  %v3283_v26 = vld [vmem:[%s3411_s10 + $0x4] sm:$0x1c]  }
  0x85   : > { %2971 = vmatprep.subr.bf16.mxu0 %v3324_v1 }
  0x86   : > { %2966 = vmatpush3.bf16.msra.mxu1 %v3228_v29  ;;  %v1806_v29 = vshrl.u32 %v3283_v26, 16 }
  0x87   : > { %2948 = vmatmul.mubr.bf16.vlgmr.msra.gmra.mrb[12].mxu0 %v986_v30  ;;  %2991 = vmatprep.subr.bf16.mxu1 %v3324_v1  ;;  %v1809_v30 = vshll.u32 %v3283_v26, 16 }
  0x88   : > { %2972 = vmatpush3.bf16.msra.mxu0 %v3227_v31  ;;  %2987 = vmatprep.mubr.msk.bf16.mxu0 %vm3325_vm0, %v3324_v1  ;;  %v3279_v31 = vld [vmem:[%s3950_s1 + $0x370] sm:$0xff]  }
  0x89   : > { %2973 = vmatprep.subr.bf16.mxu0 %v3324_v1  ;;  %2968 = vmatmul.mubr.bf16.vlgmr.msra.gmra.mrb[12].mxu1 %v1110_v32  ;;  %v3278_v32 = vld [vmem:[%s3411_s10 + $0x4] ss:$0 sps:$4 sm:$0xcc]  }
  0x8a   : > { %2992 = vmatpush3.bf16.msra.mxu1 %v3231_v33  ;;  %3007 = vmatprep.mubr.msk.bf16.mxu1 %vm3325_vm0, %v3324_v1  ;;  %v3277_v33 = vld [vmem:[%s3950_s1 + $0x338] sm:$0xff]  }
  0x8b   : > { %2993 = vmatprep.subr.bf16.mxu1 %v3324_v1 }
  0x8c   : > { %2974 = vmatpush3.bf16.msra.mxu0 %v3229_v34  ;;  %v1808_v34 = vrot.slane %v1806_v29, 2 }
  0x8d   : > { %2975 = vmatprep.subr.bf16.mxu0 %v3324_v1 }
  0x8e   : > { %2994 = vmatpush3.bf16.msra.mxu1 %v3233_v35  ;;  %v1811_v35 = vrot.slane %v1809_v30, 3 }
  0x8f   : > { %2995 = vmatprep.subr.bf16.mxu1 %v3324_v1 }
  0x90   : > { %2976 = vmatpush3.bf16.msra.mxu0 %v3232_v36  ;;  %v3281_v36 = vld [vmem:[%s3950_s1 + $0x378] sm:$0xff]  }
  0x91   : > { %2977 = vmatprep.subr.bf16.mxu0 %v3324_v1 }
  0x92   : > { %2996 = vmatpush3.bf16.msra.mxu1 %v3235_v37  ;;  %v1688_v37 = vrot.slane %v3278_v32, 2 }
  0x93   : > { %2997 = vmatprep.subr.bf16.mxu1 %v3324_v1 }
  0x94   : > { %2978 = vmatpush3.bf16.msra.mxu0 %v3234_v38  ;;  %v3280_v38 = vld [vmem:[%s3950_s1 + $0x380] sm:$0xff]  }
  0x95   : > { %2979 = vmatprep.subr.bf16.mxu0 %v3324_v1 }
  0x96   : > { %2998 = vmatpush3.bf16.msra.mxu1 %v3237_v39  ;;  %v1812_v39 = vor.u32 %v1811_v35, %v1808_v34 }
  0x97   : > { %2999 = vmatprep.subr.bf16.mxu1 %v3324_v1 }
  0x98   : > { %2980 = vmatpush3.bf16.msra.mxu0 %v3236_v40  ;;  %v3284_v40 = vld [vmem:[%s3950_s1 + $0x3c0] sm:$0xff]  }
  0x99   : > { %2981 = vmatprep.subr.bf16.mxu0 %v3324_v1 }
  0x9a   : > { %3000 = vmatpush3.bf16.msra.mxu1 %v3239_v41  ;;  %v3282_v41 = vld [vmem:[%s3950_s1 + $0x388] sm:$0xff]  }
  0x9b   : > { %3001 = vmatprep.subr.bf16.mxu1 %v3324_v1 }
  0x9c   : > { %2982 = vmatpush3.bf16.msra.mxu0 %v3238_v42  ;;  %v3286_v42 = vld [vmem:[%s3950_s1 + $0x3c8] sm:$0xff]  }
  0x9d   : > { %2983 = vmatprep.subr.bf16.mxu0 %v3324_v1 }
  0x9e   : > { %3002 = vmatpush3.bf16.msra.mxu1 %v3241_v44  ;;  %v3288_v44 = vld [vmem:[%s3950_s1 + $0x3d0] sm:$0xff]  }
  0x9f   : > { %3003 = vmatprep.subr.bf16.mxu1 %v3324_v1 }
  0xa0   : > { %2984 = vmatpush3.bf16.msra.mxu0 %v3240_v45  ;;  %v3287_v45 = vld [vmem:[%s3950_s1 + $0x398] sm:$0xff]  }
  0xa1   : > { %2985 = vmatprep.subr.bf16.mxu0 %v3324_v1 }
  0xa2   : > { %3004 = vmatpush3.bf16.msra.mxu1 %v3243_v47  ;;  %v3289_v47 = vld [vmem:[%s3950_s1 + $0x3a0] sm:$0xff]  }
  0xa3   : > { %3005 = vmatprep.subr.bf16.mxu1 %v3324_v1 }
  0xa4   : > { %2986 = vmatpush3.bf16.msra.mxu0 %v3242_v48  ;;  %v3292_v48 = vld [vmem:[%s3950_s1 + $0x3e0] sm:$0xff]  }
  0xa5   : > { %3011 = vmatprep.subr.bf16.mxu0 %v3324_v1 }
  0xa6   : > { %3006 = vmatpush3.bf16.msra.mxu1 %v3245_v51  ;;  %v3299_v51 = vld [vmem:[%s3411_s10 + $0x4] sm:$0x38]  }
  0xa7   : > { %2988 = vmatmul.mubr.bf16.vlgmr.msra.gmra.mrb[16].mxu0 %v1202_v52  ;;  %3031 = vmatprep.subr.bf16.mxu1 %v3324_v1 }
  0xa8   : > { %3012 = vmatpush3.bf16.msra.mxu0 %v3244_v53  ;;  %3027 = vmatprep.mubr.msk.bf16.mxu0 %vm3325_vm0, %v3324_v1  ;;  %v3294_v53 = vld [vmem:[%s3950_s1 + $0x3e8] sm:$0xff]  }
  0xa9   : > { %3013 = vmatprep.subr.bf16.mxu0 %v3324_v1  ;;  %3008 = vmatmul.mubr.bf16.vlgmr.msra.gmra.mrb[16].mxu1 %v1339_v54 }
  0xaa   : > { %3032 = vmatpush3.bf16.msra.mxu1 %v3248_v55  ;;  %3047 = vmatprep.mubr.msk.bf16.mxu1 %vm3325_vm0, %v3324_v1 }
  0xab   : > { %3033 = vmatprep.subr.bf16.mxu1 %v3324_v1 }
  0xac   : > { %3014 = vmatpush3.bf16.msra.mxu0 %v3246_v56 }
  0xad   : > { %3015 = vmatprep.subr.bf16.mxu0 %v3324_v1 }
  0xae   : > { %3034 = vmatpush3.bf16.msra.mxu1 %v3250_v57  ;;  %v3293_v57 = vld [vmem:[%s3950_s1 + $0x3b0] sm:$0xff]  }
  0xaf   : > { %3035 = vmatprep.subr.bf16.mxu1 %v3324_v1 }
  0xb0   : > { %3016 = vmatpush3.bf16.msra.mxu0 %v3249_v58 }
  0xb1   : > { %3017 = vmatprep.subr.bf16.mxu0 %v3324_v1 }
  0xb2   : > { %3036 = vmatpush3.bf16.msra.mxu1 %v3252_v59 }
  0xb3   : > { %3037 = vmatprep.subr.bf16.mxu1 %v3324_v1 }
  0xb4   : > { %3018 = vmatpush3.bf16.msra.mxu0 %v3251_v60 }
  0xb5   : > { %3019 = vmatprep.subr.bf16.mxu0 %v3324_v1 }
  0xb6   : > { %3038 = vmatpush3.bf16.msra.mxu1 %v3254_v61  ;;  %v2047_v61 = vshrl.u32 %v3299_v51, 16 }
  0xb7   : > { %3039 = vmatprep.subr.bf16.mxu1 %v3324_v1 }
  0xb8   : > { %3020 = vmatpush3.bf16.msra.mxu0 %v3253_v62  ;;  %v2050_v62 = vshll.u32 %v3299_v51, 16  ;;  %v2049_v5 = vrot.slane %v2047_v61, 3 }
  0xb9   : > { %3021 = vmatprep.subr.bf16.mxu0 %v3324_v1 }
  0xba   : > { %3040 = vmatpush3.bf16.msra.mxu1 %v3256_v63  ;;  %v2052_v6 = vrot.slane %v2050_v62, 4 }
  0xbb   : > { %3041 = vmatprep.subr.bf16.mxu1 %v3324_v1 }
  0xbc   : > { %3022 = vmatpush3.bf16.msra.mxu0 %v3255_v0  ;;  %v3297_v0 = vld [vmem:[%s3950_s1 + $0x3f0] sm:$0xff]   ;;  %v2053_v11 = vor.u32 %v2052_v6, %v2049_v5 }
  0xbd   : > { %3023 = vmatprep.subr.bf16.mxu0 %v3324_v1 }
  0xbe   : > { %3042 = vmatpush3.bf16.msra.mxu1 %v3258_v3  ;;  %v3296_v3 = vld [vmem:[%s3411_s10 + $0x4] sm:$0x18]  }
  0xbf   : > { %3043 = vmatprep.subr.bf16.mxu1 %v3324_v1  ;;  %v1929_v8 = vrot.slane %v3296_v3, 3 }
  0xc0   : > { %3024 = vmatpush3.bf16.msra.mxu0 %v3257_v4  ;;  %v3295_v4 = vld [vmem:[%s3950_s1 + $0x3b8] sm:$0xff]  }
  0xc1   : > { %3025 = vmatprep.subr.bf16.mxu0 %v3324_v1 }
  0xc2   : > { %3044 = vmatpush3.bf16.msra.mxu1 %v3261_v7  ;;  %v3298_v7 = vld [vmem:[%s3950_s1 + $0x3f8] sm:$0xff]  }
  0xc3   : > { %3045 = vmatprep.subr.bf16.mxu1 %v3324_v1 }
  0xc4   : > { %3026 = vmatpush3.bf16.msra.mxu0 %v3259_v9 }
  0xc5   : > { %3051 = vmatprep.subr.bf16.mxu0 %v3324_v1 }
  0xc6   : > { %3046 = vmatpush3.bf16.msra.mxu1 %v3263_v12 }
  0xc7   : > { %3028 = vmatmul.mubr.bf16.vlgmr.msra.gmra.mrb[20].mxu0 %v1453_v13  ;;  %3071 = vmatprep.subr.bf16.mxu1 %v3324_v1 }
  0xc8   : > { %3052 = vmatpush3.bf16.msra.mxu0 %v3262_v14  ;;  %3067 = vmatprep.mubr.msk.bf16.mxu0 %vm3325_vm0, %v3324_v1 }
  0xc9   : > { %3053 = vmatprep.subr.bf16.mxu0 %v3324_v1  ;;  %3048 = vmatmul.mubr.bf16.vlgmr.msra.gmra.mrb[20].mxu1 %v1574_v15 }
  0xca   : > { %3072 = vmatpush3.bf16.msra.mxu1 %v3266_v16  ;;  %3087 = vmatprep.mubr.msk.bf16.mxu1 %vm3325_vm0, %v3324_v1 }
  0xcb   : > { %3073 = vmatprep.subr.bf16.mxu1 %v3324_v1 }
  0xcc   : > { %3054 = vmatpush3.bf16.msra.mxu0 %v3264_v17 }
  0xcd   : > { %3055 = vmatprep.subr.bf16.mxu0 %v3324_v1 }
  0xce   : > { %3074 = vmatpush3.bf16.msra.mxu1 %v3268_v18 }
  0xcf   : > { %3075 = vmatprep.subr.bf16.mxu1 %v3324_v1 }
  0xd0   : > { %3056 = vmatpush3.bf16.msra.mxu0 %v3267_v19 }
  0xd1   : > { %3057 = vmatprep.subr.bf16.mxu0 %v3324_v1 }
  0xd2   : > { %3076 = vmatpush3.bf16.msra.mxu1 %v3270_v20 }
  0xd3   : > { %3077 = vmatprep.subr.bf16.mxu1 %v3324_v1 }
  0xd4   : > { %3058 = vmatpush3.bf16.msra.mxu0 %v3269_v21 }
  0xd5   : > { %3059 = vmatprep.subr.bf16.mxu0 %v3324_v1 }
  0xd6   : > { %3078 = vmatpush3.bf16.msra.mxu1 %v3272_v22 }
  0xd7   : > { %3079 = vmatprep.subr.bf16.mxu1 %v3324_v1 }
  0xd8   : > { %3060 = vmatpush3.bf16.msra.mxu0 %v3271_v23 }
  0xd9   : > { %3061 = vmatprep.subr.bf16.mxu0 %v3324_v1 }
  0xda   : > { %3080 = vmatpush3.bf16.msra.mxu1 %v3274_v24 }
  0xdb   : > { %3081 = vmatprep.subr.bf16.mxu1 %v3324_v1 }
  0xdc   : > { %3062 = vmatpush3.bf16.msra.mxu0 %v3273_v25 }
  0xdd   : > { %3063 = vmatprep.subr.bf16.mxu0 %v3324_v1 }
  0xde   : > { %3082 = vmatpush3.bf16.msra.mxu1 %v3276_v27 }
  0xdf   : > { %3083 = vmatprep.subr.bf16.mxu1 %v3324_v1 }
  0xe0   : > { %3064 = vmatpush3.bf16.msra.mxu0 %v3275_v28 }
  0xe1   : > { %3065 = vmatprep.subr.bf16.mxu0 %v3324_v1 }
  0xe2   : > { %3084 = vmatpush3.bf16.msra.mxu1 %v3279_v31 }
  0xe3   : > { %3085 = vmatprep.subr.bf16.mxu1 %v3324_v1 }
  0xe4   : > { %3066 = vmatpush3.bf16.msra.mxu0 %v3277_v33 }
  0xe5   : > { %3091 = vmatprep.subr.bf16.mxu0 %v3324_v1 }
  0xe6   : > { %3086 = vmatpush3.bf16.msra.mxu1 %v3281_v36 }
  0xe7   : > { %3068 = vmatmul.mubr.bf16.vlgmr.msra.gmra.mrb[24].mxu0 %v1688_v37  ;;  %3111 = vmatprep.subr.bf16.mxu1 %v3324_v1 }
  0xe8   : > { %3092 = vmatpush3.bf16.msra.mxu0 %v3280_v38  ;;  %3107 = vmatprep.mubr.msk.bf16.mxu0 %vm3325_vm0, %v3324_v1 }
  0xe9   : > { %3093 = vmatprep.subr.bf16.mxu0 %v3324_v1  ;;  %3088 = vmatmul.mubr.bf16.vlgmr.msra.gmra.mrb[24].mxu1 %v1812_v39 }
  0xea   : > { %3112 = vmatpush3.bf16.msra.mxu1 %v3284_v40  ;;  %3127 = vmatprep.mubr.msk.bf16.mxu1 %vm3325_vm0, %v3324_v1 }
  0xeb   : > { %3113 = vmatprep.subr.bf16.mxu1 %v3324_v1 }
  0xec   : > { %3094 = vmatpush3.bf16.msra.mxu0 %v3282_v41 }
  0xed   : > { %3095 = vmatprep.subr.bf16.mxu0 %v3324_v1 }
  0xee   : > { %3114 = vmatpush3.bf16.msra.mxu1 %v3286_v42 }
  0xef   : > { %3115 = vmatprep.subr.bf16.mxu1 %v3324_v1 }
  0xf0   : > { %3096 = vmatpush3.bf16.msra.mxu0 %v3285_v43 }
  0xf1   : > { %3097 = vmatprep.subr.bf16.mxu0 %v3324_v1 }
  0xf2   : > { %3116 = vmatpush3.bf16.msra.mxu1 %v3288_v44 }
  0xf3   : > { %3117 = vmatprep.subr.bf16.mxu1 %v3324_v1 }
  0xf4   : > { %3098 = vmatpush3.bf16.msra.mxu0 %v3287_v45 }
  0xf5   : > { %3099 = vmatprep.subr.bf16.mxu0 %v3324_v1 }
  0xf6   : > { %3118 = vmatpush3.bf16.msra.mxu1 %v3290_v46 }
  0xf7   : > { %3119 = vmatprep.subr.bf16.mxu1 %v3324_v1 }
  0xf8   : > { %3100 = vmatpush3.bf16.msra.mxu0 %v3289_v47 }
  0xf9   : > { %3101 = vmatprep.subr.bf16.mxu0 %v3324_v1 }
  0xfa   : > { %v360_v52 = vpop.f32.mrb[0].mxu0  ;;  %3120 = vmatpush3.bf16.msra.mxu1 %v3292_v48 }
  0xfb   : > { %v366_v54 = vadd.f32 %v360_v52, %v261_v49  ;;  %v2829_v55 = vpop.f32.mrb[1].mxu0  ;;  %3121 = vmatprep.subr.bf16.mxu1 %v3324_v1 }
  0xfc   : > { %v363_v56 = vpop.f32.mrb[2].mxu0  ;;  %3102 = vmatpush3.bf16.msra.mxu0 %v3291_v50  ;;  %v480_v58 = vpop.f32.mrb[0].mxu1 }
  0xfd   : > { %367 = vst [vmem:[#allocation2] sm:$0xf] %v366_v54  ;;  %v2830_v59 = vpop.f32.mrb[3].mxu0  ;;  %3103 = vmatprep.subr.bf16.mxu0 %v3324_v1  ;;  %v2849_v60 = vpop.f32.mrb[1].mxu1 }
  0xfe   : > { %3122 = vmatpush3.bf16.msra.mxu1 %v3294_v53  ;;  %v483_v63 = vpop.f32.mrb[2].mxu1 }
  0xff   : > { %v2850_v2 = vpop.f32.mrb[3].mxu1  ;;  %3123 = vmatprep.subr.bf16.mxu1 %v3324_v1 }
 0x100   : > { %3104 = vmatpush3.bf16.msra.mxu0 %v3293_v57 }
 0x101   : > { %3105 = vmatprep.subr.bf16.mxu0 %v3324_v1 }
 0x102   : > { %3124 = vmatpush3.bf16.msra.mxu1 %v3297_v0 }
 0x103   : > { %3125 = vmatprep.subr.bf16.mxu1 %v3324_v1 }
 0x104   : > { %v369_v9 = vld [vmem:[#allocation2] sm:$0xf]  ;;  %3106 = vmatpush3.bf16.msra.mxu0 %v3295_v4 }
 0x105   : > { %v486_v10 = vadd.f32 %v480_v58, %v369_v9 }
 0x106   : > { %3126 = vmatpush3.bf16.msra.mxu1 %v3298_v7 }
 0x107   : > { %487 = vst [vmem:[#allocation2] sm:$0xf] %v486_v10  ;;  %3108 = vmatmul.mubr.bf16.vlgmr.msra.gmra.mrb[28].mxu0 %v1929_v8 }
 0x109   : > { %3128 = vmatmul.mubr.bf16.vlgmr.msra.gmra.mrb[28].mxu1 %v2053_v11 }
 0x10e   : > { %v489_v12 = vld [vmem:[#allocation2] sm:$0xf] }
 0x11a   : > { %v594_v13 = vpop.f32.mrb[4].mxu0 }
 0x11b   : > { %v600_v14 = vadd.f32 %v594_v13, %v489_v12  ;;  %v2869_v15 = vpop.f32.mrb[5].mxu0 }
 0x11c   : > { %v597_v16 = vpop.f32.mrb[6].mxu0  ;;  %v715_v17 = vpop.f32.mrb[4].mxu1 }
 0x11d   : > { %601 = vst [vmem:[#allocation2] sm:$0xf] %v600_v14  ;;  %v2870_v18 = vpop.f32.mrb[7].mxu0  ;;  %v2889_v19 = vpop.f32.mrb[5].mxu1 }
 0x11e   : > { %v718_v20 = vpop.f32.mrb[6].mxu1 }
 0x11f   : > { %v2890_v21 = vpop.f32.mrb[7].mxu1 }
 0x124   : > { %v603_v1 = vld [vmem:[#allocation2] sm:$0xf] }
 0x125   : > { %v721_v22 = vadd.f32 %v715_v17, %v603_v1 }
 0x127   : > { %722 = vst [vmem:[#allocation2] sm:$0xf] %v721_v22 }
 0x12e   : > { %v724_v23 = vld [vmem:[#allocation2] sm:$0xf] }
 0x13a   : > { %v829_v24 = vpop.f32.mrb[8].mxu0 }
 0x13b   : > { %v835_v25 = vadd.f32 %v829_v24, %v724_v23  ;;  %v2909_v26 = vpop.f32.mrb[9].mxu0 }
 0x13c   : > { %v832_v27 = vpop.f32.mrb[10].mxu0  ;;  %v953_v28 = vpop.f32.mrb[8].mxu1 }
 0x13d   : > { %836 = vst [vmem:[#allocation2] sm:$0xf] %v835_v25  ;;  %v2910_v29 = vpop.f32.mrb[11].mxu0  ;;  %v2929_v30 = vpop.f32.mrb[9].mxu1 }
 0x13e   : > { %v956_v31 = vpop.f32.mrb[10].mxu1 }
 0x13f   : > { %v2930_v32 = vpop.f32.mrb[11].mxu1  ;;  %v2664_v31 = vld [vmem:[%s3951_s2] ss:$0 sm:$0xff] }
 0x144   : > { %v839_v33 = vld [vmem:[#allocation2] sm:$0xf] }
 0x145   : > { %v959_v34 = vadd.f32 %v953_v28, %v839_v33 }
 0x147   : > { %960 = vst [vmem:[#allocation2] sm:$0xf] %v959_v34 }
 0x14e   : > { %v963_v35 = vld [vmem:[#allocation2] sm:$0xf] }
 0x15a   : > { %v1070_v36 = vpop.f32.mrb[12].mxu0 }
 0x15b   : > { %v1076_v37 = vadd.f32 %v1070_v36, %v963_v35  ;;  %v2949_v38 = vpop.f32.mrb[13].mxu0 }
 0x15c   : > { %v1073_v39 = vpop.f32.mrb[14].mxu0  ;;  %v1194_v40 = vpop.f32.mrb[12].mxu1 }
 0x15d   : > { %1077 = vst [vmem:[#allocation2] sm:$0xf] %v1076_v37  ;;  %v2950_v41 = vpop.f32.mrb[15].mxu0  ;;  %v2969_v42 = vpop.f32.mrb[13].mxu1 }
 0x15e   : > { %v1197_v43 = vpop.f32.mrb[14].mxu1 }
 0x15f   : > { %v2970_v44 = vpop.f32.mrb[15].mxu1 }
 0x164   : > { %v1080_v45 = vld [vmem:[#allocation2] sm:$0xf] }
 0x165   : > { %v1200_v46 = vadd.f32 %v1194_v40, %v1080_v45 }
 0x167   : > { %1201 = vst [vmem:[#allocation2] sm:$0xf] %v1200_v46 }
 0x16e   : > { %v1203_v47 = vld [vmem:[#allocation2] sm:$0xf] }
 0x17a   : > { %v1303_v48 = vpop.f32.mrb[16].mxu0 }
 0x17b   : > { %v1309_v49 = vadd.f32 %v1303_v48, %v1203_v47  ;;  %v2989_v50 = vpop.f32.mrb[17].mxu0 }
 0x17c   : > { %v1306_v51 = vpop.f32.mrb[18].mxu0  ;;  %v1423_v52 = vpop.f32.mrb[16].mxu1 }
 0x17d   : > { %1310 = vst [vmem:[#allocation2] sm:$0xf] %v1309_v49  ;;  %v2990_v53 = vpop.f32.mrb[19].mxu0  ;;  %v3009_v54 = vpop.f32.mrb[17].mxu1 }
 0x17e   : > { %v1426_v55 = vpop.f32.mrb[18].mxu1 }
 0x17f   : > { %v3010_v56 = vpop.f32.mrb[19].mxu1 }
 0x184   : > { %v1312_v57 = vld [vmem:[#allocation2] sm:$0xf] }
 0x185   : > { %v1429_v58 = vadd.f32 %v1423_v52, %v1312_v57 }
 0x187   : > { %1430 = vst [vmem:[#allocation2] sm:$0xf] %v1429_v58 }
 0x18e   : > { %v1432_v59 = vld [vmem:[#allocation2] sm:$0xf] }
 0x19a   : > { %v1537_v60 = vpop.f32.mrb[20].mxu0 }
 0x19b   : > { %v1543_v61 = vadd.f32 %v1537_v60, %v1432_v59  ;;  %v3029_v62 = vpop.f32.mrb[21].mxu0 }
 0x19c   : > { %v1540_v63 = vpop.f32.mrb[22].mxu0  ;;  %v1658_v0 = vpop.f32.mrb[20].mxu1 }
 0x19d   : > { %1544 = vst [vmem:[#allocation2] sm:$0xf] %v1543_v61  ;;  %v3030_v2 = vpop.f32.mrb[23].mxu0  ;;  %v3049_v3 = vpop.f32.mrb[21].mxu1 }
 0x19e   : > { %v1661_v4 = vpop.f32.mrb[22].mxu1 }
 0x19f   : > { %v3050_v5 = vpop.f32.mrb[23].mxu1 }
 0x1a4   : > { %v1546_v6 = vld [vmem:[#allocation2] sm:$0xf] }
 0x1a5   : > { %v1664_v7 = vadd.f32 %v1658_v0, %v1546_v6 }
 0x1a7   : > { %1665 = vst [vmem:[#allocation2] sm:$0xf] %v1664_v7 }
 0x1ae   : > { %v1667_v8 = vld [vmem:[#allocation2] sm:$0xf] }
 0x1ba   : > { %v1772_v9 = vpop.f32.mrb[24].mxu0 }
 0x1bb   : > { %v1778_v10 = vadd.f32 %v1772_v9, %v1667_v8  ;;  %v3069_v11 = vpop.f32.mrb[25].mxu0 }
 0x1bc   : > { %v1775_v12 = vpop.f32.mrb[26].mxu0  ;;  %v1896_v13 = vpop.f32.mrb[24].mxu1 }
 0x1bd   : > { %1779 = vst [vmem:[#allocation2] sm:$0xf] %v1778_v10  ;;  %v3070_v14 = vpop.f32.mrb[27].mxu0  ;;  %v3089_v15 = vpop.f32.mrb[25].mxu1 }
 0x1be   : > { %v1899_v16 = vpop.f32.mrb[26].mxu1 }
 0x1bf   : > { %v3090_v17 = vpop.f32.mrb[27].mxu1 }
 0x1c4   : > { %v1782_v18 = vld [vmem:[#allocation2] sm:$0xf] }
 0x1c5   : > { %v1902_v19 = vadd.f32 %v1896_v13, %v1782_v18 }
 0x1c7   : > { %1903 = vst [vmem:[#allocation2] sm:$0xf] %v1902_v19 }
 0x1ce   : > { %v1906_v20 = vld [vmem:[#allocation2] sm:$0xf] }
 0x1da   : > { %v2013_v21 = vpop.f32.mrb[28].mxu0 }
 0x1db   : > { %v2019_v1 = vadd.f32 %v2013_v21, %v1906_v20  ;;  %v3109_v22 = vpop.f32.mrb[29].mxu0 }
 0x1dc   : > { %v2016_v23 = vpop.f32.mrb[30].mxu0  ;;  %v2137_v24 = vpop.f32.mrb[28].mxu1 }
 0x1dd   : > { %2020 = vst [vmem:[#allocation2] sm:$0xf] %v2019_v1  ;;  %v3110_v25 = vpop.f32.mrb[31].mxu0  ;;  %v3129_v26 = vpop.f32.mrb[29].mxu1 }
 0x1de   : > { %v2140_v27 = vpop.f32.mrb[30].mxu1 }
 0x1df   : > { %v3130_v28 = vpop.f32.mrb[31].mxu1 }
 0x1e4   : > { %v2023_v29 = vld [vmem:[#allocation2] sm:$0xf] }
 0x1e5   : > { %v2143_v30 = vadd.f32 %v2137_v24, %v2023_v29 }
 0x1e7   : > { %2144 = vst [vmem:[#allocation2] sm:$0xf] %v2143_v30 }
 0x1ee   : > { %v2148_v32 = vld [vmem:[#allocation2] sm:$0xf] }
 0x1ef   : > { %v2156_v33 = vadd.f32 %v2664_v31, %v2148_v32 }
 0x1f1   : > { %vm2157_vm1 = vcmp.ge.f32.partialorder %v2156_v33, 0.0  ;;  %v2158_v34 = vmul.f32 0.2, %v2156_v33 }
 0x1f3   : > { %v2159_v35 = vsel %vm2157_vm1, %v2156_v33, %v2158_v34 }
 0x1f4   : > { %v2160_v36 = vpack.c.bf16 %v2159_v35, %v2159_v35 }
 0x1f6   : > { %2161 = vst [vmem:[%s253_s11] sm:$0x3] %v2160_v36 }
 0x1f7 PF: > { %s13_s14 = sadd.s32 1, %s3322_s14   ;;  %s3953_s12 = smov %s3318_s13 }
 0x1f8   : > { %p10_p5 = scmp.ge.s32.totalorder %s13_s14, 4   ;;  %s3954_s13 = smov %s3956_s15 }
 0x1fa   :  { %12 = sbr.rel (!%p10_p5) target bundleno = 2 (0x2), region = 91 }

</bundles_post_ra>
